<compile_context>
chip_gen: v7x
topology: tpu7x:2x2x1
jax: 0.10.0
libtpu: 0.0.40
codegen_flags: <defaults>
</compile_context>

<pallas_src>
import jax
import jax.numpy as jnp
from jax.experimental import pallas as pl
from jax.experimental.pallas import tpu as pltpu


def _pick_depth_group(do_, hw, howo):
    """Smallest divisor g of Do giving lane-aligned (>=256-wide if possible) blocks."""
    legal = [
        g for g in range(1, do_ + 1)
        if do_ % g == 0
        and (g == do_  # a full-volume block is always a legal BlockSpec
             or ((g * howo) % 128 == 0 and (g * 2 * hw) % 128 == 0))
    ]
    for target in (256, 128):
        for g in legal:
            if g * howo >= target:
                return g
    return legal[-1]


def _pool_matrix(g, h, w, pre_add):
    """Pooling matrix S (entries 0 / 0.125) for one depth-group of g output depths.

    Rows index the (pre-added) input lanes of a depth-group, columns index the
    packed output lanes (g * Ho * Wo); the 1/8 mean normalization is folded in.
    """
    hw = h * w
    ho, wo = h // 2, w // 2
    howo = ho * wo
    kp = g * hw if pre_add else g * 2 * hw
    r = jnp.arange(kp)
    slab = r // hw                      # pre-added depth slab (or raw input depth)
    k = slab if pre_add else slab // 2  # group-local output depth
    p = r % hw
    col = k * howo + ((p // w) // 2) * wo + ((p % w) // 2)
    s = (col[:, None] == jnp.arange(g * howo)[None, :]).astype(jnp.float32)
    return s * 0.125


def _make_kernel(g, hw, pre_add):
    """Kernel closure; captures only static Python ints/bools (no traced arrays)."""

    def kernel(x_ref, s_ref, w_ref, o_ref):
        # x_ref: (1, C_in, g*2*H*W)  one (batch, depth-group) slab, all channels
        # s_ref: (Kp, g*Ho*Wo)       pooling matrix (block-diagonal over g)
        # w_ref: (C_out, C_in)       1x1x1 conv weights
        # o_ref: (1, C_out, g*Ho*Wo)
        xb = x_ref[0].astype(jnp.float32)
        if pre_add:
            # Exact f32 D-direction pre-add on the VPU; slices are lane-aligned
            # (H*W % 128 == 0), halving the matmul K below.
            parts = [
                xb[:, (2 * k) * hw:(2 * k + 1) * hw]
                + xb[:, (2 * k + 1) * hw:(2 * k + 2) * hw]
                for k in range(g)
            ]
            xa = parts[0] if g == 1 else jnp.concatenate(parts, axis=-1)
        else:
            xa = xb

        # 2x2(x2) pooling of all channels / grouped depths in ONE MXU matmul.
        pooled = jnp.dot(xa, s_ref[...],
                         preferred_element_type=jnp.float32,
                         precision=jax.lax.Precision.HIGHEST)    # (C_in, g*Ho*Wo)

        # 1x1x1 conv (channel mix) on the MXU, f32 accumulation.
        out = jnp.dot(w_ref[...], pooled,
                      preferred_element_type=jnp.float32,
                      precision=jax.lax.Precision.HIGHEST)       # (C_out, g*Ho*Wo)

        o_ref[0] = out.astype(o_ref.dtype)

    return kernel


def downsample(x, conv_weight, *, lane_group=None):
    """Pallas TPU DownSample forward.

    x:           (N, C_in, D, H, W) with even D, H, W.
    conv_weight: (C_out, C_in, 1, 1, 1) — PyTorch Conv3d weight (bias=False).
    returns:     (N, C_out, D//2, H//2, W//2)
    """
    n, c_in, d, h, w = x.shape
    # TODO(synk): odd spatial dims need the general trilinear path; the 0.5-scale
    # align_corners=False resize is only an exact 2x2x2 mean for even sizes.
    assert d % 2 == 0 and h % 2 == 0 and w % 2 == 0, "even D/H/W required"
    do_, ho, wo = d // 2, h // 2, w // 2
    hw, howo = h * w, ho * wo
    c_out = conv_weight.shape[0]
    assert conv_weight.shape == (c_out, c_in, 1, 1, 1)

    # Depth-group size: pack g output depths into the lane axis so stores are
    # >=128 (target 256 for v6e/v7x MXU width) lanes wide and unmasked.
    g = _pick_depth_group(do_, hw, howo) if lane_group is None else lane_group
    assert do_ % g == 0
    dg = do_ // g                      # depth-groups == grid steps along depth
    lanes_in = g * 2 * hw              # packed input lanes per depth-group
    lanes_out = g * howo               # packed output lanes per depth-group

    # Exact VPU D-pre-add requires lane-aligned H*W chunks.
    pre_add = (hw % 128 == 0)

    # 1x1x1 kernel -> plain (C_out, C_in) matrix; pooling matrix for one group.
    w2 = conv_weight.reshape(c_out, c_in).astype(jnp.float32)
    s = _pool_matrix(g, h, w, pre_add)                 # (kp, lanes_out)
    kp = s.shape[0]

    # Free views only (row-major merges) — no HBM copies in the wrapper.
    xv = x.reshape(n, c_in, d * h * w)

    # Explicit per-step VMEM budget -> vmem_limit_bytes (review: derive limits
    # from a budget instead of hitting the 16/32 MiB scoped default / v7x OOM).
    itemsize = x.dtype.itemsize
    est = (2 * c_in * lanes_in * itemsize      # double-buffered input block
           + kp * lanes_out * 4                # pooling matrix (constant index)
           + 2 * c_out * c_in * 4              # conv weights
           + 2 * c_out * lanes_out * itemsize  # double-buffered output block
           + 2 * c_in * lanes_in * 4)          # in-kernel f32 temporaries
    try:
        vmem_cap = pltpu.get_tpu_info().vmem_capacity_bytes
    except Exception:
        vmem_cap = 64 * 2 ** 20                # v7x per-core physical VMEM
    vmem_limit = int(min(int(0.9 * vmem_cap), max(2 * est, 32 * 2 ** 20)))

    grid = (n, dg)
    out = pl.pallas_call(
        _make_kernel(g, hw, pre_add),
        out_shape=jax.ShapeDtypeStruct((n, c_out, do_ * howo), x.dtype),
        grid=grid,
        in_specs=[
            pl.BlockSpec((1, c_in, lanes_in), lambda i, j: (i, 0, j)),
            pl.BlockSpec((kp, lanes_out), lambda i, j: (0, 0)),
            pl.BlockSpec((c_out, c_in), lambda i, j: (0, 0)),
        ],
        out_specs=pl.BlockSpec((1, c_out, lanes_out), lambda i, j: (i, 0, j)),
        compiler_params=pltpu.CompilerParams(
            dimension_semantics=("parallel", "parallel"),
            vmem_limit_bytes=vmem_limit),
    )(xv, s, w2)
    return out.reshape(n, c_out, do_, ho, wo)


def _reference_downsample(x, conv_weight):
    """Pure-JAX reference: 2x2x2 mean (== trilinear 0.5, even dims) + 1x1x1 conv."""
    n, c, d, h, w = x.shape
    pooled = x.reshape(n, c, d // 2, 2, h // 2, 2, w // 2, 2).mean(axis=(3, 5, 7))
    w2 = conv_weight.reshape(conv_weight.shape[0], c)
    return jnp.einsum("oc,ncdhw->nodhw", w2, pooled,
                      precision=jax.lax.Precision.HIGHEST)


if __name__ == "__main__":
    key = jax.random.PRNGKey(0)
    kx, kw = jax.random.split(key)

    N, C, D, H, W = 2, 4, 16, 16, 16
    s_factor = 2
    C_out = C + s_factor

    x = jax.random.normal(kx, (N, C, D, H, W), jnp.float32)
    conv_w = 0.5 * jax.random.normal(kw, (C_out, C, 1, 1, 1), jnp.float32)

    y = jax.block_until_ready(downsample(x, conv_w))
    y_ref = jax.block_until_ready(_reference_downsample(x, conv_w))

    assert y.shape == (N, C_out, D // 2, H // 2, W // 2), y.shape
    max_err = float(jnp.max(jnp.abs(y - y_ref)))
    assert jnp.allclose(y, y_ref, rtol=1e-4, atol=1e-4), max_err

    print("KERNEL_OK")
</pallas_src>

<mosaic_0001>
module attributes {stable_mosaic.version = 11 : i64} {
  func.func @kernel(%arg0: i32, %arg1: i32, %arg2: memref<1x4x2048xf32, #tpu.memory_space<vmem>>, %arg3: memref<1024x256xf32, #tpu.memory_space<vmem>>, %arg4: memref<6x4xf32, #tpu.memory_space<vmem>>, %arg5: memref<1x6x256xf32, #tpu.memory_space<vmem>>) attributes {dimension_semantics = [#tpu.dimension_semantics<parallel>, #tpu.dimension_semantics<parallel>], iteration_bounds = array<i64: 2, 2>, scalar_prefetch = 0 : i64, scratch_operands = 0 : i64, tpu.core_type = #tpu.core_type<tc>, window_params = [{transform_indices = @transform_0, window_bounds = array<i64: 1, 4, 2048>}, {pipeline_mode = #tpu.pipeline_mode<synchronous>, transform_indices = @transform_1, window_bounds = array<i64: 1024, 256>}, {pipeline_mode = #tpu.pipeline_mode<synchronous>, transform_indices = @transform_2, window_bounds = array<i64: 6, 4>}, {transform_indices = @transform_3, window_bounds = array<i64: 1, 6, 256>}]} {
    %c0 = arith.constant 0 : index
    %c0_0 = arith.constant 0 : index
    %c0_1 = arith.constant 0 : index
    %0 = vector.load %arg2[%c0, %c0_0, %c0_1] : memref<1x4x2048xf32, #tpu.memory_space<vmem>>, vector<1x4x2048xf32>
    %1 = vector.shape_cast %0 : vector<1x4x2048xf32> to vector<4x2048xf32>
    %2 = vector.extract_strided_slice %1 {offsets = [0, 0], sizes = [4, 256], strides = [1, 1]} : vector<4x2048xf32> to vector<4x256xf32>
    %3 = vector.extract_strided_slice %1 {offsets = [0, 256], sizes = [4, 256], strides = [1, 1]} : vector<4x2048xf32> to vector<4x256xf32>
    %4 = arith.addf %2, %3 : vector<4x256xf32>
    %5 = vector.extract_strided_slice %1 {offsets = [0, 512], sizes = [4, 256], strides = [1, 1]} : vector<4x2048xf32> to vector<4x256xf32>
    %6 = vector.extract_strided_slice %1 {offsets = [0, 768], sizes = [4, 256], strides = [1, 1]} : vector<4x2048xf32> to vector<4x256xf32>
    %7 = arith.addf %5, %6 : vector<4x256xf32>
    %8 = vector.extract_strided_slice %1 {offsets = [0, 1024], sizes = [4, 256], strides = [1, 1]} : vector<4x2048xf32> to vector<4x256xf32>
    %9 = vector.extract_strided_slice %1 {offsets = [0, 1280], sizes = [4, 256], strides = [1, 1]} : vector<4x2048xf32> to vector<4x256xf32>
    %10 = arith.addf %8, %9 : vector<4x256xf32>
    %11 = vector.extract_strided_slice %1 {offsets = [0, 1536], sizes = [4, 256], strides = [1, 1]} : vector<4x2048xf32> to vector<4x256xf32>
    %12 = vector.extract_strided_slice %1 {offsets = [0, 1792], sizes = [4, 256], strides = [1, 1]} : vector<4x2048xf32> to vector<4x256xf32>
    %13 = arith.addf %11, %12 : vector<4x256xf32>
    %14 = tpu.concatenate %4, %7, %10, %13 in 1 : vector<4x256xf32>, vector<4x256xf32>, vector<4x256xf32>, vector<4x256xf32> -> vector<4x1024xf32>
    %c0_2 = arith.constant 0 : index
    %c0_3 = arith.constant 0 : index
    %15 = vector.load %arg3[%c0_2, %c0_3] : memref<1024x256xf32, #tpu.memory_space<vmem>>, vector<1024x256xf32>
    %cst = arith.constant dense<0.000000e+00> : vector<4x256xf32>
    %16 = tpu.matmul %14, %15, %cst {dimension_numbers = #tpu.dot_dimension_numbers<[1], [0], [0], [1], [0, 0, 1, 1], [], []>, precision = #tpu.contract_precision<fp32>} : vector<4x1024xf32>, vector<1024x256xf32>, vector<4x256xf32> -> vector<4x256xf32>
    %c0_4 = arith.constant 0 : index
    %c0_5 = arith.constant 0 : index
    %17 = vector.load %arg4[%c0_4, %c0_5] : memref<6x4xf32, #tpu.memory_space<vmem>>, vector<6x4xf32>
    %cst_6 = arith.constant dense<0.000000e+00> : vector<6x256xf32>
    %18 = tpu.matmul %17, %16, %cst_6 {dimension_numbers = #tpu.dot_dimension_numbers<[1], [0], [0], [1], [0, 0, 1, 1], [], []>, precision = #tpu.contract_precision<fp32>} : vector<6x4xf32>, vector<4x256xf32>, vector<6x256xf32> -> vector<6x256xf32>
    %c0_7 = arith.constant 0 : index
    %c0_8 = arith.constant 0 : index
    %c0_9 = arith.constant 0 : index
    %19 = vector.load %arg5[%c0_7, %c0_8, %c0_9] : memref<1x6x256xf32, #tpu.memory_space<vmem>>, vector<1x6x256xf32>
    %20 = vector.shape_cast %19 : vector<1x6x256xf32> to vector<6x256xf32>
    %21 = vector.shape_cast %18 : vector<6x256xf32> to vector<1x6x256xf32>
    tpu.vector_store %arg5[%c0_7, %c0_8, %c0_9], %21 {strides = array<i32>} : memref<1x6x256xf32, #tpu.memory_space<vmem>>, vector<1x6x256xf32>,
    return
  }
  func.func @transform_0(%arg0: i32, %arg1: i32) -> (i32, i32, i32) {
    %c0_i32 = arith.constant 0 : i32
    %c0_i32_0 = arith.constant 0 : i32
    return %arg0, %c0_i32, %arg1 : i32, i32, i32
  }
  func.func @transform_1(%arg0: i32, %arg1: i32) -> (i32, i32) {
    %c0_i32 = arith.constant 0 : i32
    %c0_i32_0 = arith.constant 0 : i32
    %c0_i32_1 = arith.constant 0 : i32
    return %c0_i32, %c0_i32_0 : i32, i32
  }
  func.func @transform_2(%arg0: i32, %arg1: i32) -> (i32, i32) {
    %c0_i32 = arith.constant 0 : i32
    %c0_i32_0 = arith.constant 0 : i32
    %c0_i32_1 = arith.constant 0 : i32
    return %c0_i32, %c0_i32_0 : i32, i32
  }
  func.func @transform_3(%arg0: i32, %arg1: i32) -> (i32, i32, i32) {
    %c0_i32 = arith.constant 0 : i32
    %c0_i32_0 = arith.constant 0 : i32
    return %arg0, %c0_i32, %arg1 : i32, i32, i32
  }
}

</mosaic_0001>

<bundles_post_ra>
// kernel: tpu_custom_call.1
= control target key start
LH: loop header
LB: loop body
LE: loop exit
PB: predicated region body
PF: predicated region fallthrough
CT: control target
= control target key end

     0   :  { %s11813_s0 = inlined_call_operand.hbm [shape: f32[2,4,4096], index: 0, kind: input, shape index: {}]   ;;  %s11814_s1 = inlined_call_operand.hbm [shape: f32[1024,256], index: 1, kind: input, shape index: {}]   ;;  %s11815_s2 = inlined_call_operand.vmem [shape: f32[6,4], index: 2, kind: input, shape index: {}]   ;;  %s11816_s3 = inlined_call_operand.vmem [shape: f32[2,6,512], index: 3, kind: output, shape index: {}]  }
   0x1   :  { %12715 = sst [smem:[#allocation219_spill]] %s11814_s1 }
   0x2   :  { %8 = vsyncpa [#allocation3], 0 }
   0x3   :  { %10 = vsyncpa [#allocation3 + $0x1], 0 }
   0x4   :  { %11 = vsyncpa [#allocation5], 0  ;;  %s8084_s12 = smov 0   ;;  %s8086_s13 = smov 0  }
   0x5   :  { %s8088_s14 = smov 0   ;;  %s8090_s15 = smov 0  }
   0x6   :  { %s8092_s16 = smov 0   ;;  %s8094_s17 = smov 0  }
   0x7   :  { %s8096_s18 = smov 0   ;;  %s8098_s19 = smov 0  }
   0x8 LB: > { %s6235_s20 = sadd.s32 4294967295, %s8057_s19   ;;  %p51_p0 = scmp.ne.s32.totalorder %s8033_s13, %s8029_s12  ;;  %s8057_s19 = sphi %s8098_s19, %s17_s19   ;;  %s8053_s18 = sphi %s8096_s18, %s14466_s18   ;;  %s8049_s17 = sphi %s8094_s17, %s14465_s17   ;;  %s8045_s16 = sphi %s8092_s16, %s14464_s16   ;;  %s8041_s15 = sphi %s8090_s15, %s14463_s15   ;;  %s8037_s14 = sphi %s8088_s14, %s14462_s14   ;;  %s8033_s13 = sphi %s8086_s13, %s14461_s13   ;;  %s8029_s12 = sphi %s8084_s12, %s14460_s12  }
   0x9   : > { %p8124_p1 = scmp.eq.s32.totalorder %s6235_s20, 0  ;;  %p6237_p2 = scmp.ge.s32.totalorder %s8057_s19, 1 }
   0xa   : > { %p132_p3 = scmp.lt.s32.totalorder %s8057_s19, 5  ;;  %s8059_s24 = smov [#allocation4]  }
   0xb   : > { %s12716_s21 = scalar_select %p8124_p1, 1, 0 }
   0xc   : > { %p8132_p4 = por %p8124_p1, %p51_p0  ;;  %p8136_p5 = pnand %p6237_p2, %p132_p3 }
   0xd   : > { %s144_s25 = sshll.u32 %s8059_s24, 4  ;;  %s12720_s1 = sld [smem:[#allocation219_spill]]  ;;  %s145_s25 = int_to_ptr.vmem [resolvable:$true] %s144_s25 }
   0xe   : > { %s12717_s22 = scalar_select %p8132_p4, 1, 0 }
   0xf   : > { %s12718_s23 = scalar_select %p8136_p5, 1, 0 }
  0x10   : > { %p7850_p6 = pneg %p8136_p5 }
  0x12   : > { %p8144_p7 = pnand %p7850_p6, %p8124_p1 }
  0x13   : > { %s7929_s29 = scalar_lea.hbm %s12720_s1, 32768 }
  0x14   : > { %p7930_p8 = scmp.ne.s32.totalorder %s12720_s1, %s7929_s29  ;;  %p7931_p9 = pneg %p8144_p7 }
  0x15   : > { %p7936_p12 = scmp.lt.u32.totalorder %s7929_s29, %s12720_s1 }
  0x16   : > { %p7932_p10 = pnand %p7931_p9, %p7930_p8 }
  0x18   : > { %p7933_p11 = pneg %p7932_p10 }
  0x1a   : > { %p7938_p13 = pnand %p7936_p12, %p7933_p11 }
  0x1c   : > { %7941 = shalt.err (!%p7938_p13)
}
  0x1d   : > { %s7942_s7 = scalar_lea.vmem %s145_s25, 32768  ;;  %p7950_p6 = scmp.lt.s32.totalorder %s145_s25, %s145_s25 }
  0x1e   : > { %p7943_p0 = scmp.ne.s32.totalorder %s145_s25, %s7942_s7  ;;  %p7951_p1 = scmp.lt.s32.totalorder %s7942_s7, %s7942_s7 }
  0x20   : > { %p7945_p2 = pnand %p7943_p0, %p7931_p9  ;;  %p7952_p4 = por %p7951_p1, %p7950_p6 }
  0x22   : > { %p7946_p3 = pneg %p7945_p2 }
  0x24   : > { %p7953_p5 = pnand %p7952_p4, %p7946_p3 }
  0x26   : > { %7956 = shalt.err (!%p7953_p5)
}
  0x27   : > { %s8060_s8 = smov 256   ;;  %s8061_s9 = smov 16  }
  0x28   : > { %7853 = dma.hbm_to_vmem [thread:$0]  (!%p8144_p7), %s12720_s1, 32768, %s145_s25, [#allocation5], %s8060_s8, %s8060_s8, %s8061_s9  }
  0x29   : > { %s26_s12 = sadd.s32 1, %s8049_s17  ;;  %s29_s20 = sadd.s32 1, %s8053_s18 }
  0x2a   : > { %p27_p1 = scmp.ge.s32.totalorder %s26_s12, 2  ;;  %s38_s24 = sadd.s32 1, %s8037_s14 }
  0x2b   : > { %p45_p4 = scmp.ne.s32.totalorder %s8037_s14, %s8033_s13  ;;  %p46_p5 = scmp.eq.s32.totalorder %s8057_s19, 0 }
  0x2c   : > { %s14468_s12 = smov (%p27_p1, %s26_s12), 0  ;;  %s14470_s20 = smov (!%p27_p1, %s29_s20), %s8053_s18 }
  0x2d   : > { %12721 = sst [smem:[#allocation8_spill]] %s14468_s12  ;;  %s34_s27 = ssub.s32 %s8049_s17, %s14468_s12 }
  0x2e   : > { %p31_p8 = scmp.ge.s32.totalorder %s14470_s20, 2  ;;  %p7859_p9 = scmp.lt.s32.totalorder %s8057_s19, 4 }
  0x2f   : > { %p8176_p10 = por %p46_p5, %p45_p4  ;;  %s161_s25 = sand.u32 1, %s8037_s14  }
  0x30   : > { %s14472_s20 = smov (%p31_p8, %s14470_s20), 0  ;;  %s6240_s28 = sshll.u32 %s161_s25, 6 }
  0x31   : > { %s33_s29 = ssub.s32 %s8053_s18, %s14472_s20  ;;  %s6241_s4 = sshll.u32 %s8049_s17, 4 }
  0x32   : > { %s35_s30 = sor.u32 %s34_s27, %s33_s29  ;;  %s6242_s5 = sshll.u32 %s8053_s18, 5 }
  0x33   : > { %p36_p7 = scmp.eq.s32.totalorder %s35_s30, 0  ;;  %s171_s6 = sadd.s32 %s6242_s5, %s6241_s4 }
  0x34   : > { %s165_s7 = scalar_lea.vmem [#allocation2], %s6240_s28  ;;  %s6243_s10 = sshll.u32 %s171_s6, 6 }
  0x35   : > { %s175_s8 = sshll.u32 %s165_s7, 4  ;;  %s8195_s12 = scalar_lea.hbm %s11813_s0, %s6243_s10  ;;  %s8190_s8 = int_to_ptr.vmem [resolvable:$true] %s175_s8 }
  0x36   : > { %s8188_s9 = scalar_select %p36_p7, %s8037_s14, %s38_s24  }
  0x37   : > { %p8201_p11 = pnand %p7859_p9, %p8176_p10  ;;  %s162_s24 = scalar_lea.sflag [#allocation3], %s161_s25 }
  0x38   : > { %s7957_s28 = scalar_lea.hbm %s8195_s12, 1024  ;;  %s7962_s29 = scalar_lea.hbm %s11813_s0, 4096 }
  0x39   : > { %p7958_p12 = scmp.ne.s32.totalorder %s8195_s12, %s7957_s28  ;;  %p7959_p13 = pneg %p8201_p11 }
  0x3a   : > { %p7963_p3 = scmp.lt.u32.totalorder %s8195_s12, %s11813_s0  ;;  %p7964_p6 = scmp.lt.u32.totalorder %s7962_s29, %s7957_s28 }
  0x3b   : > { %p7960_p0 = pnand %p7959_p13, %p7958_p12  ;;  %p7966_p4 = scmp.lt.u32.totalorder %s7957_s28, %s8195_s12 }
  0x3c   : > { %p7965_p1 = por %p7964_p6, %p7963_p3 }
  0x3d   : > { %p7961_p2 = pneg %p7960_p0 }
  0x3e   : > { %p7967_p5 = por %p7966_p4, %p7965_p1 }
  0x40   : > { %p7968_p8 = pnand %p7967_p5, %p7961_p2 }
  0x42   : > { %7971 = shalt.err (!%p7968_p8)
}
  0x43   : > { %s7972_s25 = scalar_lea.vmem %s8190_s8, 1024  ;;  %s8062_s5 = smov [#allocation2]  }
  0x44   : > { %p7973_p9 = scmp.ne.s32.totalorder %s8190_s8, %s7972_s25  ;;  %s7977_s6 = sshll.u32 %s8062_s5, 4  ;;  %s7978_s6 = int_to_ptr.vmem [resolvable:$false] %s7977_s6 }
  0x45   : > { %s7979_s7 = scalar_lea.vmem %s7978_s6, 2048  ;;  %p7980_p12 = scmp.lt.s32.totalorder %s8190_s8, %s7978_s6 }
  0x46   : > { %p7975_p10 = pnand %p7973_p9, %p7959_p13  ;;  %p7981_p0 = scmp.lt.s32.totalorder %s7979_s7, %s7972_s25 }
  0x48   : > { %p7976_p7 = pneg %p7975_p10  ;;  %p7982_p3 = por %p7981_p0, %p7980_p12 }
  0x4a   : > { %p7983_p6 = pnand %p7982_p3, %p7976_p7 }
  0x4c   : > { %7986 = shalt.err (!%p7983_p6)
}
  0x4d   : > { %7857 = dma.hbm_to_vmem [thread:$0]  (!%p8201_p11), %s8195_s12, 1024, %s8190_s8, %s162_s24  }
  0x4e   : > { %p12724_p2 = scmp.ne.s32.totalorder %s12718_s23, 0 }
  0x50   : > { %184 = sbr.rel (%p12724_p2) target bundleno = 1430 (0x596), region = 32 }
  0x57   : > { %s186_s10 = sand.u32 1, %s8033_s13   ;;  %p12725_p13 = scmp.ne.s32.totalorder %s12717_s22, 0 }
  0x58   : > { %s6245_s11 = sshll.u32 %s186_s10, 6  ;;  %s187_s28 = scalar_lea.sflag [#allocation3], %s186_s10 }
  0x59   : > { %s8233_s1 = scalar_lea.vmem [#allocation2], %s6245_s11 }
  0x5a   : > { %8020 = dma.done.wait (%p12725_p13), %s187_s28, 1024  }
  0x5b   : > { %8022 = vsyncadd (%p12725_p13), %s187_s28, 4294966272  ;;  %p12726_p1 = scmp.ne.s32.totalorder %s12716_s21, 0 }
  0x5d   : > { %8024 = dma.done.wait (%p12726_p1), [#allocation5], 32768  }
  0x5e   : > { %8026 = vsyncadd (%p12726_p1), [#allocation5], 4294934528  ;;  %v257_v0 = vld [vmem:[#allocation4 + $0x8] sm:$0xff]  ;;  %v259_v1 = vld [vmem:[#allocation4 + $0x18] sm:$0xff]  ;;  %vm5649_vm0 = vcmask 31744   ;;  %vm5653_vm1 = vcmask 1043456  }
  0x5f   : > { %v385_v2 = vld [vmem:[#allocation4 + $0x408] sm:$0xff]  ;;  %v512_v3 = vand.u32 4294901760, %v257_v0  ;;  %v516_v4 = vand.u32 4294901760, %v259_v1  ;;  %v387_v5 = vld [vmem:[#allocation4 + $0x418] sm:$0xff]  ;;  %v256_v7 = vld [vmem:[#allocation4] sm:$0xff]  ;;  %s6247_s23 = sshll.u32 %s8041_s15, 1 }
  0x60   : > { %v3080_v6 = vand.u32 4294901760, %v385_v2  ;;  %v258_v8 = vld [vmem:[#allocation4 + $0x10] sm:$0xff]  ;;  %v3084_v9 = vand.u32 4294901760, %v387_v5  ;;  %v514_v10 = vand.u32 4294901760, %v256_v7  ;;  %v384_v12 = vld [vmem:[#allocation4 + $0x400] sm:$0xff]  ;;  %v261_v14 = vld [vmem:[#allocation4 + $0x28] sm:$0xff] }
  0x61   : > { %v518_v11 = vand.u32 4294901760, %v258_v8  ;;  %v386_v13 = vld [vmem:[#allocation4 + $0x410] sm:$0xff]  ;;  %v8243_v15 = vpack.c.bf16 %v516_v4, %v512_v3  ;;  %v8245_v16 = vsub.f32 %v257_v0, %v512_v3  ;;  %v8247_v17 = vsub.f32 %v259_v1, %v516_v4  ;;  %v263_v19 = vld [vmem:[#allocation4 + $0x38] sm:$0xff]  ;;  %v389_v20 = vld [vmem:[#allocation4 + $0x428] sm:$0xff]  ;;  %p223_p11 = scmp.lt.s32.totalorder %s8045_s16, 1  ;;  %p225_p4 = scmp.lt.s32.totalorder %s6247_s23, 3 }
  0x62   : > { %v8249_v18 = vsub.f32 %v385_v2, %v3080_v6  ;;  %v391_v21 = vld [vmem:[#allocation4 + $0x438] sm:$0xff]  ;;  %v8251_v22 = vpack.c.bf16 %v3084_v9, %v3080_v6  ;;  %v8253_v23 = vsub.f32 %v387_v5, %v3084_v9  ;;  %v8257_v25 = vsub.f32 %v256_v7, %v514_v10  ;;  %v260_v26 = vld [vmem:[#allocation4 + $0x20] sm:$0xff]  ;;  %v262_v31 = vld [vmem:[#allocation4 + $0x30] sm:$0xff] }
  0x63   : > { %12727 = vst [vmem:[#allocation9_spill] sm:$0xff] %v8243_v15  ;;  %12728 = vst [vmem:[#allocation10_spill] sm:$0xff] %v8245_v16  ;;  %v8255_v24 = vpack.c.bf16 %v518_v11, %v514_v10  ;;  %6253 = vmatprep.subr.bf16.mxu1 %v8243_v15  ;;  %v8260_v27 = vsub.f32 %v258_v8, %v518_v11  ;;  %v3082_v28 = vand.u32 4294901760, %v384_v12  ;;  %v3086_v29 = vand.u32 4294901760, %v386_v13  ;;  %v388_v36 = vld [vmem:[#allocation4 + $0x420] sm:$0xff]  ;;  %v390_v37 = vld [vmem:[#allocation4 + $0x430] sm:$0xff] }
  0x64   : > { %12729 = vst [vmem:[#allocation11_spill] sm:$0xff] %v8247_v17  ;;  %12730 = vst [vmem:[#allocation12_spill] sm:$0xff] %v8249_v18  ;;  %v520_v30 = vand.u32 4294901760, %v261_v14  ;;  %7021 = vmatprep.subr.bf16.mxu0 %v8251_v22  ;;  %v524_v32 = vand.u32 4294901760, %v263_v19  ;;  %v3088_v33 = vand.u32 4294901760, %v389_v20  ;;  %v3092_v34 = vand.u32 4294901760, %v391_v21 }
  0x65   : > { %12731 = vst [vmem:[#allocation13_spill] sm:$0xff] %v8251_v22  ;;  %12732 = vst [vmem:[#allocation14_spill] sm:$0xff] %v8253_v23  ;;  %6255 = vmatpush1.bf16.msra.mxu1 %v8255_v24  ;;  %v522_v35 = vand.u32 4294901760, %v260_v26  ;;  %v8264_v38 = vpack.c.bf16 %v3086_v29, %v3082_v28  ;;  %v8266_v39 = vsub.f32 %v384_v12, %v3082_v28  ;;  %v265_v42 = vld [vmem:[#allocation4 + $0x48] sm:$0xff]  ;;  %v267_v43 = vld [vmem:[#allocation4 + $0x58] sm:$0xff]  ;;  %v526_v51 = vand.u32 4294901760, %v262_v31 }
  0x66   : > { %12733 = vst [vmem:[#allocation15_spill] sm:$0xff] %v8255_v24  ;;  %12734 = vst [vmem:[#allocation16_spill] sm:$0xff] %v8257_v25  ;;  %v8268_v40 = vsub.f32 %v386_v13, %v3086_v29  ;;  %v8270_v41 = vsub.f32 %v261_v14, %v520_v30  ;;  %v393_v44 = vld [vmem:[#allocation4 + $0x448] sm:$0xff]  ;;  %v8272_v45 = vpack.c.bf16 %v524_v32, %v520_v30  ;;  %v395_v49 = vld [vmem:[#allocation4 + $0x458] sm:$0xff]  ;;  %v3090_v53 = vand.u32 4294901760, %v388_v36  ;;  %s14474_s16 = smov (!%p223_p11, %s8045_s16), 1 }
  0x67   : > { %12735 = vst [vmem:[#allocation17_spill] sm:$0xff] %v8260_v27  ;;  %12736 = vst [vmem:[#allocation18_spill] sm:$0xff] %v8264_v38  ;;  %v8274_v46 = vsub.f32 %v263_v19, %v524_v32  ;;  %v8276_v47 = vpack.c.bf16 %v3092_v34, %v3088_v33  ;;  %v8278_v48 = vsub.f32 %v389_v20, %v3088_v33  ;;  %7023 = vmatpush1.bf16.msra.mxu0 %v8264_v38  ;;  %v264_v58 = vld [vmem:[#allocation4 + $0x40] sm:$0xff]  ;;  %v266_v59 = vld [vmem:[#allocation4 + $0x50] sm:$0xff]  ;;  %s14476_s23 = smov (!%p225_p4, %s6247_s23), 3  ;;  %s6248_s12 = sshll.u32 %s14474_s16, 2 }
  0x68   : > { %12737 = vst [vmem:[#allocation19_spill] sm:$0xff] %v8266_v39  ;;  %12738 = vst [vmem:[#allocation20_spill] sm:$0xff] %v8268_v40  ;;  %v8281_v50 = vsub.f32 %v391_v21, %v3092_v34  ;;  %v8283_v52 = vsub.f32 %v260_v26, %v522_v35  ;;  %6257 = vmatprep.subr.bf16.mxu1 %v8272_v45  ;;  %v3094_v54 = vand.u32 4294901760, %v390_v37  ;;  %v528_v55 = vand.u32 4294901760, %v265_v42  ;;  %v392_v0 = vld [vmem:[#allocation4 + $0x440] sm:$0xff]  ;;  %v394_v1 = vld [vmem:[#allocation4 + $0x450] sm:$0xff]  ;;  %s228_s8 = sadd.s32 %s6248_s12, %s14476_s23 }
  0x69   : > { %12739 = vst [vmem:[#allocation21_spill] sm:$0xff] %v8270_v41  ;;  %12740 = vst [vmem:[#allocation22_spill] sm:$0xff] %v8272_v45  ;;  %7025 = vmatprep.subr.bf16.mxu0 %v8276_v47  ;;  %v532_v56 = vand.u32 4294901760, %v267_v43  ;;  %v3096_v57 = vand.u32 4294901760, %v393_v44  ;;  %v8287_v60 = vpack.c.bf16 %v526_v51, %v522_v35  ;;  %v8289_v61 = vsub.f32 %v262_v31, %v526_v51  ;;  %v269_v2 = vld [vmem:[#allocation4 + $0x68] sm:$0xff]  ;;  %v271_v7 = vld [vmem:[#allocation4 + $0x78] sm:$0xff] }
  0x6a   : > { %12741 = vst [vmem:[#allocation23_spill] sm:$0xff] %v8274_v46  ;;  %12742 = vst [vmem:[#allocation24_spill] sm:$0xff] %v8276_v47  ;;  %v8291_v62 = vsub.f32 %v388_v36, %v3090_v53  ;;  %v3100_v63 = vand.u32 4294901760, %v395_v49  ;;  %v8293_v3 = vpack.c.bf16 %v3094_v54, %v3090_v53  ;;  %v8295_v4 = vsub.f32 %v390_v37, %v3094_v54  ;;  %v397_v8 = vld [vmem:[#allocation4 + $0x468] sm:$0xff]  ;;  %v399_v9 = vld [vmem:[#allocation4 + $0x478] sm:$0xff]  ;;  %s6249_s27 = sshll.u32 %s228_s8, 3 }
  0x6b   : > { %12743 = vst [vmem:[#allocation25_spill] sm:$0xff] %v8278_v48  ;;  %12744 = vst [vmem:[#allocation26_spill] sm:$0xff] %v8281_v50  ;;  %v8297_v5 = vpack.c.bf16 %v532_v56, %v528_v55  ;;  %v8299_v6 = vsub.f32 %v265_v42, %v528_v55  ;;  %6259 = vmatpush1.bf16.msra.mxu1 %v8287_v60  ;;  %v8302_v10 = vsub.f32 %v267_v43, %v532_v56  ;;  %v268_v31 = vld [vmem:[#allocation4 + $0x60] sm:$0xff]  ;;  %v270_v36 = vld [vmem:[#allocation4 + $0x70] sm:$0xff]  ;;  %s230_s29 = scalar_lea.vmem %s11816_s3, %s6249_s27 }
  0x6c   : > { %12745 = vst [vmem:[#allocation27_spill] sm:$0xff] %v8283_v52  ;;  %12746 = vst [vmem:[#allocation28_spill] sm:$0xff] %v8287_v60  ;;  %v8304_v11 = vpack.c.bf16 %v3100_v63, %v3096_v57  ;;  %v8306_v12 = vsub.f32 %v393_v44, %v3096_v57  ;;  %v8308_v13 = vsub.f32 %v395_v49, %v3100_v63  ;;  %7027 = vmatpush1.bf16.msra.mxu0 %v8293_v3  ;;  %v396_v37 = vld [vmem:[#allocation4 + $0x460] sm:$0xff]  ;;  %v398_v42 = vld [vmem:[#allocation4 + $0x470] sm:$0xff] }
  0x6d   : > { %12747 = vst [vmem:[#allocation29_spill] sm:$0xff] %v8289_v61  ;;  %12748 = vst [vmem:[#allocation30_spill] sm:$0xff] %v8291_v62  ;;  %6261 = vmatprep.subr.bf16.mxu1 %v8297_v5  ;;  %v530_v14 = vand.u32 4294901760, %v264_v58  ;;  %v534_v19 = vand.u32 4294901760, %v266_v59  ;;  %v3098_v20 = vand.u32 4294901760, %v392_v0  ;;  %v3102_v21 = vand.u32 4294901760, %v394_v1 }
  0x6e   : > { %12749 = vst [vmem:[#allocation31_spill] sm:$0xff] %v8293_v3  ;;  %12750 = vst [vmem:[#allocation32_spill] sm:$0xff] %v8295_v4  ;;  %7029 = vmatprep.subr.bf16.mxu0 %v8304_v11  ;;  %v536_v26 = vand.u32 4294901760, %v269_v2  ;;  %v540_v28 = vand.u32 4294901760, %v271_v7  ;;  %v3104_v29 = vand.u32 4294901760, %v397_v8  ;;  %v3108_v30 = vand.u32 4294901760, %v399_v9 }
  0x6f   : > { %12751 = vst [vmem:[#allocation33_spill] sm:$0xff] %v8297_v5  ;;  %12752 = vst [vmem:[#allocation34_spill] sm:$0xff] %v8299_v6  ;;  %v8313_v32 = vpack.c.bf16 %v534_v19, %v530_v14  ;;  %v8315_v33 = vsub.f32 %v264_v58, %v530_v14  ;;  %v8317_v34 = vsub.f32 %v266_v59, %v534_v19  ;;  %v273_v53 = vld [vmem:[#allocation4 + $0x88] sm:$0xff]  ;;  %v275_v54 = vld [vmem:[#allocation4 + $0x98] sm:$0xff]  ;;  %v538_v59 = vand.u32 4294901760, %v268_v31 }
  0x70   : > { %12753 = vst [vmem:[#allocation35_spill] sm:$0xff] %v8302_v10  ;;  %12754 = vst [vmem:[#allocation36_spill] sm:$0xff] %v8304_v11  ;;  %v8319_v35 = vpack.c.bf16 %v3102_v21, %v3098_v20  ;;  %v8321_v43 = vsub.f32 %v392_v0, %v3098_v20  ;;  %v8323_v44 = vsub.f32 %v394_v1, %v3102_v21  ;;  %v401_v55 = vld [vmem:[#allocation4 + $0x488] sm:$0xff]  ;;  %v542_v0 = vand.u32 4294901760, %v270_v36  ;;  %v403_v14 = vld [vmem:[#allocation4 + $0x498] sm:$0xff] }
  0x71   : > { %12755 = vst [vmem:[#allocation37_spill] sm:$0xff] %v8306_v12  ;;  %12756 = vst [vmem:[#allocation38_spill] sm:$0xff] %v8308_v13  ;;  %v8325_v49 = vpack.c.bf16 %v540_v28, %v536_v26  ;;  %v8327_v51 = vsub.f32 %v269_v2, %v536_v26  ;;  %6263 = vmatpush1.bf16.msra.mxu1 %v8313_v32  ;;  %v8331_v56 = vsub.f32 %v271_v7, %v540_v28  ;;  %v272_v26 = vld [vmem:[#allocation4 + $0x80] sm:$0xff]  ;;  %v274_v28 = vld [vmem:[#allocation4 + $0x90] sm:$0xff] }
  0x72   : > { %12757 = vst [vmem:[#allocation39_spill] sm:$0xff] %v8313_v32  ;;  %12758 = vst [vmem:[#allocation40_spill] sm:$0xff] %v8315_v33  ;;  %7031 = vmatpush1.bf16.msra.mxu0 %v8319_v35  ;;  %v8333_v57 = vpack.c.bf16 %v3108_v30, %v3104_v29  ;;  %v8335_v58 = vsub.f32 %v397_v8, %v3104_v29  ;;  %v8338_v63 = vsub.f32 %v399_v9, %v3108_v30  ;;  %v400_v8 = vld [vmem:[#allocation4 + $0x480] sm:$0xff]  ;;  %v277_v32 = vld [vmem:[#allocation4 + $0xa8] sm:$0xff] }
  0x73   : > { %12759 = vst [vmem:[#allocation41_spill] sm:$0xff] %v8317_v34  ;;  %12760 = vst [vmem:[#allocation42_spill] sm:$0xff] %v8319_v35  ;;  %6265 = vmatprep.subr.bf16.mxu1 %v8325_v49  ;;  %v3106_v1 = vand.u32 4294901760, %v396_v37  ;;  %v3110_v2 = vand.u32 4294901760, %v398_v42  ;;  %v8341_v19 = vsub.f32 %v268_v31, %v538_v59  ;;  %v544_v20 = vand.u32 4294901760, %v273_v53  ;;  %v279_v11 = vld [vmem:[#allocation4 + $0xb8] sm:$0xff] }
  0x74   : > { %12761 = vst [vmem:[#allocation43_spill] sm:$0xff] %v8321_v43  ;;  %12762 = vst [vmem:[#allocation44_spill] sm:$0xff] %v8323_v44  ;;  %7033 = vmatprep.subr.bf16.mxu0 %v8333_v57  ;;  %v548_v7 = vand.u32 4294901760, %v275_v54  ;;  %v3112_v21 = vand.u32 4294901760, %v401_v55  ;;  %v8343_v29 = vpack.c.bf16 %v542_v0, %v538_v59  ;;  %v8345_v35 = vsub.f32 %v270_v36, %v542_v0  ;;  %v405_v47 = vld [vmem:[#allocation4 + $0x4a8] sm:$0xff]  ;;  %v404_v45 = vld [vmem:[#allocation4 + $0x4a0] sm:$0xff] }
  0x75   : > { %12763 = vst [vmem:[#allocation45_spill] sm:$0xff] %v8325_v49  ;;  %12764 = vst [vmem:[#allocation46_spill] sm:$0xff] %v8327_v51  ;;  %v8347_v9 = vpack.c.bf16 %v3110_v2, %v3106_v1  ;;  %v8349_v30 = vsub.f32 %v396_v37, %v3106_v1  ;;  %v402_v49 = vld [vmem:[#allocation4 + $0x490] sm:$0xff]  ;;  %v8355_v5 = vsub.f32 %v273_v53, %v544_v20  ;;  %v3116_v36 = vand.u32 4294901760, %v403_v14  ;;  %v407_v53 = vld [vmem:[#allocation4 + $0x4b8] sm:$0xff] }
  0x76   : > { %12765 = vst [vmem:[#allocation47_spill] sm:$0xff] %v8331_v56  ;;  %12766 = vst [vmem:[#allocation48_spill] sm:$0xff] %v8333_v57  ;;  %v8351_v57 = vsub.f32 %v398_v42, %v3110_v2  ;;  %v8353_v31 = vpack.c.bf16 %v548_v7, %v544_v20  ;;  %v8357_v3 = vsub.f32 %v275_v54, %v548_v7  ;;  %6267 = vmatpush1.bf16.msra.mxu1 %v8343_v29  ;;  %v406_v15 = vld [vmem:[#allocation4 + $0x4b0] sm:$0xff] }
  0x77   : > { %12767 = vst [vmem:[#allocation49_spill] sm:$0xff] %v8335_v58  ;;  %12768 = vst [vmem:[#allocation50_spill] sm:$0xff] %v8338_v63  ;;  %7035 = vmatpush1.bf16.msra.mxu0 %v8347_v9  ;;  %v8361_v59 = vsub.f32 %v401_v55, %v3112_v21  ;;  %v546_v37 = vand.u32 4294901760, %v272_v26  ;;  %v550_v0 = vand.u32 4294901760, %v274_v28  ;;  %v3114_v1 = vand.u32 4294901760, %v400_v8  ;;  %v276_v55 = vld [vmem:[#allocation4 + $0xa0] sm:$0xff] }
  0x78   : > { %12769 = vst [vmem:[#allocation51_spill] sm:$0xff] %v8341_v19  ;;  %12770 = vst [vmem:[#allocation52_spill] sm:$0xff] %v8343_v29  ;;  %6269 = vmatprep.subr.bf16.mxu1 %v8353_v31  ;;  %v3118_v42 = vand.u32 4294901760, %v402_v49  ;;  %v552_v2 = vand.u32 4294901760, %v277_v32  ;;  %v556_v60 = vand.u32 4294901760, %v279_v11  ;;  %v8364_v20 = vpack.c.bf16 %v3116_v36, %v3112_v21  ;;  %v278_v29 = vld [vmem:[#allocation4 + $0xb0] sm:$0xff] }
  0x79   : > { %12771 = vst [vmem:[#allocation53_spill] sm:$0xff] %v8345_v35  ;;  %12772 = vst [vmem:[#allocation54_spill] sm:$0xff] %v8347_v9  ;;  %v8366_v54 = vsub.f32 %v403_v14, %v3116_v36  ;;  %v8368_v7 = vpack.c.bf16 %v550_v0, %v546_v37  ;;  %v8370_v9 = vsub.f32 %v272_v26, %v546_v37  ;;  %v281_v21 = vld [vmem:[#allocation4 + $0xc8] sm:$0xff]  ;;  %v554_v37 = vand.u32 4294901760, %v276_v55 }
  0x7a   : > { %12773 = vst [vmem:[#allocation55_spill] sm:$0xff] %v8349_v30  ;;  %12774 = vst [vmem:[#allocation56_spill] sm:$0xff] %v8351_v57  ;;  %v8372_v38 = vsub.f32 %v274_v28, %v550_v0  ;;  %v8376_v24 = vsub.f32 %v400_v8, %v3114_v1  ;;  %v8378_v22 = vsub.f32 %v402_v49, %v3118_v42  ;;  %7037 = vmatprep.subr.bf16.mxu0 %v8364_v20 }
  0x7b   : > { %12775 = vst [vmem:[#allocation57_spill] sm:$0xff] %v8353_v31  ;;  %12776 = vst [vmem:[#allocation58_spill] sm:$0xff] %v8355_v5  ;;  %v8374_v31 = vpack.c.bf16 %v3118_v42, %v3114_v1  ;;  %6271 = vmatpush1.bf16.msra.mxu1 %v8368_v7  ;;  %v8382_v14 = vpack.c.bf16 %v556_v60, %v552_v2  ;;  %v8384_v26 = vsub.f32 %v277_v32, %v552_v2 }
  0x7c   : > { %12777 = vst [vmem:[#allocation59_spill] sm:$0xff] %v8357_v3  ;;  %12778 = vst [vmem:[#allocation60_spill] sm:$0xff] %v8361_v59  ;;  %v283_v59 = vld [vmem:[#allocation4 + $0xd8] sm:$0xff]  ;;  %v8386_v36 = vsub.f32 %v279_v11, %v556_v60  ;;  %v3120_v28 = vand.u32 4294901760, %v405_v47  ;;  %v3124_v8 = vand.u32 4294901760, %v407_v53  ;;  %v558_v49 = vand.u32 4294901760, %v278_v29 }
  0x7d   : > { %12779 = vst [vmem:[#allocation61_spill] sm:$0xff] %v8364_v20  ;;  %12780 = vst [vmem:[#allocation62_spill] sm:$0xff] %v8366_v54  ;;  %7039 = vmatpush1.bf16.msra.mxu0 %v8374_v31  ;;  %v3122_v0 = vand.u32 4294901760, %v404_v45  ;;  %6273 = vmatprep.subr.bf16.mxu1 %v8382_v14  ;;  %v3126_v42 = vand.u32 4294901760, %v406_v15  ;;  %v560_v20 = vand.u32 4294901760, %v281_v21  ;;  %v8398_v2 = vsub.f32 %v276_v55, %v554_v37  ;;  %v287_v54 = vld [vmem:[#allocation4 + $0xf8] sm:$0xff] }
  0x7e   : > { %12781 = vst [vmem:[#allocation63_spill] sm:$0xff] %v8368_v7  ;;  %12782 = vst [vmem:[#allocation64_spill] sm:$0xff] %v8370_v9  ;;  %v8390_v1 = vsub.f32 %v405_v47, %v3120_v28  ;;  %v564_v7 = vand.u32 4294901760, %v283_v59  ;;  %v8392_v32 = vpack.c.bf16 %v3124_v8, %v3120_v28  ;;  %v8394_v60 = vsub.f32 %v407_v53, %v3124_v8  ;;  %v410_v9 = vld [vmem:[#allocation4 + $0x4d0] sm:$0xff]  ;;  %v285_v28 = vld [vmem:[#allocation4 + $0xe8] sm:$0xff] }
  0x7f   : > { %12783 = vst [vmem:[#allocation65_spill] sm:$0xff] %v8372_v38  ;;  %12784 = vst [vmem:[#allocation66_spill] sm:$0xff] %v8374_v31  ;;  %v8396_v11 = vpack.c.bf16 %v558_v49, %v554_v37  ;;  %v280_v31 = vld [vmem:[#allocation4 + $0xc0] sm:$0xff]  ;;  %v8400_v38 = vsub.f32 %v278_v29, %v558_v49  ;;  %v8402_v47 = vpack.c.bf16 %v3126_v42, %v3122_v0 }
  0x80   : > { %12785 = vst [vmem:[#allocation67_spill] sm:$0xff] %v8376_v24  ;;  %12786 = vst [vmem:[#allocation68_spill] sm:$0xff] %v8378_v22  ;;  %v409_v22 = vld [vmem:[#allocation4 + $0x4c8] sm:$0xff]  ;;  %v411_v24 = vld [vmem:[#allocation4 + $0x4d8] sm:$0xff]  ;;  %7041 = vmatprep.subr.bf16.mxu0 %v8392_v32  ;;  %v8410_v53 = vpack.c.bf16 %v564_v7, %v560_v20  ;;  %v8412_v55 = vsub.f32 %v281_v21, %v560_v20  ;;  %v8414_v8 = vsub.f32 %v283_v59, %v564_v7 }
  0x81   : > { %12787 = vst [vmem:[#allocation69_spill] sm:$0xff] %v8382_v14  ;;  %12788 = vst [vmem:[#allocation70_spill] sm:$0xff] %v8384_v26  ;;  %v408_v26 = vld [vmem:[#allocation4 + $0x4c0] sm:$0xff]  ;;  %v8404_v14 = vsub.f32 %v404_v45, %v3122_v0  ;;  %6275 = vmatpush1.bf16.msra.mxu1 %v8396_v11  ;;  %v3128_v29 = vand.u32 4294901760, %v409_v22  ;;  %7043 = vmatpush1.bf16.msra.mxu0 %v8402_v47  ;;  %v3132_v45 = vand.u32 4294901760, %v411_v24  ;;  %v562_v37 = vand.u32 4294901760, %v280_v31 }
  0x82   : > { %12789 = vst [vmem:[#allocation71_spill] sm:$0xff] %v8386_v36  ;;  %12790 = vst [vmem:[#allocation72_spill] sm:$0xff] %v8390_v1  ;;  %v282_v36 = vld [vmem:[#allocation4 + $0xd0] sm:$0xff]  ;;  %v8406_v1 = vsub.f32 %v406_v15, %v3126_v42  ;;  %v3130_v49 = vand.u32 4294901760, %v408_v26  ;;  %6277 = vmatprep.subr.bf16.mxu1 %v8410_v53  ;;  %v3134_v42 = vand.u32 4294901760, %v410_v9 }
  0x83   : > { %12791 = vst [vmem:[#allocation73_spill] sm:$0xff] %v8392_v32  ;;  %12792 = vst [vmem:[#allocation74_spill] sm:$0xff] %v8394_v60  ;;  %v566_v15 = vand.u32 4294901760, %v282_v36  ;;  %v8418_v0 = vsub.f32 %v409_v22, %v3128_v29  ;;  %v568_v32 = vand.u32 4294901760, %v285_v28  ;;  %v8420_v20 = vpack.c.bf16 %v3132_v45, %v3128_v29  ;;  %v289_v29 = vld [vmem:[#allocation4 + $0x108] sm:$0xff]  ;;  %v291_v60 = vld [vmem:[#allocation4 + $0x118] sm:$0xff] }
  0x84   : > { %12793 = vst [vmem:[#allocation75_spill] sm:$0xff] %v8396_v11  ;;  %12794 = vst [vmem:[#allocation76_spill] sm:$0xff] %v8398_v2  ;;  %v572_v11 = vand.u32 4294901760, %v287_v54  ;;  %v8422_v59 = vsub.f32 %v411_v24, %v3132_v45  ;;  %v8426_v21 = vsub.f32 %v280_v31, %v562_v37  ;;  %v8430_v22 = vpack.c.bf16 %v3134_v42, %v3130_v49  ;;  %v414_v2 = vld [vmem:[#allocation4 + $0x4f0] sm:$0xff] }
  0x85   : > { %12795 = vst [vmem:[#allocation77_spill] sm:$0xff] %v8400_v38  ;;  %12796 = vst [vmem:[#allocation78_spill] sm:$0xff] %v8402_v47  ;;  %v8424_v7 = vpack.c.bf16 %v566_v15, %v562_v37  ;;  %v284_v47 = vld [vmem:[#allocation4 + $0xe0] sm:$0xff]  ;;  %v8428_v38 = vsub.f32 %v282_v36, %v566_v15  ;;  %7045 = vmatprep.subr.bf16.mxu0 %v8420_v20  ;;  %v8440_v31 = vsub.f32 %v285_v28, %v568_v32 }
  0x86   : > { %12797 = vst [vmem:[#allocation79_spill] sm:$0xff] %v8404_v14  ;;  %12798 = vst [vmem:[#allocation80_spill] sm:$0xff] %v8406_v1  ;;  %v413_v1 = vld [vmem:[#allocation4 + $0x4e8] sm:$0xff]  ;;  %v415_v14 = vld [vmem:[#allocation4 + $0x4f8] sm:$0xff]  ;;  %v8438_v24 = vpack.c.bf16 %v572_v11, %v568_v32  ;;  %v8442_v45 = vsub.f32 %v287_v54, %v572_v11  ;;  %7047 = vmatpush1.bf16.msra.mxu0 %v8430_v22  ;;  %v570_v37 = vand.u32 4294901760, %v284_v47 }
  0x87   : > { %12799 = vst [vmem:[#allocation81_spill] sm:$0xff] %v8410_v53  ;;  %12800 = vst [vmem:[#allocation82_spill] sm:$0xff] %v8412_v55  ;;  %v412_v55 = vld [vmem:[#allocation4 + $0x4e0] sm:$0xff]  ;;  %v8432_v53 = vsub.f32 %v408_v26, %v3130_v49  ;;  %6279 = vmatpush1.bf16.msra.mxu1 %v8424_v7  ;;  %v3136_v36 = vand.u32 4294901760, %v413_v1  ;;  %v3140_v26 = vand.u32 4294901760, %v415_v14 }
  0x88   : > { %12801 = vst [vmem:[#allocation83_spill] sm:$0xff] %v8414_v8  ;;  %12802 = vst [vmem:[#allocation84_spill] sm:$0xff] %v8418_v0  ;;  %v286_v8 = vld [vmem:[#allocation4 + $0xf0] sm:$0xff]  ;;  %v8434_v0 = vsub.f32 %v410_v9, %v3134_v42  ;;  %v3138_v15 = vand.u32 4294901760, %v412_v55  ;;  %6281 = vmatprep.subr.bf16.mxu1 %v8438_v24  ;;  %v3142_v42 = vand.u32 4294901760, %v414_v2  ;;  %v8454_v28 = vsub.f32 %v284_v47, %v570_v37 }
  0x89   : > { %12803 = vst [vmem:[#allocation85_spill] sm:$0xff] %v8420_v20  ;;  %12804 = vst [vmem:[#allocation86_spill] sm:$0xff] %v8422_v59  ;;  %v574_v9 = vand.u32 4294901760, %v286_v8  ;;  %v8446_v49 = vsub.f32 %v413_v1, %v3136_v36  ;;  %v576_v20 = vand.u32 4294901760, %v289_v29  ;;  %v8448_v32 = vpack.c.bf16 %v3140_v26, %v3136_v36  ;;  %v293_v36 = vld [vmem:[#allocation4 + $0x128] sm:$0xff]  ;;  %v295_v59 = vld [vmem:[#allocation4 + $0x138] sm:$0xff] }
  0x8a   : > { %12805 = vst [vmem:[#allocation87_spill] sm:$0xff] %v8424_v7  ;;  %12806 = vst [vmem:[#allocation88_spill] sm:$0xff] %v8426_v21  ;;  %v580_v7 = vand.u32 4294901760, %v291_v60  ;;  %v8450_v54 = vsub.f32 %v415_v14, %v3140_v26  ;;  %v8458_v1 = vpack.c.bf16 %v3142_v42, %v3138_v15  ;;  %v418_v21 = vld [vmem:[#allocation4 + $0x510] sm:$0xff] }
  0x8b   : > { %12807 = vst [vmem:[#allocation89_spill] sm:$0xff] %v8428_v38  ;;  %12808 = vst [vmem:[#allocation90_spill] sm:$0xff] %v8430_v22  ;;  %v8452_v11 = vpack.c.bf16 %v574_v9, %v570_v37  ;;  %v288_v22 = vld [vmem:[#allocation4 + $0x100] sm:$0xff]  ;;  %v8456_v38 = vsub.f32 %v286_v8, %v574_v9  ;;  %7049 = vmatprep.subr.bf16.mxu0 %v8448_v32  ;;  %v8468_v47 = vsub.f32 %v289_v29, %v576_v20 }
  0x8c   : > { %12809 = vst [vmem:[#allocation91_spill] sm:$0xff] %v8432_v53  ;;  %12810 = vst [vmem:[#allocation92_spill] sm:$0xff] %v8434_v0  ;;  %v417_v0 = vld [vmem:[#allocation4 + $0x508] sm:$0xff]  ;;  %v419_v53 = vld [vmem:[#allocation4 + $0x518] sm:$0xff]  ;;  %v8466_v14 = vpack.c.bf16 %v580_v7, %v576_v20  ;;  %v8470_v26 = vsub.f32 %v291_v60, %v580_v7  ;;  %7051 = vmatpush1.bf16.msra.mxu0 %v8458_v1  ;;  %v578_v37 = vand.u32 4294901760, %v288_v22 }
  0x8d   : > { %12811 = vst [vmem:[#allocation93_spill] sm:$0xff] %v8438_v24  ;;  %12812 = vst [vmem:[#allocation94_spill] sm:$0xff] %v8440_v31  ;;  %v416_v31 = vld [vmem:[#allocation4 + $0x500] sm:$0xff]  ;;  %v8460_v24 = vsub.f32 %v412_v55, %v3138_v15  ;;  %6283 = vmatpush1.bf16.msra.mxu1 %v8452_v11  ;;  %v3144_v8 = vand.u32 4294901760, %v417_v0  ;;  %v3148_v55 = vand.u32 4294901760, %v419_v53 }
  0x8e   : > { %12813 = vst [vmem:[#allocation95_spill] sm:$0xff] %v8442_v45  ;;  %12814 = vst [vmem:[#allocation96_spill] sm:$0xff] %v8446_v49  ;;  %v290_v45 = vld [vmem:[#allocation4 + $0x110] sm:$0xff]  ;;  %v8462_v49 = vsub.f32 %v414_v2, %v3142_v42  ;;  %v3146_v9 = vand.u32 4294901760, %v416_v31  ;;  %6285 = vmatprep.subr.bf16.mxu1 %v8466_v14  ;;  %v3150_v42 = vand.u32 4294901760, %v418_v21  ;;  %v8482_v29 = vsub.f32 %v288_v22, %v578_v37 }
  0x8f   : > { %12815 = vst [vmem:[#allocation97_spill] sm:$0xff] %v8448_v32  ;;  %12816 = vst [vmem:[#allocation98_spill] sm:$0xff] %v8450_v54  ;;  %v582_v2 = vand.u32 4294901760, %v290_v45  ;;  %v8474_v15 = vsub.f32 %v417_v0, %v3144_v8  ;;  %v584_v32 = vand.u32 4294901760, %v293_v36  ;;  %v8476_v20 = vpack.c.bf16 %v3148_v55, %v3144_v8  ;;  %v297_v8 = vld [vmem:[#allocation4 + $0x148] sm:$0xff]  ;;  %v299_v54 = vld [vmem:[#allocation4 + $0x158] sm:$0xff] }
  0x90   : > { %12817 = vst [vmem:[#allocation99_spill] sm:$0xff] %v8452_v11  ;;  %12818 = vst [vmem:[#allocation100_spill] sm:$0xff] %v8454_v28  ;;  %v588_v11 = vand.u32 4294901760, %v295_v59  ;;  %v8478_v60 = vsub.f32 %v419_v53, %v3148_v55  ;;  %v8486_v0 = vpack.c.bf16 %v3150_v42, %v3146_v9  ;;  %v422_v28 = vld [vmem:[#allocation4 + $0x530] sm:$0xff] }
  0x91   : > { %12819 = vst [vmem:[#allocation101_spill] sm:$0xff] %v8456_v38  ;;  %12820 = vst [vmem:[#allocation102_spill] sm:$0xff] %v8458_v1  ;;  %v8480_v7 = vpack.c.bf16 %v582_v2, %v578_v37  ;;  %v292_v1 = vld [vmem:[#allocation4 + $0x120] sm:$0xff]  ;;  %v8484_v38 = vsub.f32 %v290_v45, %v582_v2  ;;  %7053 = vmatprep.subr.bf16.mxu0 %v8476_v20  ;;  %v8496_v22 = vsub.f32 %v293_v36, %v584_v32 }
  0x92   : > { %12821 = vst [vmem:[#allocation103_spill] sm:$0xff] %v8460_v24  ;;  %12822 = vst [vmem:[#allocation104_spill] sm:$0xff] %v8462_v49  ;;  %v421_v49 = vld [vmem:[#allocation4 + $0x528] sm:$0xff]  ;;  %v423_v24 = vld [vmem:[#allocation4 + $0x538] sm:$0xff]  ;;  %v8494_v53 = vpack.c.bf16 %v588_v11, %v584_v32  ;;  %v8498_v55 = vsub.f32 %v295_v59, %v588_v11  ;;  %7055 = vmatpush1.bf16.msra.mxu0 %v8486_v0  ;;  %v586_v37 = vand.u32 4294901760, %v292_v1 }
  0x93   : > { %12823 = vst [vmem:[#allocation105_spill] sm:$0xff] %v8466_v14  ;;  %12824 = vst [vmem:[#allocation106_spill] sm:$0xff] %v8468_v47  ;;  %v420_v47 = vld [vmem:[#allocation4 + $0x520] sm:$0xff]  ;;  %v8488_v14 = vsub.f32 %v416_v31, %v3146_v9  ;;  %6287 = vmatpush1.bf16.msra.mxu1 %v8480_v7  ;;  %v3152_v45 = vand.u32 4294901760, %v421_v49  ;;  %v3156_v31 = vand.u32 4294901760, %v423_v24 }
  0x94   : > { %12825 = vst [vmem:[#allocation107_spill] sm:$0xff] %v8470_v26  ;;  %12826 = vst [vmem:[#allocation108_spill] sm:$0xff] %v8474_v15  ;;  %v294_v26 = vld [vmem:[#allocation4 + $0x130] sm:$0xff]  ;;  %v8490_v15 = vsub.f32 %v418_v21, %v3150_v42  ;;  %v3154_v2 = vand.u32 4294901760, %v420_v47  ;;  %6289 = vmatprep.subr.bf16.mxu1 %v8494_v53  ;;  %v3158_v42 = vand.u32 4294901760, %v422_v28  ;;  %v8510_v36 = vsub.f32 %v292_v1, %v586_v37 }
  0x95   : > { %12827 = vst [vmem:[#allocation109_spill] sm:$0xff] %v8476_v20  ;;  %12828 = vst [vmem:[#allocation110_spill] sm:$0xff] %v8478_v60  ;;  %v590_v21 = vand.u32 4294901760, %v294_v26  ;;  %v8502_v9 = vsub.f32 %v421_v49, %v3152_v45  ;;  %v592_v20 = vand.u32 4294901760, %v297_v8  ;;  %v8504_v32 = vpack.c.bf16 %v3156_v31, %v3152_v45  ;;  %v301_v45 = vld [vmem:[#allocation4 + $0x168] sm:$0xff]  ;;  %v303_v60 = vld [vmem:[#allocation4 + $0x178] sm:$0xff] }
  0x96   : > { %12829 = vst [vmem:[#allocation111_spill] sm:$0xff] %v8480_v7  ;;  %12830 = vst [vmem:[#allocation112_spill] sm:$0xff] %v8482_v29  ;;  %v596_v7 = vand.u32 4294901760, %v299_v54  ;;  %v8506_v59 = vsub.f32 %v423_v24, %v3156_v31  ;;  %v8514_v49 = vpack.c.bf16 %v3158_v42, %v3154_v2  ;;  %v426_v29 = vld [vmem:[#allocation4 + $0x550] sm:$0xff] }
  0x97   : > { %12831 = vst [vmem:[#allocation113_spill] sm:$0xff] %v8484_v38  ;;  %12832 = vst [vmem:[#allocation114_spill] sm:$0xff] %v8486_v0  ;;  %v8508_v11 = vpack.c.bf16 %v590_v21, %v586_v37  ;;  %v296_v0 = vld [vmem:[#allocation4 + $0x140] sm:$0xff]  ;;  %v8512_v38 = vsub.f32 %v294_v26, %v590_v21  ;;  %7057 = vmatprep.subr.bf16.mxu0 %v8504_v32  ;;  %v8524_v1 = vsub.f32 %v297_v8, %v592_v20 }
  0x98   : > { %12833 = vst [vmem:[#allocation115_spill] sm:$0xff] %v8488_v14  ;;  %12834 = vst [vmem:[#allocation116_spill] sm:$0xff] %v8490_v15  ;;  %v425_v15 = vld [vmem:[#allocation4 + $0x548] sm:$0xff]  ;;  %v427_v14 = vld [vmem:[#allocation4 + $0x558] sm:$0xff]  ;;  %v8522_v24 = vpack.c.bf16 %v596_v7, %v592_v20  ;;  %v8526_v31 = vsub.f32 %v299_v54, %v596_v7  ;;  %7059 = vmatpush1.bf16.msra.mxu0 %v8514_v49  ;;  %v594_v37 = vand.u32 4294901760, %v296_v0 }
  0x99   : > { %12835 = vst [vmem:[#allocation117_spill] sm:$0xff] %v8494_v53  ;;  %12836 = vst [vmem:[#allocation118_spill] sm:$0xff] %v8496_v22  ;;  %v424_v22 = vld [vmem:[#allocation4 + $0x540] sm:$0xff]  ;;  %v8516_v53 = vsub.f32 %v420_v47, %v3154_v2  ;;  %6291 = vmatpush1.bf16.msra.mxu1 %v8508_v11  ;;  %v3160_v26 = vand.u32 4294901760, %v425_v15  ;;  %v3164_v47 = vand.u32 4294901760, %v427_v14 }
  0x9a   : > { %12837 = vst [vmem:[#allocation119_spill] sm:$0xff] %v8498_v55  ;;  %12838 = vst [vmem:[#allocation120_spill] sm:$0xff] %v8502_v9  ;;  %v298_v55 = vld [vmem:[#allocation4 + $0x150] sm:$0xff]  ;;  %v8518_v9 = vsub.f32 %v422_v28, %v3158_v42  ;;  %v3162_v21 = vand.u32 4294901760, %v424_v22  ;;  %6293 = vmatprep.subr.bf16.mxu1 %v8522_v24  ;;  %v3166_v42 = vand.u32 4294901760, %v426_v29  ;;  %v8538_v8 = vsub.f32 %v296_v0, %v594_v37 }
  0x9b   : > { %12839 = vst [vmem:[#allocation121_spill] sm:$0xff] %v8504_v32  ;;  %12840 = vst [vmem:[#allocation122_spill] sm:$0xff] %v8506_v59  ;;  %v598_v28 = vand.u32 4294901760, %v298_v55  ;;  %v8530_v2 = vsub.f32 %v425_v15, %v3160_v26  ;;  %v600_v32 = vand.u32 4294901760, %v301_v45  ;;  %v8532_v20 = vpack.c.bf16 %v3164_v47, %v3160_v26  ;;  %v305_v26 = vld [vmem:[#allocation4 + $0x188] sm:$0xff]  ;;  %v307_v59 = vld [vmem:[#allocation4 + $0x198] sm:$0xff] }
  0x9c   : > { %12841 = vst [vmem:[#allocation123_spill] sm:$0xff] %v8508_v11  ;;  %12842 = vst [vmem:[#allocation124_spill] sm:$0xff] %v8510_v36  ;;  %v604_v11 = vand.u32 4294901760, %v303_v60  ;;  %v8534_v54 = vsub.f32 %v427_v14, %v3164_v47  ;;  %v8542_v15 = vpack.c.bf16 %v3166_v42, %v3162_v21  ;;  %v430_v36 = vld [vmem:[#allocation4 + $0x570] sm:$0xff] }
  0x9d   : > { %12843 = vst [vmem:[#allocation125_spill] sm:$0xff] %v8512_v38  ;;  %12844 = vst [vmem:[#allocation126_spill] sm:$0xff] %v8514_v49  ;;  %v8536_v7 = vpack.c.bf16 %v598_v28, %v594_v37  ;;  %v300_v49 = vld [vmem:[#allocation4 + $0x160] sm:$0xff]  ;;  %v8540_v38 = vsub.f32 %v298_v55, %v598_v28  ;;  %7061 = vmatprep.subr.bf16.mxu0 %v8532_v20  ;;  %v8552_v0 = vsub.f32 %v301_v45, %v600_v32 }
  0x9e   : > { %12845 = vst [vmem:[#allocation127_spill] sm:$0xff] %v8516_v53  ;;  %12846 = vst [vmem:[#allocation128_spill] sm:$0xff] %v8518_v9  ;;  %v429_v9 = vld [vmem:[#allocation4 + $0x568] sm:$0xff]  ;;  %v431_v53 = vld [vmem:[#allocation4 + $0x578] sm:$0xff]  ;;  %v8550_v14 = vpack.c.bf16 %v604_v11, %v600_v32  ;;  %v8554_v47 = vsub.f32 %v303_v60, %v604_v11  ;;  %7063 = vmatpush1.bf16.msra.mxu0 %v8542_v15  ;;  %v602_v37 = vand.u32 4294901760, %v300_v49 }
  0x9f   : > { %12847 = vst [vmem:[#allocation129_spill] sm:$0xff] %v8522_v24  ;;  %12848 = vst [vmem:[#allocation130_spill] sm:$0xff] %v8524_v1  ;;  %v428_v1 = vld [vmem:[#allocation4 + $0x560] sm:$0xff]  ;;  %v8544_v24 = vsub.f32 %v424_v22, %v3162_v21  ;;  %6295 = vmatpush1.bf16.msra.mxu1 %v8536_v7  ;;  %v3168_v55 = vand.u32 4294901760, %v429_v9  ;;  %v3172_v22 = vand.u32 4294901760, %v431_v53 }
  0xa0   : > { %12849 = vst [vmem:[#allocation131_spill] sm:$0xff] %v8526_v31  ;;  %12850 = vst [vmem:[#allocation132_spill] sm:$0xff] %v8530_v2  ;;  %v302_v31 = vld [vmem:[#allocation4 + $0x170] sm:$0xff]  ;;  %v8546_v2 = vsub.f32 %v426_v29, %v3166_v42  ;;  %v3170_v28 = vand.u32 4294901760, %v428_v1  ;;  %6297 = vmatprep.subr.bf16.mxu1 %v8550_v14  ;;  %v3174_v42 = vand.u32 4294901760, %v430_v36  ;;  %v8566_v45 = vsub.f32 %v300_v49, %v602_v37 }
  0xa1   : > { %12851 = vst [vmem:[#allocation133_spill] sm:$0xff] %v8532_v20  ;;  %12852 = vst [vmem:[#allocation134_spill] sm:$0xff] %v8534_v54  ;;  %v606_v29 = vand.u32 4294901760, %v302_v31  ;;  %v8558_v21 = vsub.f32 %v429_v9, %v3168_v55  ;;  %v608_v20 = vand.u32 4294901760, %v305_v26  ;;  %v8560_v32 = vpack.c.bf16 %v3172_v22, %v3168_v55  ;;  %v309_v55 = vld [vmem:[#allocation4 + $0x1a8] sm:$0xff]  ;;  %v311_v54 = vld [vmem:[#allocation4 + $0x1b8] sm:$0xff] }
  0xa2   : > { %12853 = vst [vmem:[#allocation135_spill] sm:$0xff] %v8536_v7  ;;  %12854 = vst [vmem:[#allocation136_spill] sm:$0xff] %v8538_v8  ;;  %v612_v7 = vand.u32 4294901760, %v307_v59  ;;  %v8562_v60 = vsub.f32 %v431_v53, %v3172_v22  ;;  %v8570_v9 = vpack.c.bf16 %v3174_v42, %v3170_v28  ;;  %v434_v8 = vld [vmem:[#allocation4 + $0x590] sm:$0xff] }
  0xa3   : > { %12855 = vst [vmem:[#allocation137_spill] sm:$0xff] %v8540_v38  ;;  %12856 = vst [vmem:[#allocation138_spill] sm:$0xff] %v8542_v15  ;;  %v8564_v11 = vpack.c.bf16 %v606_v29, %v602_v37  ;;  %v304_v15 = vld [vmem:[#allocation4 + $0x180] sm:$0xff]  ;;  %v8568_v38 = vsub.f32 %v302_v31, %v606_v29  ;;  %7065 = vmatprep.subr.bf16.mxu0 %v8560_v32  ;;  %v8580_v49 = vsub.f32 %v305_v26, %v608_v20 }
  0xa4   : > { %12857 = vst [vmem:[#allocation139_spill] sm:$0xff] %v8544_v24  ;;  %12858 = vst [vmem:[#allocation140_spill] sm:$0xff] %v8546_v2  ;;  %v433_v2 = vld [vmem:[#allocation4 + $0x588] sm:$0xff]  ;;  %v435_v24 = vld [vmem:[#allocation4 + $0x598] sm:$0xff]  ;;  %v8578_v53 = vpack.c.bf16 %v612_v7, %v608_v20  ;;  %v8582_v22 = vsub.f32 %v307_v59, %v612_v7  ;;  %7067 = vmatpush1.bf16.msra.mxu0 %v8570_v9  ;;  %v610_v37 = vand.u32 4294901760, %v304_v15 }
  0xa5   : > { %12859 = vst [vmem:[#allocation141_spill] sm:$0xff] %v8550_v14  ;;  %12860 = vst [vmem:[#allocation142_spill] sm:$0xff] %v8552_v0  ;;  %v432_v0 = vld [vmem:[#allocation4 + $0x580] sm:$0xff]  ;;  %v8572_v14 = vsub.f32 %v428_v1, %v3170_v28  ;;  %6299 = vmatpush1.bf16.msra.mxu1 %v8564_v11  ;;  %v3176_v31 = vand.u32 4294901760, %v433_v2  ;;  %v3180_v1 = vand.u32 4294901760, %v435_v24 }
  0xa6   : > { %12861 = vst [vmem:[#allocation143_spill] sm:$0xff] %v8554_v47  ;;  %12862 = vst [vmem:[#allocation144_spill] sm:$0xff] %v8558_v21  ;;  %v306_v47 = vld [vmem:[#allocation4 + $0x190] sm:$0xff]  ;;  %v8574_v21 = vsub.f32 %v430_v36, %v3174_v42  ;;  %v3178_v29 = vand.u32 4294901760, %v432_v0  ;;  %6301 = vmatprep.subr.bf16.mxu1 %v8578_v53  ;;  %v3182_v42 = vand.u32 4294901760, %v434_v8  ;;  %v8594_v26 = vsub.f32 %v304_v15, %v610_v37 }
  0xa7   : > { %12863 = vst [vmem:[#allocation145_spill] sm:$0xff] %v8560_v32  ;;  %12864 = vst [vmem:[#allocation146_spill] sm:$0xff] %v8562_v60  ;;  %v614_v36 = vand.u32 4294901760, %v306_v47  ;;  %v8586_v28 = vsub.f32 %v433_v2, %v3176_v31  ;;  %v616_v32 = vand.u32 4294901760, %v309_v55  ;;  %v8588_v20 = vpack.c.bf16 %v3180_v1, %v3176_v31  ;;  %v313_v31 = vld [vmem:[#allocation4 + $0x1c8] sm:$0xff]  ;;  %v315_v60 = vld [vmem:[#allocation4 + $0x1d8] sm:$0xff] }
  0xa8   : > { %12865 = vst [vmem:[#allocation147_spill] sm:$0xff] %v8564_v11  ;;  %12866 = vst [vmem:[#allocation148_spill] sm:$0xff] %v8566_v45  ;;  %v620_v11 = vand.u32 4294901760, %v311_v54  ;;  %v8590_v59 = vsub.f32 %v435_v24, %v3180_v1  ;;  %v8598_v2 = vpack.c.bf16 %v3182_v42, %v3178_v29  ;;  %v438_v45 = vld [vmem:[#allocation4 + $0x5b0] sm:$0xff] }
  0xa9   : > { %12867 = vst [vmem:[#allocation149_spill] sm:$0xff] %v8568_v38  ;;  %12868 = vst [vmem:[#allocation150_spill] sm:$0xff] %v8570_v9  ;;  %v8592_v7 = vpack.c.bf16 %v614_v36, %v610_v37  ;;  %v308_v9 = vld [vmem:[#allocation4 + $0x1a0] sm:$0xff]  ;;  %v8596_v38 = vsub.f32 %v306_v47, %v614_v36  ;;  %7069 = vmatprep.subr.bf16.mxu0 %v8588_v20  ;;  %v8608_v15 = vsub.f32 %v309_v55, %v616_v32 }
  0xaa   : > { %12869 = vst [vmem:[#allocation151_spill] sm:$0xff] %v8572_v14  ;;  %12870 = vst [vmem:[#allocation152_spill] sm:$0xff] %v8574_v21  ;;  %v437_v21 = vld [vmem:[#allocation4 + $0x5a8] sm:$0xff]  ;;  %v439_v14 = vld [vmem:[#allocation4 + $0x5b8] sm:$0xff]  ;;  %v8606_v24 = vpack.c.bf16 %v620_v11, %v616_v32  ;;  %v8610_v1 = vsub.f32 %v311_v54, %v620_v11  ;;  %7071 = vmatpush1.bf16.msra.mxu0 %v8598_v2  ;;  %v618_v37 = vand.u32 4294901760, %v308_v9 }
  0xab   : > { %12871 = vst [vmem:[#allocation153_spill] sm:$0xff] %v8578_v53  ;;  %12872 = vst [vmem:[#allocation154_spill] sm:$0xff] %v8580_v49  ;;  %v436_v49 = vld [vmem:[#allocation4 + $0x5a0] sm:$0xff]  ;;  %v8600_v53 = vsub.f32 %v432_v0, %v3178_v29  ;;  %6303 = vmatpush1.bf16.msra.mxu1 %v8592_v7  ;;  %v3184_v47 = vand.u32 4294901760, %v437_v21  ;;  %v3188_v0 = vand.u32 4294901760, %v439_v14 }
  0xac   : > { %12873 = vst [vmem:[#allocation155_spill] sm:$0xff] %v8582_v22  ;;  %12874 = vst [vmem:[#allocation156_spill] sm:$0xff] %v8586_v28  ;;  %v310_v22 = vld [vmem:[#allocation4 + $0x1b0] sm:$0xff]  ;;  %v8602_v28 = vsub.f32 %v434_v8, %v3182_v42  ;;  %v3186_v36 = vand.u32 4294901760, %v436_v49  ;;  %6305 = vmatprep.subr.bf16.mxu1 %v8606_v24  ;;  %v3190_v42 = vand.u32 4294901760, %v438_v45  ;;  %v8622_v55 = vsub.f32 %v308_v9, %v618_v37 }
  0xad   : > { %12875 = vst [vmem:[#allocation157_spill] sm:$0xff] %v8588_v20  ;;  %12876 = vst [vmem:[#allocation158_spill] sm:$0xff] %v8590_v59  ;;  %v622_v8 = vand.u32 4294901760, %v310_v22  ;;  %v8614_v29 = vsub.f32 %v437_v21, %v3184_v47  ;;  %v624_v20 = vand.u32 4294901760, %v313_v31  ;;  %v8616_v32 = vpack.c.bf16 %v3188_v0, %v3184_v47  ;;  %v317_v47 = vld [vmem:[#allocation4 + $0x1e8] sm:$0xff]  ;;  %v319_v59 = vld [vmem:[#allocation4 + $0x1f8] sm:$0xff] }
  0xae   : > { %12877 = vst [vmem:[#allocation159_spill] sm:$0xff] %v8592_v7  ;;  %12878 = vst [vmem:[#allocation160_spill] sm:$0xff] %v8594_v26  ;;  %v628_v7 = vand.u32 4294901760, %v315_v60  ;;  %v8618_v54 = vsub.f32 %v439_v14, %v3188_v0  ;;  %v8626_v21 = vpack.c.bf16 %v3190_v42, %v3186_v36  ;;  %v442_v26 = vld [vmem:[#allocation4 + $0x5d0] sm:$0xff] }
  0xaf   : > { %12879 = vst [vmem:[#allocation161_spill] sm:$0xff] %v8596_v38  ;;  %12880 = vst [vmem:[#allocation162_spill] sm:$0xff] %v8598_v2  ;;  %v8620_v11 = vpack.c.bf16 %v622_v8, %v618_v37  ;;  %v312_v2 = vld [vmem:[#allocation4 + $0x1c0] sm:$0xff]  ;;  %v8624_v38 = vsub.f32 %v310_v22, %v622_v8  ;;  %7073 = vmatprep.subr.bf16.mxu0 %v8616_v32  ;;  %v8636_v9 = vsub.f32 %v313_v31, %v624_v20  ;;  %v447_v31 = vld [vmem:[#allocation4 + $0x5f8] sm:$0xff] }
  0xb0   : > { %12881 = vst [vmem:[#allocation163_spill] sm:$0xff] %v8600_v53  ;;  %12882 = vst [vmem:[#allocation164_spill] sm:$0xff] %v8602_v28  ;;  %v441_v28 = vld [vmem:[#allocation4 + $0x5c8] sm:$0xff]  ;;  %v443_v53 = vld [vmem:[#allocation4 + $0x5d8] sm:$0xff]  ;;  %v8634_v14 = vpack.c.bf16 %v628_v7, %v624_v20  ;;  %v8638_v0 = vsub.f32 %v315_v60, %v628_v7  ;;  %7075 = vmatpush1.bf16.msra.mxu0 %v8626_v21  ;;  %v626_v37 = vand.u32 4294901760, %v312_v2 }
  0xb1   : > { %12883 = vst [vmem:[#allocation165_spill] sm:$0xff] %v8606_v24  ;;  %12884 = vst [vmem:[#allocation166_spill] sm:$0xff] %v8608_v15  ;;  %v440_v15 = vld [vmem:[#allocation4 + $0x5c0] sm:$0xff]  ;;  %v8628_v24 = vsub.f32 %v436_v49, %v3186_v36  ;;  %6307 = vmatpush1.bf16.msra.mxu1 %v8620_v11  ;;  %v3192_v22 = vand.u32 4294901760, %v441_v28  ;;  %v3196_v49 = vand.u32 4294901760, %v443_v53  ;;  %v445_v20 = vld [vmem:[#allocation4 + $0x5e8] sm:$0xff] }
  0xb2   : > { %12885 = vst [vmem:[#allocation167_spill] sm:$0xff] %v8610_v1  ;;  %12886 = vst [vmem:[#allocation168_spill] sm:$0xff] %v8614_v29  ;;  %v314_v1 = vld [vmem:[#allocation4 + $0x1d0] sm:$0xff]  ;;  %v8630_v29 = vsub.f32 %v438_v45, %v3190_v42  ;;  %v3194_v8 = vand.u32 4294901760, %v440_v15  ;;  %6309 = vmatprep.subr.bf16.mxu1 %v8634_v14  ;;  %v3198_v42 = vand.u32 4294901760, %v442_v26 }
  0xb3   : > { %12887 = vst [vmem:[#allocation169_spill] sm:$0xff] %v8616_v32  ;;  %12888 = vst [vmem:[#allocation170_spill] sm:$0xff] %v8618_v54  ;;  %v630_v45 = vand.u32 4294901760, %v314_v1  ;;  %v8642_v36 = vsub.f32 %v441_v28, %v3192_v22  ;;  %v632_v32 = vand.u32 4294901760, %v317_v47  ;;  %v8644_v60 = vpack.c.bf16 %v3196_v49, %v3192_v22  ;;  %v232_v22 = vld [vmem:[%s8233_s1] sm:$0xff]  ;;  %v233_v54 = vld [vmem:[%s8233_s1 + $0x8] sm:$0xff] }
  0xb4   : > { %12889 = vst [vmem:[#allocation171_spill] sm:$0xff] %v8620_v11  ;;  %12890 = vst [vmem:[#allocation172_spill] sm:$0xff] %v8622_v55  ;;  %v636_v11 = vand.u32 4294901760, %v319_v59  ;;  %v8646_v7 = vsub.f32 %v443_v53, %v3196_v49  ;;  %v446_v55 = vld [vmem:[#allocation4 + $0x5f0] sm:$0xff] }
  0xb5   : > { %12891 = vst [vmem:[#allocation173_spill] sm:$0xff] %v8624_v38  ;;  %12892 = vst [vmem:[#allocation174_spill] sm:$0xff] %v8626_v21  ;;  %v8648_v21 = vpack.c.bf16 %v630_v45, %v626_v37  ;;  %v8652_v28 = vsub.f32 %v314_v1, %v630_v45  ;;  %v8658_v38 = vsub.f32 %v442_v26, %v3198_v42  ;;  %7077 = vmatprep.subr.bf16.mxu0 %v8644_v60 }
  0xb6   : > { %12893 = vst [vmem:[#allocation175_spill] sm:$0xff] %v8628_v24  ;;  %12894 = vst [vmem:[#allocation176_spill] sm:$0xff] %v8630_v29  ;;  %v318_v29 = vld [vmem:[#allocation4 + $0x1f0] sm:$0xff]  ;;  %v8656_v24 = vsub.f32 %v440_v15, %v3194_v8  ;;  %v8664_v53 = vpack.c.bf16 %v636_v11, %v632_v32  ;;  %v8668_v49 = vsub.f32 %v319_v59, %v636_v11  ;;  %v3200_v1 = vand.u32 4294901760, %v445_v20 }
  0xb7   : > { %12895 = vst [vmem:[#allocation177_spill] sm:$0xff] %v8634_v14  ;;  %12896 = vst [vmem:[#allocation178_spill] sm:$0xff] %v8636_v9  ;;  %v316_v9 = vld [vmem:[#allocation4 + $0x1e0] sm:$0xff]  ;;  %6311 = vmatpush1.bf16.msra.mxu1 %v8648_v21  ;;  %v3204_v26 = vand.u32 4294901760, %v447_v31 }
  0xb8   : > { %12897 = vst [vmem:[#allocation179_spill] sm:$0xff] %v8638_v0  ;;  %12898 = vst [vmem:[#allocation180_spill] sm:$0xff] %v8642_v36  ;;  %v8650_v0 = vsub.f32 %v312_v2, %v626_v37  ;;  %v444_v14 = vld [vmem:[#allocation4 + $0x5e0] sm:$0xff]  ;;  %v8654_v36 = vpack.c.bf16 %v3198_v42, %v3194_v8  ;;  %v8666_v2 = vsub.f32 %v317_v47, %v632_v32  ;;  %v634_v15 = vand.u32 4294901760, %v316_v9 }
  0xb9   : > { %12899 = vst [vmem:[#allocation181_spill] sm:$0xff] %v8644_v60  ;;  %12900 = vst [vmem:[#allocation182_spill] sm:$0xff] %v8646_v7  ;;  %v638_v37 = vand.u32 4294901760, %v318_v29  ;;  %v3202_v45 = vand.u32 4294901760, %v444_v14  ;;  %6313 = vmatprep.subr.bf16.mxu1 %v8664_v53  ;;  %v8672_v8 = vsub.f32 %v445_v20, %v3200_v1  ;;  %v3206_v42 = vand.u32 4294901760, %v446_v55 }
  0xba   : > { %12901 = vst [vmem:[#allocation183_spill] sm:$0xff] %v8648_v21  ;;  %12902 = vst [vmem:[#allocation184_spill] sm:$0xff] %v8650_v0  ;;  %7079 = vmatpush1.bf16.msra.mxu0 %v8654_v36  ;;  %v240_v21 = vadd.f32 %v233_v54, %v232_v22  ;;  %v12028_v32 = vand.u32 4294901760, %v8245_v16  ;;  %v8675_v47 = vpack.c.bf16 %v3204_v26, %v3200_v1 }
  0xbb   : > { %12903 = vst [vmem:[#allocation185_spill] sm:$0xff] %v8652_v28  ;;  %12904 = vst [vmem:[#allocation186_spill] sm:$0xff] %v8654_v36  ;;  %v8677_v59 = vsub.f32 %v447_v31, %v3204_v26  ;;  %v8679_v11 = vpack.c.bf16 %v638_v37, %v634_v15  ;;  %v8681_v60 = vsub.f32 %v316_v9, %v634_v15  ;;  %v236_v36 = vld [vmem:[%s8233_s1 + $0x20] sm:$0xff] }
  0xbc   : > { %12905 = vst [vmem:[#allocation187_spill] sm:$0xff] %v8656_v24  ;;  %12906 = vst [vmem:[#allocation188_spill] sm:$0xff] %v8658_v38  ;;  %v8687_v38 = vpack.c.bf16 %v3206_v42, %v3202_v45  ;;  %v8689_v20 = vsub.f32 %v444_v14, %v3202_v45  ;;  %7081 = vmatprep.subr.bf16.mxu0 %v8675_v47  ;;  %v245_v54 = vcombine.high %v240_v21, %v240_v21 }
  0xbd   : > { %12907 = vst [vmem:[#allocation189_spill] sm:$0xff] %v8664_v53  ;;  %12908 = vst [vmem:[#allocation190_spill] sm:$0xff] %v8666_v2  ;;  %v8685_v2 = vsub.f32 %v318_v29, %v638_v37  ;;  %v8691_v53 = vsub.f32 %v446_v55, %v3206_v42  ;;  %6315 = vmatpush1.bf16.msra.mxu1 %v8679_v11  ;;  %v8695_v31 = vand.u32 4294901760, %v240_v21  ;;  %v12029_v29 = vand.u32 4294901760, %v8247_v17 }
  0xbe   : > { %12909 = vst [vmem:[#allocation191_spill] sm:$0xff] %v8668_v49  ;;  %12910 = vst [vmem:[#allocation192_spill] sm:$0xff] %v8672_v8  ;;  %v237_v49 = vld [vmem:[%s8233_s1 + $0x28] sm:$0xff]  ;;  %v660_v9 = vsub.f32 %v8245_v16, %v12028_v32  ;;  %7083 = vmatpush1.bf16.msra.mxu0 %v8687_v38  ;;  %v12038_v14 = vand.u32 4294901760, %v8249_v18  ;;  %v12043_v55 = vand.u32 4294901760, %v8253_v23  ;;  %v8705_v26 = vand.u32 4294901760, %v245_v54 }
  0xbf   : > { %12911 = vst [vmem:[#allocation193_spill] sm:$0xff] %v8675_v47  ;;  %12912 = vst [vmem:[#allocation194_spill] sm:$0xff] %v8677_v59  ;;  %v242_v22 = vadd.f32 %v237_v49, %v236_v36  ;;  %v672_v37 = vsub.f32 %v8247_v17, %v12029_v29  ;;  %v8711_v45 = vsub.f32 %v240_v21, %v8695_v31  ;;  %v12924_v21 = vand.u32 4294901760, %v8257_v25 }
  0xc0   : > { %12913 = vst [vmem:[#allocation195_spill] sm:$0xff] %v8679_v11  ;;  %12914 = vst [vmem:[#allocation196_spill] sm:$0xff] %v8681_v60  ;;  %v661_v15 = vand.u32 4294901760, %v660_v9  ;;  %v3228_v36 = vsub.f32 %v8249_v18, %v12038_v14  ;;  %v3240_v49 = vsub.f32 %v8253_v23, %v12043_v55  ;;  %v8722_v9 = vsub.f32 %v245_v54, %v8705_v26 }
  0xc1   : > { %12915 = vst [vmem:[#allocation197_spill] sm:$0xff] %v8685_v2  ;;  %12916 = vst [vmem:[#allocation198_spill] sm:$0xff] %v8687_v38  ;;  %v251_v42 = vcombine.high %v242_v22, %v242_v22  ;;  %v8713_v32 = vand.u32 4294901760, %v242_v22  ;;  %v673_v1 = vand.u32 4294901760, %v672_v37  ;;  %v12046_v29 = vand.u32 4294901760, %v8711_v45 }
  0xc2   : > { %12917 = vst [vmem:[#allocation199_spill] sm:$0xff] %v8689_v20  ;;  %12918 = vst [vmem:[#allocation200_spill] sm:$0xff] %v8691_v53  ;;  %v666_v38 = vsub.f32 %v8257_v25, %v12924_v21  ;;  %v3229_v47 = vand.u32 4294901760, %v3228_v36  ;;  %v12047_v14 = vand.u32 4294901760, %v8260_v27  ;;  %v12048_v18 = vand.u32 4294901760, %v8722_v9 }
  0xc3   : > { %12919 = vst [vmem:[#allocation201_spill] sm:$0xff] %v8695_v31  ;;  %12920 = vst [vmem:[#allocation202_spill] sm:$0xff] %v8705_v26  ;;  %v8728_v11 = vand.u32 4294901760, %v251_v42  ;;  %v3241_v31 = vand.u32 4294901760, %v3240_v49  ;;  %v6316_v17 = vpack.c.bf16 %v673_v1, %v661_v15  ;;  %v649_v54 = vsub.f32 %v8711_v45, %v12046_v29 }
  0xc4   : > { %12921 = vst [vmem:[#allocation203_spill] sm:$0xff] %v8711_v45  ;;  %12922 = vst [vmem:[#allocation204_spill] sm:$0xff] %v8713_v32  ;;  %v667_v37 = vand.u32 4294901760, %v666_v38  ;;  %v678_v21 = vsub.f32 %v8260_v27, %v12047_v14  ;;  %v8742_v36 = vsub.f32 %v242_v22, %v8713_v32  ;;  %v643_v1 = vsub.f32 %v8722_v9, %v12048_v18 }
  0xc5   : > { %12923 = vst [vmem:[#allocation205_spill] sm:$0xff] %v8722_v9  ;;  %12925 = vst [vmem:[#allocation206_spill] sm:$0xff] %v8728_v11  ;;  %v8736_v55 = vsub.f32 %v251_v42, %v8728_v11  ;;  %v7084_v23 = vpack.c.bf16 %v3241_v31, %v3229_v47  ;;  %6317 = vmatprep.subr.bf16.mxu1 %v6316_v17  ;;  %v650_v15 = vand.u32 4294901760, %v649_v54  ;;  %v12049_v49 = vand.u32 4294901760, %v8266_v39 }
  0xc6   : > { %12927 = vst [vmem:[#allocation208_spill] sm:$0xff] %v8742_v36  ;;  %v12052_v38 = vand.u32 4294901760, %v8268_v40  ;;  %v679_v47 = vand.u32 4294901760, %v678_v21  ;;  %v12058_v31 = vand.u32 4294901760, %v8742_v36  ;;  %v12069_v29 = vand.u32 4294901760, %v8270_v41 }
  0xc7   : > { %12926 = vst [vmem:[#allocation207_spill] sm:$0xff] %v8736_v55  ;;  %v12057_v42 = vand.u32 4294901760, %v8736_v55  ;;  %7085 = vmatprep.subr.bf16.mxu0 %v7084_v23  ;;  %v644_v22 = vand.u32 4294901760, %v643_v1  ;;  %v3234_v14 = vsub.f32 %v8266_v39, %v12049_v49  ;;  %v12068_v54 = vand.u32 4294901760, %v8274_v46 }
  0xc8   : > { %v3246_v17 = vsub.f32 %v8268_v40, %v12052_v38  ;;  %v6318_v21 = vpack.c.bf16 %v679_v47, %v667_v37  ;;  %v3217_v18 = vsub.f32 %v8742_v36, %v12058_v31  ;;  %v684_v1 = vsub.f32 %v8270_v41, %v12069_v29 }
  0xc9   : > { %v3211_v23 = vsub.f32 %v8736_v55, %v12057_v42  ;;  %645 = vmatprep.mubr.f32.mxu1 %v644_v22  ;;  %v3235_v49 = vand.u32 4294901760, %v3234_v14  ;;  %v696_v38 = vsub.f32 %v8274_v46, %v12068_v54  ;;  %v12065_v9 = vand.u32 4294901760, %v8278_v48 }
  0xca   : > { %v3247_v45 = vand.u32 4294901760, %v3246_v17  ;;  %651 = vmatmul.mubr.f32.vlgmr.msra.gmra.mrb[0].mxu1 %v650_v15  ;;  %v3218_v37 = vand.u32 4294901760, %v3217_v18  ;;  %v685_v47 = vand.u32 4294901760, %v684_v1  ;;  %v12061_v42 = vand.u32 4294901760, %v8281_v50 }
  0xcb   : > { %v3212_v32 = vand.u32 4294901760, %v3211_v23  ;;  %6319 = vmatpush1.bf16.msra.mxu1 %v6318_v21  ;;  %v697_v36 = vand.u32 4294901760, %v696_v38  ;;  %v3252_v14 = vsub.f32 %v8278_v48, %v12065_v9  ;;  %v12063_v22 = vand.u32 4294901760, %v8283_v52  ;;  %1042 = vmatprep.mubr.f32.mxu1 %v8705_v26 }
  0xcc   : > { %v7086_v31 = vpack.c.bf16 %v3247_v45, %v3235_v49  ;;  %v3264_v15 = vsub.f32 %v8281_v50, %v12061_v42  ;;  %v12062_v18 = vand.u32 4294901760, %v8289_v61  ;;  %v12064_v17 = vand.u32 4294901760, %v8291_v62 }
  0xcd   : > { %3213 = vmatprep.mubr.f32.mxu0 %v3212_v32  ;;  %v12066_v45 = vand.u32 4294901760, %v8295_v4  ;;  %v6320_v49 = vpack.c.bf16 %v697_v36, %v685_v47  ;;  %v3253_v38 = vand.u32 4294901760, %v3252_v14  ;;  %v690_v23 = vsub.f32 %v8283_v52, %v12063_v22 }
  0xce   : > { %3219 = vmatmul.mubr.f32.vlgmr.msra.gmra.mrb[0].mxu0 %v3218_v37  ;;  %v12067_v21 = vand.u32 4294901760, %v8299_v6  ;;  %v3265_v32 = vand.u32 4294901760, %v3264_v15  ;;  %v702_v1 = vsub.f32 %v8289_v61, %v12062_v18  ;;  %v3258_v42 = vsub.f32 %v8291_v62, %v12064_v17 }
  0xcf   : > { %7087 = vmatpush1.bf16.msra.mxu0 %v7086_v31  ;;  %v3270_v36 = vsub.f32 %v8295_v4, %v12066_v45  ;;  %3610 = vmatprep.mubr.f32.mxu0 %v8728_v11  ;;  %v691_v37 = vand.u32 4294901760, %v690_v23  ;;  %v12084_v47 = vand.u32 4294901760, %v8302_v10  ;;  %v12074_v14 = vand.u32 4294901760, %v8306_v12 }
  0xd0   : > { %6321 = vmatprep.subr.bf16.mxu1 %v6320_v49  ;;  %v708_v31 = vsub.f32 %v8299_v6, %v12067_v21  ;;  %v7088_v15 = vpack.c.bf16 %v3265_v32, %v3253_v38  ;;  %v703_v18 = vand.u32 4294901760, %v702_v1  ;;  %v3259_v22 = vand.u32 4294901760, %v3258_v42 }
  0xd1   : > { %v3271_v17 = vand.u32 4294901760, %v3270_v36  ;;  %v720_v45 = vsub.f32 %v8302_v10, %v12084_v47  ;;  %v3276_v49 = vsub.f32 %v8306_v12, %v12074_v14  ;;  %v12072_v23 = vand.u32 4294901760, %v8308_v13 }
  0xd2   : > { %v709_v9 = vand.u32 4294901760, %v708_v31  ;;  %7089 = vmatprep.subr.bf16.mxu0 %v7088_v15  ;;  %v6322_v21 = vpack.c.bf16 %v703_v18, %v691_v37  ;;  %v12070_v29 = vand.u32 4294901760, %v8315_v33  ;;  %v12071_v38 = vand.u32 4294901760, %v8317_v34 }
  0xd3   : > { %v7090_v54 = vpack.c.bf16 %v3271_v17, %v3259_v22  ;;  %v721_v42 = vand.u32 4294901760, %v720_v45  ;;  %v3277_v32 = vand.u32 4294901760, %v3276_v49  ;;  %v3288_v1 = vsub.f32 %v8308_v13, %v12072_v23 }
  0xd4   : > { %v12073_v36 = vand.u32 4294901760, %v8321_v43  ;;  %6323 = vmatpush1.bf16.msra.mxu1 %v6322_v21  ;;  %v714_v31 = vsub.f32 %v8315_v33, %v12070_v29  ;;  %v726_v22 = vsub.f32 %v8317_v34, %v12071_v38  ;;  %v12075_v18 = vand.u32 4294901760, %v8323_v44 }
  0xd5   : > { %7091 = vmatpush1.bf16.msra.mxu0 %v7090_v54  ;;  %v12076_v17 = vand.u32 4294901760, %v8327_v51  ;;  %v6324_v45 = vpack.c.bf16 %v721_v42, %v709_v9  ;;  %v3289_v37 = vand.u32 4294901760, %v3288_v1  ;;  %v12082_v54 = vand.u32 4294901760, %v8331_v56 }
  0xd6   : > { %v3282_v15 = vsub.f32 %v8321_v43, %v12073_v36  ;;  %v715_v21 = vand.u32 4294901760, %v714_v31  ;;  %v727_v49 = vand.u32 4294901760, %v726_v22  ;;  %v3294_v29 = vsub.f32 %v8323_v44, %v12075_v18 }
  0xd7   : > { %v732_v38 = vsub.f32 %v8327_v51, %v12076_v17  ;;  %6325 = vmatprep.subr.bf16.mxu1 %v6324_v45  ;;  %v7092_v23 = vpack.c.bf16 %v3289_v37, %v3277_v32  ;;  %v744_v42 = vsub.f32 %v8331_v56, %v12082_v54  ;;  %v12079_v1 = vand.u32 4294901760, %v8335_v58 }
  0xd8   : > { %v3283_v9 = vand.u32 4294901760, %v3282_v15  ;;  %v6326_v36 = vpack.c.bf16 %v727_v49, %v715_v21  ;;  %v3295_v31 = vand.u32 4294901760, %v3294_v29  ;;  %v12078_v14 = vand.u32 4294901760, %v8338_v63 }
  0xd9   : > { %v733_v22 = vand.u32 4294901760, %v732_v38  ;;  %7093 = vmatprep.subr.bf16.mxu0 %v7092_v23  ;;  %v745_v18 = vand.u32 4294901760, %v744_v42  ;;  %v3300_v17 = vsub.f32 %v8335_v58, %v12079_v1  ;;  %v12077_v32 = vand.u32 4294901760, %v8341_v19 }
  0xda   : > { %v12080_v45 = vand.u32 4294901760, %v8345_v35  ;;  %6327 = vmatpush1.bf16.msra.mxu1 %v6326_v36  ;;  %v7094_v37 = vpack.c.bf16 %v3295_v31, %v3283_v9  ;;  %v3312_v15 = vsub.f32 %v8338_v63, %v12078_v14  ;;  %v12081_v29 = vand.u32 4294901760, %v8349_v30  ;;  %v12928_v14 = vld [vmem:[#allocation60_spill] sm:$0xff] }
  0xdb   : > { %v12083_v38 = vand.u32 4294901760, %v8351_v57  ;;  %v6328_v23 = vpack.c.bf16 %v745_v18, %v733_v22  ;;  %v3301_v21 = vand.u32 4294901760, %v3300_v17  ;;  %v738_v49 = vsub.f32 %v8341_v19, %v12077_v32 }
  0xdc   : > { %v750_v42 = vsub.f32 %v8345_v35, %v12080_v45  ;;  %7095 = vmatpush1.bf16.msra.mxu0 %v7094_v37  ;;  %v3313_v36 = vand.u32 4294901760, %v3312_v15  ;;  %v3306_v9 = vsub.f32 %v8349_v30, %v12081_v29  ;;  %v12087_v18 = vand.u32 4294901760, %v8355_v5 }
  0xdd   : > { %v3318_v31 = vsub.f32 %v8351_v57, %v12083_v38  ;;  %6329 = vmatprep.subr.bf16.mxu1 %v6328_v23  ;;  %v739_v17 = vand.u32 4294901760, %v738_v49  ;;  %v12088_v32 = vand.u32 4294901760, %v8357_v3  ;;  %v12091_v1 = vand.u32 4294901760, %v12928_v14  ;;  %v12929_v49 = vld [vmem:[#allocation62_spill] sm:$0xff] }
  0xde   : > { %v751_v22 = vand.u32 4294901760, %v750_v42  ;;  %v7096_v45 = vpack.c.bf16 %v3313_v36, %v3301_v21  ;;  %v3307_v37 = vand.u32 4294901760, %v3306_v9  ;;  %v756_v29 = vsub.f32 %v8355_v5, %v12087_v18  ;;  %v12930_v36 = vld [vmem:[#allocation64_spill] sm:$0xff] }
  0xdf   : > { %v3319_v15 = vand.u32 4294901760, %v3318_v31  ;;  %v768_v38 = vsub.f32 %v8357_v3, %v12088_v32  ;;  %v3324_v23 = vsub.f32 %v12928_v14, %v12091_v1  ;;  %v12092_v42 = vand.u32 4294901760, %v12929_v49  ;;  %v12931_v31 = vld [vmem:[#allocation65_spill] sm:$0xff]  ;;  %v12932_v32 = vld [vmem:[#allocation67_spill] sm:$0xff] }
  0xe0   : > { %v6330_v54 = vpack.c.bf16 %v751_v22, %v739_v17  ;;  %7097 = vmatprep.subr.bf16.mxu0 %v7096_v45  ;;  %v757_v21 = vand.u32 4294901760, %v756_v29  ;;  %v12097_v9 = vand.u32 4294901760, %v12930_v36  ;;  %v12098_v11 = vand.u32 4294901760, %v12931_v31 }
  0xe1   : > { %v7098_v47 = vpack.c.bf16 %v3319_v15, %v3307_v37  ;;  %v769_v18 = vand.u32 4294901760, %v768_v38  ;;  %v3325_v17 = vand.u32 4294901760, %v3324_v23  ;;  %v3336_v22 = vsub.f32 %v12929_v49, %v12092_v42  ;;  %v12933_v37 = vld [vmem:[#allocation68_spill] sm:$0xff]  ;;  %v12935_v49 = vld [vmem:[#allocation71_spill] sm:$0xff] }
  0xe2   : > { %6331 = vmatpush1.bf16.msra.mxu1 %v6330_v54  ;;  %v12100_v26 = vand.u32 4294901760, %v12932_v32  ;;  %v762_v45 = vsub.f32 %v12930_v36, %v12097_v9  ;;  %v774_v29 = vsub.f32 %v12931_v31, %v12098_v11  ;;  %v12105_v15 = vand.u32 4294901760, %v12933_v37  ;;  %v12934_v54 = vld [vmem:[#allocation70_spill] sm:$0xff] }
  0xe3   : > { %7099 = vmatpush1.bf16.msra.mxu0 %v7098_v47  ;;  %v12106_v38 = vand.u32 4294901760, %v12934_v54  ;;  %v6332_v23 = vpack.c.bf16 %v769_v18, %v757_v21  ;;  %v3337_v1 = vand.u32 4294901760, %v3336_v22  ;;  %v12108_v47 = vand.u32 4294901760, %v12935_v49  ;;  %v12936_v22 = vld [vmem:[#allocation72_spill] sm:$0xff]  ;;  %v12937_v36 = vld [vmem:[#allocation74_spill] sm:$0xff] }
  0xe4   : > { %v3330_v42 = vsub.f32 %v12932_v32, %v12100_v26  ;;  %v763_v14 = vand.u32 4294901760, %v762_v45  ;;  %v775_v55 = vand.u32 4294901760, %v774_v29  ;;  %v3342_v9 = vsub.f32 %v12933_v37, %v12105_v15 }
  0xe5   : > { %v780_v11 = vsub.f32 %v12934_v54, %v12106_v38  ;;  %6333 = vmatprep.subr.bf16.mxu1 %v6332_v23  ;;  %v7100_v31 = vpack.c.bf16 %v3337_v1, %v3325_v17  ;;  %v792_v21 = vsub.f32 %v12935_v49, %v12108_v47  ;;  %v12109_v26 = vand.u32 4294901760, %v12936_v22  ;;  %v12938_v23 = vld [vmem:[#allocation76_spill] sm:$0xff] }
  0xe6   : > { %v3331_v18 = vand.u32 4294901760, %v3330_v42  ;;  %v6334_v32 = vpack.c.bf16 %v775_v55, %v763_v14  ;;  %v3343_v45 = vand.u32 4294901760, %v3342_v9  ;;  %v12111_v3 = vand.u32 4294901760, %v12937_v36  ;;  %v12939_v42 = vld [vmem:[#allocation77_spill] sm:$0xff]  ;;  %v12940_v14 = vld [vmem:[#allocation79_spill] sm:$0xff]  ;;  %v12941_v9 = vld [vmem:[#allocation80_spill] sm:$0xff] }
  0xe7   : > { %v781_v29 = vand.u32 4294901760, %v780_v11  ;;  %7101 = vmatprep.subr.bf16.mxu0 %v7100_v31  ;;  %v793_v15 = vand.u32 4294901760, %v792_v21  ;;  %v3348_v38 = vsub.f32 %v12936_v22, %v12109_v26  ;;  %v12112_v1 = vand.u32 4294901760, %v12938_v23 }
  0xe8   : > { %v12116_v17 = vand.u32 4294901760, %v12939_v42  ;;  %6335 = vmatpush1.bf16.msra.mxu1 %v6334_v32  ;;  %v7102_v54 = vpack.c.bf16 %v3343_v45, %v3331_v18  ;;  %v3360_v55 = vsub.f32 %v12937_v36, %v12111_v3  ;;  %v12117_v11 = vand.u32 4294901760, %v12940_v14  ;;  %v12944_v36 = vld [vmem:[#allocation84_spill] sm:$0xff] }
  0xe9   : > { %v12119_v47 = vand.u32 4294901760, %v12941_v9  ;;  %v6336_v31 = vpack.c.bf16 %v793_v15, %v781_v29  ;;  %v3349_v21 = vand.u32 4294901760, %v3348_v38  ;;  %v786_v26 = vsub.f32 %v12938_v23, %v12112_v1  ;;  %v12942_v15 = vld [vmem:[#allocation82_spill] sm:$0xff]  ;;  %v12943_v1 = vld [vmem:[#allocation83_spill] sm:$0xff] }
  0xea   : > { %v798_v22 = vsub.f32 %v12939_v42, %v12116_v17  ;;  %7103 = vmatpush1.bf16.msra.mxu0 %v7102_v54  ;;  %v3361_v32 = vand.u32 4294901760, %v3360_v55  ;;  %v3354_v18 = vsub.f32 %v12940_v14, %v12117_v11  ;;  %v12122_v38 = vand.u32 4294901760, %v12942_v15 }
  0xeb   : > { %v3366_v45 = vsub.f32 %v12941_v9, %v12119_v47  ;;  %6337 = vmatprep.subr.bf16.mxu1 %v6336_v31  ;;  %v787_v29 = vand.u32 4294901760, %v786_v26  ;;  %v12123_v23 = vand.u32 4294901760, %v12943_v1  ;;  %v12125_v49 = vand.u32 4294901760, %v12944_v36 }
  0xec   : > { %v799_v3 = vand.u32 4294901760, %v798_v22  ;;  %v7104_v17 = vpack.c.bf16 %v3361_v32, %v3349_v21  ;;  %v3355_v54 = vand.u32 4294901760, %v3354_v18  ;;  %v804_v11 = vsub.f32 %v12942_v15, %v12122_v38  ;;  %v12945_v22 = vld [vmem:[#allocation86_spill] sm:$0xff]  ;;  %v12946_v32 = vld [vmem:[#allocation88_spill] sm:$0xff] }
  0xed   : > { %v3367_v55 = vand.u32 4294901760, %v3366_v45  ;;  %v816_v47 = vsub.f32 %v12943_v1, %v12123_v23  ;;  %v3372_v26 = vsub.f32 %v12944_v36, %v12125_v49  ;;  %v12126_v31 = vand.u32 4294901760, %v12945_v22  ;;  %v12947_v45 = vld [vmem:[#allocation89_spill] sm:$0xff]  ;;  %v12948_v23 = vld [vmem:[#allocation91_spill] sm:$0xff] }
  0xee   : > { %v6338_v14 = vpack.c.bf16 %v799_v3, %v787_v29  ;;  %7105 = vmatprep.subr.bf16.mxu0 %v7104_v17  ;;  %v805_v21 = vand.u32 4294901760, %v804_v11  ;;  %v12130_v18 = vand.u32 4294901760, %v12946_v32  ;;  %v12131_v42 = vand.u32 4294901760, %v12947_v45 }
  0xef   : > { %v7106_v9 = vpack.c.bf16 %v3367_v55, %v3355_v54  ;;  %v817_v38 = vand.u32 4294901760, %v816_v47  ;;  %v3373_v3 = vand.u32 4294901760, %v3372_v26  ;;  %v3384_v29 = vsub.f32 %v12945_v22, %v12126_v31  ;;  %v12949_v54 = vld [vmem:[#allocation92_spill] sm:$0xff]  ;;  %v12951_v22 = vld [vmem:[#allocation95_spill] sm:$0xff] }
  0xf0   : > { %6339 = vmatpush1.bf16.msra.mxu1 %v6338_v14  ;;  %v12133_v1 = vand.u32 4294901760, %v12948_v23  ;;  %v810_v17 = vsub.f32 %v12946_v32, %v12130_v18  ;;  %v822_v11 = vsub.f32 %v12947_v45, %v12131_v42  ;;  %v12137_v55 = vand.u32 4294901760, %v12949_v54  ;;  %v12950_v14 = vld [vmem:[#allocation94_spill] sm:$0xff] }
  0xf1   : > { %7107 = vmatpush1.bf16.msra.mxu0 %v7106_v9  ;;  %v12138_v47 = vand.u32 4294901760, %v12950_v14  ;;  %v6340_v26 = vpack.c.bf16 %v817_v38, %v805_v21  ;;  %v3385_v49 = vand.u32 4294901760, %v3384_v29  ;;  %v12140_v9 = vand.u32 4294901760, %v12951_v22  ;;  %v12952_v29 = vld [vmem:[#allocation96_spill] sm:$0xff]  ;;  %v12953_v32 = vld [vmem:[#allocation98_spill] sm:$0xff] }
  0xf2   : > { %v3378_v31 = vsub.f32 %v12948_v23, %v12133_v1  ;;  %v811_v36 = vand.u32 4294901760, %v810_v17  ;;  %v823_v15 = vand.u32 4294901760, %v822_v11  ;;  %v3390_v18 = vsub.f32 %v12949_v54, %v12137_v55 }
  0xf3   : > { %v828_v42 = vsub.f32 %v12950_v14, %v12138_v47  ;;  %6341 = vmatprep.subr.bf16.mxu1 %v6340_v26  ;;  %v7108_v45 = vpack.c.bf16 %v3385_v49, %v3373_v3  ;;  %v840_v21 = vsub.f32 %v12951_v22, %v12140_v9  ;;  %v12141_v1 = vand.u32 4294901760, %v12952_v29  ;;  %v12954_v26 = vld [vmem:[#allocation100_spill] sm:$0xff] }
  0xf4   : > { %v3379_v38 = vand.u32 4294901760, %v3378_v31  ;;  %v6342_v23 = vpack.c.bf16 %v823_v15, %v811_v36  ;;  %v3391_v17 = vand.u32 4294901760, %v3390_v18  ;;  %v12143_v37 = vand.u32 4294901760, %v12953_v32  ;;  %v12955_v31 = vld [vmem:[#allocation101_spill] sm:$0xff]  ;;  %v12956_v15 = vld [vmem:[#allocation103_spill] sm:$0xff]  ;;  %v12957_v18 = vld [vmem:[#allocation104_spill] sm:$0xff] }
  0xf5   : > { %v829_v11 = vand.u32 4294901760, %v828_v42  ;;  %7109 = vmatprep.subr.bf16.mxu0 %v7108_v45  ;;  %v841_v55 = vand.u32 4294901760, %v840_v21  ;;  %v3396_v47 = vsub.f32 %v12952_v29, %v12141_v1  ;;  %v12144_v49 = vand.u32 4294901760, %v12954_v26 }
  0xf6   : > { %v12148_v3 = vand.u32 4294901760, %v12955_v31  ;;  %6343 = vmatpush1.bf16.msra.mxu1 %v6342_v23  ;;  %v7110_v14 = vpack.c.bf16 %v3391_v17, %v3379_v38  ;;  %v3408_v36 = vsub.f32 %v12953_v32, %v12143_v37  ;;  %v12149_v42 = vand.u32 4294901760, %v12956_v15  ;;  %v12960_v32 = vld [vmem:[#allocation108_spill] sm:$0xff] }
  0xf7   : > { %v12151_v9 = vand.u32 4294901760, %v12957_v18  ;;  %v6344_v45 = vpack.c.bf16 %v841_v55, %v829_v11  ;;  %v3397_v21 = vand.u32 4294901760, %v3396_v47  ;;  %v834_v1 = vsub.f32 %v12954_v26, %v12144_v49  ;;  %v12958_v55 = vld [vmem:[#allocation106_spill] sm:$0xff]  ;;  %v12959_v49 = vld [vmem:[#allocation107_spill] sm:$0xff] }
  0xf8   : > { %v846_v29 = vsub.f32 %v12955_v31, %v12148_v3  ;;  %7111 = vmatpush1.bf16.msra.mxu0 %v7110_v14  ;;  %v3409_v23 = vand.u32 4294901760, %v3408_v36  ;;  %v3402_v38 = vsub.f32 %v12956_v15, %v12149_v42  ;;  %v12154_v47 = vand.u32 4294901760, %v12958_v55 }
  0xf9   : > { %v3414_v17 = vsub.f32 %v12957_v18, %v12151_v9  ;;  %6345 = vmatprep.subr.bf16.mxu1 %v6344_v45  ;;  %v835_v11 = vand.u32 4294901760, %v834_v1  ;;  %v12155_v26 = vand.u32 4294901760, %v12959_v49  ;;  %v12157_v22 = vand.u32 4294901760, %v12960_v32 }
  0xfa   : > { %v847_v37 = vand.u32 4294901760, %v846_v29  ;;  %v7112_v3 = vpack.c.bf16 %v3409_v23, %v3397_v21  ;;  %v3403_v14 = vand.u32 4294901760, %v3402_v38  ;;  %v852_v42 = vsub.f32 %v12958_v55, %v12154_v47  ;;  %v12961_v29 = vld [vmem:[#allocation110_spill] sm:$0xff]  ;;  %v12962_v23 = vld [vmem:[#allocation112_spill] sm:$0xff] }
  0xfb   : > { %v3415_v36 = vand.u32 4294901760, %v3414_v17  ;;  %v864_v9 = vsub.f32 %v12959_v49, %v12155_v26  ;;  %v3420_v1 = vsub.f32 %v12960_v32, %v12157_v22  ;;  %v12158_v45 = vand.u32 4294901760, %v12961_v29  ;;  %v12963_v17 = vld [vmem:[#allocation113_spill] sm:$0xff]  ;;  %v12964_v26 = vld [vmem:[#allocation115_spill] sm:$0xff] }
  0xfc   : > { %v6346_v15 = vpack.c.bf16 %v847_v37, %v835_v11  ;;  %7113 = vmatprep.subr.bf16.mxu0 %v7112_v3  ;;  %v853_v21 = vand.u32 4294901760, %v852_v42  ;;  %v12162_v38 = vand.u32 4294901760, %v12962_v23  ;;  %v12163_v31 = vand.u32 4294901760, %v12963_v17 }
  0xfd   : > { %v7114_v18 = vpack.c.bf16 %v3415_v36, %v3403_v14  ;;  %v865_v47 = vand.u32 4294901760, %v864_v9  ;;  %v3421_v37 = vand.u32 4294901760, %v3420_v1  ;;  %v3432_v11 = vsub.f32 %v12961_v29, %v12158_v45  ;;  %v12965_v14 = vld [vmem:[#allocation116_spill] sm:$0xff]  ;;  %v12967_v29 = vld [vmem:[#allocation119_spill] sm:$0xff] }
  0xfe   : > { %6347 = vmatpush1.bf16.msra.mxu1 %v6346_v15  ;;  %v12165_v49 = vand.u32 4294901760, %v12964_v26  ;;  %v858_v3 = vsub.f32 %v12962_v23, %v12162_v38  ;;  %v870_v42 = vsub.f32 %v12963_v17, %v12163_v31  ;;  %v12169_v36 = vand.u32 4294901760, %v12965_v14  ;;  %v12966_v15 = vld [vmem:[#allocation118_spill] sm:$0xff] }
  0xff   : > { %7115 = vmatpush1.bf16.msra.mxu0 %v7114_v18  ;;  %v12170_v9 = vand.u32 4294901760, %v12966_v15  ;;  %v6348_v1 = vpack.c.bf16 %v865_v47, %v853_v21  ;;  %v3433_v22 = vand.u32 4294901760, %v3432_v11  ;;  %v12172_v18 = vand.u32 4294901760, %v12967_v29  ;;  %v12968_v11 = vld [vmem:[#allocation120_spill] sm:$0xff]  ;;  %v12969_v17 = vld [vmem:[#allocation122_spill] sm:$0xff] }
 0x100   : > { %v3426_v45 = vsub.f32 %v12964_v26, %v12165_v49  ;;  %v859_v32 = vand.u32 4294901760, %v858_v3  ;;  %v871_v55 = vand.u32 4294901760, %v870_v42  ;;  %v3438_v38 = vsub.f32 %v12965_v14, %v12169_v36 }
 0x101   : > { %v876_v31 = vsub.f32 %v12966_v15, %v12170_v9  ;;  %6349 = vmatprep.subr.bf16.mxu1 %v6348_v1  ;;  %v7116_v54 = vpack.c.bf16 %v3433_v22, %v3421_v37  ;;  %v888_v21 = vsub.f32 %v12967_v29, %v12172_v18  ;;  %v12173_v49 = vand.u32 4294901760, %v12968_v11  ;;  %v12970_v1 = vld [vmem:[#allocation124_spill] sm:$0xff] }
 0x102   : > { %v3427_v47 = vand.u32 4294901760, %v3426_v45  ;;  %v6350_v26 = vpack.c.bf16 %v871_v55, %v859_v32  ;;  %v3439_v3 = vand.u32 4294901760, %v3438_v38  ;;  %v12175_v23 = vand.u32 4294901760, %v12969_v17  ;;  %v12971_v45 = vld [vmem:[#allocation125_spill] sm:$0xff]  ;;  %v12972_v55 = vld [vmem:[#allocation127_spill] sm:$0xff]  ;;  %v12973_v38 = vld [vmem:[#allocation128_spill] sm:$0xff] }
 0x103   : > { %v877_v42 = vand.u32 4294901760, %v876_v31  ;;  %7117 = vmatprep.subr.bf16.mxu0 %v7116_v54  ;;  %v889_v36 = vand.u32 4294901760, %v888_v21  ;;  %v3444_v9 = vsub.f32 %v12968_v11, %v12173_v49  ;;  %v12176_v22 = vand.u32 4294901760, %v12970_v1 }
 0x104   : > { %v12180_v37 = vand.u32 4294901760, %v12971_v45  ;;  %6351 = vmatpush1.bf16.msra.mxu1 %v6350_v26  ;;  %v7118_v15 = vpack.c.bf16 %v3439_v3, %v3427_v47  ;;  %v3456_v32 = vsub.f32 %v12969_v17, %v12175_v23  ;;  %v12181_v31 = vand.u32 4294901760, %v12972_v55  ;;  %v12976_v17 = vld [vmem:[#allocation132_spill] sm:$0xff] }
 0x105   : > { %v12183_v18 = vand.u32 4294901760, %v12973_v38  ;;  %v6352_v54 = vpack.c.bf16 %v889_v36, %v877_v42  ;;  %v3445_v21 = vand.u32 4294901760, %v3444_v9  ;;  %v882_v49 = vsub.f32 %v12970_v1, %v12176_v22  ;;  %v12974_v36 = vld [vmem:[#allocation130_spill] sm:$0xff]  ;;  %v12975_v22 = vld [vmem:[#allocation131_spill] sm:$0xff] }
 0x106   : > { %v894_v11 = vsub.f32 %v12971_v45, %v12180_v37  ;;  %7119 = vmatpush1.bf16.msra.mxu0 %v7118_v15  ;;  %v3457_v26 = vand.u32 4294901760, %v3456_v32  ;;  %v3450_v47 = vsub.f32 %v12972_v55, %v12181_v31  ;;  %v12186_v9 = vand.u32 4294901760, %v12974_v36 }
 0x107   : > { %v3462_v3 = vsub.f32 %v12973_v38, %v12183_v18  ;;  %6353 = vmatprep.subr.bf16.mxu1 %v6352_v54  ;;  %v883_v42 = vand.u32 4294901760, %v882_v49  ;;  %v12187_v1 = vand.u32 4294901760, %v12975_v22  ;;  %v12189_v29 = vand.u32 4294901760, %v12976_v17 }
 0x108   : > { %v895_v23 = vand.u32 4294901760, %v894_v11  ;;  %v7120_v37 = vpack.c.bf16 %v3457_v26, %v3445_v21  ;;  %v3451_v15 = vand.u32 4294901760, %v3450_v47  ;;  %v900_v31 = vsub.f32 %v12974_v36, %v12186_v9  ;;  %v12977_v11 = vld [vmem:[#allocation134_spill] sm:$0xff]  ;;  %v12978_v26 = vld [vmem:[#allocation136_spill] sm:$0xff] }
 0x109   : > { %v3463_v32 = vand.u32 4294901760, %v3462_v3  ;;  %v912_v18 = vsub.f32 %v12975_v22, %v12187_v1  ;;  %v3468_v49 = vsub.f32 %v12976_v17, %v12189_v29  ;;  %v12190_v54 = vand.u32 4294901760, %v12977_v11  ;;  %v12979_v3 = vld [vmem:[#allocation137_spill] sm:$0xff]  ;;  %v12980_v1 = vld [vmem:[#allocation139_spill] sm:$0xff] }
 0x10a   : > { %v6354_v55 = vpack.c.bf16 %v895_v23, %v883_v42  ;;  %7121 = vmatprep.subr.bf16.mxu0 %v7120_v37  ;;  %v901_v21 = vand.u32 4294901760, %v900_v31  ;;  %v12194_v47 = vand.u32 4294901760, %v12978_v26  ;;  %v12195_v45 = vand.u32 4294901760, %v12979_v3 }
 0x10b   : > { %v7122_v38 = vpack.c.bf16 %v3463_v32, %v3451_v15  ;;  %v913_v9 = vand.u32 4294901760, %v912_v18  ;;  %v3469_v23 = vand.u32 4294901760, %v3468_v49  ;;  %v3480_v42 = vsub.f32 %v12977_v11, %v12190_v54  ;;  %v12981_v15 = vld [vmem:[#allocation140_spill] sm:$0xff]  ;;  %v12983_v11 = vld [vmem:[#allocation143_spill] sm:$0xff] }
 0x10c   : > { %6355 = vmatpush1.bf16.msra.mxu1 %v6354_v55  ;;  %v12197_v22 = vand.u32 4294901760, %v12980_v1  ;;  %v906_v37 = vsub.f32 %v12978_v26, %v12194_v47  ;;  %v918_v31 = vsub.f32 %v12979_v3, %v12195_v45  ;;  %v12201_v32 = vand.u32 4294901760, %v12981_v15  ;;  %v12982_v55 = vld [vmem:[#allocation142_spill] sm:$0xff] }
 0x10d   : > { %7123 = vmatpush1.bf16.msra.mxu0 %v7122_v38  ;;  %v12202_v18 = vand.u32 4294901760, %v12982_v55  ;;  %v6356_v49 = vpack.c.bf16 %v913_v9, %v901_v21  ;;  %v3481_v29 = vand.u32 4294901760, %v3480_v42  ;;  %v12204_v38 = vand.u32 4294901760, %v12983_v11  ;;  %v12984_v42 = vld [vmem:[#allocation144_spill] sm:$0xff]  ;;  %v12985_v26 = vld [vmem:[#allocation146_spill] sm:$0xff] }
 0x10e   : > { %v3474_v54 = vsub.f32 %v12980_v1, %v12197_v22  ;;  %v907_v17 = vand.u32 4294901760, %v906_v37  ;;  %v919_v36 = vand.u32 4294901760, %v918_v31  ;;  %v3486_v47 = vsub.f32 %v12981_v15, %v12201_v32 }
 0x10f   : > { %v924_v45 = vsub.f32 %v12982_v55, %v12202_v18  ;;  %6357 = vmatprep.subr.bf16.mxu1 %v6356_v49  ;;  %v7124_v3 = vpack.c.bf16 %v3481_v29, %v3469_v23  ;;  %v936_v21 = vsub.f32 %v12983_v11, %v12204_v38  ;;  %v12205_v22 = vand.u32 4294901760, %v12984_v42  ;;  %v12986_v49 = vld [vmem:[#allocation148_spill] sm:$0xff] }
 0x110   : > { %v3475_v9 = vand.u32 4294901760, %v3474_v54  ;;  %v6358_v1 = vpack.c.bf16 %v919_v36, %v907_v17  ;;  %v3487_v37 = vand.u32 4294901760, %v3486_v47  ;;  %v12207_v14 = vand.u32 4294901760, %v12985_v26  ;;  %v12987_v54 = vld [vmem:[#allocation149_spill] sm:$0xff]  ;;  %v12988_v36 = vld [vmem:[#allocation151_spill] sm:$0xff]  ;;  %v12989_v47 = vld [vmem:[#allocation152_spill] sm:$0xff] }
 0x111   : > { %v925_v31 = vand.u32 4294901760, %v924_v45  ;;  %7125 = vmatprep.subr.bf16.mxu0 %v7124_v3  ;;  %v937_v32 = vand.u32 4294901760, %v936_v21  ;;  %v3492_v18 = vsub.f32 %v12984_v42, %v12205_v22  ;;  %v12208_v29 = vand.u32 4294901760, %v12986_v49 }
 0x112   : > { %v12212_v23 = vand.u32 4294901760, %v12987_v54  ;;  %6359 = vmatpush1.bf16.msra.mxu1 %v6358_v1  ;;  %v7126_v55 = vpack.c.bf16 %v3487_v37, %v3475_v9  ;;  %v3504_v17 = vsub.f32 %v12985_v26, %v12207_v14  ;;  %v12213_v45 = vand.u32 4294901760, %v12988_v36  ;;  %v12992_v26 = vld [vmem:[#allocation156_spill] sm:$0xff] }
 0x113   : > { %v12215_v38 = vand.u32 4294901760, %v12989_v47  ;;  %v6360_v3 = vpack.c.bf16 %v937_v32, %v925_v31  ;;  %v3493_v21 = vand.u32 4294901760, %v3492_v18  ;;  %v930_v22 = vsub.f32 %v12986_v49, %v12208_v29  ;;  %v12990_v32 = vld [vmem:[#allocation154_spill] sm:$0xff]  ;;  %v12991_v29 = vld [vmem:[#allocation155_spill] sm:$0xff] }
 0x114   : > { %v942_v42 = vsub.f32 %v12987_v54, %v12212_v23  ;;  %7127 = vmatpush1.bf16.msra.mxu0 %v7126_v55  ;;  %v3505_v1 = vand.u32 4294901760, %v3504_v17  ;;  %v3498_v9 = vsub.f32 %v12988_v36, %v12213_v45  ;;  %v12218_v18 = vand.u32 4294901760, %v12990_v32 }
 0x115   : > { %v3510_v37 = vsub.f32 %v12989_v47, %v12215_v38  ;;  %6361 = vmatprep.subr.bf16.mxu1 %v6360_v3  ;;  %v931_v31 = vand.u32 4294901760, %v930_v22  ;;  %v12219_v49 = vand.u32 4294901760, %v12991_v29  ;;  %v12221_v11 = vand.u32 4294901760, %v12992_v26 }
 0x116   : > { %v943_v14 = vand.u32 4294901760, %v942_v42  ;;  %v7128_v23 = vpack.c.bf16 %v3505_v1, %v3493_v21  ;;  %v3499_v55 = vand.u32 4294901760, %v3498_v9  ;;  %v948_v45 = vsub.f32 %v12990_v32, %v12218_v18  ;;  %v12993_v42 = vld [vmem:[#allocation158_spill] sm:$0xff]  ;;  %v12994_v1 = vld [vmem:[#allocation160_spill] sm:$0xff] }
 0x117   : > { %v3511_v17 = vand.u32 4294901760, %v3510_v37  ;;  %v960_v38 = vsub.f32 %v12991_v29, %v12219_v49  ;;  %v3516_v22 = vsub.f32 %v12992_v26, %v12221_v11  ;;  %v12222_v3 = vand.u32 4294901760, %v12993_v42  ;;  %v12995_v37 = vld [vmem:[#allocation161_spill] sm:$0xff]  ;;  %v12996_v49 = vld [vmem:[#allocation163_spill] sm:$0xff] }
 0x118   : > { %v6362_v36 = vpack.c.bf16 %v943_v14, %v931_v31  ;;  %7129 = vmatprep.subr.bf16.mxu0 %v7128_v23  ;;  %v949_v21 = vand.u32 4294901760, %v948_v45  ;;  %v12226_v9 = vand.u32 4294901760, %v12994_v1  ;;  %v12227_v54 = vand.u32 4294901760, %v12995_v37 }
 0x119   : > { %v7130_v47 = vpack.c.bf16 %v3511_v17, %v3499_v55  ;;  %v961_v18 = vand.u32 4294901760, %v960_v38  ;;  %v3517_v14 = vand.u32 4294901760, %v3516_v22  ;;  %v3528_v31 = vsub.f32 %v12993_v42, %v12222_v3  ;;  %v12997_v55 = vld [vmem:[#allocation164_spill] sm:$0xff]  ;;  %v12999_v42 = vld [vmem:[#allocation167_spill] sm:$0xff] }
 0x11a   : > { %6363 = vmatpush1.bf16.msra.mxu1 %v6362_v36  ;;  %v12229_v29 = vand.u32 4294901760, %v12996_v49  ;;  %v954_v23 = vsub.f32 %v12994_v1, %v12226_v9  ;;  %v966_v45 = vsub.f32 %v12995_v37, %v12227_v54  ;;  %v12233_v17 = vand.u32 4294901760, %v12997_v55  ;;  %v12998_v36 = vld [vmem:[#allocation166_spill] sm:$0xff] }
 0x11b   : > { %7131 = vmatpush1.bf16.msra.mxu0 %v7130_v47  ;;  %v12234_v38 = vand.u32 4294901760, %v12998_v36  ;;  %v6364_v22 = vpack.c.bf16 %v961_v18, %v949_v21  ;;  %v3529_v11 = vand.u32 4294901760, %v3528_v31  ;;  %v12236_v47 = vand.u32 4294901760, %v12999_v42  ;;  %v13000_v31 = vld [vmem:[#allocation168_spill] sm:$0xff]  ;;  %v13001_v1 = vld [vmem:[#allocation170_spill] sm:$0xff] }
 0x11c   : > { %v3522_v3 = vsub.f32 %v12996_v49, %v12229_v29  ;;  %v955_v26 = vand.u32 4294901760, %v954_v23  ;;  %v967_v32 = vand.u32 4294901760, %v966_v45  ;;  %v3534_v9 = vsub.f32 %v12997_v55, %v12233_v17 }
 0x11d   : > { %v972_v54 = vsub.f32 %v12998_v36, %v12234_v38  ;;  %6365 = vmatprep.subr.bf16.mxu1 %v6364_v22  ;;  %v7132_v37 = vpack.c.bf16 %v3529_v11, %v3517_v14  ;;  %v984_v21 = vsub.f32 %v12999_v42, %v12236_v47  ;;  %v12237_v29 = vand.u32 4294901760, %v13000_v31  ;;  %v13002_v22 = vld [vmem:[#allocation172_spill] sm:$0xff] }
 0x11e   : > { %v3523_v18 = vand.u32 4294901760, %v3522_v3  ;;  %v6366_v49 = vpack.c.bf16 %v967_v32, %v955_v26  ;;  %v3535_v23 = vand.u32 4294901760, %v3534_v9  ;;  %v12239_v15 = vand.u32 4294901760, %v13001_v1  ;;  %v13003_v3 = vld [vmem:[#allocation173_spill] sm:$0xff]  ;;  %v13004_v32 = vld [vmem:[#allocation175_spill] sm:$0xff]  ;;  %v13005_v9 = vld [vmem:[#allocation176_spill] sm:$0xff] }
 0x11f   : > { %v973_v45 = vand.u32 4294901760, %v972_v54  ;;  %7133 = vmatprep.subr.bf16.mxu0 %v7132_v37  ;;  %v985_v17 = vand.u32 4294901760, %v984_v21  ;;  %v3540_v38 = vsub.f32 %v13000_v31, %v12237_v29  ;;  %v12240_v11 = vand.u32 4294901760, %v13002_v22 }
 0x120   : > { %v12244_v14 = vand.u32 4294901760, %v13003_v3  ;;  %6367 = vmatpush1.bf16.msra.mxu1 %v6366_v49  ;;  %v7134_v36 = vpack.c.bf16 %v3535_v23, %v3523_v18  ;;  %v3552_v26 = vsub.f32 %v13001_v1, %v12239_v15  ;;  %v12245_v54 = vand.u32 4294901760, %v13004_v32  ;;  %v13008_v1 = vld [vmem:[#allocation180_spill] sm:$0xff] }
 0x121   : > { %v12247_v47 = vand.u32 4294901760, %v13005_v9  ;;  %v6368_v37 = vpack.c.bf16 %v985_v17, %v973_v45  ;;  %v3541_v21 = vand.u32 4294901760, %v3540_v38  ;;  %v978_v29 = vsub.f32 %v13002_v22, %v12240_v11  ;;  %v13006_v17 = vld [vmem:[#allocation178_spill] sm:$0xff]  ;;  %v13007_v11 = vld [vmem:[#allocation179_spill] sm:$0xff] }
 0x122   : > { %v990_v31 = vsub.f32 %v13003_v3, %v12244_v14  ;;  %7135 = vmatpush1.bf16.msra.mxu0 %v7134_v36  ;;  %v3553_v49 = vand.u32 4294901760, %v3552_v26  ;;  %v3546_v18 = vsub.f32 %v13004_v32, %v12245_v54  ;;  %v12251_v38 = vand.u32 4294901760, %v13006_v17 }
 0x123   : > { %v3558_v23 = vsub.f32 %v13005_v9, %v12247_v47  ;;  %6369 = vmatprep.subr.bf16.mxu1 %v6368_v37  ;;  %v979_v45 = vand.u32 4294901760, %v978_v29  ;;  %v12248_v22 = vand.u32 4294901760, %v13007_v11  ;;  %v12249_v42 = vand.u32 4294901760, %v13008_v1 }
 0x124   : > { %v991_v15 = vand.u32 4294901760, %v990_v31  ;;  %v7136_v14 = vpack.c.bf16 %v3553_v49, %v3541_v21  ;;  %v3547_v36 = vand.u32 4294901760, %v3546_v18  ;;  %v996_v54 = vsub.f32 %v13006_v17, %v12251_v38  ;;  %v13011_v38 = vld [vmem:[#allocation191_spill] sm:$0xff]  ;;  %v13078_v17 = vld [vmem:[#allocation77_spill] sm:$0xff] }
 0x125   : > { %v3559_v26 = vand.u32 4294901760, %v3558_v23  ;;  %v1008_v47 = vsub.f32 %v13007_v11, %v12248_v22  ;;  %v3564_v29 = vsub.f32 %v13008_v1, %v12249_v42  ;;  %v12250_v31 = vand.u32 4294901760, %v8646_v7 }
 0x126   : > { %v6370_v32 = vpack.c.bf16 %v991_v15, %v979_v45  ;;  %7137 = vmatprep.subr.bf16.mxu0 %v7136_v14  ;;  %v997_v21 = vand.u32 4294901760, %v996_v54  ;;  %v12255_v49 = vand.u32 4294901760, %v8650_v0  ;;  %v12256_v18 = vand.u32 4294901760, %v8652_v28 }
 0x127   : > { %v7138_v37 = vpack.c.bf16 %v3559_v26, %v3547_v36  ;;  %v1009_v23 = vand.u32 4294901760, %v1008_v47  ;;  %v3565_v15 = vand.u32 4294901760, %v3564_v29  ;;  %v3576_v45 = vsub.f32 %v8646_v7, %v12250_v31  ;;  %v13009_v36 = vld [vmem:[#allocation188_spill] sm:$0xff] }
 0x128   : > { %6371 = vmatpush1.bf16.msra.mxu1 %v6370_v32  ;;  %v12259_v22 = vand.u32 4294901760, %v8656_v24  ;;  %v1002_v14 = vsub.f32 %v8650_v0, %v12255_v49  ;;  %v1014_v54 = vsub.f32 %v8652_v28, %v12256_v18  ;;  %v12262_v26 = vand.u32 4294901760, %v13009_v36  ;;  %v13010_v32 = vld [vmem:[#allocation190_spill] sm:$0xff]  ;;  %v13070_v0 = vld [vmem:[#allocation65_spill] sm:$0xff] }
 0x129   : > { %7139 = vmatpush1.bf16.msra.mxu0 %v7138_v37  ;;  %v12263_v47 = vand.u32 4294901760, %v13010_v32  ;;  %v6372_v29 = vpack.c.bf16 %v1009_v23, %v997_v21  ;;  %v3577_v42 = vand.u32 4294901760, %v3576_v45  ;;  %v12267_v37 = vand.u32 4294901760, %v13011_v38 }
 0x12a   : > { %v3570_v31 = vsub.f32 %v8656_v24, %v12259_v22  ;;  %v1003_v7 = vand.u32 4294901760, %v1002_v14  ;;  %v1015_v1 = vand.u32 4294901760, %v1014_v54  ;;  %v3582_v49 = vsub.f32 %v13009_v36, %v12262_v26 }
 0x12b   : > { %v1020_v18 = vsub.f32 %v13010_v32, %v12263_v47  ;;  %6373 = vmatprep.subr.bf16.mxu1 %v6372_v29  ;;  %v7140_v28 = vpack.c.bf16 %v3577_v42, %v3565_v15  ;;  %v1032_v23 = vsub.f32 %v13011_v38, %v12267_v37  ;;  %v12266_v45 = vand.u32 4294901760, %v8672_v8  ;;  %v13073_v38 = vld [vmem:[#allocation70_spill] sm:$0xff] }
 0x12c   : > { %v3571_v21 = vand.u32 4294901760, %v3570_v31  ;;  %v6374_v22 = vpack.c.bf16 %v1015_v1, %v1003_v7  ;;  %v3583_v14 = vand.u32 4294901760, %v3582_v49  ;;  %v12264_v24 = vand.u32 4294901760, %v8677_v59 }
 0x12d   : > { %v1021_v54 = vand.u32 4294901760, %v1020_v18  ;;  %7141 = vmatprep.subr.bf16.mxu0 %v7140_v28  ;;  %v1033_v26 = vand.u32 4294901760, %v1032_v23  ;;  %v3588_v47 = vsub.f32 %v8672_v8, %v12266_v45  ;;  %v12265_v42 = vand.u32 4294901760, %v8681_v60  ;;  %v13012_v45 = vld [vmem:[#allocation11_spill] sm:$0xff]  ;;  %v13076_v8 = vld [vmem:[#allocation74_spill] sm:$0xff] }
 0x12e   : > { %v12268_v31 = vand.u32 4294901760, %v8685_v2  ;;  %6375 = vmatpush1.bf16.msra.mxu1 %v6374_v22  ;;  %v7142_v15 = vpack.c.bf16 %v3583_v14, %v3571_v21  ;;  %v3600_v7 = vsub.f32 %v8677_v59, %v12264_v24  ;;  %v12273_v1 = vand.u32 4294901760, %v8689_v20 }
 0x12f   : > { %v12274_v49 = vand.u32 4294901760, %v8691_v53  ;;  %v6376_v28 = vpack.c.bf16 %v1033_v26, %v1021_v54  ;;  %v3589_v18 = vand.u32 4294901760, %v3588_v47  ;;  %v1026_v29 = vsub.f32 %v8681_v60, %v12265_v42 }
 0x130   : > { %v1038_v23 = vsub.f32 %v8685_v2, %v12268_v31  ;;  %7143 = vmatpush1.bf16.msra.mxu0 %v7142_v15  ;;  %v3601_v22 = vand.u32 4294901760, %v3600_v7  ;;  %v3594_v21 = vsub.f32 %v8689_v20, %v12273_v1  ;;  %v6380_v37 = vpack.c.bf16 %v13012_v45, %v8245_v16  ;;  %v13013_v15 = vld [vmem:[#allocation12_spill] sm:$0xff]  ;;  %v13014_v7 = vld [vmem:[#allocation14_spill] sm:$0xff] }
 0x131   : > { %v3606_v14 = vsub.f32 %v8691_v53, %v12274_v49  ;;  %6377 = vmatprep.subr.bf16.mxu1 %v6376_v28  ;;  %v1027_v26 = vand.u32 4294901760, %v1026_v29  ;;  %v7148_v2 = vpack.c.bf16 %v13014_v7, %v13013_v15  ;;  %v6382_v1 = vpack.c.bf16 %v8260_v27, %v8257_v25  ;;  %v13032_v49 = vld [vmem:[#allocation131_spill] sm:$0xff]  ;;  %v13050_v25 = vld [vmem:[#allocation158_spill] sm:$0xff]  ;;  %v13052_v15 = vld [vmem:[#allocation161_spill] sm:$0xff] }
 0x132   : > { %v1039_v47 = vand.u32 4294901760, %v1038_v23  ;;  %v7144_v54 = vpack.c.bf16 %v3601_v22, %v3589_v18  ;;  %v3595_v24 = vand.u32 4294901760, %v3594_v21  ;;  %v7150_v28 = vpack.c.bf16 %v8268_v40, %v8266_v39  ;;  %v13015_v23 = vld [vmem:[#allocation201_spill] sm:$0xff]  ;;  %v13045_v40 = vld [vmem:[#allocation151_spill] sm:$0xff]  ;;  %v13059_v39 = vld [vmem:[#allocation172_spill] sm:$0xff] }
 0x133   : > { %v3607_v42 = vand.u32 4294901760, %v3606_v14  ;;  %v6384_v18 = vpack.c.bf16 %v8274_v46, %v8270_v41  ;;  %v7152_v29 = vpack.c.bf16 %v8281_v50, %v8278_v48  ;;  %v7158_v22 = vpack.c.bf16 %v8323_v44, %v8321_v43  ;;  %v13034_v44 = vld [vmem:[#allocation134_spill] sm:$0xff]  ;;  %v13036_v43 = vld [vmem:[#allocation137_spill] sm:$0xff]  ;;  %v13064_v50 = vld [vmem:[#allocation187_spill] sm:$0xff] }
 0x134   : > { %v6378_v31 = vpack.c.bf16 %v1039_v47, %v1027_v26  ;;  %7145 = vmatprep.subr.bf16.mxu0 %v7144_v54  ;;  %v6392_v21 = vpack.c.bf16 %v8331_v56, %v8327_v51  ;;  %v6394_v14 = vpack.c.bf16 %v8345_v35, %v8341_v19  ;;  %v7162_v26 = vpack.c.bf16 %v8351_v57, %v8349_v30  ;;  %v13017_v47 = vld [vmem:[#allocation59_spill] sm:$0xff]  ;;  %v13022_v56 = vld [vmem:[#allocation118_spill] sm:$0xff]  ;;  %v13027_v35 = vld [vmem:[#allocation125_spill] sm:$0xff] }
 0x135   : > { %v7146_v60 = vpack.c.bf16 %v3607_v42, %v3595_v24  ;;  %v6386_v24 = vpack.c.bf16 %v8289_v61, %v8283_v52  ;;  %v7154_v42 = vpack.c.bf16 %v8295_v4, %v8291_v62  ;;  %v6396_v54 = vpack.c.bf16 %v13017_v47, %v8355_v5  ;;  %v13023_v51 = vld [vmem:[#allocation119_spill] sm:$0xff]  ;;  %v13030_v47 = vld [vmem:[#allocation128_spill] sm:$0xff]  ;;  %v13031_v30 = vld [vmem:[#allocation130_spill] sm:$0xff] }
 0x136   : > { %6379 = vmatpush1.bf16.msra.mxu1 %v6378_v31  ;;  %v6390_v31 = vpack.c.bf16 %v8317_v34, %v8315_v33  ;;  %v13026_v34 = vld [vmem:[#allocation124_spill] sm:$0xff]  ;;  %v13028_v33 = vld [vmem:[#allocation205_spill] sm:$0xff]  ;;  %v13029_v57 = vld [vmem:[#allocation127_spill] sm:$0xff] }
 0x137   : > { %7147 = vmatpush1.bf16.msra.mxu0 %v7146_v60  ;;  %6381 = vmatprep.subr.bf16.mxu1 %v6380_v37  ;;  %v13016_v60 = vld [vmem:[#allocation204_spill] sm:$0xff]  ;;  %v6388_v37 = vpack.c.bf16 %v8302_v10, %v8299_v6  ;;  %v13039_v61 = vld [vmem:[#allocation142_spill] sm:$0xff]  ;;  %v13040_v52 = vld [vmem:[#allocation143_spill] sm:$0xff] }
 0x138   : > { %7149 = vmatprep.subr.bf16.mxu0 %v7148_v2  ;;  %v7156_v2 = vpack.c.bf16 %v8308_v13, %v8306_v12  ;;  %v13033_v12 = vld [vmem:[#allocation132_spill] sm:$0xff]  ;;  %v13042_v48 = vld [vmem:[#allocation146_spill] sm:$0xff]  ;;  %v13048_v4 = vld [vmem:[#allocation155_spill] sm:$0xff] }
 0x139   : > { %1044 = vmatmul.mubr.f32.vlgmr.msra.gmra.mrb[0].mxu1 %v13015_v23  ;;  %v13021_v23 = vld [vmem:[#allocation116_spill] sm:$0xff]  ;;  %v13054_v5 = vld [vmem:[#allocation166_spill] sm:$0xff]  ;;  %v13058_v13 = vld [vmem:[#allocation207_spill] sm:$0xff] }
 0x13a   : > { %6383 = vmatpush1.bf16.msra.mxu1 %v6382_v1  ;;  %3612 = vmatmul.mubr.f32.vlgmr.msra.gmra.mrb[0].mxu0 %v13016_v60  ;;  %v7160_v1 = vpack.c.bf16 %v8338_v63, %v8335_v58  ;;  %v13020_v60 = vld [vmem:[#allocation115_spill] sm:$0xff]  ;;  %v13024_v63 = vld [vmem:[#allocation120_spill] sm:$0xff]  ;;  %v13057_v41 = vld [vmem:[#allocation170_spill] sm:$0xff] }
 0x13b   : > { %7151 = vmatpush1.bf16.msra.mxu0 %v7150_v28  ;;  %6385 = vmatprep.subr.bf16.mxu1 %v6384_v18  ;;  %v13018_v28 = vld [vmem:[#allocation112_spill] sm:$0xff]  ;;  %v13019_v18 = vld [vmem:[#allocation113_spill] sm:$0xff]  ;;  %v13037_v58 = vld [vmem:[#allocation139_spill] sm:$0xff] }
 0x13c   : > { %7153 = vmatprep.subr.bf16.mxu0 %v7152_v29  ;;  %v13025_v29 = vld [vmem:[#allocation122_spill] sm:$0xff]  ;;  %1244 = vmatprep.mubr.f32.mxu1 %v13028_v33  ;;  %v13035_v6 = vld [vmem:[#allocation136_spill] sm:$0xff]  ;;  %v13063_v33 = vld [vmem:[#allocation185_spill] sm:$0xff] }
 0x13d   : > { %v13038_v62 = vld [vmem:[#allocation140_spill] sm:$0xff]  ;;  %3812 = vmatprep.mubr.f32.mxu0 %v13058_v13  ;;  %v13062_v16 = vld [vmem:[#allocation182_spill] sm:$0xff] }
 0x13e   : > { %6387 = vmatpush1.bf16.msra.mxu1 %v6386_v24  ;;  %v13046_v10 = vld [vmem:[#allocation152_spill] sm:$0xff]  ;;  %v13066_v7 = vld [vmem:[#allocation62_spill] sm:$0xff]  ;;  %v13068_v24 = vld [vmem:[#allocation197_spill] sm:$0xff] }
 0x13f   : > { %7155 = vmatpush1.bf16.msra.mxu0 %v7154_v42  ;;  %6389 = vmatprep.subr.bf16.mxu1 %v6388_v37  ;;  %v13049_v37 = vld [vmem:[#allocation156_spill] sm:$0xff]  ;;  %v13071_v42 = vld [vmem:[#allocation67_spill] sm:$0xff] }
 0x140   : > { %7157 = vmatprep.subr.bf16.mxu0 %v7156_v2  ;;  %v13055_v2 = vld [vmem:[#allocation167_spill] sm:$0xff]  ;;  %v13061_v19 = vld [vmem:[#allocation180_spill] sm:$0xff] }
 0x141   : > { %v13065_v13 = vld [vmem:[#allocation60_spill] sm:$0xff] }
 0x142   : > { %6391 = vmatpush1.bf16.msra.mxu1 %v6390_v31  ;;  %v7164_v27 = vpack.c.bf16 %v13066_v7, %v13065_v13  ;;  %v13069_v46 = vld [vmem:[#allocation64_spill] sm:$0xff]  ;;  %v13074_v7 = vld [vmem:[#allocation71_spill] sm:$0xff] }
 0x143   : > { %7159 = vmatpush1.bf16.msra.mxu0 %v7158_v22  ;;  %6393 = vmatprep.subr.bf16.mxu1 %v6392_v21  ;;  %v6398_v31 = vpack.c.bf16 %v13070_v0, %v13069_v46  ;;  %v6400_v13 = vpack.c.bf16 %v13074_v7, %v13073_v38  ;;  %v13075_v45 = vld [vmem:[#allocation72_spill] sm:$0xff]  ;;  %v13082_v46 = vld [vmem:[#allocation83_spill] sm:$0xff]  ;;  %v13086_v38 = vld [vmem:[#allocation89_spill] sm:$0xff] }
 0x144   : > { %7161 = vmatprep.subr.bf16.mxu0 %v7160_v1  ;;  %v13072_v1 = vld [vmem:[#allocation68_spill] sm:$0xff]  ;;  %v7168_v59 = vpack.c.bf16 %v13076_v8, %v13075_v45 }
 0x145   : > { %v7166_v32 = vpack.c.bf16 %v13072_v1, %v13071_v42  ;;  %v13077_v22 = vld [vmem:[#allocation76_spill] sm:$0xff]  ;;  %v13084_v42 = vld [vmem:[#allocation86_spill] sm:$0xff] }
 0x146   : > { %6395 = vmatpush1.bf16.msra.mxu1 %v6394_v14  ;;  %v6402_v21 = vpack.c.bf16 %v13078_v17, %v13077_v22  ;;  %v13079_v14 = vld [vmem:[#allocation79_spill] sm:$0xff]  ;;  %v13080_v0 = vld [vmem:[#allocation80_spill] sm:$0xff] }
 0x147   : > { %7163 = vmatpush1.bf16.msra.mxu0 %v7162_v26  ;;  %6397 = vmatprep.subr.bf16.mxu1 %v6396_v54  ;;  %v7170_v26 = vpack.c.bf16 %v13080_v0, %v13079_v14  ;;  %v13081_v54 = vld [vmem:[#allocation82_spill] sm:$0xff]  ;;  %v13083_v1 = vld [vmem:[#allocation84_spill] sm:$0xff]  ;;  %v13090_v22 = vld [vmem:[#allocation95_spill] sm:$0xff] }
 0x148   : > { %7165 = vmatprep.subr.bf16.mxu0 %v7164_v27  ;;  %v6404_v20 = vpack.c.bf16 %v13082_v46, %v13081_v54  ;;  %v7172_v7 = vpack.c.bf16 %v13084_v42, %v13083_v1  ;;  %v13085_v27 = vld [vmem:[#allocation88_spill] sm:$0xff]  ;;  %v13092_v14 = vld [vmem:[#allocation98_spill] sm:$0xff]  ;;  %v13094_v54 = vld [vmem:[#allocation101_spill] sm:$0xff] }
 0x149   : > { %v6406_v8 = vpack.c.bf16 %v13086_v38, %v13085_v27  ;;  %v13088_v17 = vld [vmem:[#allocation92_spill] sm:$0xff]  ;;  %v13098_v27 = vld [vmem:[#allocation107_spill] sm:$0xff] }
 0x14a   : > { %6399 = vmatpush1.bf16.msra.mxu1 %v6398_v31  ;;  %v13087_v31 = vld [vmem:[#allocation91_spill] sm:$0xff]  ;;  %v13091_v0 = vld [vmem:[#allocation96_spill] sm:$0xff] }
 0x14b   : > { %7167 = vmatpush1.bf16.msra.mxu0 %v7166_v32  ;;  %6401 = vmatprep.subr.bf16.mxu1 %v6400_v13  ;;  %v7174_v32 = vpack.c.bf16 %v13088_v17, %v13087_v31  ;;  %v13089_v13 = vld [vmem:[#allocation94_spill] sm:$0xff]  ;;  %v7176_v46 = vpack.c.bf16 %v13092_v14, %v13091_v0  ;;  %v13096_v38 = vld [vmem:[#allocation104_spill] sm:$0xff] }
 0x14c   : > { %7169 = vmatprep.subr.bf16.mxu0 %v7168_v59  ;;  %v6408_v45 = vpack.c.bf16 %v13090_v22, %v13089_v13  ;;  %v13093_v59 = vld [vmem:[#allocation100_spill] sm:$0xff]  ;;  %v13100_v31 = vld [vmem:[#allocation110_spill] sm:$0xff] }
 0x14d   : > { %v6410_v42 = vpack.c.bf16 %v13094_v54, %v13093_v59  ;;  %v13099_v17 = vld [vmem:[#allocation108_spill] sm:$0xff] }
 0x14e   : > { %6403 = vmatpush1.bf16.msra.mxu1 %v6402_v21  ;;  %v13095_v21 = vld [vmem:[#allocation103_spill] sm:$0xff]  ;;  %v7180_v22 = vpack.c.bf16 %v13100_v31, %v13099_v17 }
 0x14f   : > { %7171 = vmatpush1.bf16.msra.mxu0 %v7170_v26  ;;  %6405 = vmatprep.subr.bf16.mxu1 %v6404_v20  ;;  %v7178_v26 = vpack.c.bf16 %v13096_v38, %v13095_v21  ;;  %v13097_v20 = vld [vmem:[#allocation106_spill] sm:$0xff] }
 0x150   : > { %7173 = vmatprep.subr.bf16.mxu0 %v7172_v7  ;;  %v6412_v1 = vpack.c.bf16 %v13098_v27, %v13097_v20  ;;  %v13103_v7 = vpack.c.bf16 %v13023_v51, %v13022_v56 }
 0x152   : > { %6407 = vmatpush1.bf16.msra.mxu1 %v6406_v8  ;;  %v13101_v8 = vpack.c.bf16 %v13019_v18, %v13018_v28 }
 0x153   : > { %7175 = vmatpush1.bf16.msra.mxu0 %v7174_v32  ;;  %6409 = vmatprep.subr.bf16.mxu1 %v6408_v45  ;;  %v13102_v45 = vpack.c.bf16 %v13021_v23, %v13020_v60  ;;  %v13108_v32 = vpack.c.bf16 %v13034_v44, %v13033_v12 }
 0x154   : > { %7177 = vmatprep.subr.bf16.mxu0 %v7176_v46  ;;  %v13104_v46 = vpack.c.bf16 %v13025_v29, %v13024_v63 }
 0x156   : > { %6411 = vmatpush1.bf16.msra.mxu1 %v6410_v42  ;;  %v13105_v42 = vpack.c.bf16 %v13027_v35, %v13026_v34 }
 0x157   : > { %7179 = vmatpush1.bf16.msra.mxu0 %v7178_v26  ;;  %6413 = vmatprep.subr.bf16.mxu1 %v6412_v1  ;;  %v13107_v1 = vpack.c.bf16 %v13032_v49, %v13031_v30  ;;  %v13109_v26 = vpack.c.bf16 %v13036_v43, %v13035_v6 }
 0x158   : > { %7181 = vmatprep.subr.bf16.mxu0 %v7180_v22  ;;  %v13106_v22 = vpack.c.bf16 %v13030_v47, %v13029_v57 }
 0x15a   : > { %6415 = vmatpush1.bf16.msra.mxu1 %v13101_v8  ;;  %v13110_v8 = vpack.c.bf16 %v13038_v62, %v13037_v58 }
 0x15b   : > { %7183 = vmatpush1.bf16.msra.mxu0 %v13102_v45  ;;  %6417 = vmatprep.subr.bf16.mxu1 %v13103_v7  ;;  %v13111_v45 = vpack.c.bf16 %v13040_v52, %v13039_v61  ;;  %v13112_v7 = vld [vmem:[#allocation144_spill] sm:$0xff] }
 0x15c   : > { %7185 = vmatprep.subr.bf16.mxu0 %v13104_v46  ;;  %v13113_v46 = vpack.c.bf16 %v13042_v48, %v13112_v7 }
 0x15e   : > { %6419 = vmatpush1.bf16.msra.mxu1 %v13105_v42  ;;  %v13114_v42 = vld [vmem:[#allocation149_spill] sm:$0xff] }
 0x15f   : > { %7187 = vmatpush1.bf16.msra.mxu0 %v13106_v22  ;;  %6421 = vmatprep.subr.bf16.mxu1 %v13107_v1  ;;  %v13115_v22 = vld [vmem:[#allocation148_spill] sm:$0xff] }
 0x160   : > { %7189 = vmatprep.subr.bf16.mxu0 %v13108_v32  ;;  %v13116_v1 = vpack.c.bf16 %v13114_v42, %v13115_v22  ;;  %v13117_v32 = vpack.c.bf16 %v13046_v10, %v13045_v40 }
 0x162   : > { %6423 = vmatpush1.bf16.msra.mxu1 %v13109_v26  ;;  %v13118_v26 = vld [vmem:[#allocation154_spill] sm:$0xff] }
 0x163   : > { %7191 = vmatpush1.bf16.msra.mxu0 %v13110_v8  ;;  %6425 = vmatprep.subr.bf16.mxu1 %v13111_v45  ;;  %v13119_v62 = vpack.c.bf16 %v13048_v4, %v13118_v26  ;;  %v13120_v8 = vpack.c.bf16 %v13050_v25, %v13049_v37  ;;  %v13121_v45 = vld [vmem:[#allocation160_spill] sm:$0xff] }
 0x164   : > { %7193 = vmatprep.subr.bf16.mxu0 %v13113_v46  ;;  %v13122_v48 = vpack.c.bf16 %v13052_v15, %v13121_v45  ;;  %v13123_v46 = vld [vmem:[#allocation163_spill] sm:$0xff] }
 0x165   : > { %v13124_v42 = vpack.c.bf16 %v12997_v55, %v13123_v46 }
 0x166   : > { %6427 = vmatpush1.bf16.msra.mxu1 %v13116_v1  ;;  %v13125_v1 = vpack.c.bf16 %v13055_v2, %v13054_v5  ;;  %v13235_v2 = vld [vmem:[#allocation23_spill] sm:$0xff] }
 0x167   : > { %7195 = vmatpush1.bf16.msra.mxu0 %v13117_v32  ;;  %6429 = vmatprep.subr.bf16.mxu1 %v13119_v62  ;;  %v13126_v32 = vld [vmem:[#allocation168_spill] sm:$0xff]  ;;  %v13128_v62 = vpack.c.bf16 %v13003_v3, %v13059_v39  ;;  %v13138_v3 = vld [vmem:[#allocation190_spill] sm:$0xff] }
 0x168   : > { %7197 = vmatprep.subr.bf16.mxu0 %v13120_v8  ;;  %v13127_v4 = vpack.c.bf16 %v13057_v41, %v13126_v32  ;;  %v13129_v8 = vld [vmem:[#allocation175_spill] sm:$0xff]  ;;  %v13233_v32 = vld [vmem:[#allocation21_spill] sm:$0xff] }
 0x169   : > { %v13130_v15 = vpack.c.bf16 %v13005_v9, %v13129_v8  ;;  %v13141_v8 = vld [vmem:[#allocation192_spill] sm:$0xff] }
 0x16a   : > { %6431 = vmatpush1.bf16.msra.mxu1 %v13122_v48  ;;  %v13131_v48 = vld [vmem:[#allocation178_spill] sm:$0xff] }
 0x16b   : > { %7199 = vmatpush1.bf16.msra.mxu0 %v13124_v42  ;;  %6433 = vmatprep.subr.bf16.mxu1 %v13125_v1  ;;  %v13132_v55 = vpack.c.bf16 %v13007_v11, %v13131_v48  ;;  %v13133_v42 = vpack.c.bf16 %v13062_v16, %v13061_v19  ;;  %v13134_v1 = vld [vmem:[#allocation184_spill] sm:$0xff]  ;;  %v13223_v19 = vld [vmem:[#allocation195_spill] sm:$0xff]  ;;  %v13226_v48 = vld [vmem:[#allocation17_spill] sm:$0xff] }
 0x16c   : > { %7201 = vmatprep.subr.bf16.mxu0 %v13127_v4  ;;  %v13135_v41 = vpack.c.bf16 %v13063_v33, %v13134_v1  ;;  %v13136_v4 = vpack.c.bf16 %v13009_v36, %v13064_v50  ;;  %v13148_v36 = vld [vmem:[#allocation13_spill] sm:$0xff] }
 0x16e   : > { %6435 = vmatpush1.bf16.msra.mxu1 %v13128_v62  ;;  %v13137_v62 = vld [vmem:[#allocation191_spill] sm:$0xff] }
 0x16f   : > { %7203 = vmatpush1.bf16.msra.mxu0 %v13130_v15  ;;  %6437 = vmatprep.subr.bf16.mxu1 %v13132_v55  ;;  %v13139_v9 = vpack.c.bf16 %v13137_v62, %v13138_v3  ;;  %v13140_v15 = vld [vmem:[#allocation194_spill] sm:$0xff]  ;;  %v13143_v55 = vld [vmem:[#allocation196_spill] sm:$0xff]  ;;  %v13150_v62 = vld [vmem:[#allocation15_spill] sm:$0xff] }
 0x170   : > { %7205 = vmatprep.subr.bf16.mxu0 %v13133_v42  ;;  %v13142_v11 = vpack.c.bf16 %v13140_v15, %v13141_v8  ;;  %v13144_v16 = vpack.c.bf16 %v13068_v24, %v13143_v55  ;;  %v13145_v42 = vld [vmem:[#allocation199_spill] sm:$0xff]  ;;  %v13152_v15 = vld [vmem:[#allocation18_spill] sm:$0xff]  ;;  %v13154_v24 = vld [vmem:[#allocation24_spill] sm:$0xff] }
 0x171   : > { %v13146_v33 = vpack.c.bf16 %v8691_v53, %v13145_v42  ;;  %v13161_v42 = vld [vmem:[#allocation33_spill] sm:$0xff]  ;;  %v13163_v8 = vld [vmem:[#allocation39_spill] sm:$0xff] }
 0x172   : > { %6439 = vmatpush1.bf16.msra.mxu1 %v13135_v41  ;;  %v13147_v41 = vld [vmem:[#allocation9_spill] sm:$0xff] }
 0x173   : > { %7207 = vmatpush1.bf16.msra.mxu0 %v13136_v4  ;;  %6441 = vmatprep.subr.bf16.mxu1 %v13139_v9  ;;  %v13149_v4 = vld [vmem:[#allocation203_spill] sm:$0xff]  ;;  %v13151_v9 = vld [vmem:[#allocation208_spill] sm:$0xff] }
 0x174   : > { %7209 = vmatprep.subr.bf16.mxu0 %v13142_v11  ;;  %v13153_v11 = vld [vmem:[#allocation22_spill] sm:$0xff] }
 0x176   : > { %6443 = vmatpush1.bf16.msra.mxu1 %v13144_v16  ;;  %v13155_v16 = vld [vmem:[#allocation205_spill] sm:$0xff] }
 0x177   : > { %7211 = vmatpush1.bf16.msra.mxu0 %v13146_v33  ;;  %6445 = vmatprep.subr.bf16.mxu1 %v13147_v41  ;;  %v13156_v55 = vand.u32 4294901760, %v13155_v16  ;;  %v13157_v33 = vld [vmem:[#allocation207_spill] sm:$0xff]  ;;  %v13159_v41 = vld [vmem:[#allocation28_spill] sm:$0xff]  ;;  %v13168_v16 = vld [vmem:[#allocation54_spill] sm:$0xff] }
 0x178   : > { %7213 = vmatprep.subr.bf16.mxu0 %v13148_v36  ;;  %v13158_v53 = vand.u32 4294901760, %v13157_v33  ;;  %v13160_v36 = vld [vmem:[#allocation31_spill] sm:$0xff]  ;;  %v13170_v33 = vld [vmem:[#allocation61_spill] sm:$0xff] }
 0x179   : > { %1247 = vmatmul.mubr.f32.vlgmr.msra.gmra.mrb[0].mxu1 %v13149_v4 }
 0x17a   : > { %6447 = vmatpush1.bf16.msra.mxu1 %v13150_v62  ;;  %3815 = vmatmul.mubr.f32.vlgmr.msra.gmra.mrb[0].mxu0 %v13151_v9  ;;  %v13162_v62 = vld [vmem:[#allocation36_spill] sm:$0xff] }
 0x17b   : > { %7215 = vmatpush1.bf16.msra.mxu0 %v13152_v15  ;;  %6449 = vmatprep.subr.bf16.mxu1 %v13153_v11  ;;  %v13164_v15 = vld [vmem:[#allocation42_spill] sm:$0xff]  ;;  %v13165_v11 = vld [vmem:[#allocation45_spill] sm:$0xff] }
 0x17c   : > { %7217 = vmatprep.subr.bf16.mxu0 %v13154_v24  ;;  %1384 = vmatprep.mubr.f32.mxu1 %v13156_v55  ;;  %v13166_v24 = vld [vmem:[#allocation48_spill] sm:$0xff] }
 0x17d   : > { %3952 = vmatprep.mubr.f32.mxu0 %v13158_v53  ;;  %v13167_v55 = vld [vmem:[#allocation52_spill] sm:$0xff]  ;;  %v13169_v53 = vld [vmem:[#allocation57_spill] sm:$0xff] }
 0x17e   : > { %6451 = vmatpush1.bf16.msra.mxu1 %v13159_v41  ;;  %v13216_v41 = vld [vmem:[#allocation11_spill] sm:$0xff] }
 0x17f   : > { %7219 = vmatpush1.bf16.msra.mxu0 %v13160_v36  ;;  %6453 = vmatprep.subr.bf16.mxu1 %v13161_v42  ;;  %v13171_v36 = vld [vmem:[#allocation63_spill] sm:$0xff]  ;;  %v13172_v42 = vld [vmem:[#allocation66_spill] sm:$0xff] }
 0x180   : > { %7221 = vmatprep.subr.bf16.mxu0 %v13162_v62  ;;  %v13173_v62 = vld [vmem:[#allocation69_spill] sm:$0xff] }
 0x182   : > { %6455 = vmatpush1.bf16.msra.mxu1 %v13163_v8  ;;  %v13174_v8 = vld [vmem:[#allocation73_spill] sm:$0xff] }
 0x183   : > { %7223 = vmatpush1.bf16.msra.mxu0 %v13164_v15  ;;  %6457 = vmatprep.subr.bf16.mxu1 %v13165_v11  ;;  %v13175_v15 = vld [vmem:[#allocation75_spill] sm:$0xff]  ;;  %v13176_v11 = vld [vmem:[#allocation78_spill] sm:$0xff] }
 0x184   : > { %7225 = vmatprep.subr.bf16.mxu0 %v13166_v24  ;;  %v13177_v24 = vld [vmem:[#allocation81_spill] sm:$0xff] }
 0x186   : > { %6459 = vmatpush1.bf16.msra.mxu1 %v13167_v55  ;;  %v13178_v55 = vld [vmem:[#allocation85_spill] sm:$0xff] }
 0x187   : > { %7227 = vmatpush1.bf16.msra.mxu0 %v13168_v16  ;;  %6461 = vmatprep.subr.bf16.mxu1 %v13169_v53  ;;  %v13179_v16 = vld [vmem:[#allocation87_spill] sm:$0xff]  ;;  %v13180_v53 = vld [vmem:[#allocation90_spill] sm:$0xff] }
 0x188   : > { %7229 = vmatprep.subr.bf16.mxu0 %v13170_v33  ;;  %v13181_v33 = vld [vmem:[#allocation93_spill] sm:$0xff] }
 0x18a   : > { %6463 = vmatpush1.bf16.msra.mxu1 %v13171_v36  ;;  %v13182_v36 = vld [vmem:[#allocation97_spill] sm:$0xff] }
 0x18b   : > { %7231 = vmatpush1.bf16.msra.mxu0 %v13172_v42  ;;  %6465 = vmatprep.subr.bf16.mxu1 %v13173_v62  ;;  %v13183_v42 = vld [vmem:[#allocation99_spill] sm:$0xff]  ;;  %v13184_v62 = vld [vmem:[#allocation102_spill] sm:$0xff] }
 0x18c   : > { %7233 = vmatprep.subr.bf16.mxu0 %v13174_v8  ;;  %v13185_v8 = vld [vmem:[#allocation105_spill] sm:$0xff] }
 0x18e   : > { %6467 = vmatpush1.bf16.msra.mxu1 %v13175_v15  ;;  %v13186_v15 = vld [vmem:[#allocation109_spill] sm:$0xff] }
 0x18f   : > { %7235 = vmatpush1.bf16.msra.mxu0 %v13176_v11  ;;  %6469 = vmatprep.subr.bf16.mxu1 %v13177_v24  ;;  %v13187_v11 = vld [vmem:[#allocation111_spill] sm:$0xff]  ;;  %v13188_v24 = vld [vmem:[#allocation114_spill] sm:$0xff] }
 0x190   : > { %7237 = vmatprep.subr.bf16.mxu0 %v13178_v55  ;;  %v13189_v55 = vld [vmem:[#allocation117_spill] sm:$0xff] }
 0x192   : > { %6471 = vmatpush1.bf16.msra.mxu1 %v13179_v16  ;;  %v13190_v16 = vld [vmem:[#allocation121_spill] sm:$0xff] }
 0x193   : > { %7239 = vmatpush1.bf16.msra.mxu0 %v13180_v53  ;;  %6473 = vmatprep.subr.bf16.mxu1 %v13181_v33  ;;  %v13191_v53 = vld [vmem:[#allocation123_spill] sm:$0xff]  ;;  %v13192_v33 = vld [vmem:[#allocation126_spill] sm:$0xff] }
 0x194   : > { %7241 = vmatprep.subr.bf16.mxu0 %v13182_v36  ;;  %v13193_v36 = vld [vmem:[#allocation129_spill] sm:$0xff] }
 0x196   : > { %6475 = vmatpush1.bf16.msra.mxu1 %v13183_v42  ;;  %v13194_v42 = vld [vmem:[#allocation133_spill] sm:$0xff] }
 0x197   : > { %7243 = vmatpush1.bf16.msra.mxu0 %v13184_v62  ;;  %6477 = vmatprep.subr.bf16.mxu1 %v13185_v8  ;;  %v13195_v62 = vld [vmem:[#allocation135_spill] sm:$0xff]  ;;  %v13196_v8 = vld [vmem:[#allocation138_spill] sm:$0xff] }
 0x198   : > { %7245 = vmatprep.subr.bf16.mxu0 %v13186_v15  ;;  %v13197_v15 = vld [vmem:[#allocation141_spill] sm:$0xff] }
 0x19a   : > { %6479 = vmatpush1.bf16.msra.mxu1 %v13187_v11  ;;  %v13198_v11 = vld [vmem:[#allocation145_spill] sm:$0xff] }
 0x19b   : > { %7247 = vmatpush1.bf16.msra.mxu0 %v13188_v24  ;;  %6481 = vmatprep.subr.bf16.mxu1 %v13189_v55  ;;  %v13199_v24 = vld [vmem:[#allocation147_spill] sm:$0xff]  ;;  %v13200_v55 = vld [vmem:[#allocation150_spill] sm:$0xff] }
 0x19c   : > { %7249 = vmatprep.subr.bf16.mxu0 %v13190_v16  ;;  %v13201_v16 = vld [vmem:[#allocation153_spill] sm:$0xff] }
 0x19e   : > { %6483 = vmatpush1.bf16.msra.mxu1 %v13191_v53  ;;  %v13202_v53 = vld [vmem:[#allocation157_spill] sm:$0xff] }
 0x19f   : > { %7251 = vmatpush1.bf16.msra.mxu0 %v13192_v33  ;;  %6485 = vmatprep.subr.bf16.mxu1 %v13193_v36  ;;  %v13203_v33 = vld [vmem:[#allocation159_spill] sm:$0xff]  ;;  %v13204_v36 = vld [vmem:[#allocation162_spill] sm:$0xff] }
 0x1a0   : > { %7253 = vmatprep.subr.bf16.mxu0 %v13194_v42  ;;  %v13205_v42 = vld [vmem:[#allocation165_spill] sm:$0xff] }
 0x1a2   : > { %6487 = vmatpush1.bf16.msra.mxu1 %v13195_v62  ;;  %v13206_v62 = vld [vmem:[#allocation169_spill] sm:$0xff] }
 0x1a3   : > { %7255 = vmatpush1.bf16.msra.mxu0 %v13196_v8  ;;  %6489 = vmatprep.subr.bf16.mxu1 %v13197_v15  ;;  %v13207_v8 = vld [vmem:[#allocation171_spill] sm:$0xff]  ;;  %v13208_v15 = vld [vmem:[#allocation174_spill] sm:$0xff] }
 0x1a4   : > { %7257 = vmatprep.subr.bf16.mxu0 %v13198_v11  ;;  %v13209_v11 = vld [vmem:[#allocation177_spill] sm:$0xff] }
 0x1a6   : > { %6491 = vmatpush1.bf16.msra.mxu1 %v13199_v24  ;;  %v13210_v24 = vld [vmem:[#allocation181_spill] sm:$0xff] }
 0x1a7   : > { %7259 = vmatpush1.bf16.msra.mxu0 %v13200_v55  ;;  %6493 = vmatprep.subr.bf16.mxu1 %v13201_v16  ;;  %v13211_v55 = vld [vmem:[#allocation183_spill] sm:$0xff]  ;;  %v13212_v16 = vld [vmem:[#allocation186_spill] sm:$0xff] }
 0x1a8   : > { %7261 = vmatprep.subr.bf16.mxu0 %v13202_v53  ;;  %v13213_v53 = vld [vmem:[#allocation189_spill] sm:$0xff] }
 0x1aa   : > { %6495 = vmatpush1.bf16.msra.mxu1 %v13203_v33  ;;  %v13214_v33 = vld [vmem:[#allocation10_spill] sm:$0xff] }
 0x1ab   : > { %7263 = vmatpush1.bf16.msra.mxu0 %v13204_v36  ;;  %6497 = vmatprep.subr.bf16.mxu1 %v13205_v42  ;;  %v13215_v36 = vand.u32 4294901760, %v13214_v33  ;;  %v13217_v42 = vand.u32 4294901760, %v13216_v41  ;;  %v13229_v33 = vld [vmem:[#allocation19_spill] sm:$0xff] }
 0x1ac   : > { %7265 = vmatprep.subr.bf16.mxu0 %v13206_v62  ;;  %v13218_v62 = vld [vmem:[#allocation193_spill] sm:$0xff]  ;;  %v13230_v41 = vand.u32 4294901760, %v13229_v33 }
 0x1ad   : > { %v6508_v3 = vpack.c.bf16 %v13217_v42, %v13215_v36  ;;  %v13231_v36 = vld [vmem:[#allocation20_spill] sm:$0xff] }
 0x1ae   : > { %6499 = vmatpush1.bf16.msra.mxu1 %v13207_v8  ;;  %v13219_v8 = vld [vmem:[#allocation12_spill] sm:$0xff]  ;;  %v13232_v42 = vand.u32 4294901760, %v13231_v36 }
 0x1af   : > { %7267 = vmatpush1.bf16.msra.mxu0 %v13208_v15  ;;  %6501 = vmatprep.subr.bf16.mxu1 %v13209_v11  ;;  %v13220_v50 = vand.u32 4294901760, %v13219_v8  ;;  %v13221_v15 = vld [vmem:[#allocation14_spill] sm:$0xff]  ;;  %v13234_v8 = vand.u32 4294901760, %v13233_v32 }
 0x1b0   : > { %7269 = vmatprep.subr.bf16.mxu0 %v13210_v24  ;;  %v13222_v1 = vand.u32 4294901760, %v13221_v15  ;;  %v13224_v24 = vld [vmem:[#allocation16_spill] sm:$0xff]  ;;  %v13236_v15 = vand.u32 4294901760, %v13235_v2  ;;  %v13247_v2 = vld [vmem:[#allocation30_spill] sm:$0xff] }
 0x1b2   : > { %6503 = vmatpush1.bf16.msra.mxu1 %v13211_v55  ;;  %v7276_v11 = vpack.c.bf16 %v13222_v1, %v13220_v50  ;;  %v13225_v55 = vand.u32 4294901760, %v13224_v24  ;;  %v6512_v50 = vpack.c.bf16 %v13236_v15, %v13234_v8  ;;  %v13237_v1 = vld [vmem:[#allocation25_spill] sm:$0xff]  ;;  %v13239_v24 = vld [vmem:[#allocation26_spill] sm:$0xff] }
 0x1b3   : > { %7271 = vmatpush1.bf16.msra.mxu0 %v13212_v16  ;;  %6505 = vmatprep.subr.bf16.mxu1 %v13213_v53  ;;  %v13227_v16 = vand.u32 4294901760, %v13226_v48  ;;  %v13228_v53 = vld [vmem:[#allocation198_spill] sm:$0xff]  ;;  %v13240_v5 = vand.u32 4294901760, %v13239_v24 }
 0x1b4   : > { %7273 = vmatprep.subr.bf16.mxu0 %v13218_v62  ;;  %v7278_v62 = vpack.c.bf16 %v13232_v42, %v13230_v41  ;;  %v13245_v41 = vld [vmem:[#allocation29_spill] sm:$0xff]  ;;  %v13249_v42 = vld [vmem:[#allocation32_spill] sm:$0xff] }
 0x1b5   : > { %v6510_v39 = vpack.c.bf16 %v13227_v16, %v13225_v55  ;;  %v13241_v55 = vand.u32 4294901760, %v13149_v4  ;;  %v13243_v16 = vld [vmem:[#allocation27_spill] sm:$0xff]  ;;  %v13246_v32 = vand.u32 4294901760, %v13245_v41  ;;  %v13250_v8 = vand.u32 4294901760, %v13249_v42  ;;  %v13259_v41 = vld [vmem:[#allocation202_spill] sm:$0xff] }
 0x1b6   : > { %6507 = vmatpush1.bf16.msra.mxu1 %v13223_v19  ;;  %v13238_v19 = vand.u32 4294901760, %v13237_v1  ;;  %v13244_v33 = vand.u32 4294901760, %v13243_v16  ;;  %v13253_v4 = vld [vmem:[#allocation35_spill] sm:$0xff] }
 0x1b7   : > { %7275 = vmatpush1.bf16.msra.mxu0 %v13228_v53  ;;  %6509 = vmatprep.subr.bf16.mxu1 %v6508_v3  ;;  %v13242_v3 = vand.u32 4294901760, %v13151_v9  ;;  %v13254_v1 = vand.u32 4294901760, %v13253_v4  ;;  %v13255_v9 = vld [vmem:[#allocation37_spill] sm:$0xff]  ;;  %v13265_v42 = vld [vmem:[#allocation43_spill] sm:$0xff]  ;;  %v13269_v4 = vld [vmem:[#allocation46_spill] sm:$0xff] }
 0x1b8   : > { %7277 = vmatprep.subr.bf16.mxu0 %v7276_v11  ;;  %v7280_v48 = vpack.c.bf16 %v13240_v5, %v13238_v19  ;;  %v6514_v36 = vpack.c.bf16 %v13246_v32, %v13244_v33  ;;  %v13248_v11 = vand.u32 4294901760, %v13247_v2  ;;  %v13251_v5 = vld [vmem:[#allocation34_spill] sm:$0xff]  ;;  %v13256_v24 = vand.u32 4294901760, %v13255_v9  ;;  %v13263_v32 = vld [vmem:[#allocation41_spill] sm:$0xff]  ;;  %v13271_v9 = vld [vmem:[#allocation47_spill] sm:$0xff] }
 0x1b9   : > { %1388 = vmatmul.mubr.f32.vlgmr.msra.gmra.mrb[0].mxu1 %v13241_v55  ;;  %v13252_v19 = vand.u32 4294901760, %v13251_v5  ;;  %v13257_v55 = vld [vmem:[#allocation38_spill] sm:$0xff]  ;;  %v13264_v2 = vand.u32 4294901760, %v13263_v32 }
 0x1ba   : > { %6511 = vmatpush1.bf16.msra.mxu1 %v6510_v39  ;;  %3956 = vmatmul.mubr.f32.vlgmr.msra.gmra.mrb[0].mxu0 %v13242_v3  ;;  %v7282_v15 = vpack.c.bf16 %v13250_v8, %v13248_v11  ;;  %v13258_v3 = vand.u32 4294901760, %v13257_v55  ;;  %v13266_v8 = vand.u32 4294901760, %v13265_v42  ;;  %v13275_v53 = vld [vmem:[#allocation50_spill] sm:$0xff]  ;;  %v13281_v42 = vld [vmem:[#allocation55_spill] sm:$0xff] }
 0x1bb   : > { %7279 = vmatpush1.bf16.msra.mxu0 %v7278_v62  ;;  %6513 = vmatprep.subr.bf16.mxu1 %v6512_v50  ;;  %v6516_v39 = vpack.c.bf16 %v13254_v1, %v13252_v19  ;;  %v13260_v62 = vld [vmem:[#allocation206_spill] sm:$0xff]  ;;  %v13261_v50 = vld [vmem:[#allocation40_spill] sm:$0xff]  ;;  %v13270_v1 = vand.u32 4294901760, %v13269_v4 }
 0x1bc   : > { %7281 = vmatprep.subr.bf16.mxu0 %v7280_v48  ;;  %v7284_v16 = vpack.c.bf16 %v13258_v3, %v13256_v24  ;;  %1651 = vmatprep.mubr.f32.mxu1 %v13259_v41  ;;  %v13262_v33 = vand.u32 4294901760, %v13261_v50  ;;  %v13267_v48 = vld [vmem:[#allocation44_spill] sm:$0xff]  ;;  %v13272_v24 = vand.u32 4294901760, %v13271_v9  ;;  %v13273_v3 = vld [vmem:[#allocation49_spill] sm:$0xff]  ;;  %v13276_v50 = vand.u32 4294901760, %v13275_v53  ;;  %v13287_v9 = vld [vmem:[#allocation59_spill] sm:$0xff] }
 0x1bd   : > { %4219 = vmatprep.mubr.f32.mxu0 %v13260_v62  ;;  %v13268_v5 = vand.u32 4294901760, %v13267_v48  ;;  %v13283_v48 = vld [vmem:[#allocation56_spill] sm:$0xff] }
 0x1be   : > { %6515 = vmatpush1.bf16.msra.mxu1 %v6514_v36  ;;  %v6518_v11 = vpack.c.bf16 %v13264_v2, %v13262_v33  ;;  %v6520_v55 = vpack.c.bf16 %v13272_v24, %v13270_v1  ;;  %v13274_v36 = vand.u32 4294901760, %v13273_v3  ;;  %v13277_v33 = vld [vmem:[#allocation51_spill] sm:$0xff]  ;;  %v13285_v1 = vld [vmem:[#allocation58_spill] sm:$0xff]  ;;  %v13288_v24 = vand.u32 4294901760, %v13287_v9  ;;  %v13289_v53 = vld [vmem:[#allocation60_spill] sm:$0xff] }
 0x1bf   : > { %7283 = vmatpush1.bf16.msra.mxu0 %v7282_v15  ;;  %6517 = vmatprep.subr.bf16.mxu1 %v6516_v39  ;;  %v7286_v19 = vpack.c.bf16 %v13268_v5, %v13266_v8  ;;  %v13278_v15 = vand.u32 4294901760, %v13277_v33  ;;  %v13279_v39 = vld [vmem:[#allocation53_spill] sm:$0xff]  ;;  %v13282_v8 = vand.u32 4294901760, %v13281_v42  ;;  %v13284_v5 = vand.u32 4294901760, %v13283_v48  ;;  %v13297_v42 = vld [vmem:[#allocation67_spill] sm:$0xff]  ;;  %v13299_v48 = vld [vmem:[#allocation68_spill] sm:$0xff] }
 0x1c0   : > { %7285 = vmatprep.subr.bf16.mxu0 %v7284_v16  ;;  %v7288_v62 = vpack.c.bf16 %v13276_v50, %v13274_v36  ;;  %v13280_v32 = vand.u32 4294901760, %v13279_v39  ;;  %v13286_v16 = vand.u32 4294901760, %v13285_v1  ;;  %v13291_v36 = vld [vmem:[#allocation62_spill] sm:$0xff]  ;;  %v13303_v9 = vld [vmem:[#allocation71_spill] sm:$0xff] }
 0x1c1   : > { %v7290_v4 = vpack.c.bf16 %v13284_v5, %v13282_v8  ;;  %v13292_v50 = vand.u32 4294901760, %v13291_v36  ;;  %v13298_v8 = vand.u32 4294901760, %v13297_v42  ;;  %v13300_v5 = vand.u32 4294901760, %v13299_v48  ;;  %v13307_v36 = vld [vmem:[#allocation74_spill] sm:$0xff]  ;;  %v13313_v42 = vld [vmem:[#allocation79_spill] sm:$0xff]  ;;  %v13315_v48 = vld [vmem:[#allocation80_spill] sm:$0xff] }
 0x1c2   : > { %6519 = vmatpush1.bf16.msra.mxu1 %v6518_v11  ;;  %v6522_v2 = vpack.c.bf16 %v13280_v32, %v13278_v15  ;;  %v6524_v3 = vpack.c.bf16 %v13288_v24, %v13286_v16  ;;  %v13290_v11 = vand.u32 4294901760, %v13289_v53  ;;  %v13293_v15 = vld [vmem:[#allocation64_spill] sm:$0xff]  ;;  %v13301_v16 = vld [vmem:[#allocation70_spill] sm:$0xff]  ;;  %v13304_v24 = vand.u32 4294901760, %v13303_v9  ;;  %v13319_v9 = vld [vmem:[#allocation83_spill] sm:$0xff] }
 0x1c3   : > { %7287 = vmatpush1.bf16.msra.mxu0 %v7286_v19  ;;  %6521 = vmatprep.subr.bf16.mxu1 %v6520_v55  ;;  %v13294_v19 = vand.u32 4294901760, %v13293_v15  ;;  %v13295_v55 = vld [vmem:[#allocation65_spill] sm:$0xff]  ;;  %v7294_v1 = vpack.c.bf16 %v13300_v5, %v13298_v8  ;;  %v13314_v8 = vand.u32 4294901760, %v13313_v42  ;;  %v13316_v5 = vand.u32 4294901760, %v13315_v48  ;;  %v13329_v42 = vld [vmem:[#allocation91_spill] sm:$0xff]  ;;  %v13331_v48 = vld [vmem:[#allocation92_spill] sm:$0xff] }
 0x1c4   : > { %7289 = vmatprep.subr.bf16.mxu0 %v7288_v62  ;;  %v7292_v33 = vpack.c.bf16 %v13292_v50, %v13290_v11  ;;  %v13296_v39 = vand.u32 4294901760, %v13295_v55  ;;  %v13302_v62 = vand.u32 4294901760, %v13301_v16  ;;  %v13305_v11 = vld [vmem:[#allocation72_spill] sm:$0xff]  ;;  %v13308_v50 = vand.u32 4294901760, %v13307_v36  ;;  %v13323_v36 = vld [vmem:[#allocation86_spill] sm:$0xff] }
 0x1c5   : > { %v7298_v16 = vpack.c.bf16 %v13316_v5, %v13314_v8  ;;  %v13330_v8 = vand.u32 4294901760, %v13329_v42  ;;  %v13332_v5 = vand.u32 4294901760, %v13331_v48  ;;  %v13355_v48 = vand.u32 4294901760, %v13027_v35 }
 0x1c6   : > { %6523 = vmatpush1.bf16.msra.mxu1 %v6522_v2  ;;  %v6526_v32 = vpack.c.bf16 %v13296_v39, %v13294_v19  ;;  %v6528_v53 = vpack.c.bf16 %v13304_v24, %v13302_v62  ;;  %v13306_v2 = vand.u32 4294901760, %v13305_v11  ;;  %v13309_v19 = vld [vmem:[#allocation76_spill] sm:$0xff]  ;;  %v13317_v62 = vld [vmem:[#allocation82_spill] sm:$0xff]  ;;  %v13320_v24 = vand.u32 4294901760, %v13319_v9 }
 0x1c7   : > { %7291 = vmatpush1.bf16.msra.mxu0 %v7290_v4  ;;  %6525 = vmatprep.subr.bf16.mxu1 %v6524_v3  ;;  %v13310_v4 = vand.u32 4294901760, %v13309_v19  ;;  %v13311_v3 = vld [vmem:[#allocation77_spill] sm:$0xff]  ;;  %v13363_v35 = vand.u32 4294901760, %v13036_v43  ;;  %v13372_v43 = vand.u32 4294901760, %v13115_v22  ;;  %v13380_v22 = vand.u32 4294901760, %v13049_v37 }
 0x1c8   : > { %7293 = vmatprep.subr.bf16.mxu0 %v7292_v33  ;;  %v7296_v15 = vpack.c.bf16 %v13308_v50, %v13306_v2  ;;  %v13312_v55 = vand.u32 4294901760, %v13311_v3  ;;  %v13318_v33 = vand.u32 4294901760, %v13317_v62  ;;  %v13321_v2 = vld [vmem:[#allocation84_spill] sm:$0xff]  ;;  %v13324_v50 = vand.u32 4294901760, %v13323_v36 }
 0x1c9   : > { %v7302_v62 = vpack.c.bf16 %v13332_v5, %v13330_v8 }
 0x1ca   : > { %6527 = vmatpush1.bf16.msra.mxu1 %v6526_v32  ;;  %v6530_v39 = vpack.c.bf16 %v13312_v55, %v13310_v4  ;;  %v6532_v11 = vpack.c.bf16 %v13320_v24, %v13318_v33  ;;  %v13322_v32 = vand.u32 4294901760, %v13321_v2  ;;  %v13325_v4 = vld [vmem:[#allocation88_spill] sm:$0xff]  ;;  %v13334_v33 = vld [vmem:[#allocation95_spill] sm:$0xff]  ;;  %v13337_v2 = vand.u32 4294901760, %v13092_v14 }
 0x1cb   : > { %7295 = vmatpush1.bf16.msra.mxu0 %v7294_v1  ;;  %6529 = vmatprep.subr.bf16.mxu1 %v6528_v53  ;;  %v13326_v1 = vand.u32 4294901760, %v13325_v4  ;;  %v13327_v53 = vld [vmem:[#allocation89_spill] sm:$0xff]  ;;  %v13335_v9 = vand.u32 4294901760, %v13334_v33  ;;  %v13344_v14 = vand.u32 4294901760, %v13099_v17  ;;  %v13351_v17 = vand.u32 4294901760, %v13023_v51 }
 0x1cc   : > { %7297 = vmatprep.subr.bf16.mxu0 %v7296_v15  ;;  %v7300_v19 = vpack.c.bf16 %v13324_v50, %v13322_v32  ;;  %v13328_v3 = vand.u32 4294901760, %v13327_v53  ;;  %v13333_v15 = vand.u32 4294901760, %v13089_v13  ;;  %v13340_v50 = vand.u32 4294901760, %v13095_v21 }
 0x1cd   : > { %v13341_v13 = vand.u32 4294901760, %v13096_v38  ;;  %v13348_v38 = vand.u32 4294901760, %v13020_v60  ;;  %v13356_v60 = vand.u32 4294901760, %v13029_v57  ;;  %v13358_v51 = vand.u32 4294901760, %v13031_v30 }
 0x1ce   : > { %6531 = vmatpush1.bf16.msra.mxu1 %v6530_v39  ;;  %v6534_v55 = vpack.c.bf16 %v13328_v3, %v13326_v1  ;;  %v6536_v24 = vpack.c.bf16 %v13335_v9, %v13333_v15  ;;  %v13336_v39 = vand.u32 4294901760, %v13091_v0  ;;  %v13343_v0 = vand.u32 4294901760, %v13098_v27 }
 0x1cf   : > { %7299 = vmatpush1.bf16.msra.mxu0 %v7298_v16  ;;  %6533 = vmatprep.subr.bf16.mxu1 %v6532_v11  ;;  %v13338_v16 = vand.u32 4294901760, %v13093_v59  ;;  %v13339_v11 = vand.u32 4294901760, %v13094_v54  ;;  %v7306_v4 = vpack.c.bf16 %v13341_v13, %v13340_v50  ;;  %v13345_v59 = vand.u32 4294901760, %v13100_v31  ;;  %v323_v50 = vld [vmem:[#allocation4 + $0x218] sm:$0xff] }
 0x1d0   : > { %7301 = vmatprep.subr.bf16.mxu0 %v7300_v19  ;;  %v7304_v32 = vpack.c.bf16 %v13337_v2, %v13336_v39  ;;  %v13342_v19 = vand.u32 4294901760, %v13097_v20  ;;  %v13346_v54 = vand.u32 4294901760, %v13018_v28  ;;  %v13347_v3 = vand.u32 4294901760, %v13019_v18  ;;  %v13370_v2 = vld [vmem:[#allocation146_spill] sm:$0xff] }
 0x1d1   : > { %v6538_v36 = vpack.c.bf16 %v13339_v11, %v13338_v16  ;;  %v7308_v53 = vpack.c.bf16 %v13345_v59, %v13344_v14  ;;  %v13349_v20 = vand.u32 4294901760, %v13021_v23  ;;  %v13352_v31 = vand.u32 4294901760, %v13024_v63  ;;  %v13373_v16 = vld [vmem:[#allocation149_spill] sm:$0xff] }
 0x1d2   : > { %6535 = vmatpush1.bf16.msra.mxu1 %v6534_v55  ;;  %v6540_v1 = vpack.c.bf16 %v13343_v0, %v13342_v19  ;;  %v6542_v21 = vpack.c.bf16 %v13347_v3, %v13346_v54  ;;  %v13350_v55 = vand.u32 4294901760, %v13022_v56  ;;  %v13353_v28 = vand.u32 4294901760, %v13025_v29  ;;  %v451_v3 = vld [vmem:[#allocation4 + $0x618] sm:$0xff] }
 0x1d3   : > { %7303 = vmatpush1.bf16.msra.mxu0 %v7302_v62  ;;  %6537 = vmatprep.subr.bf16.mxu1 %v6536_v24  ;;  %v7310_v27 = vpack.c.bf16 %v13349_v20, %v13348_v38  ;;  %v13354_v18 = vand.u32 4294901760, %v13026_v34  ;;  %v13357_v23 = vand.u32 4294901760, %v13030_v47  ;;  %v13359_v56 = vand.u32 4294901760, %v13032_v49  ;;  %v13365_v47 = vld [vmem:[#allocation140_spill] sm:$0xff] }
 0x1d4   : > { %7305 = vmatprep.subr.bf16.mxu0 %v7304_v32  ;;  %v6544_v42 = vpack.c.bf16 %v13351_v17, %v13350_v55  ;;  %v7312_v8 = vpack.c.bf16 %v13353_v28, %v13352_v31  ;;  %v13360_v63 = vand.u32 4294901760, %v13033_v12  ;;  %v13361_v29 = vand.u32 4294901760, %v13034_v44  ;;  %v13390_v55 = vld [vmem:[#allocation167_spill] sm:$0xff]  ;;  %v13394_v31 = vld [vmem:[#allocation170_spill] sm:$0xff] }
 0x1d5   : > { %v6546_v5 = vpack.c.bf16 %v13355_v48, %v13354_v18  ;;  %v7314_v62 = vpack.c.bf16 %v13357_v23, %v13356_v60  ;;  %v6548_v15 = vpack.c.bf16 %v13359_v56, %v13358_v51  ;;  %v13362_v34 = vand.u32 4294901760, %v13035_v6  ;;  %v13396_v18 = vld [vmem:[#allocation172_spill] sm:$0xff]  ;;  %v13398_v60 = vld [vmem:[#allocation173_spill] sm:$0xff]  ;;  %v322_v56 = vld [vmem:[#allocation4 + $0x210] sm:$0xff] }
 0x1d6   : > { %6539 = vmatpush1.bf16.msra.mxu1 %v6538_v36  ;;  %v7316_v33 = vpack.c.bf16 %v13361_v29, %v13360_v63  ;;  %v13364_v57 = vand.u32 4294901760, %v13037_v58  ;;  %v13366_v24 = vand.u32 4294901760, %v13365_v47  ;;  %v13367_v30 = vand.u32 4294901760, %v13039_v61  ;;  %v321_v36 = vld [vmem:[#allocation4 + $0x208] sm:$0xff]  ;;  %v320_v51 = vld [vmem:[#allocation4 + $0x200] sm:$0xff]  ;;  %v13400_v63 = vld [vmem:[#allocation175_spill] sm:$0xff] }
 0x1d7   : > { %7307 = vmatpush1.bf16.msra.mxu0 %v7306_v4  ;;  %6541 = vmatprep.subr.bf16.mxu1 %v6540_v1  ;;  %v6550_v9 = vpack.c.bf16 %v13363_v35, %v13362_v34  ;;  %v13368_v49 = vand.u32 4294901760, %v13040_v52  ;;  %v13369_v44 = vand.u32 4294901760, %v13112_v7  ;;  %v13371_v32 = vand.u32 4294901760, %v13370_v2  ;;  %v13378_v4 = vld [vmem:[#allocation155_spill] sm:$0xff]  ;;  %v13402_v34 = vld [vmem:[#allocation176_spill] sm:$0xff]  ;;  %v13404_v47 = vld [vmem:[#allocation178_spill] sm:$0xff] }
 0x1d8   : > { %7309 = vmatprep.subr.bf16.mxu0 %v7308_v53  ;;  %v7318_v39 = vpack.c.bf16 %v13366_v24, %v13364_v57  ;;  %v13374_v11 = vand.u32 4294901760, %v13373_v16  ;;  %v13375_v13 = vand.u32 4294901760, %v13045_v40  ;;  %v13376_v61 = vand.u32 4294901760, %v13046_v10  ;;  %v13383_v53 = vld [vmem:[#allocation161_spill] sm:$0xff]  ;;  %v449_v10 = vld [vmem:[#allocation4 + $0x608] sm:$0xff]  ;;  %v450_v16 = vld [vmem:[#allocation4 + $0x610] sm:$0xff] }
 0x1d9   : > { %v6552_v12 = vpack.c.bf16 %v13368_v49, %v13367_v30  ;;  %v7320_v6 = vpack.c.bf16 %v13371_v32, %v13369_v44  ;;  %v13377_v7 = vand.u32 4294901760, %v13118_v26  ;;  %v13379_v19 = vand.u32 4294901760, %v13378_v4  ;;  %v13406_v30 = vld [vmem:[#allocation179_spill] sm:$0xff]  ;;  %v13412_v4 = vld [vmem:[#allocation184_spill] sm:$0xff] }
 0x1da   : > { %6543 = vmatpush1.bf16.msra.mxu1 %v6542_v21  ;;  %v9731_v58 = vpack.c.bf16 %v13374_v11, %v13372_v43  ;;  %v9737_v52 = vpack.c.bf16 %v13376_v61, %v13375_v13  ;;  %v13381_v1 = vand.u32 4294901760, %v13050_v25  ;;  %v13382_v59 = vand.u32 4294901760, %v13121_v45  ;;  %v13386_v21 = vld [vmem:[#allocation164_spill] sm:$0xff]  ;;  %v448_v43 = vld [vmem:[#allocation4 + $0x600] sm:$0xff]  ;;  %v13410_v13 = vld [vmem:[#allocation182_spill] sm:$0xff] }
 0x1db   : > { %7311 = vmatpush1.bf16.msra.mxu0 %v7310_v27  ;;  %6545 = vmatprep.subr.bf16.mxu1 %v6544_v42  ;;  %v9743_v0 = vpack.c.bf16 %v13379_v19, %v13377_v7  ;;  %v13384_v40 = vand.u32 4294901760, %v13383_v53  ;;  %v13385_v26 = vand.u32 4294901760, %v13123_v46  ;;  %v13387_v38 = vand.u32 4294901760, %v13386_v21  ;;  %v13388_v27 = vld [vmem:[#allocation166_spill] sm:$0xff]  ;;  %v13392_v42 = vld [vmem:[#allocation168_spill] sm:$0xff] }
 0x1dc   : > { %7313 = vmatprep.subr.bf16.mxu0 %v7312_v8  ;;  %v9749_v14 = vpack.c.bf16 %v13381_v1, %v13380_v22  ;;  %v13389_v37 = vand.u32 4294901760, %v13388_v27  ;;  %v13391_v25 = vand.u32 4294901760, %v13390_v55  ;;  %v13393_v45 = vand.u32 4294901760, %v13392_v42  ;;  %v13408_v11 = vld [vmem:[#allocation180_spill] sm:$0xff]  ;;  %v13414_v22 = vld [vmem:[#allocation185_spill] sm:$0xff]  ;;  %v13420_v27 = vld [vmem:[#allocation190_spill] sm:$0xff] }
 0x1dd   : > { %v9755_v54 = vpack.c.bf16 %v13384_v40, %v13382_v59  ;;  %v9761_v20 = vpack.c.bf16 %v13387_v38, %v13385_v26  ;;  %v13395_v28 = vand.u32 4294901760, %v13394_v31  ;;  %v13397_v48 = vand.u32 4294901760, %v13396_v18  ;;  %v13416_v26 = vld [vmem:[#allocation187_spill] sm:$0xff]  ;;  %v13418_v38 = vld [vmem:[#allocation188_spill] sm:$0xff] }
 0x1de   : > { %v9767_v17 = vpack.c.bf16 %v13391_v25, %v13389_v37  ;;  %v13399_v46 = vand.u32 4294901760, %v13398_v60  ;;  %6547 = vmatpush1.bf16.msra.mxu1 %v6546_v5  ;;  %v13401_v29 = vand.u32 4294901760, %v13400_v63  ;;  %v13403_v35 = vand.u32 4294901760, %v13402_v34  ;;  %v13422_v55 = vld [vmem:[#allocation191_spill] sm:$0xff]  ;;  %v327_v18 = vld [vmem:[#allocation4 + $0x238] sm:$0xff] }
 0x1df   : > { %v9773_v8 = vpack.c.bf16 %v13395_v28, %v13393_v45  ;;  %v13405_v24 = vand.u32 4294901760, %v13404_v47  ;;  %v13407_v49 = vand.u32 4294901760, %v13406_v30  ;;  %v1796_v2 = vand.u32 4294901760, %v321_v36  ;;  %7315 = vmatpush1.bf16.msra.mxu0 %v7314_v62  ;;  %6549 = vmatprep.subr.bf16.mxu1 %v6548_v15  ;;  %v325_v28 = vld [vmem:[#allocation4 + $0x228] sm:$0xff] }
 0x1e0   : > { %v9779_v23 = vpack.c.bf16 %v13399_v46, %v13397_v48  ;;  %v9785_v57 = vpack.c.bf16 %v13403_v35, %v13401_v29  ;;  %v1800_v32 = vand.u32 4294901760, %v323_v50  ;;  %v13409_v5 = vand.u32 4294901760, %v13408_v11  ;;  %7317 = vmatprep.subr.bf16.mxu0 %v7316_v33  ;;  %v13424_v48 = vld [vmem:[#allocation192_spill] sm:$0xff]  ;;  %v13426_v46 = vld [vmem:[#allocation194_spill] sm:$0xff]  ;;  %v13430_v35 = vld [vmem:[#allocation197_spill] sm:$0xff] }
 0x1e1   : > { %v9791_v44 = vpack.c.bf16 %v13407_v49, %v13405_v24  ;;  %v13411_v61 = vand.u32 4294901760, %v13410_v13  ;;  %v13413_v19 = vand.u32 4294901760, %v13412_v4  ;;  %v13415_v1 = vand.u32 4294901760, %v13414_v22  ;;  %v13428_v29 = vld [vmem:[#allocation196_spill] sm:$0xff]  ;;  %v453_v11 = vld [vmem:[#allocation4 + $0x628] sm:$0xff]  ;;  %v13432_v13 = vld [vmem:[#allocation199_spill] sm:$0xff] }
 0x1e2   : > { %v4364_v53 = vand.u32 4294901760, %v449_v10  ;;  %v4368_v40 = vand.u32 4294901760, %v451_v3  ;;  %v13417_v21 = vand.u32 4294901760, %v13416_v26  ;;  %v13419_v62 = vand.u32 4294901760, %v13418_v38  ;;  %6551 = vmatpush1.bf16.msra.mxu1 %v6550_v9  ;;  %v13434_v4 = vld [vmem:[#allocation200_spill] sm:$0xff] }
 0x1e3   : > { %v9797_v7 = vpack.c.bf16 %v13411_v61, %v13409_v5  ;;  %v9803_v59 = vpack.c.bf16 %v13415_v1, %v13413_v19  ;;  %v13421_v37 = vand.u32 4294901760, %v13420_v27  ;;  %v13423_v25 = vand.u32 4294901760, %v13422_v55  ;;  %v455_v5 = vld [vmem:[#allocation4 + $0x638] sm:$0xff]  ;;  %7319 = vmatpush1.bf16.msra.mxu0 %v7318_v39  ;;  %6553 = vmatprep.subr.bf16.mxu1 %v6552_v12  ;;  %v326_v55 = vld [vmem:[#allocation4 + $0x230] sm:$0xff] }
 0x1e4   : > { %v9809_v15 = vpack.c.bf16 %v13419_v62, %v13417_v21  ;;  %v1798_v45 = vand.u32 4294901760, %v320_v51  ;;  %v1802_v31 = vand.u32 4294901760, %v322_v56  ;;  %v13425_v60 = vand.u32 4294901760, %v13424_v48  ;;  %7321 = vmatprep.subr.bf16.mxu0 %v7320_v6 }
 0x1e5   : > { %v9815_v42 = vpack.c.bf16 %v13423_v25, %v13421_v37  ;;  %v13427_v33 = vand.u32 4294901760, %v13426_v46  ;;  %v13429_v34 = vand.u32 4294901760, %v13428_v29  ;;  %v13431_v47 = vand.u32 4294901760, %v13430_v35  ;;  %v324_v37 = vld [vmem:[#allocation4 + $0x220] sm:$0xff]  ;;  %v331_v46 = vld [vmem:[#allocation4 + $0x258] sm:$0xff]  ;;  %v457_v29 = vld [vmem:[#allocation4 + $0x648] sm:$0xff] }
 0x1e6   : > { %v4366_v30 = vand.u32 4294901760, %v448_v43  ;;  %v4370_v49 = vand.u32 4294901760, %v450_v16  ;;  %v13433_v61 = vand.u32 4294901760, %v13432_v13  ;;  %v13435_v19 = vand.u32 4294901760, %v13434_v4  ;;  %6555 = vmatpush1.bf16.msra.mxu1 %v9731_v58  ;;  %v330_v58 = vld [vmem:[#allocation4 + $0x250] sm:$0xff]  ;;  %v335_v4 = vld [vmem:[#allocation4 + $0x278] sm:$0xff] }
 0x1e7   : > { %v9821_v63 = vpack.c.bf16 %v13427_v33, %v13425_v60  ;;  %v9827_v24 = vpack.c.bf16 %v13431_v47, %v13429_v34  ;;  %v9835_v1 = vpack.c.bf16 %v1800_v32, %v1796_v2  ;;  %v9837_v26 = vsub.f32 %v321_v36, %v1796_v2  ;;  %v452_v2 = vld [vmem:[#allocation4 + $0x620] sm:$0xff]  ;;  %v459_v34 = vld [vmem:[#allocation4 + $0x658] sm:$0xff]  ;;  %7323 = vmatpush1.bf16.msra.mxu0 %v9737_v52  ;;  %v458_v52 = vld [vmem:[#allocation4 + $0x650] sm:$0xff] }
 0x1e8   : > { %v9833_v22 = vpack.c.bf16 %v13435_v19, %v13433_v61  ;;  %v9839_v21 = vsub.f32 %v323_v50, %v1800_v32  ;;  %v9841_v38 = vpack.c.bf16 %v4368_v40, %v4364_v53  ;;  %v9843_v62 = vsub.f32 %v449_v10, %v4364_v53  ;;  %v454_v50 = vld [vmem:[#allocation4 + $0x630] sm:$0xff]  ;;  %v329_v53 = vld [vmem:[#allocation4 + $0x248] sm:$0xff]  ;;  %6557 = vmatprep.subr.bf16.mxu1 %v9743_v0 }
 0x1e9   : > { %13436 = vst [vmem:[#allocation112_spill] sm:$0xff] %v9835_v1  ;;  %13437 = vst [vmem:[#allocation113_spill] sm:$0xff] %v9837_v26  ;;  %v1804_v27 = vand.u32 4294901760, %v325_v28  ;;  %v1808_v9 = vand.u32 4294901760, %v327_v18  ;;  %v9845_v25 = vsub.f32 %v451_v3, %v4368_v40  ;;  %v9847_v48 = vpack.c.bf16 %v1802_v31, %v1798_v45  ;;  %7325 = vmatprep.subr.bf16.mxu0 %v9749_v14  ;;  %v333_v61 = vld [vmem:[#allocation4 + $0x268] sm:$0xff] }
 0x1ea   : > { %13438 = vst [vmem:[#allocation115_spill] sm:$0xff] %v9839_v21  ;;  %13439 = vst [vmem:[#allocation116_spill] sm:$0xff] %v9841_v38  ;;  %v4372_v60 = vand.u32 4294901760, %v453_v11  ;;  %v4376_v36 = vand.u32 4294901760, %v455_v5  ;;  %v9849_v32 = vsub.f32 %v320_v51, %v1798_v45  ;;  %v9851_v39 = vsub.f32 %v322_v56, %v1802_v31  ;;  %v328_v31 = vld [vmem:[#allocation4 + $0x240] sm:$0xff]  ;;  %6559 = vmatpush1.bf16.msra.mxu1 %v9755_v54 }
 0x1eb   : > { %13440 = vst [vmem:[#allocation118_spill] sm:$0xff] %v9843_v62  ;;  %13441 = vst [vmem:[#allocation119_spill] sm:$0xff] %v9845_v25  ;;  %v9853_v12 = vpack.c.bf16 %v4370_v49, %v4366_v30  ;;  %v9855_v10 = vsub.f32 %v448_v43, %v4366_v30  ;;  %v9858_v6 = vsub.f32 %v450_v16, %v4370_v49  ;;  %v1806_v40 = vand.u32 4294901760, %v324_v37  ;;  %v456_v30 = vld [vmem:[#allocation4 + $0x640] sm:$0xff] }
 0x1ec   : > { %13442 = vst [vmem:[#allocation120_spill] sm:$0xff] %v9847_v48  ;;  %13443 = vst [vmem:[#allocation122_spill] sm:$0xff] %v9849_v32  ;;  %v9860_v3 = vsub.f32 %v325_v28, %v1804_v27  ;;  %v1810_v33 = vand.u32 4294901760, %v326_v55  ;;  %v9864_v51 = vpack.c.bf16 %v1808_v9, %v1804_v27  ;;  %v9866_v56 = vsub.f32 %v327_v18, %v1808_v9 }
 0x1ed   : > { %13444 = vst [vmem:[#allocation124_spill] sm:$0xff] %v9851_v39  ;;  %13445 = vst [vmem:[#allocation125_spill] sm:$0xff] %v9853_v12  ;;  %v4374_v43 = vand.u32 4294901760, %v452_v2  ;;  %v4378_v45 = vand.u32 4294901760, %v454_v50  ;;  %v9869_v16 = vpack.c.bf16 %v4376_v36, %v4372_v60  ;;  %v9871_v28 = vsub.f32 %v453_v11, %v4372_v60  ;;  %7327 = vmatpush1.bf16.msra.mxu0 %v9761_v20 }
 0x1ee   : > { %13446 = vst [vmem:[#allocation127_spill] sm:$0xff] %v9855_v10  ;;  %13447 = vst [vmem:[#allocation128_spill] sm:$0xff] %v9858_v6  ;;  %v1812_v35 = vand.u32 4294901760, %v329_v53  ;;  %v1816_v47 = vand.u32 4294901760, %v331_v46  ;;  %v9873_v49 = vsub.f32 %v455_v5, %v4376_v36  ;;  %v9875_v0 = vsub.f32 %v324_v37, %v1806_v40  ;;  %6561 = vmatprep.subr.bf16.mxu1 %v9767_v17  ;;  %v461_v36 = vld [vmem:[#allocation4 + $0x668] sm:$0xff] }
 0x1ef   : > { %13448 = vst [vmem:[#allocation130_spill] sm:$0xff] %v9860_v3  ;;  %13449 = vst [vmem:[#allocation131_spill] sm:$0xff] %v9864_v51  ;;  %v4380_v18 = vand.u32 4294901760, %v457_v29  ;;  %v4384_v13 = vand.u32 4294901760, %v459_v34  ;;  %v9878_v19 = vpack.c.bf16 %v1810_v33, %v1806_v40  ;;  %v9880_v14 = vsub.f32 %v326_v55, %v1810_v33  ;;  %7329 = vmatprep.subr.bf16.mxu0 %v9773_v8 }
 0x1f0   : > { %13450 = vst [vmem:[#allocation132_spill] sm:$0xff] %v9866_v56  ;;  %13451 = vst [vmem:[#allocation134_spill] sm:$0xff] %v9869_v16  ;;  %v1814_v11 = vand.u32 4294901760, %v328_v31  ;;  %v1818_v27 = vand.u32 4294901760, %v330_v58  ;;  %v9884_v5 = vpack.c.bf16 %v4378_v45, %v4374_v43  ;;  %v9886_v9 = vsub.f32 %v452_v2, %v4374_v43  ;;  %v332_v43 = vld [vmem:[#allocation4 + $0x260] sm:$0xff]  ;;  %6563 = vmatpush1.bf16.msra.mxu1 %v9779_v23  ;;  %v337_v23 = vld [vmem:[#allocation4 + $0x288] sm:$0xff] }
 0x1f1   : > { %13452 = vst [vmem:[#allocation136_spill] sm:$0xff] %v9871_v28  ;;  %13453 = vst [vmem:[#allocation137_spill] sm:$0xff] %v9873_v49  ;;  %v4382_v37 = vand.u32 4294901760, %v456_v30  ;;  %v4386_v60 = vand.u32 4294901760, %v458_v52  ;;  %v9889_v54 = vsub.f32 %v454_v50, %v4378_v45  ;;  %v9891_v55 = vpack.c.bf16 %v1816_v47, %v1812_v35  ;;  %7331 = vmatpush1.bf16.msra.mxu0 %v9785_v57  ;;  %v465_v57 = vld [vmem:[#allocation4 + $0x688] sm:$0xff] }
 0x1f2   : > { %13454 = vst [vmem:[#allocation139_spill] sm:$0xff] %v9875_v0  ;;  %13455 = vst [vmem:[#allocation142_spill] sm:$0xff] %v9878_v19  ;;  %v463_v0 = vld [vmem:[#allocation4 + $0x678] sm:$0xff]  ;;  %v1820_v40 = vand.u32 4294901760, %v333_v61  ;;  %v1824_v33 = vand.u32 4294901760, %v335_v4  ;;  %v9893_v19 = vsub.f32 %v329_v53, %v1812_v35  ;;  %v9895_v20 = vsub.f32 %v331_v46, %v1816_v47  ;;  %6565 = vmatprep.subr.bf16.mxu1 %v9791_v44 }
 0x1f3   : > { %13456 = vst [vmem:[#allocation143_spill] sm:$0xff] %v9880_v14  ;;  %13457 = vst [vmem:[#allocation151_spill] sm:$0xff] %v9884_v5  ;;  %v9897_v17 = vpack.c.bf16 %v4384_v13, %v4380_v18  ;;  %v9899_v2 = vsub.f32 %v457_v29, %v4380_v18  ;;  %v9902_v5 = vsub.f32 %v459_v34, %v4384_v13  ;;  %v4388_v50 = vand.u32 4294901760, %v461_v36  ;;  %v339_v34 = vld [vmem:[#allocation4 + $0x298] sm:$0xff] }
 0x1f4   : > { %13458 = vst [vmem:[#allocation152_spill] sm:$0xff] %v9886_v9  ;;  %13459 = vst [vmem:[#allocation156_spill] sm:$0xff] %v9889_v54  ;;  %v9904_v8 = vpack.c.bf16 %v1818_v27, %v1814_v11  ;;  %v4392_v45 = vand.u32 4294901760, %v463_v0  ;;  %v460_v54 = vld [vmem:[#allocation4 + $0x660] sm:$0xff]  ;;  %v462_v9 = vld [vmem:[#allocation4 + $0x670] sm:$0xff]  ;;  %v9908_v53 = vsub.f32 %v328_v31, %v1814_v11  ;;  %v9910_v46 = vsub.f32 %v330_v58, %v1818_v27 }
 0x1f5   : > { %13460 = vst [vmem:[#allocation158_spill] sm:$0xff] %v9891_v55  ;;  %13461 = vst [vmem:[#allocation94_spill] sm:$0xff] %v9893_v19  ;;  %v334_v55 = vld [vmem:[#allocation4 + $0x270] sm:$0xff]  ;;  %v9912_v29 = vpack.c.bf16 %v4386_v60, %v4382_v37  ;;  %7333 = vmatprep.subr.bf16.mxu0 %v9797_v7  ;;  %v9915_v35 = vsub.f32 %v456_v30, %v4382_v37  ;;  %v9917_v47 = vsub.f32 %v458_v52, %v4386_v60  ;;  %v467_v44 = vld [vmem:[#allocation4 + $0x698] sm:$0xff] }
 0x1f6   : > { %13462 = vst [vmem:[#allocation96_spill] sm:$0xff] %v9895_v20  ;;  %13463 = vst [vmem:[#allocation98_spill] sm:$0xff] %v9897_v17  ;;  %v9919_v18 = vpack.c.bf16 %v1824_v33, %v1820_v40  ;;  %v9921_v13 = vsub.f32 %v333_v61, %v1820_v40  ;;  %v1822_v31 = vand.u32 4294901760, %v332_v43  ;;  %v1826_v11 = vand.u32 4294901760, %v334_v55  ;;  %6567 = vmatpush1.bf16.msra.mxu1 %v9803_v59  ;;  %v464_v40 = vld [vmem:[#allocation4 + $0x680] sm:$0xff] }
 0x1f7   : > { %13464 = vst [vmem:[#allocation100_spill] sm:$0xff] %v9899_v2  ;;  %13465 = vst [vmem:[#allocation101_spill] sm:$0xff] %v9902_v5  ;;  %v4390_v58 = vand.u32 4294901760, %v460_v54  ;;  %v4394_v27 = vand.u32 4294901760, %v462_v9  ;;  %v9926_v7 = vpack.c.bf16 %v4392_v45, %v4388_v50  ;;  %v1828_v30 = vand.u32 4294901760, %v337_v23  ;;  %7335 = vmatpush1.bf16.msra.mxu0 %v9809_v15  ;;  %6569 = vmatprep.subr.bf16.mxu1 %v9815_v42 }
 0x1f8   : > { %13466 = vst [vmem:[#allocation103_spill] sm:$0xff] %v9904_v8  ;;  %13467 = vst [vmem:[#allocation104_spill] sm:$0xff] %v9908_v53  ;;  %v338_v53 = vld [vmem:[#allocation4 + $0x290] sm:$0xff]  ;;  %v1832_v52 = vand.u32 4294901760, %v339_v34  ;;  %v9930_v61 = vsub.f32 %v461_v36, %v4388_v50  ;;  %v9932_v37 = vsub.f32 %v463_v0, %v4392_v45  ;;  %v9934_v60 = vsub.f32 %v332_v43, %v1822_v31  ;;  %v469_v45 = vld [vmem:[#allocation4 + $0x6a8] sm:$0xff] }
 0x1f9   : > { %13468 = vst [vmem:[#allocation106_spill] sm:$0xff] %v9910_v46  ;;  %13469 = vst [vmem:[#allocation107_spill] sm:$0xff] %v9912_v29  ;;  %v336_v46 = vld [vmem:[#allocation4 + $0x280] sm:$0xff]  ;;  %v9924_v29 = vsub.f32 %v335_v4, %v1824_v33  ;;  %7337 = vmatprep.subr.bf16.mxu0 %v9821_v63  ;;  %v4396_v59 = vand.u32 4294901760, %v465_v57  ;;  %v4400_v4 = vand.u32 4294901760, %v467_v44  ;;  %v9939_v15 = vsub.f32 %v334_v55, %v1826_v11 }
 0x1fa   : > { %13470 = vst [vmem:[#allocation108_spill] sm:$0xff] %v9915_v35  ;;  %13471 = vst [vmem:[#allocation110_spill] sm:$0xff] %v9917_v47  ;;  %v1830_v33 = vand.u32 4294901760, %v336_v46  ;;  %v341_v47 = vld [vmem:[#allocation4 + $0x2a8] sm:$0xff]  ;;  %v343_v35 = vld [vmem:[#allocation4 + $0x2b8] sm:$0xff]  ;;  %v9941_v42 = vpack.c.bf16 %v4394_v27, %v4390_v58  ;;  %v9943_v0 = vsub.f32 %v460_v54, %v4390_v58  ;;  %6571 = vmatpush1.bf16.msra.mxu1 %v9827_v24  ;;  %v4398_v63 = vand.u32 4294901760, %v464_v40 }
 0x1fb   : > { %13472 = vst [vmem:[#allocation144_spill] sm:$0xff] %v9919_v18  ;;  %13473 = vst [vmem:[#allocation148_spill] sm:$0xff] %v9921_v13  ;;  %v466_v13 = vld [vmem:[#allocation4 + $0x690] sm:$0xff]  ;;  %v9946_v36 = vsub.f32 %v462_v9, %v4394_v27  ;;  %v9948_v43 = vpack.c.bf16 %v1832_v52, %v1828_v30  ;;  %7339 = vmatpush1.bf16.msra.mxu0 %v9833_v22  ;;  %v9952_v55 = vsub.f32 %v337_v23, %v1828_v30  ;;  %v13488_v9 = vld [vmem:[#allocation13_spill] sm:$0xff] }
 0x1fc   : > { %13474 = vst [vmem:[#allocation154_spill] sm:$0xff] %v9924_v29  ;;  %13475 = vst [vmem:[#allocation160_spill] sm:$0xff] %v9926_v7  ;;  %v1834_v29 = vand.u32 4294901760, %v338_v53  ;;  %v9937_v7 = vpack.c.bf16 %v1826_v11, %v1822_v31  ;;  %v4402_v50 = vand.u32 4294901760, %v466_v13  ;;  %v13485_v31 = vld [vmem:[#allocation9_spill] sm:$0xff]  ;;  %v9954_v11 = vsub.f32 %v339_v34, %v1832_v52  ;;  %v342_v24 = vld [vmem:[#allocation4 + $0x2b0] sm:$0xff]  ;;  %7341 = vmatprep.subr.bf16.mxu0 %v13488_v9 }
 0x1fd   : > { %13476 = vst [vmem:[#allocation163_spill] sm:$0xff] %v9930_v61  ;;  %13477 = vst [vmem:[#allocation203_spill] sm:$0xff] %v9932_v37  ;;  %6573 = vmatprep.subr.bf16.mxu1 %v13485_v31  ;;  %v1836_v54 = vand.u32 4294901760, %v341_v47  ;;  %v1840_v58 = vand.u32 4294901760, %v343_v35  ;;  %v9957_v27 = vpack.c.bf16 %v4400_v4, %v4396_v59  ;;  %v468_v22 = vld [vmem:[#allocation4 + $0x6a0] sm:$0xff]  ;;  %v9966_v23 = vsub.f32 %v336_v46, %v1830_v33  ;;  %v347_v9 = vld [vmem:[#allocation4 + $0x2d8] sm:$0xff] }
 0x1fe   : > { %13478 = vst [vmem:[#allocation208_spill] sm:$0xff] %v9934_v60  ;;  %13479 = vst [vmem:[#allocation205_spill] sm:$0xff] %v9937_v7  ;;  %v471_v60 = vld [vmem:[#allocation4 + $0x6b8] sm:$0xff]  ;;  %v9963_v37 = vpack.c.bf16 %v1834_v29, %v1830_v33  ;;  %v13493_v31 = vld [vmem:[#allocation201_spill] sm:$0xff]  ;;  %v9968_v34 = vsub.f32 %v338_v53, %v1834_v29  ;;  %v4404_v30 = vand.u32 4294901760, %v469_v45  ;;  %v9978_v53 = vsub.f32 %v466_v13, %v4402_v50 }
 0x1ff   : > { %13480 = vst [vmem:[#allocation207_spill] sm:$0xff] %v9939_v15  ;;  %13481 = vst [vmem:[#allocation10_spill] sm:$0xff] %v9941_v42  ;;  %v9961_v15 = vsub.f32 %v467_v44, %v4400_v4  ;;  %1653 = vmatmul.mubr.f32.vlgmr.msra.gmra.mrb[0].mxu1 %v13493_v31  ;;  %v4408_v52 = vand.u32 4294901760, %v471_v60  ;;  %v13496_v61 = vld [vmem:[#allocation15_spill] sm:$0xff]  ;;  %v9972_v44 = vpack.c.bf16 %v4402_v50, %v4398_v63  ;;  %v13501_v46 = vld [vmem:[#allocation22_spill] sm:$0xff] }
 0x200   : > { %13482 = vst [vmem:[#allocation11_spill] sm:$0xff] %v9943_v0  ;;  %13483 = vst [vmem:[#allocation12_spill] sm:$0xff] %v9946_v36  ;;  %v340_v0 = vld [vmem:[#allocation4 + $0x2a0] sm:$0xff]  ;;  %v9959_v36 = vsub.f32 %v465_v57, %v4396_v59  ;;  %6575 = vmatpush1.bf16.msra.mxu1 %v13496_v61  ;;  %v13497_v57 = vld [vmem:[#allocation204_spill] sm:$0xff]  ;;  %v9974_v59 = vsub.f32 %v464_v40, %v4398_v63  ;;  %v9980_v29 = vpack.c.bf16 %v1840_v58, %v1836_v54 }
 0x201   : > { %13484 = vst [vmem:[#allocation14_spill] sm:$0xff] %v9948_v43  ;;  %13486 = vst [vmem:[#allocation16_spill] sm:$0xff] %v9952_v55  ;;  %v345_v55 = vld [vmem:[#allocation4 + $0x2c8] sm:$0xff]  ;;  %4221 = vmatmul.mubr.f32.vlgmr.msra.gmra.mrb[0].mxu0 %v13497_v57  ;;  %v1838_v4 = vand.u32 4294901760, %v340_v0  ;;  %6577 = vmatprep.subr.bf16.mxu1 %v13501_v46  ;;  %v9982_v33 = vsub.f32 %v341_v47, %v1836_v54  ;;  %v475_v61 = vld [vmem:[#allocation4 + $0x6d8] sm:$0xff]  ;;  %v4406_v40 = vand.u32 4294901760, %v468_v22 }
 0x202   : > { %13487 = vst [vmem:[#allocation17_spill] sm:$0xff] %v9954_v11  ;;  %13489 = vst [vmem:[#allocation19_spill] sm:$0xff] %v9957_v27  ;;  %v470_v11 = vld [vmem:[#allocation4 + $0x6b0] sm:$0xff]  ;;  %1788 = vmatprep.mubr.f32.mxu1 %v13259_v41  ;;  %v13506_v27 = vld [vmem:[#allocation206_spill] sm:$0xff]  ;;  %v9987_v13 = vsub.f32 %v343_v35, %v1840_v58  ;;  %v9989_v50 = vpack.c.bf16 %v4408_v52, %v4404_v30  ;;  %v9991_v47 = vsub.f32 %v469_v45, %v4404_v30 }
 0x203   : > { %13490 = vst [vmem:[#allocation20_spill] sm:$0xff] %v9959_v36  ;;  %13491 = vst [vmem:[#allocation21_spill] sm:$0xff] %v9961_v15  ;;  %v1842_v15 = vand.u32 4294901760, %v342_v24  ;;  %v13500_v36 = vld [vmem:[#allocation18_spill] sm:$0xff]  ;;  %v4410_v63 = vand.u32 4294901760, %v470_v11  ;;  %4356 = vmatprep.mubr.f32.mxu0 %v13506_v27  ;;  %v9993_v54 = vsub.f32 %v471_v60, %v4408_v52  ;;  %v472_v46 = vld [vmem:[#allocation4 + $0x6c0] sm:$0xff]  ;;  %v10004_v60 = vsub.f32 %v468_v22, %v4406_v40 }
 0x204   : > { %13492 = vst [vmem:[#allocation23_spill] sm:$0xff] %v9963_v37  ;;  %13494 = vst [vmem:[#allocation25_spill] sm:$0xff] %v9966_v23  ;;  %7343 = vmatpush1.bf16.msra.mxu0 %v13500_v36  ;;  %v13505_v23 = vld [vmem:[#allocation24_spill] sm:$0xff]  ;;  %v344_v37 = vld [vmem:[#allocation4 + $0x2c0] sm:$0xff] }
 0x205   : > { %13495 = vst [vmem:[#allocation26_spill] sm:$0xff] %v9968_v34  ;;  %13498 = vst [vmem:[#allocation27_spill] sm:$0xff] %v9972_v44  ;;  %v473_v34 = vld [vmem:[#allocation4 + $0x6c8] sm:$0xff]  ;;  %7345 = vmatprep.subr.bf16.mxu0 %v13505_v23  ;;  %v1848_v44 = vand.u32 4294901760, %v347_v9  ;;  %v346_v36 = vld [vmem:[#allocation4 + $0x2d0] sm:$0xff]  ;;  %v9996_v41 = vpack.c.bf16 %v1842_v15, %v1838_v4  ;;  %v10002_v45 = vsub.f32 %v342_v24, %v1842_v15  ;;  %v1846_v30 = vand.u32 4294901760, %v344_v37 }
 0x206   : > { %13499 = vst [vmem:[#allocation29_spill] sm:$0xff] %v9974_v59  ;;  %13502 = vst [vmem:[#allocation30_spill] sm:$0xff] %v9978_v53  ;;  %v1844_v59 = vand.u32 4294901760, %v345_v55  ;;  %v13511_v23 = vld [vmem:[#allocation28_spill] sm:$0xff]  ;;  %v4412_v53 = vand.u32 4294901760, %v473_v34  ;;  %v474_v43 = vld [vmem:[#allocation4 + $0x6d0] sm:$0xff] }
 0x207   : > { %13503 = vst [vmem:[#allocation32_spill] sm:$0xff] %v9980_v29  ;;  %13504 = vst [vmem:[#allocation34_spill] sm:$0xff] %v9982_v33  ;;  %6579 = vmatpush1.bf16.msra.mxu1 %v13511_v23  ;;  %v9998_v33 = vsub.f32 %v340_v0, %v1838_v4  ;;  %v4416_v29 = vand.u32 4294901760, %v475_v61  ;;  %v349_v42 = vld [vmem:[#allocation4 + $0x2e8] sm:$0xff]  ;;  %v351_v27 = vld [vmem:[#allocation4 + $0x2f8] sm:$0xff]  ;;  %v1850_v52 = vand.u32 4294901760, %v346_v36  ;;  %v10009_v0 = vsub.f32 %v470_v11, %v4410_v63 }
 0x208   : > { %13507 = vst [vmem:[#allocation35_spill] sm:$0xff] %v9987_v13  ;;  %13508 = vst [vmem:[#allocation37_spill] sm:$0xff] %v9989_v50  ;;  %v13514_v35 = vld [vmem:[#allocation31_spill] sm:$0xff]  ;;  %v13515_v58 = vld [vmem:[#allocation33_spill] sm:$0xff]  ;;  %v10011_v4 = vpack.c.bf16 %v1848_v44, %v1844_v59  ;;  %v4414_v13 = vand.u32 4294901760, %v472_v46  ;;  %v1852_v15 = vand.u32 4294901760, %v349_v42  ;;  %v10020_v11 = vsub.f32 %v473_v34, %v4412_v53 }
 0x209   : > { %13509 = vst [vmem:[#allocation38_spill] sm:$0xff] %v9991_v47  ;;  %13510 = vst [vmem:[#allocation202_spill] sm:$0xff] %v9993_v54  ;;  %7347 = vmatpush1.bf16.msra.mxu0 %v13514_v35  ;;  %6581 = vmatprep.subr.bf16.mxu1 %v13515_v58  ;;  %v13518_v23 = vld [vmem:[#allocation36_spill] sm:$0xff]  ;;  %v10007_v54 = vpack.c.bf16 %v4410_v63, %v4406_v40  ;;  %v477_v47 = vld [vmem:[#allocation4 + $0x6e8] sm:$0xff]  ;;  %v4418_v58 = vand.u32 4294901760, %v474_v43  ;;  %v1856_v24 = vand.u32 4294901760, %v351_v27 }
 0x20a   : > { %13512 = vst [vmem:[#allocation40_spill] sm:$0xff] %v9996_v41  ;;  %13513 = vst [vmem:[#allocation41_spill] sm:$0xff] %v9998_v33  ;;  %7349 = vmatprep.subr.bf16.mxu0 %v13518_v23  ;;  %v10013_v33 = vsub.f32 %v345_v55, %v1844_v59  ;;  %v479_v35 = vld [vmem:[#allocation4 + $0x6f8] sm:$0xff]  ;;  %v348_v22 = vld [vmem:[#allocation4 + $0x2e0] sm:$0xff]  ;;  %v10016_v41 = vsub.f32 %v347_v9, %v1848_v44  ;;  %v10018_v40 = vpack.c.bf16 %v4416_v29, %v4412_v53 }
 0x20b   : > { %13516 = vst [vmem:[#allocation43_spill] sm:$0xff] %v10002_v45  ;;  %13517 = vst [vmem:[#allocation44_spill] sm:$0xff] %v10004_v60  ;;  %v350_v60 = vld [vmem:[#allocation4 + $0x2f0] sm:$0xff]  ;;  %v10022_v63 = vsub.f32 %v475_v61, %v4416_v29  ;;  %v476_v55 = vld [vmem:[#allocation4 + $0x6e0] sm:$0xff]  ;;  %v10031_v34 = vsub.f32 %v346_v36, %v1850_v52  ;;  %v10033_v53 = vsub.f32 %v472_v46, %v4414_v13  ;;  %v1854_v29 = vand.u32 4294901760, %v348_v22 }
 0x20c   : > { %13519 = vst [vmem:[#allocation46_spill] sm:$0xff] %v10007_v54  ;;  %13520 = vst [vmem:[#allocation47_spill] sm:$0xff] %v10009_v0  ;;  %v13523_v45 = vld [vmem:[#allocation39_spill] sm:$0xff]  ;;  %v13528_v59 = vld [vmem:[#allocation42_spill] sm:$0xff]  ;;  %v10028_v0 = vsub.f32 %v344_v37, %v1846_v30  ;;  %v4424_v54 = vand.u32 4294901760, %v479_v35  ;;  %v1858_v61 = vand.u32 4294901760, %v350_v60  ;;  %v10039_v37 = vpack.c.bf16 %v1856_v24, %v1852_v15 }
 0x20d   : > { %13521 = vst [vmem:[#allocation49_spill] sm:$0xff] %v10011_v4  ;;  %13522 = vst [vmem:[#allocation50_spill] sm:$0xff] %v10013_v33  ;;  %6583 = vmatpush1.bf16.msra.mxu1 %v13523_v45  ;;  %7351 = vmatpush1.bf16.msra.mxu0 %v13528_v59  ;;  %v13529_v23 = vld [vmem:[#allocation45_spill] sm:$0xff]  ;;  %v10026_v33 = vpack.c.bf16 %v1850_v52, %v1846_v30  ;;  %v4420_v4 = vand.u32 4294901760, %v477_v47  ;;  %v478_v45 = vld [vmem:[#allocation4 + $0x6f0] sm:$0xff]  ;;  %v10041_v30 = vsub.f32 %v349_v42, %v1852_v15 }
 0x20e   : > { %13524 = vst [vmem:[#allocation51_spill] sm:$0xff] %v10016_v41  ;;  %13525 = vst [vmem:[#allocation53_spill] sm:$0xff] %v10018_v40  ;;  %6585 = vmatprep.subr.bf16.mxu1 %v13529_v23  ;;  %v353_v9 = vld [vmem:[#allocation4 + $0x308] sm:$0xff]  ;;  %v355_v44 = vld [vmem:[#allocation4 + $0x318] sm:$0xff]  ;;  %v10035_v23 = vpack.c.bf16 %v4418_v58, %v4414_v13  ;;  %v10046_v13 = vsub.f32 %v351_v27, %v1856_v24 }
 0x20f   : > { %13526 = vst [vmem:[#allocation55_spill] sm:$0xff] %v10020_v11  ;;  %13527 = vst [vmem:[#allocation56_spill] sm:$0xff] %v10022_v63  ;;  %v13532_v41 = vld [vmem:[#allocation48_spill] sm:$0xff]  ;;  %v481_v59 = vld [vmem:[#allocation4 + $0x708] sm:$0xff]  ;;  %v10037_v11 = vsub.f32 %v474_v43, %v4418_v58  ;;  %v1860_v36 = vand.u32 4294901760, %v353_v9  ;;  %v1864_v52 = vand.u32 4294901760, %v355_v44  ;;  %v10048_v43 = vpack.c.bf16 %v4424_v54, %v4420_v4 }
 0x210   : > { %13530 = vst [vmem:[#allocation58_spill] sm:$0xff] %v10026_v33  ;;  %13531 = vst [vmem:[#allocation59_spill] sm:$0xff] %v10028_v0  ;;  %7353 = vmatprep.subr.bf16.mxu0 %v13532_v41  ;;  %v483_v63 = vld [vmem:[#allocation4 + $0x718] sm:$0xff]  ;;  %v4422_v33 = vand.u32 4294901760, %v476_v55  ;;  %v4426_v41 = vand.u32 4294901760, %v478_v45  ;;  %v352_v46 = vld [vmem:[#allocation4 + $0x300] sm:$0xff]  ;;  %v10051_v15 = vsub.f32 %v477_v47, %v4420_v4 }
 0x211   : > { %13533 = vst [vmem:[#allocation60_spill] sm:$0xff] %v10031_v34  ;;  %13534 = vst [vmem:[#allocation62_spill] sm:$0xff] %v10033_v53  ;;  %v13539_v0 = vld [vmem:[#allocation52_spill] sm:$0xff]  ;;  %v354_v53 = vld [vmem:[#allocation4 + $0x310] sm:$0xff]  ;;  %v4428_v58 = vand.u32 4294901760, %v481_v59  ;;  %v1862_v24 = vand.u32 4294901760, %v352_v46 }
 0x212   : > { %13535 = vst [vmem:[#allocation64_spill] sm:$0xff] %v10035_v23  ;;  %13536 = vst [vmem:[#allocation65_spill] sm:$0xff] %v10037_v11  ;;  %6587 = vmatpush1.bf16.msra.mxu1 %v13539_v0  ;;  %v13540_v34 = vld [vmem:[#allocation54_spill] sm:$0xff]  ;;  %v13541_v40 = vld [vmem:[#allocation57_spill] sm:$0xff]  ;;  %v4432_v11 = vand.u32 4294901760, %v483_v63  ;;  %v10053_v0 = vsub.f32 %v479_v35, %v4424_v54  ;;  %v10061_v27 = vsub.f32 %v476_v55, %v4422_v33 }
 0x213   : > { %13537 = vst [vmem:[#allocation67_spill] sm:$0xff] %v10039_v37  ;;  %13538 = vst [vmem:[#allocation68_spill] sm:$0xff] %v10041_v30  ;;  %7355 = vmatpush1.bf16.msra.mxu0 %v13540_v34  ;;  %6589 = vmatprep.subr.bf16.mxu1 %v13541_v40  ;;  %v13544_v42 = vld [vmem:[#allocation61_spill] sm:$0xff]  ;;  %v10055_v30 = vpack.c.bf16 %v1858_v61, %v1854_v29  ;;  %v10057_v37 = vsub.f32 %v348_v22, %v1854_v29  ;;  %v482_v34 = vld [vmem:[#allocation4 + $0x710] sm:$0xff] }
 0x214   : > { %13542 = vst [vmem:[#allocation70_spill] sm:$0xff] %v10046_v13  ;;  %13543 = vst [vmem:[#allocation71_spill] sm:$0xff] %v10048_v43  ;;  %7357 = vmatprep.subr.bf16.mxu0 %v13544_v42  ;;  %v480_v23 = vld [vmem:[#allocation4 + $0x700] sm:$0xff]  ;;  %v357_v50 = vld [vmem:[#allocation4 + $0x328] sm:$0xff]  ;;  %v10059_v40 = vsub.f32 %v350_v60, %v1858_v61  ;;  %v1866_v13 = vand.u32 4294901760, %v354_v53  ;;  %v10064_v54 = vpack.c.bf16 %v4426_v41, %v4422_v33 }
 0x215   : > { %13545 = vst [vmem:[#allocation72_spill] sm:$0xff] %v10051_v15  ;;  %13546 = vst [vmem:[#allocation74_spill] sm:$0xff] %v10053_v0  ;;  %v359_v43 = vld [vmem:[#allocation4 + $0x338] sm:$0xff]  ;;  %v485_v7 = vld [vmem:[#allocation4 + $0x728] sm:$0xff]  ;;  %v10066_v4 = vsub.f32 %v478_v45, %v4426_v41  ;;  %v10068_v35 = vpack.c.bf16 %v1864_v52, %v1860_v36  ;;  %v10070_v22 = vsub.f32 %v353_v9, %v1860_v36  ;;  %v1868_v45 = vand.u32 4294901760, %v357_v50 }
 0x216   : > { %13547 = vst [vmem:[#allocation76_spill] sm:$0xff] %v10055_v30  ;;  %13548 = vst [vmem:[#allocation77_spill] sm:$0xff] %v10057_v37  ;;  %v487_v42 = vld [vmem:[#allocation4 + $0x738] sm:$0xff]  ;;  %v13551_v47 = vld [vmem:[#allocation63_spill] sm:$0xff]  ;;  %v10074_v55 = vsub.f32 %v355_v44, %v1864_v52  ;;  %v10076_v61 = vpack.c.bf16 %v4432_v11, %v4428_v58  ;;  %v1872_v41 = vand.u32 4294901760, %v359_v43  ;;  %v10083_v44 = vpack.c.bf16 %v1866_v13, %v1862_v24 }
 0x217   : > { %13549 = vst [vmem:[#allocation79_spill] sm:$0xff] %v10059_v40  ;;  %13550 = vst [vmem:[#allocation80_spill] sm:$0xff] %v10061_v27  ;;  %6591 = vmatpush1.bf16.msra.mxu1 %v13551_v47  ;;  %v13556_v29 = vld [vmem:[#allocation66_spill] sm:$0xff]  ;;  %v13557_v60 = vld [vmem:[#allocation69_spill] sm:$0xff]  ;;  %v4430_v27 = vand.u32 4294901760, %v480_v23  ;;  %v4434_v40 = vand.u32 4294901760, %v482_v34  ;;  %v10085_v52 = vsub.f32 %v352_v46, %v1862_v24 }
 0x218   : > { %13552 = vst [vmem:[#allocation82_spill] sm:$0xff] %v10064_v54  ;;  %13553 = vst [vmem:[#allocation83_spill] sm:$0xff] %v10066_v4  ;;  %7359 = vmatpush1.bf16.msra.mxu0 %v13556_v29  ;;  %6593 = vmatprep.subr.bf16.mxu1 %v13557_v60  ;;  %v356_v37 = vld [vmem:[#allocation4 + $0x320] sm:$0xff]  ;;  %v358_v47 = vld [vmem:[#allocation4 + $0x330] sm:$0xff]  ;;  %v4436_v4 = vand.u32 4294901760, %v485_v7  ;;  %v4440_v0 = vand.u32 4294901760, %v487_v42  ;;  %v10081_v29 = vsub.f32 %v483_v63, %v4432_v11 }
 0x219   : > { %13554 = vst [vmem:[#allocation84_spill] sm:$0xff] %v10068_v35  ;;  %13555 = vst [vmem:[#allocation86_spill] sm:$0xff] %v10070_v22  ;;  %v13560_v33 = vld [vmem:[#allocation73_spill] sm:$0xff]  ;;  %v486_v36 = vld [vmem:[#allocation4 + $0x730] sm:$0xff]  ;;  %v10079_v22 = vsub.f32 %v481_v59, %v4428_v58  ;;  %v10090_v15 = vsub.f32 %v480_v23, %v4430_v27  ;;  %v10094_v11 = vpack.c.bf16 %v4434_v40, %v4430_v27 }
 0x21a   : > { %13558 = vst [vmem:[#allocation88_spill] sm:$0xff] %v10074_v55  ;;  %13559 = vst [vmem:[#allocation89_spill] sm:$0xff] %v10076_v61  ;;  %7361 = vmatprep.subr.bf16.mxu0 %v13560_v33  ;;  %v484_v9 = vld [vmem:[#allocation4 + $0x720] sm:$0xff]  ;;  %v13565_v60 = vld [vmem:[#allocation75_spill] sm:$0xff]  ;;  %v10088_v55 = vsub.f32 %v354_v53, %v1866_v13  ;;  %v1870_v33 = vand.u32 4294901760, %v356_v37  ;;  %v1874_v61 = vand.u32 4294901760, %v358_v47  ;;  %v10096_v63 = vsub.f32 %v482_v34, %v4434_v40 }
 0x21b   : > { %13561 = vst [vmem:[#allocation91_spill] sm:$0xff] %v10079_v22  ;;  %13562 = vst [vmem:[#allocation92_spill] sm:$0xff] %v10081_v29  ;;  %6595 = vmatpush1.bf16.msra.mxu1 %v13565_v60  ;;  %v361_v35 = vld [vmem:[#allocation4 + $0x348] sm:$0xff]  ;;  %v363_v54 = vld [vmem:[#allocation4 + $0x358] sm:$0xff]  ;;  %v4438_v46 = vand.u32 4294901760, %v484_v9  ;;  %v4442_v58 = vand.u32 4294901760, %v486_v36  ;;  %v10099_v23 = vpack.c.bf16 %v1872_v41, %v1868_v45  ;;  %v10101_v13 = vsub.f32 %v357_v50, %v1868_v45 }
 0x21c   : > { %13563 = vst [vmem:[#allocation95_spill] sm:$0xff] %v10083_v44  ;;  %13564 = vst [vmem:[#allocation140_spill] sm:$0xff] %v10085_v52  ;;  %v13568_v30 = vld [vmem:[#allocation78_spill] sm:$0xff]  ;;  %v13569_v59 = vld [vmem:[#allocation81_spill] sm:$0xff]  ;;  %v10107_v27 = vsub.f32 %v485_v7, %v4436_v4  ;;  %v10109_v34 = vsub.f32 %v487_v42, %v4440_v0  ;;  %v1876_v40 = vand.u32 4294901760, %v361_v35  ;;  %v10114_v50 = vsub.f32 %v356_v37, %v1870_v33 }
 0x21d   : > { %13566 = vst [vmem:[#allocation146_spill] sm:$0xff] %v10088_v55  ;;  %13567 = vst [vmem:[#allocation149_spill] sm:$0xff] %v10090_v15  ;;  %7363 = vmatpush1.bf16.msra.mxu0 %v13568_v30  ;;  %6597 = vmatprep.subr.bf16.mxu1 %v13569_v59  ;;  %v489_v24 = vld [vmem:[#allocation4 + $0x748] sm:$0xff]  ;;  %v491_v60 = vld [vmem:[#allocation4 + $0x758] sm:$0xff]  ;;  %v10103_v15 = vsub.f32 %v359_v43, %v1872_v41  ;;  %v10105_v55 = vpack.c.bf16 %v4440_v0, %v4436_v4 }
 0x21e   : > { %13570 = vst [vmem:[#allocation155_spill] sm:$0xff] %v10094_v11  ;;  %13571 = vst [vmem:[#allocation161_spill] sm:$0xff] %v10096_v63  ;;  %v13572_v53 = vld [vmem:[#allocation85_spill] sm:$0xff]  ;;  %v362_v59 = vld [vmem:[#allocation4 + $0x350] sm:$0xff]  ;;  %v1880_v63 = vand.u32 4294901760, %v363_v54  ;;  %v4444_v43 = vand.u32 4294901760, %v489_v24  ;;  %v10118_v0 = vsub.f32 %v358_v47, %v1874_v61  ;;  %v10120_v42 = vpack.c.bf16 %v4442_v58, %v4438_v46 }
 0x21f   : > { %7365 = vmatprep.subr.bf16.mxu0 %v13572_v53  ;;  %13573 = vst [vmem:[#allocation164_spill] sm:$0xff] %v10099_v23  ;;  %13574 = vst [vmem:[#allocation166_spill] sm:$0xff] %v10101_v13  ;;  %v360_v30 = vld [vmem:[#allocation4 + $0x340] sm:$0xff]  ;;  %v490_v29 = vld [vmem:[#allocation4 + $0x750] sm:$0xff]  ;;  %v10112_v53 = vpack.c.bf16 %v1874_v61, %v1870_v33  ;;  %v4448_v45 = vand.u32 4294901760, %v491_v60  ;;  %v10125_v37 = vsub.f32 %v486_v36, %v4442_v58 }
 0x220   : > { %13575 = vst [vmem:[#allocation167_spill] sm:$0xff] %v10103_v15  ;;  %13576 = vst [vmem:[#allocation168_spill] sm:$0xff] %v10105_v55  ;;  %v488_v52 = vld [vmem:[#allocation4 + $0x740] sm:$0xff]  ;;  %v13579_v22 = vld [vmem:[#allocation87_spill] sm:$0xff]  ;;  %v1878_v4 = vand.u32 4294901760, %v360_v30  ;;  %v10127_v23 = vpack.c.bf16 %v1880_v63, %v1876_v40 }
 0x221   : > { %13577 = vst [vmem:[#allocation170_spill] sm:$0xff] %v10107_v27  ;;  %13578 = vst [vmem:[#allocation172_spill] sm:$0xff] %v10109_v34  ;;  %6599 = vmatpush1.bf16.msra.mxu1 %v13579_v22  ;;  %v365_v41 = vld [vmem:[#allocation4 + $0x368] sm:$0xff]  ;;  %v367_v15 = vld [vmem:[#allocation4 + $0x378] sm:$0xff]  ;;  %v1882_v34 = vand.u32 4294901760, %v362_v59  ;;  %v10123_v22 = vsub.f32 %v484_v9, %v4438_v46  ;;  %v4446_v33 = vand.u32 4294901760, %v488_v52  ;;  %v10136_v9 = vsub.f32 %v489_v24, %v4444_v43 }
 0x222   : > { %13580 = vst [vmem:[#allocation173_spill] sm:$0xff] %v10112_v53  ;;  %13581 = vst [vmem:[#allocation175_spill] sm:$0xff] %v10114_v50  ;;  %v13582_v13 = vld [vmem:[#allocation90_spill] sm:$0xff]  ;;  %v13583_v7 = vld [vmem:[#allocation93_spill] sm:$0xff]  ;;  %v4450_v50 = vand.u32 4294901760, %v490_v29  ;;  %v1884_v61 = vand.u32 4294901760, %v365_v41  ;;  %v10138_v36 = vsub.f32 %v491_v60, %v4448_v45 }
 0x223   : > { %7367 = vmatpush1.bf16.msra.mxu0 %v13582_v13  ;;  %6601 = vmatprep.subr.bf16.mxu1 %v13583_v7  ;;  %13584 = vst [vmem:[#allocation176_spill] sm:$0xff] %v10118_v0  ;;  %13585 = vst [vmem:[#allocation178_spill] sm:$0xff] %v10120_v42  ;;  %v13586_v27 = vld [vmem:[#allocation97_spill] sm:$0xff]  ;;  %v493_v53 = vld [vmem:[#allocation4 + $0x768] sm:$0xff]  ;;  %v10129_v13 = vsub.f32 %v361_v35, %v1876_v40  ;;  %v1888_v47 = vand.u32 4294901760, %v367_v15  ;;  %v10132_v0 = vsub.f32 %v363_v54, %v1880_v63 }
 0x224   : > { %7369 = vmatprep.subr.bf16.mxu0 %v13586_v27  ;;  %13587 = vst [vmem:[#allocation179_spill] sm:$0xff] %v10123_v22  ;;  %13588 = vst [vmem:[#allocation180_spill] sm:$0xff] %v10125_v37  ;;  %v495_v55 = vld [vmem:[#allocation4 + $0x778] sm:$0xff]  ;;  %v13591_v7 = vld [vmem:[#allocation99_spill] sm:$0xff]  ;;  %v10134_v42 = vpack.c.bf16 %v4448_v45, %v4444_v43  ;;  %v10142_v35 = vpack.c.bf16 %v1882_v34, %v1878_v4  ;;  %v10144_v40 = vsub.f32 %v360_v30, %v1878_v4 }
 0x225   : > { %13589 = vst [vmem:[#allocation182_spill] sm:$0xff] %v10127_v23  ;;  %13590 = vst [vmem:[#allocation184_spill] sm:$0xff] %v10129_v13  ;;  %6603 = vmatpush1.bf16.msra.mxu1 %v13591_v7  ;;  %v364_v46 = vld [vmem:[#allocation4 + $0x360] sm:$0xff]  ;;  %v366_v58 = vld [vmem:[#allocation4 + $0x370] sm:$0xff]  ;;  %v4452_v7 = vand.u32 4294901760, %v493_v53  ;;  %v4456_v54 = vand.u32 4294901760, %v495_v55  ;;  %v10147_v60 = vsub.f32 %v362_v59, %v1882_v34  ;;  %v10149_v43 = vpack.c.bf16 %v4450_v50, %v4446_v33 }
 0x226   : > { %13592 = vst [vmem:[#allocation185_spill] sm:$0xff] %v10132_v0  ;;  %13593 = vst [vmem:[#allocation187_spill] sm:$0xff] %v10134_v42  ;;  %v492_v27 = vld [vmem:[#allocation4 + $0x760] sm:$0xff]  ;;  %v13596_v37 = vld [vmem:[#allocation102_spill] sm:$0xff]  ;;  %v10151_v45 = vsub.f32 %v488_v52, %v4446_v33  ;;  %v1886_v30 = vand.u32 4294901760, %v364_v46  ;;  %v1890_v4 = vand.u32 4294901760, %v366_v58 }
 0x227   : > { %13594 = vst [vmem:[#allocation188_spill] sm:$0xff] %v10136_v9  ;;  %13595 = vst [vmem:[#allocation190_spill] sm:$0xff] %v10138_v36  ;;  %7371 = vmatpush1.bf16.msra.mxu0 %v13596_v37  ;;  %v13597_v22 = vld [vmem:[#allocation105_spill] sm:$0xff]  ;;  %v494_v63 = vld [vmem:[#allocation4 + $0x770] sm:$0xff]  ;;  %v10153_v37 = vsub.f32 %v490_v29, %v4450_v50  ;;  %v10157_v36 = vsub.f32 %v365_v41, %v1884_v61  ;;  %v4454_v42 = vand.u32 4294901760, %v492_v27 }
 0x228   : > { %6605 = vmatprep.subr.bf16.mxu1 %v13597_v22  ;;  %13598 = vst [vmem:[#allocation191_spill] sm:$0xff] %v10142_v35  ;;  %13599 = vst [vmem:[#allocation192_spill] sm:$0xff] %v10144_v40  ;;  %v369_v0 = vld [vmem:[#allocation4 + $0x388] sm:$0xff]  ;;  %v371_v13 = vld [vmem:[#allocation4 + $0x398] sm:$0xff]  ;;  %v10155_v22 = vpack.c.bf16 %v1888_v47, %v1884_v61  ;;  %v10162_v50 = vsub.f32 %v367_v15, %v1888_v47  ;;  %v10164_v41 = vpack.c.bf16 %v4456_v54, %v4452_v7 }
 0x229   : > { %v13600_v24 = vld [vmem:[#allocation109_spill] sm:$0xff]  ;;  %13601 = vst [vmem:[#allocation194_spill] sm:$0xff] %v10147_v60  ;;  %13602 = vst [vmem:[#allocation196_spill] sm:$0xff] %v10149_v43  ;;  %v497_v40 = vld [vmem:[#allocation4 + $0x788] sm:$0xff]  ;;  %v1892_v59 = vand.u32 4294901760, %v369_v0  ;;  %v1896_v34 = vand.u32 4294901760, %v371_v13  ;;  %v10166_v33 = vsub.f32 %v493_v53, %v4452_v7  ;;  %v10175_v15 = vsub.f32 %v366_v58, %v1890_v4 }
 0x22a   : > { %7373 = vmatprep.subr.bf16.mxu0 %v13600_v24  ;;  %13603 = vst [vmem:[#allocation197_spill] sm:$0xff] %v10151_v45  ;;  %13604 = vst [vmem:[#allocation199_spill] sm:$0xff] %v10153_v37  ;;  %v499_v9 = vld [vmem:[#allocation4 + $0x798] sm:$0xff]  ;;  %v13607_v35 = vld [vmem:[#allocation111_spill] sm:$0xff]  ;;  %v4458_v24 = vand.u32 4294901760, %v494_v63  ;;  %v4460_v37 = vand.u32 4294901760, %v497_v40 }
 0x22b   : > { %13605 = vst [vmem:[#allocation200_spill] sm:$0xff] %v10155_v22  ;;  %13606 = vst [vmem:[#allocation9_spill] sm:$0xff] %v10157_v36  ;;  %6607 = vmatpush1.bf16.msra.mxu1 %v13607_v35  ;;  %v368_v60 = vld [vmem:[#allocation4 + $0x380] sm:$0xff]  ;;  %v370_v43 = vld [vmem:[#allocation4 + $0x390] sm:$0xff]  ;;  %v10169_v35 = vsub.f32 %v495_v55, %v4456_v54  ;;  %v10171_v36 = vsub.f32 %v364_v46, %v1886_v30  ;;  %v4464_v45 = vand.u32 4294901760, %v499_v9 }
 0x22c   : > { %v13608_v52 = vld [vmem:[#allocation114_spill] sm:$0xff]  ;;  %v13609_v29 = vld [vmem:[#allocation117_spill] sm:$0xff]  ;;  %13610 = vst [vmem:[#allocation13_spill] sm:$0xff] %v10162_v50  ;;  %13611 = vst [vmem:[#allocation201_spill] sm:$0xff] %v10164_v41  ;;  %v10173_v22 = vpack.c.bf16 %v1890_v4, %v1886_v30  ;;  %v1894_v47 = vand.u32 4294901760, %v368_v60  ;;  %v1898_v50 = vand.u32 4294901760, %v370_v43  ;;  %v10180_v55 = vpack.c.bf16 %v4458_v24, %v4454_v42 }
 0x22d   : > { %7375 = vmatpush1.bf16.msra.mxu0 %v13608_v52  ;;  %6609 = vmatprep.subr.bf16.mxu1 %v13609_v29  ;;  %13612 = vst [vmem:[#allocation15_spill] sm:$0xff] %v10166_v33  ;;  %v13613_v61 = vld [vmem:[#allocation121_spill] sm:$0xff]  ;;  %13614 = vst [vmem:[#allocation204_spill] sm:$0xff] %v10169_v35  ;;  %v498_v29 = vld [vmem:[#allocation4 + $0x790] sm:$0xff]  ;;  %v10182_v46 = vsub.f32 %v492_v27, %v4454_v42  ;;  %v10184_v54 = vsub.f32 %v494_v63, %v4458_v24 }
 0x22e   : > { %7377 = vmatprep.subr.bf16.mxu0 %v13613_v61  ;;  %13615 = vst [vmem:[#allocation18_spill] sm:$0xff] %v10171_v36  ;;  %v496_v52 = vld [vmem:[#allocation4 + $0x780] sm:$0xff]  ;;  %13616 = vst [vmem:[#allocation22_spill] sm:$0xff] %v10173_v22  ;;  %v373_v53 = vld [vmem:[#allocation4 + $0x3a8] sm:$0xff]  ;;  %v10186_v36 = vpack.c.bf16 %v1896_v34, %v1892_v59  ;;  %v10194_v41 = vsub.f32 %v371_v13, %v1896_v34  ;;  %v4466_v23 = vand.u32 4294901760, %v498_v29 }
 0x22f   : > { %13617 = vst [vmem:[#allocation24_spill] sm:$0xff] %v10175_v15  ;;  %v234_v7 = vld [vmem:[%s8233_s1 + $0x10] sm:$0xff]  ;;  %v235_v33 = vld [vmem:[%s8233_s1 + $0x18] sm:$0xff]  ;;  %13619 = vst [vmem:[#allocation206_spill] sm:$0xff] %v10180_v55  ;;  %v10192_v15 = vsub.f32 %v369_v0, %v1892_v59  ;;  %v10197_v63 = vpack.c.bf16 %v4464_v45, %v4460_v37  ;;  %v10199_v24 = vsub.f32 %v497_v40, %v4460_v37  ;;  %v1900_v0 = vand.u32 4294901760, %v373_v53 }
 0x230   : > { %v13618_v61 = vld [vmem:[#allocation123_spill] sm:$0xff]  ;;  %13620 = vst [vmem:[#allocation28_spill] sm:$0xff] %v10182_v46  ;;  %13621 = vst [vmem:[#allocation31_spill] sm:$0xff] %v10184_v54  ;;  %v375_v35 = vld [vmem:[#allocation4 + $0x3b8] sm:$0xff]  ;;  %v10201_v54 = vsub.f32 %v499_v9, %v4464_v45  ;;  %v10203_v46 = vadd.f32 %v235_v33, %v234_v7 }
 0x231   : > { %6611 = vmatpush1.bf16.msra.mxu1 %v13618_v61  ;;  %13622 = vst [vmem:[#allocation33_spill] sm:$0xff] %v10186_v36  ;;  %v238_v30 = vld [vmem:[%s8233_s1 + $0x30] sm:$0xff]  ;;  %v239_v22 = vld [vmem:[%s8233_s1 + $0x38] sm:$0xff]  ;;  %v13623_v58 = vld [vmem:[#allocation126_spill] sm:$0xff]  ;;  %v4462_v61 = vand.u32 4294901760, %v496_v52  ;;  %v1904_v59 = vand.u32 4294901760, %v375_v35 }
 0x232   : > { %7379 = vmatpush1.bf16.msra.mxu0 %v13623_v58  ;;  %v13624_v4 = vld [vmem:[#allocation129_spill] sm:$0xff]  ;;  %13625 = vst [vmem:[#allocation36_spill] sm:$0xff] %v10192_v15  ;;  %13626 = vst [vmem:[#allocation39_spill] sm:$0xff] %v10194_v41  ;;  %v501_v55 = vld [vmem:[#allocation4 + $0x7a8] sm:$0xff]  ;;  %v10205_v58 = vpack.c.bf16 %v1898_v50, %v1894_v47  ;;  %v10210_v15 = vsub.f32 %v368_v60, %v1894_v47 }
 0x233   : > { %6613 = vmatprep.subr.bf16.mxu1 %v13624_v4  ;;  %v503_v42 = vld [vmem:[#allocation4 + $0x7b8] sm:$0xff]  ;;  %v13627_v27 = vld [vmem:[#allocation133_spill] sm:$0xff]  ;;  %13628 = vst [vmem:[#allocation42_spill] sm:$0xff] %v10197_v63  ;;  %13629 = vst [vmem:[#allocation45_spill] sm:$0xff] %v10199_v24  ;;  %v10207_v4 = vadd.f32 %v239_v22, %v238_v30  ;;  %v4468_v40 = vand.u32 4294901760, %v501_v55  ;;  %v10218_v24 = vsub.f32 %v496_v52, %v4462_v61 }
 0x234   : > { %7381 = vmatprep.subr.bf16.mxu0 %v13627_v27  ;;  %13630 = vst [vmem:[#allocation48_spill] sm:$0xff] %v10201_v54  ;;  %13631 = vst [vmem:[#allocation52_spill] sm:$0xff] %v10205_v58  ;;  %v372_v13 = vld [vmem:[#allocation4 + $0x3a0] sm:$0xff]  ;;  %v374_v34 = vld [vmem:[#allocation4 + $0x3b0] sm:$0xff]  ;;  %v10212_v27 = vsub.f32 %v370_v43, %v1898_v50  ;;  %v4472_v37 = vand.u32 4294901760, %v503_v42  ;;  %v10216_v54 = vpack.c.bf16 %v4466_v23, %v4462_v61 }
 0x235   : > { %v13632_v41 = vld [vmem:[#allocation135_spill] sm:$0xff]  ;;  %13633 = vst [vmem:[#allocation54_spill] sm:$0xff] %v10210_v15  ;;  %v500_v9 = vld [vmem:[#allocation4 + $0x7a0] sm:$0xff]  ;;  %v13635_v33 = vld [vmem:[#allocation138_spill] sm:$0xff]  ;;  %v10220_v22 = vsub.f32 %v498_v29, %v4466_v23  ;;  %v10223_v43 = vsub.f32 %v373_v53, %v1900_v0  ;;  %v1902_v50 = vand.u32 4294901760, %v372_v13  ;;  %v1906_v47 = vand.u32 4294901760, %v374_v34 }
 0x236   : > { %6615 = vmatpush1.bf16.msra.mxu1 %v13632_v41  ;;  %13634 = vst [vmem:[#allocation57_spill] sm:$0xff] %v10212_v27  ;;  %v502_v45 = vld [vmem:[#allocation4 + $0x7b0] sm:$0xff]  ;;  %7383 = vmatpush1.bf16.msra.mxu0 %v13635_v33  ;;  %v13636_v7 = vld [vmem:[#allocation141_spill] sm:$0xff]  ;;  %13637 = vst [vmem:[#allocation61_spill] sm:$0xff] %v10216_v54  ;;  %v248_v33 = vcombine.high %v10203_v46, %v10203_v46  ;;  %v4470_v54 = vand.u32 4294901760, %v500_v9  ;;  %v254_v29 = vcombine.high %v10207_v4, %v10207_v4 }
 0x237   : > { %6617 = vmatprep.subr.bf16.mxu1 %v13636_v7  ;;  %13638 = vst [vmem:[#allocation63_spill] sm:$0xff] %v10218_v24  ;;  %13639 = vst [vmem:[#allocation66_spill] sm:$0xff] %v10220_v22  ;;  %v377_v30 = vld [vmem:[#allocation4 + $0x3c8] sm:$0xff]  ;;  %v379_v41 = vld [vmem:[#allocation4 + $0x3d8] sm:$0xff]  ;;  %v10227_v7 = vpack.c.bf16 %v1904_v59, %v1900_v0  ;;  %v4474_v52 = vand.u32 4294901760, %v502_v45  ;;  %v10232_v53 = vsub.f32 %v375_v35, %v1904_v59 }
 0x238   : > { %v13640_v60 = vld [vmem:[#allocation145_spill] sm:$0xff]  ;;  %13641 = vst [vmem:[#allocation69_spill] sm:$0xff] %v10223_v43  ;;  %v505_v27 = vld [vmem:[#allocation4 + $0x7c8] sm:$0xff]  ;;  %v507_v15 = vld [vmem:[#allocation4 + $0x7d8] sm:$0xff]  ;;  %v1908_v43 = vand.u32 4294901760, %v377_v30  ;;  %v1912_v24 = vand.u32 4294901760, %v379_v41  ;;  %v10238_v0 = vsub.f32 %v501_v55, %v4468_v40  ;;  %v10243_v18 = vpack.c.bf16 %v1906_v47, %v1902_v50 }
 0x239   : > { %7385 = vmatprep.subr.bf16.mxu0 %v13640_v60  ;;  %13642 = vst [vmem:[#allocation73_spill] sm:$0xff] %v10227_v7  ;;  %v376_v61 = vld [vmem:[#allocation4 + $0x3c0] sm:$0xff]  ;;  %v378_v23 = vld [vmem:[#allocation4 + $0x3d0] sm:$0xff]  ;;  %13644 = vst [vmem:[#allocation75_spill] sm:$0xff] %v10232_v53  ;;  %v10234_v60 = vpack.c.bf16 %v4472_v37, %v4468_v40  ;;  %v10240_v7 = vsub.f32 %v503_v42, %v4472_v37  ;;  %v4476_v36 = vand.u32 4294901760, %v505_v27  ;;  %v4480_v11 = vand.u32 4294901760, %v507_v15 }
 0x23a   : > { %v13643_v22 = vld [vmem:[#allocation147_spill] sm:$0xff]  ;;  %v13646_v58 = vld [vmem:[#allocation150_spill] sm:$0xff]  ;;  %v13647_v63 = vld [vmem:[#allocation153_spill] sm:$0xff]  ;;  %13648 = vst [vmem:[#allocation81_spill] sm:$0xff] %v10238_v0  ;;  %v1910_v35 = vand.u32 4294901760, %v376_v61  ;;  %v1914_v59 = vand.u32 4294901760, %v378_v23  ;;  %v10247_v5 = vsub.f32 %v372_v13, %v1902_v50  ;;  %v10251_v55 = vpack.c.bf16 %v4474_v52, %v4470_v54 }
 0x23b   : > { %6619 = vmatpush1.bf16.msra.mxu1 %v13643_v22  ;;  %13645 = vst [vmem:[#allocation78_spill] sm:$0xff] %v10234_v60  ;;  %7387 = vmatpush1.bf16.msra.mxu0 %v13646_v58  ;;  %13649 = vst [vmem:[#allocation85_spill] sm:$0xff] %v10240_v7  ;;  %v13650_v44 = vld [vmem:[#allocation157_spill] sm:$0xff]  ;;  %v506_v53 = vld [vmem:[#allocation4 + $0x7d0] sm:$0xff]  ;;  %v10245_v60 = vand.u32 4294901760, %v248_v33  ;;  %v10249_v58 = vsub.f32 %v374_v34, %v1906_v47  ;;  %v10253_v42 = vand.u32 4294901760, %v254_v29 }
 0x23c   : > { %6621 = vmatprep.subr.bf16.mxu1 %v13647_v63  ;;  %7389 = vmatprep.subr.bf16.mxu0 %v13650_v44  ;;  %13651 = vst [vmem:[#allocation87_spill] sm:$0xff] %v10243_v18  ;;  %v504_v22 = vld [vmem:[#allocation4 + $0x7c0] sm:$0xff]  ;;  %13653 = vst [vmem:[#allocation93_spill] sm:$0xff] %v10247_v5  ;;  %v13657_v63 = vld [vmem:[#allocation159_spill] sm:$0xff]  ;;  %v10256_v40 = vsub.f32 %v500_v9, %v4470_v54  ;;  %v10258_v44 = vsub.f32 %v502_v45, %v4474_v52 }
 0x23d   : > { %13652 = vst [vmem:[#allocation90_spill] sm:$0xff] %v10245_v60  ;;  %13654 = vst [vmem:[#allocation97_spill] sm:$0xff] %v10249_v58  ;;  %v10260_v37 = vpack.c.bf16 %v1912_v24, %v1908_v43  ;;  %v10262_v7 = vsub.f32 %v377_v30, %v1908_v43  ;;  %v13662_v0 = vld [vmem:[#allocation162_spill] sm:$0xff]  ;;  %v13663_v13 = vld [vmem:[#allocation165_spill] sm:$0xff]  ;;  %v10266_v34 = vsub.f32 %v379_v41, %v1912_v24  ;;  %v4478_v47 = vand.u32 4294901760, %v504_v22 }
 0x23e   : > { %13655 = vst [vmem:[#allocation99_spill] sm:$0xff] %v10251_v55  ;;  %13656 = vst [vmem:[#allocation102_spill] sm:$0xff] %v10253_v42  ;;  %v10268_v50 = vpack.c.bf16 %v4480_v11, %v4476_v36  ;;  %v4482_v58 = vand.u32 4294901760, %v506_v53  ;;  %v381_v5 = vld [vmem:[#allocation4 + $0x3e8] sm:$0xff]  ;;  %v13666_v54 = vld [vmem:[#allocation169_spill] sm:$0xff]  ;;  %v10271_v9 = vsub.f32 %v505_v27, %v4476_v36  ;;  %v10273_v45 = vsub.f32 %v507_v15, %v4480_v11 }
 0x23f   : > { %6623 = vmatpush1.bf16.msra.mxu1 %v13657_v63  ;;  %13658 = vst [vmem:[#allocation105_spill] sm:$0xff] %v10256_v40  ;;  %13659 = vst [vmem:[#allocation109_spill] sm:$0xff] %v10258_v44  ;;  %7391 = vmatpush1.bf16.msra.mxu0 %v13662_v0  ;;  %v383_v63 = vld [vmem:[#allocation4 + $0x3f8] sm:$0xff]  ;;  %v10275_v30 = vpack.c.bf16 %v1914_v59, %v1910_v35  ;;  %v10278_v43 = vsub.f32 %v248_v33, %v10245_v60  ;;  %v509_v24 = vld [vmem:[#allocation4 + $0x7e8] sm:$0xff]  ;;  %v1916_v15 = vand.u32 4294901760, %v381_v5 }
 0x240   : > { %13660 = vst [vmem:[#allocation111_spill] sm:$0xff] %v10260_v37  ;;  %13661 = vst [vmem:[#allocation114_spill] sm:$0xff] %v10262_v7  ;;  %6625 = vmatprep.subr.bf16.mxu1 %v13663_v13  ;;  %7393 = vmatprep.subr.bf16.mxu0 %v13666_v54  ;;  %v10280_v52 = vsub.f32 %v376_v61, %v1910_v35  ;;  %v511_v41 = vld [vmem:[#allocation4 + $0x7f8] sm:$0xff]  ;;  %v13673_v36 = vld [vmem:[#allocation171_spill] sm:$0xff]  ;;  %v10288_v11 = vsub.f32 %v378_v23, %v1914_v59  ;;  %v1920_v27 = vand.u32 4294901760, %v383_v63 }
 0x241   : > { %13664 = vst [vmem:[#allocation117_spill] sm:$0xff] %v10266_v34  ;;  %13665 = vst [vmem:[#allocation121_spill] sm:$0xff] %v10268_v50  ;;  %v10285_v34 = vsub.f32 %v254_v29, %v10253_v42  ;;  %v380_v54 = vld [vmem:[#allocation4 + $0x3e0] sm:$0xff]  ;;  %v10291_v33 = vand.u32 4294901760, %v10203_v46  ;;  %v13676_v61 = vld [vmem:[#allocation174_spill] sm:$0xff]  ;;  %v10295_v0 = vpack.c.bf16 %v4482_v58, %v4478_v47  ;;  %v10297_v13 = vsub.f32 %v504_v22, %v4478_v47 }
 0x242   : > { %13667 = vst [vmem:[#allocation123_spill] sm:$0xff] %v10271_v9  ;;  %13668 = vst [vmem:[#allocation126_spill] sm:$0xff] %v10273_v45  ;;  %v13677_v35 = vld [vmem:[#allocation177_spill] sm:$0xff]  ;;  %v382_v29 = vld [vmem:[#allocation4 + $0x3f0] sm:$0xff]  ;;  %v4488_v45 = vand.u32 4294901760, %v511_v41  ;;  %v13683_v47 = vand.u32 4294901760, %v9839_v21 }
 0x243   : > { %13669 = vst [vmem:[#allocation129_spill] sm:$0xff] %v10275_v30  ;;  %13670 = vst [vmem:[#allocation133_spill] sm:$0xff] %v10278_v43  ;;  %6627 = vmatpush1.bf16.msra.mxu1 %v13673_v36  ;;  %7395 = vmatpush1.bf16.msra.mxu0 %v13676_v61  ;;  %v13680_v59 = vld [vmem:[#allocation181_spill] sm:$0xff]  ;;  %v10302_v36 = vsub.f32 %v506_v53, %v4482_v58  ;;  %v1918_v61 = vand.u32 4294901760, %v380_v54  ;;  %v10313_v53 = vpack.c.bf16 %v1920_v27, %v1916_v15  ;;  %v510_v9 = vld [vmem:[#allocation4 + $0x7f0] sm:$0xff] }
 0x244   : > { %13671 = vst [vmem:[#allocation135_spill] sm:$0xff] %v10280_v52  ;;  %13672 = vst [vmem:[#allocation138_spill] sm:$0xff] %v10285_v34  ;;  %6629 = vmatprep.subr.bf16.mxu1 %v13677_v35  ;;  %7397 = vmatprep.subr.bf16.mxu0 %v13680_v59  ;;  %v508_v7 = vld [vmem:[#allocation4 + $0x7e0] sm:$0xff]  ;;  %v13682_v35 = vand.u32 4294901760, %v9837_v26  ;;  %v1956_v52 = vsub.f32 %v9839_v21, %v13683_v47  ;;  %v10315_v58 = vsub.f32 %v381_v5, %v1916_v15  ;;  %v13688_v44 = vld [vmem:[#allocation186_spill] sm:$0xff] }
 0x245   : > { %13674 = vst [vmem:[#allocation141_spill] sm:$0xff] %v10288_v11  ;;  %13675 = vst [vmem:[#allocation145_spill] sm:$0xff] %v10291_v33  ;;  %v4484_v11 = vand.u32 4294901760, %v509_v24  ;;  %v1922_v59 = vand.u32 4294901760, %v382_v29  ;;  %v10326_v47 = vand.u32 4294901760, %v10207_v4  ;;  %v13693_v15 = vand.u32 4294901760, %v9845_v25 }
 0x246   : > { %13678 = vst [vmem:[#allocation147_spill] sm:$0xff] %v10295_v0  ;;  %13679 = vst [vmem:[#allocation150_spill] sm:$0xff] %v10297_v13  ;;  %v1944_v22 = vsub.f32 %v9837_v26, %v13682_v35  ;;  %v13684_v13 = vld [vmem:[#allocation183_spill] sm:$0xff]  ;;  %v13689_v35 = vld [vmem:[#allocation189_spill] sm:$0xff]  ;;  %v10323_v26 = vsub.f32 %v383_v63, %v1920_v27  ;;  %v13697_v63 = vand.u32 4294901760, %v10278_v43 }
 0x247   : > { %13681 = vst [vmem:[#allocation153_spill] sm:$0xff] %v10302_v36  ;;  %6631 = vmatpush1.bf16.msra.mxu1 %v13684_v13  ;;  %13685 = vst [vmem:[#allocation157_spill] sm:$0xff] %v10313_v53  ;;  %v10319_v36 = vsub.f32 %v10203_v46, %v10291_v33  ;;  %7399 = vmatpush1.bf16.msra.mxu0 %v13688_v44  ;;  %v13692_v13 = vand.u32 4294901760, %v9843_v62  ;;  %v4524_v23 = vsub.f32 %v9845_v25, %v13693_v15  ;;  %v13694_v21 = vld [vmem:[#allocation193_spill] sm:$0xff]  ;;  %v13699_v40 = vld [vmem:[#allocation195_spill] sm:$0xff] }
 0x248   : > { %13686 = vst [vmem:[#allocation159_spill] sm:$0xff] %v10315_v58  ;;  %6633 = vmatprep.subr.bf16.mxu1 %v13689_v35  ;;  %13690 = vst [vmem:[#allocation165_spill] sm:$0xff] %v10323_v26  ;;  %7401 = vmatprep.subr.bf16.mxu0 %v13694_v21  ;;  %v10335_v46 = vpack.c.bf16 %v4488_v45, %v4484_v11  ;;  %v10337_v44 = vsub.f32 %v509_v24, %v4484_v11  ;;  %v4486_v35 = vand.u32 4294901760, %v508_v7  ;;  %v13701_v25 = vld [vmem:[#allocation198_spill] sm:$0xff] }
 0x249   : > { %13687 = vst [vmem:[#allocation162_spill] sm:$0xff] %v10319_v36  ;;  %13691 = vst [vmem:[#allocation169_spill] sm:$0xff] %v10326_v47  ;;  %v4512_v5 = vsub.f32 %v9843_v62, %v13692_v13  ;;  %v1927_v27 = vsub.f32 %v10278_v43, %v13697_v63  ;;  %v4490_v33 = vand.u32 4294901760, %v510_v9  ;;  %v1945_v26 = vand.u32 4294901760, %v1944_v22 }
 0x24a   : > { %13695 = vst [vmem:[#allocation171_spill] sm:$0xff] %v10335_v46  ;;  %13696 = vst [vmem:[#allocation174_spill] sm:$0xff] %v10337_v44  ;;  %v1957_v58 = vand.u32 4294901760, %v1956_v52  ;;  %v13698_v13 = vand.u32 4294901760, %v10285_v34  ;;  %v10346_v15 = vsub.f32 %v511_v41, %v4488_v45  ;;  %v12497_v21 = vand.u32 4294901760, %v10319_v36  ;;  %v13824_v44 = vld [vmem:[#allocation65_spill] sm:$0xff] }
 0x24b   : > { %6635 = vmatpush1.bf16.msra.mxu1 %v13699_v40  ;;  %7403 = vmatpush1.bf16.msra.mxu0 %v13701_v25  ;;  %v10353_v22 = vpack.c.bf16 %v1922_v59, %v1918_v61  ;;  %v4513_v52 = vand.u32 4294901760, %v4512_v5  ;;  %v4525_v63 = vand.u32 4294901760, %v4524_v23  ;;  %v10360_v40 = vsub.f32 %v380_v54, %v1918_v61 }
 0x24c   : > { %v4495_v62 = vsub.f32 %v10285_v34, %v13698_v13  ;;  %13700 = vst [vmem:[#allocation177_spill] sm:$0xff] %v10346_v15  ;;  %6637 = vmatprep.subr.bf16.mxu1 %v9835_v1  ;;  %v10357_v13 = vsub.f32 %v10207_v4, %v10326_v47  ;;  %7405 = vmatprep.subr.bf16.mxu0 %v9841_v38  ;;  %v1928_v11 = vand.u32 4294901760, %v1927_v27  ;;  %v13710_v54 = vand.u32 4294901760, %v9851_v39  ;;  %v13730_v38 = vld [vmem:[#allocation144_spill] sm:$0xff]  ;;  %v13823_v15 = vld [vmem:[#allocation187_spill] sm:$0xff] }
 0x24d   : > { %13702 = vst [vmem:[#allocation181_spill] sm:$0xff] %v10353_v22  ;;  %13704 = vst [vmem:[#allocation186_spill] sm:$0xff] %v10360_v40  ;;  %v10362_v45 = vsub.f32 %v382_v29, %v1922_v59  ;;  %v10364_v41 = vsub.f32 %v508_v7, %v4486_v35  ;;  %v10367_v25 = vpack.c.bf16 %v4490_v33, %v4486_v35  ;;  %v13709_v7 = vand.u32 4294901760, %v9849_v32  ;;  %v13711_v35 = vld [vmem:[#allocation139_spill] sm:$0xff]  ;;  %v13716_v59 = vld [vmem:[#allocation158_spill] sm:$0xff] }
 0x24e   : > { %13703 = vst [vmem:[#allocation183_spill] sm:$0xff] %v10357_v13  ;;  %1790 = vmatmul.mubr.f32.vlgmr.msra.gmra.mrb[0].mxu1 %v13493_v31  ;;  %v10369_v24 = vsub.f32 %v510_v9, %v4490_v33  ;;  %v10371_v23 = vpack.c.bf16 %v1957_v58, %v1945_v26  ;;  %v4496_v5 = vand.u32 4294901760, %v4495_v62  ;;  %4358 = vmatmul.mubr.f32.vlgmr.msra.gmra.mrb[0].mxu0 %v13497_v57  ;;  %v12498_v62 = vand.u32 4294901760, %v10357_v13  ;;  %v13714_v33 = vld [vmem:[#allocation142_spill] sm:$0xff]  ;;  %v13715_v58 = vld [vmem:[#allocation151_spill] sm:$0xff]  ;;  %v13733_v34 = vld [vmem:[#allocation160_spill] sm:$0xff] }
 0x24f   : > { %13705 = vst [vmem:[#allocation189_spill] sm:$0xff] %v10362_v45  ;;  %13706 = vst [vmem:[#allocation193_spill] sm:$0xff] %v10364_v41  ;;  %6639 = vmatpush1.bf16.msra.mxu1 %v9847_v48  ;;  %v10378_v4 = vsub.f32 %v10319_v36, %v12497_v21  ;;  %v1950_v31 = vsub.f32 %v9849_v32, %v13709_v7  ;;  %v1962_v9 = vsub.f32 %v9851_v39, %v13710_v54  ;;  %v13713_v54 = vld [vmem:[#allocation156_spill] sm:$0xff]  ;;  %v13728_v48 = vld [vmem:[#allocation101_spill] sm:$0xff] }
 0x250   : > { %13707 = vst [vmem:[#allocation195_spill] sm:$0xff] %v10367_v25  ;;  %13708 = vst [vmem:[#allocation198_spill] sm:$0xff] %v10369_v24  ;;  %7407 = vmatpush1.bf16.msra.mxu0 %v9853_v12  ;;  %6641 = vmatprep.subr.bf16.mxu1 %v9864_v51  ;;  %v10388_v26 = vpack.c.bf16 %v4525_v63, %v4513_v52  ;;  %v13712_v63 = vld [vmem:[#allocation152_spill] sm:$0xff]  ;;  %v13717_v7 = vand.u32 4294901760, %v9855_v10  ;;  %v13718_v52 = vand.u32 4294901760, %v9858_v6  ;;  %v13720_v27 = vand.u32 4294901760, %v9866_v56 }
 0x251   : > { %7409 = vmatprep.subr.bf16.mxu0 %v9869_v16  ;;  %1929 = vmatprep.mubr.f32.mxu1 %v1928_v11  ;;  %v1951_v29 = vand.u32 4294901760, %v1950_v31  ;;  %v1963_v57 = vand.u32 4294901760, %v1962_v9  ;;  %v13719_v11 = vand.u32 4294901760, %v9860_v3  ;;  %v13723_v9 = vand.u32 4294901760, %v13711_v35  ;;  %v13729_v36 = vld [vmem:[#allocation107_spill] sm:$0xff]  ;;  %v13786_v32 = vld [vmem:[#allocation82_spill] sm:$0xff] }
 0x252   : > { %4497 = vmatprep.mubr.f32.mxu0 %v4496_v5  ;;  %v10410_v5 = vsub.f32 %v10357_v13, %v12498_v62  ;;  %v4518_v21 = vsub.f32 %v9855_v10, %v13717_v7  ;;  %v4530_v31 = vsub.f32 %v9858_v6, %v13718_v52  ;;  %v1980_v62 = vsub.f32 %v9866_v56, %v13720_v27  ;;  %v13767_v56 = vld [vmem:[#allocation49_spill] sm:$0xff]  ;;  %v13785_v10 = vld [vmem:[#allocation76_spill] sm:$0xff]  ;;  %v13818_v41 = vld [vmem:[#allocation178_spill] sm:$0xff] }
 0x253   : > { %6643 = vmatpush1.bf16.msra.mxu1 %v13714_v33  ;;  %v1968_v61 = vsub.f32 %v9860_v3, %v13719_v11  ;;  %v13724_v33 = vand.u32 4294901760, %v9880_v14  ;;  %v13725_v16 = vand.u32 4294901760, %v13712_v63  ;;  %v13726_v51 = vand.u32 4294901760, %v13713_v54 }
 0x254   : > { %7411 = vmatpush1.bf16.msra.mxu0 %v13715_v58  ;;  %6645 = vmatprep.subr.bf16.mxu1 %v13716_v59  ;;  %v13721_v59 = vand.u32 4294901760, %v9871_v28  ;;  %v13722_v58 = vand.u32 4294901760, %v9873_v49  ;;  %v10445_v12 = vpack.c.bf16 %v1963_v57, %v1951_v29  ;;  %v4531_v1 = vand.u32 4294901760, %v4530_v31  ;;  %v13732_v57 = vld [vmem:[#allocation104_spill] sm:$0xff] }
 0x255   : > { %7413 = vmatprep.subr.bf16.mxu0 %v9897_v17  ;;  %v1974_v17 = vsub.f32 %v13711_v35, %v13723_v9  ;;  %v1986_v11 = vsub.f32 %v9880_v14, %v13724_v33  ;;  %v4542_v27 = vsub.f32 %v13712_v63, %v13725_v16  ;;  %v4519_v16 = vand.u32 4294901760, %v4518_v21  ;;  %v13734_v14 = vld [vmem:[#allocation205_spill] sm:$0xff] }
 0x256   : > { %v4536_v7 = vsub.f32 %v9871_v28, %v13721_v59  ;;  %v4548_v52 = vsub.f32 %v9873_v49, %v13722_v58  ;;  %v4554_v59 = vsub.f32 %v13713_v54, %v13726_v51  ;;  %v13727_v58 = vand.u32 4294901760, %v9893_v19  ;;  %v13764_v49 = vld [vmem:[#allocation20_spill] sm:$0xff]  ;;  %v13766_v28 = vld [vmem:[#allocation46_spill] sm:$0xff] }
 0x257   : > { %6647 = vmatpush1.bf16.msra.mxu1 %v9904_v8  ;;  %v13731_v51 = vand.u32 4294901760, %v9895_v20  ;;  %v1969_v43 = vand.u32 4294901760, %v1968_v61  ;;  %v1975_v54 = vand.u32 4294901760, %v1974_v17  ;;  %v1987_v33 = vand.u32 4294901760, %v1986_v11  ;;  %v13745_v61 = vld [vmem:[#allocation154_spill] sm:$0xff] }
 0x258   : > { %v1992_v9 = vsub.f32 %v9893_v19, %v13727_v58  ;;  %7415 = vmatpush1.bf16.msra.mxu0 %v13729_v36  ;;  %6649 = vmatprep.subr.bf16.mxu1 %v13730_v38  ;;  %v1981_v58 = vand.u32 4294901760, %v1980_v62  ;;  %v4537_v19 = vand.u32 4294901760, %v4536_v7  ;;  %v4549_v13 = vand.u32 4294901760, %v4548_v52  ;;  %v13738_v62 = vld [vmem:[#allocation10_spill] sm:$0xff] }
 0x259   : > { %v2004_v8 = vsub.f32 %v9895_v20, %v13731_v51  ;;  %7417 = vmatprep.subr.bf16.mxu0 %v13733_v34  ;;  %v4543_v63 = vand.u32 4294901760, %v4542_v27  ;;  %v4555_v36 = vand.u32 4294901760, %v4554_v59  ;;  %v13735_v31 = vand.u32 4294901760, %v9899_v2  ;;  %v13737_v34 = vld [vmem:[#allocation106_spill] sm:$0xff]  ;;  %v13741_v27 = vld [vmem:[#allocation108_spill] sm:$0xff] }
 0x25a   : > { %v1993_v21 = vand.u32 4294901760, %v1992_v9  ;;  %v13736_v51 = vand.u32 4294901760, %v13728_v48  ;;  %v13739_v7 = vld [vmem:[#allocation14_spill] sm:$0xff]  ;;  %v13740_v52 = vand.u32 4294901760, %v13732_v57  ;;  %v10484_v47 = vpack.c.bf16 %v1987_v33, %v1975_v54 }
 0x25b   : > { %6651 = vmatpush1.bf16.msra.mxu1 %v13734_v14  ;;  %v4560_v38 = vsub.f32 %v9899_v2, %v13735_v31  ;;  %v2005_v17 = vand.u32 4294901760, %v2004_v8  ;;  %v13742_v9 = vld [vmem:[#allocation110_spill] sm:$0xff]  ;;  %v13743_v31 = vld [vmem:[#allocation19_spill] sm:$0xff]  ;;  %v10475_v2 = vpack.c.bf16 %v4531_v1, %v4519_v16  ;;  %v10482_v8 = vpack.c.bf16 %v4549_v13, %v4537_v19 }
 0x25c   : > { %v4572_v29 = vsub.f32 %v13728_v48, %v13736_v51  ;;  %7419 = vmatpush1.bf16.msra.mxu0 %v13738_v62  ;;  %6653 = vmatprep.subr.bf16.mxu1 %v13739_v7  ;;  %v1998_v11 = vsub.f32 %v13732_v57, %v13740_v52  ;;  %v13744_v51 = vld [vmem:[#allocation148_spill] sm:$0xff]  ;;  %v13746_v62 = vld [vmem:[#allocation163_spill] sm:$0xff]  ;;  %v10480_v7 = vpack.c.bf16 %v1981_v58, %v1969_v43  ;;  %v13749_v48 = vand.u32 4294901760, %v13737_v34 }
 0x25d   : > { %7421 = vmatprep.subr.bf16.mxu0 %v13743_v31  ;;  %v12545_v35 = vand.u32 4294901760, %v13746_v62  ;;  %v13747_v52 = vld [vmem:[#allocation203_spill] sm:$0xff]  ;;  %v10488_v14 = vpack.c.bf16 %v4555_v36, %v4543_v63  ;;  %v4561_v1 = vand.u32 4294901760, %v4560_v38  ;;  %v13751_v43 = vld [vmem:[#allocation32_spill] sm:$0xff]  ;;  %v10495_v19 = vpack.c.bf16 %v2005_v17, %v1993_v21  ;;  %v13754_v63 = vld [vmem:[#allocation37_spill] sm:$0xff] }
 0x25e   : > { %v12551_v59 = vand.u32 4294901760, %v13747_v52  ;;  %v13748_v57 = vld [vmem:[#allocation23_spill] sm:$0xff]  ;;  %v4573_v16 = vand.u32 4294901760, %v4572_v29  ;;  %v2010_v20 = vsub.f32 %v13737_v34, %v13749_v48  ;;  %v1999_v13 = vand.u32 4294901760, %v1998_v11  ;;  %v13757_v11 = vld [vmem:[#allocation208_spill] sm:$0xff] }
 0x25f   : > { %6655 = vmatpush1.bf16.msra.mxu1 %v13748_v57  ;;  %v13750_v31 = vld [vmem:[#allocation27_spill] sm:$0xff]  ;;  %v13752_v54 = vand.u32 4294901760, %v13741_v27  ;;  %v13753_v36 = vand.u32 4294901760, %v13742_v9  ;;  %v13755_v29 = vand.u32 4294901760, %v13744_v51  ;;  %v13756_v58 = vand.u32 4294901760, %v13745_v61 }
 0x260   : > { %7423 = vmatpush1.bf16.msra.mxu0 %v13750_v31  ;;  %6657 = vmatprep.subr.bf16.mxu1 %v13751_v43  ;;  %v4584_v17 = vsub.f32 %v13746_v62, %v12545_v35  ;;  %v13758_v43 = vld [vmem:[#allocation207_spill] sm:$0xff]  ;;  %v13765_v62 = vld [vmem:[#allocation21_spill] sm:$0xff]  ;;  %v13769_v34 = vand.u32 4294901760, %v13757_v11 }
 0x261   : > { %v4566_v33 = vsub.f32 %v13741_v27, %v13752_v54  ;;  %v4578_v38 = vsub.f32 %v13742_v9, %v13753_v36  ;;  %7425 = vmatprep.subr.bf16.mxu0 %v13754_v63  ;;  %v2016_v48 = vsub.f32 %v13744_v51, %v13755_v29  ;;  %v2028_v21 = vsub.f32 %v13745_v61, %v13756_v58  ;;  %v13759_v31 = vld [vmem:[#allocation11_spill] sm:$0xff]  ;;  %v13760_v9 = vld [vmem:[#allocation12_spill] sm:$0xff]  ;;  %v13763_v61 = vld [vmem:[#allocation17_spill] sm:$0xff] }
 0x262   : > { %v4596_v36 = vsub.f32 %v13747_v52, %v12551_v59  ;;  %v13761_v51 = vld [vmem:[#allocation40_spill] sm:$0xff]  ;;  %v10527_v59 = vpack.c.bf16 %v4573_v16, %v4561_v1  ;;  %v2011_v63 = vand.u32 4294901760, %v2010_v20  ;;  %v13768_v29 = vld [vmem:[#allocation53_spill] sm:$0xff]  ;;  %v4585_v58 = vand.u32 4294901760, %v4584_v17 }
 0x263   : > { %6659 = vmatpush1.bf16.msra.mxu1 %v13761_v51  ;;  %v13762_v27 = vld [vmem:[#allocation16_spill] sm:$0xff]  ;;  %v4567_v57 = vand.u32 4294901760, %v4566_v33  ;;  %v4579_v52 = vand.u32 4294901760, %v4578_v38  ;;  %v2017_v51 = vand.u32 4294901760, %v2016_v48  ;;  %v2029_v3 = vand.u32 4294901760, %v2028_v21  ;;  %v13773_v38 = vld [vmem:[#allocation58_spill] sm:$0xff] }
 0x264   : > { %7427 = vmatpush1.bf16.msra.mxu0 %v13766_v28  ;;  %6661 = vmatprep.subr.bf16.mxu1 %v13767_v56  ;;  %v2022_v35 = vsub.f32 %v13757_v11, %v13769_v34  ;;  %v4597_v6 = vand.u32 4294901760, %v4596_v36  ;;  %v13770_v54 = vand.u32 4294901760, %v13758_v43  ;;  %v13771_v1 = vand.u32 4294901760, %v13759_v31  ;;  %v13778_v56 = vld [vmem:[#allocation64_spill] sm:$0xff] }
 0x265   : > { %7429 = vmatprep.subr.bf16.mxu0 %v13768_v29  ;;  %v13772_v16 = vand.u32 4294901760, %v13760_v9  ;;  %v13774_v48 = vand.u32 4294901760, %v13762_v27  ;;  %v13775_v34 = vand.u32 4294901760, %v13763_v61  ;;  %v10563_v11 = vpack.c.bf16 %v4579_v52, %v4567_v57  ;;  %v13787_v57 = vld [vmem:[#allocation84_spill] sm:$0xff] }
 0x266   : > { %v2034_v28 = vsub.f32 %v13758_v43, %v13770_v54  ;;  %v4590_v20 = vsub.f32 %v13759_v31, %v13771_v1  ;;  %v13776_v54 = vand.u32 4294901760, %v13764_v49  ;;  %v13777_v1 = vand.u32 4294901760, %v13765_v62  ;;  %v13782_v43 = vld [vmem:[#allocation29_spill] sm:$0xff] }
 0x267   : > { %v4602_v33 = vsub.f32 %v13760_v9, %v13772_v16  ;;  %6663 = vmatpush1.bf16.msra.mxu1 %v13773_v38  ;;  %v2040_v21 = vsub.f32 %v13762_v27, %v13774_v48  ;;  %v2052_v17 = vsub.f32 %v13763_v61, %v13775_v34  ;;  %v13779_v16 = vld [vmem:[#allocation67_spill] sm:$0xff]  ;;  %v10557_v38 = vpack.c.bf16 %v2011_v63, %v1999_v13  ;;  %v13780_v9 = vld [vmem:[#allocation25_spill] sm:$0xff]  ;;  %v13781_v27 = vld [vmem:[#allocation26_spill] sm:$0xff] }
 0x268   : > { %v4608_v36 = vsub.f32 %v13764_v49, %v13776_v54  ;;  %v4620_v29 = vsub.f32 %v13765_v62, %v13777_v1  ;;  %7431 = vmatpush1.bf16.msra.mxu0 %v13778_v56  ;;  %6665 = vmatprep.subr.bf16.mxu1 %v13779_v16  ;;  %v13783_v61 = vld [vmem:[#allocation71_spill] sm:$0xff]  ;;  %v10565_v54 = vpack.c.bf16 %v2029_v3, %v2017_v51  ;;  %v2023_v49 = vand.u32 4294901760, %v2022_v35  ;;  %v13784_v1 = vld [vmem:[#allocation30_spill] sm:$0xff] }
 0x269   : > { %7433 = vmatprep.subr.bf16.mxu0 %v13783_v61  ;;  %v12575_v62 = vand.u32 4294901760, %v13784_v1  ;;  %v10568_v56 = vpack.c.bf16 %v4597_v6, %v4585_v58  ;;  %v2035_v16 = vand.u32 4294901760, %v2034_v28  ;;  %v4591_v13 = vand.u32 4294901760, %v4590_v20  ;;  %v13792_v20 = vld [vmem:[#allocation89_spill] sm:$0xff] }
 0x26a   : > { %v4603_v63 = vand.u32 4294901760, %v4602_v33  ;;  %v2041_v48 = vand.u32 4294901760, %v2040_v21  ;;  %v2053_v31 = vand.u32 4294901760, %v2052_v17  ;;  %v4609_v39 = vand.u32 4294901760, %v4608_v36  ;;  %v13793_v21 = vld [vmem:[#allocation35_spill] sm:$0xff]  ;;  %v13794_v36 = vld [vmem:[#allocation38_spill] sm:$0xff] }
 0x26b   : > { %6667 = vmatpush1.bf16.msra.mxu1 %v13785_v10  ;;  %v4621_v34 = vand.u32 4294901760, %v4620_v29  ;;  %v13788_v3 = vand.u32 4294901760, %v13780_v9  ;;  %v13789_v6 = vand.u32 4294901760, %v13781_v27  ;;  %v13790_v51 = vand.u32 4294901760, %v13782_v43  ;;  %v13791_v29 = vld [vmem:[#allocation34_spill] sm:$0xff]  ;;  %v13796_v10 = vld [vmem:[#allocation41_spill] sm:$0xff] }
 0x26c   : > { %7435 = vmatpush1.bf16.msra.mxu0 %v13786_v32  ;;  %6669 = vmatprep.subr.bf16.mxu1 %v13787_v57  ;;  %v4626_v33 = vsub.f32 %v13784_v1, %v12575_v62  ;;  %v13795_v57 = vld [vmem:[#allocation202_spill] sm:$0xff]  ;;  %v10596_v32 = vpack.c.bf16 %v2035_v16, %v2023_v49  ;;  %v10604_v24 = vpack.c.bf16 %v2053_v31, %v2041_v48  ;;  %v13802_v17 = vld [vmem:[#allocation47_spill] sm:$0xff]  ;;  %v13804_v49 = vld [vmem:[#allocation164_spill] sm:$0xff]  ;;  %v13805_v61 = vand.u32 4294901760, %v13791_v29 }
 0x26d   : > { %v10576_v35 = vsub.f32 %v13780_v9, %v13788_v3  ;;  %v10581_v28 = vsub.f32 %v13781_v27, %v13789_v6  ;;  %v10586_v52 = vsub.f32 %v13782_v43, %v13790_v51  ;;  %7437 = vmatprep.subr.bf16.mxu0 %v13792_v20  ;;  %v12577_v6 = vand.u32 4294901760, %v13795_v57  ;;  %v13797_v51 = vld [vmem:[#allocation43_spill] sm:$0xff]  ;;  %v13798_v27 = vld [vmem:[#allocation44_spill] sm:$0xff] }
 0x26e   : > { %v13799_v9 = vld [vmem:[#allocation95_spill] sm:$0xff]  ;;  %v10602_v20 = vpack.c.bf16 %v4603_v63, %v4591_v13  ;;  %13800 = vst [vmem:[#allocation209_spill] sm:$0xff] %v10604_v24  ;;  %v10606_v62 = vpack.c.bf16 %v4621_v34, %v4609_v39  ;;  %v2064_v13 = vsub.f32 %v13791_v29, %v13805_v61  ;;  %v13806_v31 = vld [vmem:[#allocation168_spill] sm:$0xff]  ;;  %v4627_v39 = vand.u32 4294901760, %v4626_v33 }
 0x26f   : > { %6671 = vmatpush1.bf16.msra.mxu1 %v13799_v9  ;;  %v13803_v1 = vld [vmem:[#allocation155_spill] sm:$0xff]  ;;  %v2047_v16 = vand.u32 4294901760, %v10576_v35  ;;  %v2059_v43 = vand.u32 4294901760, %v10581_v28  ;;  %v4615_v58 = vand.u32 4294901760, %v10586_v52  ;;  %v13807_v48 = vand.u32 4294901760, %v13793_v21  ;;  %v13813_v9 = vld [vmem:[#allocation173_spill] sm:$0xff] }
 0x270   : > { %13801 = vst [vmem:[#allocation210_spill] sm:$0xff] %v10606_v62  ;;  %7439 = vmatpush1.bf16.msra.mxu0 %v13803_v1  ;;  %6673 = vmatprep.subr.bf16.mxu1 %v13804_v49  ;;  %v13808_v63 = vand.u32 4294901760, %v13794_v36  ;;  %v4644_v35 = vsub.f32 %v13795_v57, %v12577_v6  ;;  %v13809_v28 = vand.u32 4294901760, %v13796_v10  ;;  %v13810_v61 = vand.u32 4294901760, %v13797_v51  ;;  %v13812_v49 = vld [vmem:[#allocation50_spill] sm:$0xff]  ;;  %v13815_v57 = vld [vmem:[#allocation51_spill] sm:$0xff] }
 0x271   : > { %7441 = vmatprep.subr.bf16.mxu0 %v13806_v31  ;;  %v2076_v34 = vsub.f32 %v13793_v21, %v13807_v48  ;;  %v13811_v31 = vand.u32 4294901760, %v13798_v27  ;;  %v13816_v21 = vld [vmem:[#allocation55_spill] sm:$0xff]  ;;  %v13821_v1 = vld [vmem:[#allocation60_spill] sm:$0xff]  ;;  %v13827_v45 = vand.u32 4294901760, %v13815_v57 }
 0x272   : > { %v4632_v3 = vsub.f32 %v13794_v36, %v13808_v63  ;;  %v2070_v52 = vsub.f32 %v13796_v10, %v13809_v28  ;;  %v2082_v33 = vsub.f32 %v13797_v51, %v13810_v61  ;;  %v13814_v63 = vand.u32 4294901760, %v13802_v17  ;;  %v13817_v10 = vld [vmem:[#allocation56_spill] sm:$0xff]  ;;  %v13819_v61 = vld [vmem:[#allocation182_spill] sm:$0xff] }
 0x273   : > { %v4638_v48 = vsub.f32 %v13798_v27, %v13811_v31  ;;  %6675 = vmatpush1.bf16.msra.mxu1 %v13813_v9  ;;  %v2065_v51 = vand.u32 4294901760, %v2064_v13  ;;  %v13820_v31 = vld [vmem:[#allocation59_spill] sm:$0xff]  ;;  %v13822_v9 = vld [vmem:[#allocation62_spill] sm:$0xff]  ;;  %v4645_v36 = vand.u32 4294901760, %v4644_v35  ;;  %v2100_v40 = vsub.f32 %v13815_v57, %v13827_v45 }
 0x274   : > { %v4650_v6 = vsub.f32 %v13802_v17, %v13814_v63  ;;  %7443 = vmatpush1.bf16.msra.mxu0 %v13818_v41  ;;  %6677 = vmatprep.subr.bf16.mxu1 %v13819_v61  ;;  %v2077_v63 = vand.u32 4294901760, %v2076_v34  ;;  %v4633_v17 = vand.u32 4294901760, %v4632_v3  ;;  %v2071_v62 = vand.u32 4294901760, %v2070_v52  ;;  %v13826_v61 = vld [vmem:[#allocation191_spill] sm:$0xff] }
 0x275   : > { %7445 = vmatprep.subr.bf16.mxu0 %v13823_v15  ;;  %v2083_v29 = vand.u32 4294901760, %v2082_v33  ;;  %v4639_v24 = vand.u32 4294901760, %v4638_v48  ;;  %v13825_v41 = vand.u32 4294901760, %v13812_v49  ;;  %v13828_v34 = vand.u32 4294901760, %v13816_v21  ;;  %v13830_v33 = vld [vmem:[#allocation196_spill] sm:$0xff] }
 0x276   : > { %v4651_v27 = vand.u32 4294901760, %v4650_v6  ;;  %v13829_v35 = vand.u32 4294901760, %v13817_v10  ;;  %v13831_v48 = vld [vmem:[#allocation200_spill] sm:$0xff]  ;;  %v13832_v6 = vand.u32 4294901760, %v13820_v31  ;;  %v13833_v45 = vand.u32 4294901760, %v13821_v1 }
 0x277   : > { %v2088_v13 = vsub.f32 %v13812_v49, %v13825_v41  ;;  %6679 = vmatpush1.bf16.msra.mxu1 %v13826_v61  ;;  %v4656_v3 = vsub.f32 %v13816_v21, %v13828_v34  ;;  %v13834_v34 = vand.u32 4294901760, %v13822_v9  ;;  %v13835_v21 = vld [vmem:[#allocation201_spill] sm:$0xff]  ;;  %v13836_v41 = vand.u32 4294901760, %v13824_v44  ;;  %v13856_v49 = vld [vmem:[#allocation88_spill] sm:$0xff] }
 0x278   : > { %v4668_v52 = vsub.f32 %v13817_v10, %v13829_v35  ;;  %7447 = vmatpush1.bf16.msra.mxu0 %v13830_v33  ;;  %6681 = vmatprep.subr.bf16.mxu1 %v13831_v48  ;;  %v2094_v28 = vsub.f32 %v13820_v31, %v13832_v6  ;;  %v2106_v61 = vsub.f32 %v13821_v1, %v13833_v45  ;;  %v13837_v10 = vld [vmem:[#allocation68_spill] sm:$0xff]  ;;  %v13840_v1 = vld [vmem:[#allocation70_spill] sm:$0xff] }
 0x279   : > { %v4662_v15 = vsub.f32 %v13822_v9, %v13834_v34  ;;  %7449 = vmatprep.subr.bf16.mxu0 %v13835_v21  ;;  %v10677_v35 = vpack.c.bf16 %v2059_v43, %v2047_v16  ;;  %v10679_v33 = vpack.c.bf16 %v4627_v39, %v4615_v58  ;;  %v4674_v48 = vsub.f32 %v13824_v44, %v13836_v41  ;;  %v13841_v9 = vld [vmem:[#allocation22_spill] sm:$0xff]  ;;  %v13844_v41 = vld [vmem:[#allocation33_spill] sm:$0xff] }
 0x27a   : > { %v10685_v31 = vpack.c.bf16 %v2077_v63, %v2065_v51  ;;  %v10687_v57 = vpack.c.bf16 %v4645_v36, %v4633_v17  ;;  %v10689_v45 = vpack.c.bf16 %v2083_v29, %v2071_v62  ;;  %v10693_v43 = vpack.c.bf16 %v4651_v27, %v4639_v24  ;;  %v13843_v21 = vld [vmem:[#allocation206_spill] sm:$0xff]  ;;  %v13847_v24 = vld [vmem:[#allocation72_spill] sm:$0xff] }
 0x27b   : > { %6683 = vmatpush1.bf16.msra.mxu1 %v13841_v9  ;;  %v2089_v58 = vand.u32 4294901760, %v2088_v13  ;;  %v2101_v16 = vand.u32 4294901760, %v2100_v40  ;;  %v4657_v39 = vand.u32 4294901760, %v4656_v3  ;;  %v4669_v6 = vand.u32 4294901760, %v4668_v52  ;;  %v13845_v36 = vld [vmem:[#allocation42_spill] sm:$0xff]  ;;  %v13850_v52 = vld [vmem:[#allocation77_spill] sm:$0xff] }
 0x27c   : > { %13838 = vst [vmem:[#allocation211_spill] sm:$0xff] %v10687_v57  ;;  %13839 = vst [vmem:[#allocation212_spill] sm:$0xff] %v10689_v45  ;;  %7451 = vmatpush1.bf16.msra.mxu0 %v13843_v21  ;;  %6685 = vmatprep.subr.bf16.mxu1 %v13844_v41  ;;  %v2095_v51 = vand.u32 4294901760, %v2094_v28  ;;  %v2107_v63 = vand.u32 4294901760, %v2106_v61  ;;  %v4663_v17 = vand.u32 4294901760, %v4662_v15  ;;  %v4675_v62 = vand.u32 4294901760, %v4674_v48 }
 0x27d   : > { %13842 = vst [vmem:[#allocation213_spill] sm:$0xff] %v10693_v43  ;;  %7453 = vmatprep.subr.bf16.mxu0 %v13845_v36  ;;  %v13846_v29 = vand.u32 4294901760, %v13837_v10  ;;  %v13848_v40 = vld [vmem:[#allocation74_spill] sm:$0xff]  ;;  %v13849_v3 = vand.u32 4294901760, %v13840_v1  ;;  %v13851_v61 = vld [vmem:[#allocation79_spill] sm:$0xff]  ;;  %v13852_v21 = vld [vmem:[#allocation80_spill] sm:$0xff]  ;;  %v10720_v28 = vpack.c.bf16 %v4669_v6, %v4657_v39 }
 0x27e   : > { %v13853_v48 = vld [vmem:[#allocation52_spill] sm:$0xff]  ;;  %v13854_v9 = vld [vmem:[#allocation83_spill] sm:$0xff]  ;;  %v13858_v45 = vld [vmem:[#allocation61_spill] sm:$0xff]  ;;  %v10722_v15 = vpack.c.bf16 %v2107_v63, %v2095_v51  ;;  %v10726_v44 = vpack.c.bf16 %v4675_v62, %v4663_v17  ;;  %v13864_v13 = vand.u32 4294901760, %v13847_v24  ;;  %v13867_v51 = vand.u32 4294901760, %v13851_v61 }
 0x27f   : > { %v10701_v34 = vsub.f32 %v13837_v10, %v13846_v29  ;;  %v2124_v41 = vsub.f32 %v13840_v1, %v13849_v3  ;;  %6687 = vmatpush1.bf16.msra.mxu1 %v13853_v48  ;;  %v13855_v29 = vld [vmem:[#allocation86_spill] sm:$0xff]  ;;  %v13857_v43 = vld [vmem:[#allocation91_spill] sm:$0xff]  ;;  %v13859_v57 = vld [vmem:[#allocation73_spill] sm:$0xff]  ;;  %v10718_v3 = vpack.c.bf16 %v2101_v16, %v2089_v58  ;;  %v13866_v16 = vand.u32 4294901760, %v13850_v52 }
 0x280   : > { %7455 = vmatpush1.bf16.msra.mxu0 %v13858_v45  ;;  %6689 = vmatprep.subr.bf16.mxu1 %v13859_v57  ;;  %13860 = vst [vmem:[#allocation214_spill] sm:$0xff] %v10722_v15  ;;  %v13861_v36 = vld [vmem:[#allocation92_spill] sm:$0xff]  ;;  %v13862_v1 = vld [vmem:[#allocation78_spill] sm:$0xff]  ;;  %13863 = vst [vmem:[#allocation215_spill] sm:$0xff] %v10726_v44  ;;  %v4680_v10 = vsub.f32 %v13847_v24, %v13864_v13  ;;  %v13865_v57 = vand.u32 4294901760, %v13848_v40  ;;  %v2130_v63 = vsub.f32 %v13851_v61, %v13867_v51 }
 0x281   : > { %7457 = vmatprep.subr.bf16.mxu0 %v13862_v1  ;;  %v2113_v27 = vand.u32 4294901760, %v10701_v34  ;;  %v2125_v6 = vand.u32 4294901760, %v2124_v41  ;;  %v2118_v39 = vsub.f32 %v13850_v52, %v13866_v16  ;;  %v13868_v17 = vand.u32 4294901760, %v13852_v21  ;;  %v13877_v61 = vld [vmem:[#allocation161_spill] sm:$0xff]  ;;  %v13879_v24 = vld [vmem:[#allocation167_spill] sm:$0xff] }
 0x282   : > { %v4692_v58 = vsub.f32 %v13848_v40, %v13865_v57  ;;  %v13869_v62 = vand.u32 4294901760, %v13854_v9  ;;  %v13870_v57 = vand.u32 4294901760, %v13855_v29  ;;  %v13871_v16 = vand.u32 4294901760, %v13856_v49 }
 0x283   : > { %v4686_v34 = vsub.f32 %v13852_v21, %v13868_v17  ;;  %6691 = vmatpush1.bf16.msra.mxu1 %v10243_v18  ;;  %v13872_v51 = vand.u32 4294901760, %v13857_v43  ;;  %v13873_v17 = vand.u32 4294901760, %v13861_v36  ;;  %v13874_v18 = vld [vmem:[#allocation140_spill] sm:$0xff]  ;;  %v2119_v52 = vand.u32 4294901760, %v2118_v39 }
 0x284   : > { %v4698_v13 = vsub.f32 %v13854_v9, %v13869_v62  ;;  %v2136_v41 = vsub.f32 %v13855_v29, %v13870_v57  ;;  %v2148_v48 = vsub.f32 %v13856_v49, %v13871_v16  ;;  %7459 = vmatpush1.bf16.msra.mxu0 %v10251_v55  ;;  %6693 = vmatprep.subr.bf16.mxu1 %v10260_v37  ;;  %v13875_v9 = vld [vmem:[#allocation146_spill] sm:$0xff]  ;;  %v13876_v29 = vld [vmem:[#allocation149_spill] sm:$0xff]  ;;  %v4681_v16 = vand.u32 4294901760, %v4680_v10 }
 0x285   : > { %v4704_v1 = vsub.f32 %v13857_v43, %v13872_v51  ;;  %v4716_v62 = vsub.f32 %v13861_v36, %v13873_v17  ;;  %v12619_v21 = vand.u32 4294901760, %v13876_v29  ;;  %7461 = vmatprep.subr.bf16.mxu0 %v10268_v50  ;;  %v4693_v49 = vand.u32 4294901760, %v4692_v58  ;;  %v13878_v43 = vld [vmem:[#allocation166_spill] sm:$0xff] }
 0x286   : > { %v12628_v51 = vand.u32 4294901760, %v13877_v61  ;;  %v2131_v37 = vand.u32 4294901760, %v2130_v63  ;;  %v4687_v40 = vand.u32 4294901760, %v4686_v34  ;;  %v4699_v17 = vand.u32 4294901760, %v4698_v13 }
 0x287   : > { %6695 = vmatpush1.bf16.msra.mxu1 %v10275_v30  ;;  %v2137_v45 = vand.u32 4294901760, %v2136_v41  ;;  %v2149_v57 = vand.u32 4294901760, %v2148_v48  ;;  %v4705_v36 = vand.u32 4294901760, %v4704_v1  ;;  %v4717_v10 = vand.u32 4294901760, %v4716_v62  ;;  %v13883_v41 = vld [vmem:[#allocation170_spill] sm:$0xff]  ;;  %v13887_v30 = vld [vmem:[#allocation176_spill] sm:$0xff] }
 0x288   : > { %7463 = vmatpush1.bf16.msra.mxu0 %v10295_v0  ;;  %6697 = vmatprep.subr.bf16.mxu1 %v10313_v53  ;;  %v13880_v58 = vand.u32 4294901760, %v13874_v18  ;;  %v13881_v39 = vand.u32 4294901760, %v13875_v9  ;;  %v4710_v34 = vsub.f32 %v13876_v29, %v12619_v21  ;;  %v4722_v1 = vsub.f32 %v13877_v61, %v12628_v51  ;;  %v13886_v0 = vld [vmem:[#allocation175_spill] sm:$0xff]  ;;  %v13949_v61 = vld [vmem:[#allocation165_spill] sm:$0xff] }
 0x289   : > { %7465 = vmatprep.subr.bf16.mxu0 %v10335_v46  ;;  %v13882_v48 = vand.u32 4294901760, %v13878_v43  ;;  %v10790_v53 = vpack.c.bf16 %v2125_v6, %v2113_v27  ;;  %v10798_v51 = vpack.c.bf16 %v4693_v49, %v4681_v16  ;;  %v10800_v15 = vpack.c.bf16 %v2131_v37, %v2119_v52  ;;  %v13892_v16 = vld [vmem:[#allocation179_spill] sm:$0xff] }
 0x28a   : > { %v2142_v55 = vsub.f32 %v13874_v18, %v13880_v58  ;;  %v2154_v63 = vsub.f32 %v13875_v9, %v13881_v39  ;;  %v13884_v58 = vld [vmem:[#allocation172_spill] sm:$0xff]  ;;  %v13885_v39 = vand.u32 4294901760, %v13879_v24  ;;  %v10804_v62 = vpack.c.bf16 %v2149_v57, %v2137_v45  ;;  %v13950_v18 = vld [vmem:[#allocation174_spill] sm:$0xff]  ;;  %v13951_v9 = vld [vmem:[#allocation177_spill] sm:$0xff] }
 0x28b   : > { %v2160_v13 = vsub.f32 %v13878_v43, %v13882_v48  ;;  %v12629_v44 = vand.u32 4294901760, %v13884_v58  ;;  %6699 = vmatpush1.bf16.msra.mxu1 %v10353_v22  ;;  %v10802_v48 = vpack.c.bf16 %v4699_v17, %v4687_v40  ;;  %v10808_v27 = vpack.c.bf16 %v4717_v10, %v4705_v36  ;;  %v13914_v22 = vld [vmem:[#allocation15_spill] sm:$0xff]  ;;  %v13945_v43 = vld [vmem:[#allocation141_spill] sm:$0xff] }
 0x28c   : > { %v2172_v21 = vsub.f32 %v13879_v24, %v13885_v39  ;;  %7467 = vmatpush1.bf16.msra.mxu0 %v10367_v25  ;;  %6701 = vmatprep.subr.bf16.mxu1 %v10371_v23  ;;  %v2143_v6 = vand.u32 4294901760, %v2142_v55  ;;  %v2155_v39 = vand.u32 4294901760, %v2154_v63  ;;  %v4711_v46 = vand.u32 4294901760, %v4710_v34  ;;  %v13894_v63 = vld [vmem:[#allocation180_spill] sm:$0xff]  ;;  %v13902_v25 = vld [vmem:[#allocation197_spill] sm:$0xff]  ;;  %v13946_v24 = vld [vmem:[#allocation150_spill] sm:$0xff] }
 0x28d   : > { %7469 = vmatprep.subr.bf16.mxu0 %v10388_v26  ;;  %v4723_v50 = vand.u32 4294901760, %v4722_v1  ;;  %v2161_v49 = vand.u32 4294901760, %v2160_v13  ;;  %v13888_v37 = vand.u32 4294901760, %v13883_v41  ;;  %v4740_v45 = vsub.f32 %v13884_v58, %v12629_v44  ;;  %v13943_v58 = vld [vmem:[#allocation211_spill] sm:$0xff] }
 0x28e   : > { %v13889_v52 = vand.u32 4294901760, %v10378_v4  ;;  %v2173_v23 = vand.u32 4294901760, %v2172_v21  ;;  %v13890_v55 = vand.u32 4294901760, %v13886_v0  ;;  %v13891_v26 = vand.u32 4294901760, %v13887_v30  ;;  %v13895_v4 = vld [vmem:[#allocation184_spill] sm:$0xff]  ;;  %v13896_v21 = vld [vmem:[#allocation185_spill] sm:$0xff] }
 0x28f   : > { %v4728_v40 = vsub.f32 %v13883_v41, %v13888_v37  ;;  %v13893_v10 = vand.u32 4294901760, %v10410_v5  ;;  %v13897_v37 = vld [vmem:[#allocation188_spill] sm:$0xff]  ;;  %v13900_v5 = vld [vmem:[#allocation194_spill] sm:$0xff]  ;;  %v10841_v34 = vpack.c.bf16 %v4723_v50, %v4711_v46  ;;  %v4741_v13 = vand.u32 4294901760, %v4740_v45  ;;  %v13953_v41 = vld [vmem:[#allocation189_spill] sm:$0xff] }
 0x290   : > { %1935 = vmatmul.mubr.f32.vlgmr.msra.gmra.mrb[0].mxu1 %v13889_v52  ;;  %v2166_v36 = vsub.f32 %v13886_v0, %v13890_v55  ;;  %v2178_v57 = vsub.f32 %v13887_v30, %v13891_v26  ;;  %v10835_v55 = vpack.c.bf16 %v2155_v39, %v2143_v6  ;;  %v13898_v26 = vld [vmem:[#allocation190_spill] sm:$0xff]  ;;  %v12640_v52 = vand.u32 4294901760, %v13902_v25  ;;  %v13959_v0 = vld [vmem:[#allocation213_spill] sm:$0xff] }
 0x291   : > { %6703 = vmatpush1.bf16.msra.mxu1 %v10445_v12  ;;  %4503 = vmatmul.mubr.f32.vlgmr.msra.gmra.mrb[0].mxu0 %v13893_v10  ;;  %v12632_v44 = vand.u32 4294901760, %v13898_v26  ;;  %v13899_v12 = vld [vmem:[#allocation192_spill] sm:$0xff]  ;;  %v12637_v10 = vand.u32 4294901760, %v13900_v5  ;;  %13901 = vst [vmem:[#allocation216_spill] sm:$0xff] %v10841_v34  ;;  %v4729_v1 = vand.u32 4294901760, %v4728_v40  ;;  %v13904_v39 = vand.u32 4294901760, %v13892_v16 }
 0x292   : > { %7471 = vmatpush1.bf16.msra.mxu0 %v10475_v2  ;;  %6705 = vmatprep.subr.bf16.mxu1 %v10480_v7  ;;  %v10845_v2 = vpack.c.bf16 %v2173_v23, %v2161_v49  ;;  %v2167_v7 = vand.u32 4294901760, %v2166_v36  ;;  %v2179_v6 = vand.u32 4294901760, %v2178_v57  ;;  %v13905_v50 = vand.u32 4294901760, %v13894_v63  ;;  %v13955_v30 = vld [vmem:[#allocation198_spill] sm:$0xff] }
 0x293   : > { %7473 = vmatprep.subr.bf16.mxu0 %v10482_v8  ;;  %2326 = vmatprep.mubr.f32.mxu1 %v10245_v60  ;;  %v10850_v17 = vsub.f32 %v13892_v16, %v13904_v39  ;;  %v13906_v8 = vand.u32 4294901760, %v13895_v4  ;;  %v13907_v40 = vand.u32 4294901760, %v13896_v21  ;;  %v13908_v23 = vand.u32 4294901760, %v13897_v37 }
 0x294   : > { %13903 = vst [vmem:[#allocation217_spill] sm:$0xff] %v10845_v2  ;;  %4894 = vmatprep.mubr.f32.mxu0 %v10253_v42  ;;  %v10857_v46 = vsub.f32 %v13894_v63, %v13905_v50  ;;  %v13909_v57 = vand.u32 4294901760, %v13899_v12  ;;  %v10889_v50 = vsub.f32 %v13900_v5, %v12637_v10  ;;  %v10902_v60 = vpack.c.bf16 %v2179_v6, %v2167_v7  ;;  %v13917_v6 = vld [vmem:[#allocation18_spill] sm:$0xff]  ;;  %v13923_v7 = vld [vmem:[#allocation36_spill] sm:$0xff]  ;;  %v13937_v5 = vld [vmem:[#allocation105_spill] sm:$0xff] }
 0x295   : > { %6707 = vmatpush1.bf16.msra.mxu1 %v10484_v47  ;;  %v10862_v49 = vsub.f32 %v13895_v4, %v13906_v8  ;;  %v10867_v45 = vsub.f32 %v13896_v21, %v13907_v40  ;;  %v10872_v36 = vsub.f32 %v13897_v37, %v13908_v23  ;;  %v10879_v47 = vsub.f32 %v13898_v26, %v12632_v44  ;;  %v13910_v8 = vld [vmem:[#allocation199_spill] sm:$0xff]  ;;  %v13911_v23 = vld [vmem:[#allocation9_spill] sm:$0xff]  ;;  %v13915_v40 = vld [vmem:[#allocation204_spill] sm:$0xff] }
 0x296   : > { %7475 = vmatpush1.bf16.msra.mxu0 %v10488_v14  ;;  %6709 = vmatprep.subr.bf16.mxu1 %v10495_v19  ;;  %v10884_v39 = vsub.f32 %v13899_v12, %v13909_v57  ;;  %v10893_v14 = vpack.c.bf16 %v4741_v13, %v4729_v1  ;;  %v10898_v19 = vsub.f32 %v13902_v25, %v12640_v52  ;;  %v12641_v44 = vand.u32 4294901760, %v13911_v23  ;;  %v13912_v57 = vld [vmem:[#allocation13_spill] sm:$0xff]  ;;  %v13919_v52 = vld [vmem:[#allocation24_spill] sm:$0xff]  ;;  %v13920_v1 = vld [vmem:[#allocation210_spill] sm:$0xff] }
 0x297   : > { %7477 = vmatprep.subr.bf16.mxu0 %v10527_v59  ;;  %v12642_v42 = vand.u32 4294901760, %v13912_v57  ;;  %13913 = vst [vmem:[#allocation218_spill] sm:$0xff] %v10902_v60  ;;  %v4735_v10 = vand.u32 4294901760, %v10850_v17  ;;  %v12643_v2 = vand.u32 4294901760, %v13914_v22  ;;  %v12644_v34 = vand.u32 4294901760, %v13915_v40  ;;  %v13921_v17 = vld [vmem:[#allocation28_spill] sm:$0xff] }
 0x298   : > { %v4747_v59 = vand.u32 4294901760, %v10857_v46  ;;  %v13922_v13 = vld [vmem:[#allocation31_spill] sm:$0xff]  ;;  %v13925_v12 = vld [vmem:[#allocation45_spill] sm:$0xff]  ;;  %v13927_v26 = vld [vmem:[#allocation54_spill] sm:$0xff] }
 0x299   : > { %6711 = vmatpush1.bf16.msra.mxu1 %v10557_v38  ;;  %v13916_v38 = vand.u32 4294901760, %v13910_v8  ;;  %v13924_v37 = vld [vmem:[#allocation39_spill] sm:$0xff]  ;;  %v13935_v4 = vld [vmem:[#allocation93_spill] sm:$0xff] }
 0x29a   : > { %7479 = vmatpush1.bf16.msra.mxu0 %v10563_v11  ;;  %6713 = vmatprep.subr.bf16.mxu1 %v10565_v54  ;;  %v10927_v11 = vsub.f32 %v13911_v23, %v12641_v44  ;;  %v10932_v54 = vsub.f32 %v13912_v57, %v12642_v42  ;;  %v13918_v44 = vld [vmem:[#allocation209_spill] sm:$0xff]  ;;  %v13930_v23 = vld [vmem:[#allocation66_spill] sm:$0xff]  ;;  %v13944_v42 = vld [vmem:[#allocation135_spill] sm:$0xff]  ;;  %v11011_v60 = vpack.c.bf16 %v4747_v59, %v4735_v10  ;;  %v13958_v10 = vand.u32 4294901760, %v13919_v52 }
 0x29b   : > { %v10920_v46 = vsub.f32 %v13910_v8, %v13916_v38  ;;  %7481 = vmatprep.subr.bf16.mxu0 %v10568_v56  ;;  %v10938_v38 = vsub.f32 %v13914_v22, %v12643_v2  ;;  %v10943_v56 = vsub.f32 %v13915_v40, %v12644_v34  ;;  %v13928_v34 = vld [vmem:[#allocation57_spill] sm:$0xff]  ;;  %v13932_v40 = vld [vmem:[#allocation75_spill] sm:$0xff]  ;;  %v13956_v2 = vld [vmem:[#allocation212_spill] sm:$0xff] }
 0x29c   : > { %v13931_v22 = vld [vmem:[#allocation69_spill] sm:$0xff]  ;;  %v2209_v29 = vand.u32 4294901760, %v10927_v11  ;;  %v2226_v59 = vsub.f32 %v13919_v52, %v13958_v10 }
 0x29d   : > { %6715 = vmatpush1.bf16.msra.mxu1 %v10596_v32  ;;  %v13933_v57 = vld [vmem:[#allocation81_spill] sm:$0xff]  ;;  %v4771_v25 = vand.u32 4294901760, %v10920_v46  ;;  %v13957_v46 = vand.u32 4294901760, %v13917_v6  ;;  %v4777_v63 = vand.u32 4294901760, %v10938_v38  ;;  %v13961_v32 = vand.u32 4294901760, %v10867_v45 }
 0x29e   : > { %7483 = vmatpush1.bf16.msra.mxu0 %v10602_v20  ;;  %6717 = vmatprep.subr.bf16.mxu1 %v13918_v44  ;;  %v13929_v20 = vld [vmem:[#allocation63_spill] sm:$0xff]  ;;  %v13934_v8 = vld [vmem:[#allocation85_spill] sm:$0xff]  ;;  %v13952_v44 = vld [vmem:[#allocation186_spill] sm:$0xff]  ;;  %v13964_v38 = vand.u32 4294901760, %v10884_v39 }
 0x29f   : > { %7485 = vmatprep.subr.bf16.mxu0 %v13920_v1  ;;  %v13926_v1 = vld [vmem:[#allocation48_spill] sm:$0xff]  ;;  %v13936_v21 = vld [vmem:[#allocation97_spill] sm:$0xff]  ;;  %v2214_v16 = vsub.f32 %v13917_v6, %v13957_v46  ;;  %v13960_v46 = vand.u32 4294901760, %v10862_v49  ;;  %v13967_v49 = vand.u32 4294901760, %v13921_v17 }
 0x2a1   : > { %6719 = vmatpush1.bf16.msra.mxu1 %v10677_v35  ;;  %v13938_v35 = vld [vmem:[#allocation109_spill] sm:$0xff]  ;;  %v11038_v6 = vpack.c.bf16 %v13961_v32, %v13960_v46  ;;  %v4782_v45 = vsub.f32 %v13921_v17, %v13967_v49  ;;  %v12671_v32 = vand.u32 4294901760, %v13926_v1  ;;  %v13968_v46 = vld [vmem:[#allocation214_spill] sm:$0xff] }
 0x2a2   : > { %7487 = vmatpush1.bf16.msra.mxu0 %v10679_v33  ;;  %6721 = vmatprep.subr.bf16.mxu1 %v10685_v31  ;;  %v13948_v31 = vld [vmem:[#allocation159_spill] sm:$0xff]  ;;  %v2221_v33 = vand.u32 4294901760, %v10932_v54 }
 0x2a3   : > { %7489 = vmatprep.subr.bf16.mxu0 %v13943_v58  ;;  %v13954_v58 = vld [vmem:[#allocation193_spill] sm:$0xff] }
 0x2a4   : > { %v11063_v39 = vpack.c.bf16 %v2221_v33, %v2209_v29  ;;  %v12672_v29 = vand.u32 4294901760, %v13928_v34  ;;  %v12676_v33 = vand.u32 4294901760, %v13930_v23 }
 0x2a5   : > { %6723 = vmatpush1.bf16.msra.mxu1 %v13956_v2  ;;  %v4789_v2 = vand.u32 4294901760, %v10943_v56  ;;  %v13965_v56 = vand.u32 4294901760, %v10889_v50  ;;  %v2215_v50 = vand.u32 4294901760, %v2214_v16  ;;  %v12675_v16 = vand.u32 4294901760, %v13929_v20 }
 0x2a6   : > { %7491 = vmatpush1.bf16.msra.mxu0 %v13959_v0  ;;  %6725 = vmatprep.subr.bf16.mxu1 %v10718_v3  ;;  %v13962_v0 = vand.u32 4294901760, %v10872_v36  ;;  %v13963_v3 = vand.u32 4294901760, %v10879_v47  ;;  %v12674_v36 = vand.u32 4294901760, %v13924_v37  ;;  %v12670_v47 = vand.u32 4294901760, %v13925_v12 }
 0x2a7   : > { %7493 = vmatprep.subr.bf16.mxu0 %v10720_v28  ;;  %v11050_v11 = vpack.c.bf16 %v13965_v56, %v13964_v38  ;;  %v13966_v28 = vand.u32 4294901760, %v10898_v19  ;;  %v12673_v19 = vand.u32 4294901760, %v13927_v26  ;;  %v13970_v38 = vand.u32 4294901760, %v13922_v13 }
 0x2a8   : > { %v11044_v10 = vpack.c.bf16 %v13963_v3, %v13962_v0  ;;  %v2227_v0 = vand.u32 4294901760, %v2226_v59  ;;  %v11068_v3 = vpack.c.bf16 %v4789_v2, %v4777_v63  ;;  %v12678_v63 = vand.u32 4294901760, %v13932_v40 }
 0x2a9   : > { %v11054_v54 = vpack.c.bf16 %v4771_v25, %v13966_v28  ;;  %6727 = vmatpush1.bf16.msra.mxu1 %v13968_v46  ;;  %v13969_v25 = vld [vmem:[#allocation215_spill] sm:$0xff]  ;;  %v4794_v56 = vsub.f32 %v13922_v13, %v13970_v38  ;;  %v13971_v28 = vand.u32 4294901760, %v13923_v7  ;;  %v4783_v59 = vand.u32 4294901760, %v4782_v45 }
 0x2aa   : > { %7495 = vmatpush1.bf16.msra.mxu0 %v13969_v25  ;;  %6729 = vmatprep.subr.bf16.mxu1 %v10790_v53  ;;  %v12677_v53 = vand.u32 4294901760, %v13931_v22  ;;  %v2244_v2 = vsub.f32 %v13924_v37, %v12674_v36  ;;  %v4800_v46 = vsub.f32 %v13925_v12, %v12670_v47  ;;  %v11092_v25 = vpack.c.bf16 %v2227_v0, %v2215_v50 }
 0x2ab   : > { %v2232_v49 = vsub.f32 %v13923_v7, %v13971_v28  ;;  %7497 = vmatprep.subr.bf16.mxu0 %v10798_v51  ;;  %v4812_v51 = vsub.f32 %v13926_v1, %v12671_v32  ;;  %v2238_v45 = vsub.f32 %v13927_v26, %v12673_v19  ;;  %v12680_v38 = vand.u32 4294901760, %v13933_v57 }
 0x2ac   : > { %v12679_v28 = vand.u32 4294901760, %v13934_v8  ;;  %v4795_v47 = vand.u32 4294901760, %v4794_v56  ;;  %v2250_v32 = vsub.f32 %v13928_v34, %v12672_v29  ;;  %v4806_v0 = vsub.f32 %v13929_v20, %v12675_v16  ;;  %v13978_v20 = vld [vmem:[#allocation218_spill] sm:$0xff] }
 0x2ad   : > { %6731 = vmatpush1.bf16.msra.mxu1 %v10800_v15  ;;  %v2268_v56 = vsub.f32 %v13932_v40, %v12678_v63  ;;  %v2233_v29 = vand.u32 4294901760, %v2232_v49  ;;  %v2245_v19 = vand.u32 4294901760, %v2244_v2  ;;  %v4801_v36 = vand.u32 4294901760, %v4800_v46  ;;  %v13972_v15 = vld [vmem:[#allocation216_spill] sm:$0xff]  ;;  %v13973_v63 = vld [vmem:[#allocation217_spill] sm:$0xff] }
 0x2ae   : > { %7499 = vmatpush1.bf16.msra.mxu0 %v10802_v48  ;;  %6733 = vmatprep.subr.bf16.mxu1 %v10804_v62  ;;  %v4818_v48 = vsub.f32 %v13930_v23, %v12676_v33  ;;  %v2256_v62 = vsub.f32 %v13931_v22, %v12677_v53  ;;  %v2239_v50 = vand.u32 4294901760, %v2238_v45  ;;  %v4824_v16 = vsub.f32 %v13933_v57, %v12680_v38  ;;  %v13977_v22 = vld [vmem:[#allocation117_spill] sm:$0xff] }
 0x2af   : > { %7501 = vmatprep.subr.bf16.mxu0 %v10808_v27  ;;  %v4813_v27 = vand.u32 4294901760, %v4812_v51  ;;  %v4836_v33 = vsub.f32 %v13934_v8, %v12679_v28  ;;  %v2251_v49 = vand.u32 4294901760, %v2250_v32  ;;  %v13974_v2 = vand.u32 4294901760, %v13935_v4 }
 0x2b0   : > { %v13975_v46 = vand.u32 4294901760, %v13936_v21  ;;  %v4807_v28 = vand.u32 4294901760, %v4806_v0  ;;  %v4819_v38 = vand.u32 4294901760, %v4818_v48  ;;  %v2257_v53 = vand.u32 4294901760, %v2256_v62  ;;  %v13982_v0 = vld [vmem:[#allocation126_spill] sm:$0xff] }
 0x2b1   : > { %6735 = vmatpush1.bf16.msra.mxu1 %v10835_v55  ;;  %v2262_v55 = vsub.f32 %v13935_v4, %v13974_v2  ;;  %v2269_v57 = vand.u32 4294901760, %v2268_v56  ;;  %v6748_v8 = vpack.c.bf16 %v2245_v19, %v2233_v29  ;;  %v12702_v40 = vand.u32 4294901760, %v13977_v22 }
 0x2b2   : > { %7503 = vmatpush1.bf16.msra.mxu0 %v13972_v15  ;;  %6737 = vmatprep.subr.bf16.mxu1 %v13973_v63  ;;  %v2274_v51 = vsub.f32 %v13936_v21, %v13975_v46  ;;  %v7514_v15 = vpack.c.bf16 %v4795_v47, %v4783_v59  ;;  %v13976_v63 = vld [vmem:[#allocation114_spill] sm:$0xff]  ;;  %v7516_v2 = vpack.c.bf16 %v4813_v27, %v4801_v36  ;;  %v4825_v4 = vand.u32 4294901760, %v4824_v16  ;;  %v13981_v16 = vld [vmem:[#allocation123_spill] sm:$0xff] }
 0x2b3   : > { %7505 = vmatprep.subr.bf16.mxu0 %v10893_v14  ;;  %v12703_v32 = vand.u32 4294901760, %v13976_v63  ;;  %v4837_v23 = vand.u32 4294901760, %v4836_v33  ;;  %v13979_v46 = vand.u32 4294901760, %v13937_v5  ;;  %v6750_v14 = vpack.c.bf16 %v2251_v49, %v2239_v50 }
 0x2b4   : > { %v2263_v47 = vand.u32 4294901760, %v2262_v55  ;;  %v2275_v19 = vand.u32 4294901760, %v2274_v51  ;;  %v13980_v29 = vand.u32 4294901760, %v13938_v35  ;;  %v6752_v36 = vpack.c.bf16 %v2269_v57, %v2257_v53 }
 0x2b5   : > { %6739 = vmatpush1.bf16.msra.mxu1 %v13978_v20  ;;  %v4830_v45 = vsub.f32 %v13937_v5, %v13979_v46  ;;  %v7518_v20 = vpack.c.bf16 %v4819_v38, %v4807_v28  ;;  %v12695_v33 = vand.u32 4294901760, %v13981_v16  ;;  %v12693_v48 = vand.u32 4294901760, %v13982_v0  ;;  %v13983_v38 = vld [vmem:[#allocation153_spill] sm:$0xff] }
 0x2b6   : > { %7507 = vmatpush1.bf16.msra.mxu0 %v11011_v60  ;;  %6741 = vmatprep.subr.bf16.mxu1 %v11038_v6  ;;  %v4842_v59 = vsub.f32 %v13938_v35, %v13980_v29  ;;  %v2280_v60 = vsub.f32 %v13976_v63, %v12703_v32  ;;  %v2292_v6 = vsub.f32 %v13977_v22, %v12702_v40  ;;  %v12692_v50 = vand.u32 4294901760, %v13944_v42  ;;  %v14012_v32 = vld [vmem:[#allocation148_spill] sm:$0xff] }
 0x2b7   : > { %7509 = vmatprep.subr.bf16.mxu0 %v11044_v10  ;;  %v12691_v62 = vand.u32 4294901760, %v13945_v43  ;;  %v7520_v10 = vpack.c.bf16 %v4837_v23, %v4825_v4  ;;  %v4831_v57 = vand.u32 4294901760, %v4830_v45  ;;  %v12689_v53 = vand.u32 4294901760, %v13946_v24 }
 0x2b8   : > { %v12688_v28 = vand.u32 4294901760, %v13983_v38  ;;  %v6754_v56 = vpack.c.bf16 %v2275_v19, %v2263_v47  ;;  %v4843_v27 = vand.u32 4294901760, %v4842_v59  ;;  %v12690_v49 = vand.u32 4294901760, %v13948_v31 }
 0x2b9   : > { %6743 = vmatpush1.bf16.msra.mxu1 %v11050_v11  ;;  %v12694_v55 = vand.u32 4294901760, %v13949_v61  ;;  %v4848_v4 = vsub.f32 %v13981_v16, %v12695_v33  ;;  %v4860_v23 = vsub.f32 %v13982_v0, %v12693_v48  ;;  %v12696_v11 = vand.u32 4294901760, %v13950_v18 }
 0x2ba   : > { %7511 = vmatpush1.bf16.msra.mxu0 %v11054_v54  ;;  %6745 = vmatprep.subr.bf16.mxu1 %v11063_v39  ;;  %v12701_v54 = vand.u32 4294901760, %v13951_v9  ;;  %v2281_v39 = vand.u32 4294901760, %v2280_v60  ;;  %v2293_v51 = vand.u32 4294901760, %v2292_v6  ;;  %v2286_v45 = vsub.f32 %v13944_v42, %v12692_v50 }
 0x2bb   : > { %7513 = vmatprep.subr.bf16.mxu0 %v11068_v3  ;;  %v2298_v3 = vsub.f32 %v13945_v43, %v12691_v62  ;;  %v4854_v46 = vsub.f32 %v13946_v24, %v12689_v53  ;;  %v4866_v47 = vsub.f32 %v13983_v38, %v12688_v28  ;;  %v12700_v19 = vand.u32 4294901760, %v13952_v44 }
 0x2bc   : > { %v12699_v29 = vand.u32 4294901760, %v13953_v41  ;;  %v2304_v59 = vsub.f32 %v13948_v31, %v12690_v49  ;;  %v12697_v60 = vand.u32 4294901760, %v13954_v58  ;;  %v12698_v6 = vand.u32 4294901760, %v13955_v30 }
 0x2bd   : > { %6747 = vmatpush1.bf16.msra.mxu1 %v11092_v25  ;;  %v2316_v25 = vsub.f32 %v13949_v61, %v12694_v55  ;;  %v4849_v28 = vand.u32 4294901760, %v4848_v4  ;;  %v4861_v53 = vand.u32 4294901760, %v4860_v23  ;;  %v7522_v49 = vpack.c.bf16 %v4843_v27, %v4831_v57 }
 0x2be   : > { %7515 = vmatpush1.bf16.msra.mxu0 %v7514_v15  ;;  %6749 = vmatprep.subr.bf16.mxu1 %v6748_v8  ;;  %v4872_v15 = vsub.f32 %v13950_v18, %v12696_v11  ;;  %v4884_v8 = vsub.f32 %v13951_v9, %v12701_v54  ;;  %v6756_v62 = vpack.c.bf16 %v2293_v51, %v2281_v39  ;;  %v2287_v50 = vand.u32 4294901760, %v2286_v45 }
 0x2bf   : > { %7517 = vmatprep.subr.bf16.mxu0 %v7516_v2  ;;  %v2299_v48 = vand.u32 4294901760, %v2298_v3  ;;  %v4855_v55 = vand.u32 4294901760, %v4854_v46  ;;  %v4867_v33 = vand.u32 4294901760, %v4866_v47  ;;  %v2310_v2 = vsub.f32 %v13952_v44, %v12700_v19  ;;  %v14009_v19 = vld [vmem:[#allocation106_spill] sm:$0xff] }
 0x2c0   : > { %v2322_v4 = vsub.f32 %v13953_v41, %v12699_v29  ;;  %v2305_v23 = vand.u32 4294901760, %v2304_v59  ;;  %v2317_v11 = vand.u32 4294901760, %v2316_v25  ;;  %v4878_v57 = vsub.f32 %v13954_v58, %v12697_v60  ;;  %v14008_v29 = vld [vmem:[#allocation104_spill] sm:$0xff] }
 0x2c1   : > { %6751 = vmatpush1.bf16.msra.mxu1 %v6750_v14  ;;  %v4890_v14 = vsub.f32 %v13955_v30, %v12698_v6  ;;  %v7524_v27 = vpack.c.bf16 %v4861_v53, %v4849_v28  ;;  %v4873_v39 = vand.u32 4294901760, %v4872_v15  ;;  %v4885_v51 = vand.u32 4294901760, %v4884_v8  ;;  %v13984_v53 = vld [vmem:[#allocation113_spill] sm:$0xff]  ;;  %v13985_v28 = vld [vmem:[#allocation115_spill] sm:$0xff] }
 0x2c2   : > { %7519 = vmatpush1.bf16.msra.mxu0 %v7518_v20  ;;  %6753 = vmatprep.subr.bf16.mxu1 %v6752_v36  ;;  %v6758_v45 = vpack.c.bf16 %v2299_v48, %v2287_v50  ;;  %v2311_v3 = vand.u32 4294901760, %v2310_v2  ;;  %v2323_v46 = vand.u32 4294901760, %v2322_v4  ;;  %v7526_v20 = vpack.c.bf16 %v4867_v33, %v4855_v55  ;;  %v13986_v48 = vld [vmem:[#allocation118_spill] sm:$0xff]  ;;  %v13987_v50 = vld [vmem:[#allocation119_spill] sm:$0xff]  ;;  %v13989_v33 = vld [vmem:[#allocation124_spill] sm:$0xff] }
 0x2c3   : > { %7521 = vmatprep.subr.bf16.mxu0 %v7520_v10  ;;  %v6760_v36 = vpack.c.bf16 %v2317_v11, %v2305_v23  ;;  %v4879_v47 = vand.u32 4294901760, %v4878_v57  ;;  %v4891_v59 = vand.u32 4294901760, %v4890_v14  ;;  %v7528_v25 = vpack.c.bf16 %v4885_v51, %v4873_v39  ;;  %v13990_v55 = vld [vmem:[#allocation127_spill] sm:$0xff]  ;;  %v13991_v11 = vld [vmem:[#allocation128_spill] sm:$0xff]  ;;  %v13992_v2 = vld [vmem:[#allocation130_spill] sm:$0xff] }
 0x2c4   : > { %v6762_v60 = vpack.c.bf16 %v2323_v46, %v2311_v3  ;;  %v6764_v15 = vpack.c.bf16 %v13985_v28, %v13984_v53  ;;  %v7534_v8 = vpack.c.bf16 %v13991_v11, %v13990_v55  ;;  %v13993_v4 = vld [vmem:[#allocation132_spill] sm:$0xff]  ;;  %v13995_v14 = vld [vmem:[#allocation137_spill] sm:$0xff]  ;;  %v6774_v54 = vpack.c.bf16 %v14009_v19, %v14008_v29 }
 0x2c5   : > { %6755 = vmatpush1.bf16.msra.mxu1 %v6754_v56  ;;  %v7530_v10 = vpack.c.bf16 %v4891_v59, %v4879_v47  ;;  %v7532_v56 = vpack.c.bf16 %v13987_v50, %v13986_v48  ;;  %v6768_v23 = vpack.c.bf16 %v13993_v4, %v13992_v2  ;;  %v13994_v57 = vld [vmem:[#allocation136_spill] sm:$0xff]  ;;  %v13996_v39 = vld [vmem:[#allocation145_spill] sm:$0xff]  ;;  %v14002_v47 = vld [vmem:[#allocation94_spill] sm:$0xff] }
 0x2c6   : > { %7523 = vmatpush1.bf16.msra.mxu0 %v7522_v49  ;;  %6757 = vmatprep.subr.bf16.mxu1 %v6756_v62  ;;  %v13988_v62 = vld [vmem:[#allocation122_spill] sm:$0xff]  ;;  %v13997_v51 = vld [vmem:[#allocation169_spill] sm:$0xff]  ;;  %v14000_v46 = vld [vmem:[#allocation152_spill] sm:$0xff] }
 0x2c7   : > { %7525 = vmatprep.subr.bf16.mxu0 %v7524_v27  ;;  %v6766_v49 = vpack.c.bf16 %v13989_v33, %v13988_v62  ;;  %v7536_v27 = vpack.c.bf16 %v13995_v14, %v13994_v57  ;;  %v14003_v59 = vld [vmem:[#allocation96_spill] sm:$0xff]  ;;  %v14006_v6 = vld [vmem:[#allocation133_spill] sm:$0xff] }
 0x2c8   : > { %v14019_v19 = vld [vmem:[#allocation12_spill] sm:$0xff]  ;;  %v14021_v29 = vld [vmem:[#allocation17_spill] sm:$0xff] }
 0x2c9   : > { %6759 = vmatpush1.bf16.msra.mxu1 %v6758_v45  ;;  %v13999_v45 = vld [vmem:[#allocation143_spill] sm:$0xff] }
 0x2ca   : > { %7527 = vmatpush1.bf16.msra.mxu0 %v7526_v20  ;;  %6761 = vmatprep.subr.bf16.mxu1 %v6760_v36  ;;  %v14001_v20 = vld [vmem:[#allocation156_spill] sm:$0xff] }
 0x2cb   : > { %7529 = vmatprep.subr.bf16.mxu0 %v7528_v25  ;;  %v7538_v36 = vpack.c.bf16 %v14001_v20, %v14000_v46  ;;  %v6772_v25 = vpack.c.bf16 %v14003_v59, %v14002_v47  ;;  %v14015_v59 = vld [vmem:[#allocation203_spill] sm:$0xff] }
 0x2cc   : > { %v14017_v47 = vld [vmem:[#allocation207_spill] sm:$0xff] }
 0x2cd   : > { %6763 = vmatpush1.bf16.msra.mxu1 %v6762_v60  ;;  %v13998_v60 = vld [vmem:[#allocation139_spill] sm:$0xff] }
 0x2ce   : > { %7531 = vmatpush1.bf16.msra.mxu0 %v7530_v10  ;;  %6765 = vmatprep.subr.bf16.mxu1 %v6764_v15  ;;  %v6770_v3 = vpack.c.bf16 %v13999_v45, %v13998_v60  ;;  %v14004_v10 = vld [vmem:[#allocation100_spill] sm:$0xff]  ;;  %v14005_v15 = vld [vmem:[#allocation101_spill] sm:$0xff] }
 0x2cf   : > { %7533 = vmatprep.subr.bf16.mxu0 %v7532_v56  ;;  %v7540_v56 = vpack.c.bf16 %v14005_v15, %v14004_v10  ;;  %v14016_v10 = vld [vmem:[#allocation208_spill] sm:$0xff] }
 0x2d0   : > { %2328 = vmatmul.mubr.f32.vlgmr.msra.gmra.mrb[0].mxu1 %v13996_v39  ;;  %v6778_v20 = vpack.c.bf16 %v14017_v47, %v14016_v10  ;;  %v14027_v47 = vld [vmem:[#allocation30_spill] sm:$0xff]  ;;  %v14029_v10 = vld [vmem:[#allocation35_spill] sm:$0xff] }
 0x2d1   : > { %6767 = vmatpush1.bf16.msra.mxu1 %v6766_v49  ;;  %4896 = vmatmul.mubr.f32.vlgmr.msra.gmra.mrb[0].mxu0 %v13997_v51  ;;  %v14007_v49 = vld [vmem:[#allocation138_spill] sm:$0xff] }
 0x2d2   : > { %7535 = vmatpush1.bf16.msra.mxu0 %v7534_v8  ;;  %6769 = vmatprep.subr.bf16.mxu1 %v6768_v23  ;;  %v14010_v8 = vld [vmem:[#allocation108_spill] sm:$0xff]  ;;  %v14011_v23 = vld [vmem:[#allocation110_spill] sm:$0xff] }
 0x2d3   : > { %7537 = vmatprep.subr.bf16.mxu0 %v7536_v27  ;;  %2528 = vmatprep.mubr.f32.mxu1 %v14006_v6  ;;  %v7542_v40 = vpack.c.bf16 %v14011_v23, %v14010_v8  ;;  %v14013_v51 = vld [vmem:[#allocation154_spill] sm:$0xff]  ;;  %v14014_v27 = vld [vmem:[#allocation163_spill] sm:$0xff]  ;;  %v14022_v23 = vld [vmem:[#allocation20_spill] sm:$0xff] }
 0x2d4   : > { %5096 = vmatprep.mubr.f32.mxu0 %v14007_v49  ;;  %v6776_v39 = vpack.c.bf16 %v14013_v51, %v14012_v32  ;;  %v7544_v15 = vpack.c.bf16 %v14015_v59, %v14014_v27  ;;  %v14023_v8 = vld [vmem:[#allocation21_spill] sm:$0xff]  ;;  %v14025_v32 = vld [vmem:[#allocation26_spill] sm:$0xff] }
 0x2d5   : > { %6771 = vmatpush1.bf16.msra.mxu1 %v6770_v3  ;;  %v14018_v3 = vld [vmem:[#allocation11_spill] sm:$0xff]  ;;  %v7548_v51 = vpack.c.bf16 %v14023_v8, %v14022_v23 }
 0x2d6   : > { %7539 = vmatpush1.bf16.msra.mxu0 %v7538_v36  ;;  %6773 = vmatprep.subr.bf16.mxu1 %v6772_v25  ;;  %v7546_v36 = vpack.c.bf16 %v14019_v19, %v14018_v3  ;;  %v14020_v25 = vld [vmem:[#allocation16_spill] sm:$0xff]  ;;  %v14030_v19 = vld [vmem:[#allocation38_spill] sm:$0xff] }
 0x2d7   : > { %7541 = vmatprep.subr.bf16.mxu0 %v7540_v56  ;;  %v6780_v46 = vpack.c.bf16 %v14021_v29, %v14020_v25  ;;  %v14024_v56 = vld [vmem:[#allocation25_spill] sm:$0xff]  ;;  %v14031_v3 = vld [vmem:[#allocation202_spill] sm:$0xff]  ;;  %v14033_v25 = vld [vmem:[#allocation43_spill] sm:$0xff] }
 0x2d8   : > { %v6782_v59 = vpack.c.bf16 %v14025_v32, %v14024_v56  ;;  %v7552_v29 = vpack.c.bf16 %v14031_v3, %v14030_v19  ;;  %v14035_v32 = vld [vmem:[#allocation47_spill] sm:$0xff] }
 0x2d9   : > { %6775 = vmatpush1.bf16.msra.mxu1 %v6774_v54  ;;  %v14026_v54 = vld [vmem:[#allocation29_spill] sm:$0xff]  ;;  %v14037_v56 = vld [vmem:[#allocation51_spill] sm:$0xff] }
 0x2da   : > { %7543 = vmatpush1.bf16.msra.mxu0 %v7542_v40  ;;  %6777 = vmatprep.subr.bf16.mxu1 %v6776_v39  ;;  %v7550_v40 = vpack.c.bf16 %v14027_v47, %v14026_v54  ;;  %v14028_v39 = vld [vmem:[#allocation34_spill] sm:$0xff]  ;;  %v14038_v47 = vld [vmem:[#allocation55_spill] sm:$0xff]  ;;  %v14039_v54 = vld [vmem:[#allocation56_spill] sm:$0xff] }
 0x2db   : > { %7545 = vmatprep.subr.bf16.mxu0 %v7544_v15  ;;  %v6784_v27 = vpack.c.bf16 %v14029_v10, %v14028_v39  ;;  %v14032_v15 = vld [vmem:[#allocation41_spill] sm:$0xff]  ;;  %v7556_v10 = vpack.c.bf16 %v14039_v54, %v14038_v47  ;;  %v14041_v39 = vld [vmem:[#allocation60_spill] sm:$0xff] }
 0x2dc   : > { %v6786_v8 = vpack.c.bf16 %v14033_v25, %v14032_v15  ;;  %v14043_v25 = vld [vmem:[#allocation65_spill] sm:$0xff]  ;;  %v14045_v15 = vld [vmem:[#allocation70_spill] sm:$0xff] }
 0x2dd   : > { %6779 = vmatpush1.bf16.msra.mxu1 %v6778_v20  ;;  %v14034_v20 = vld [vmem:[#allocation44_spill] sm:$0xff] }
 0x2de   : > { %7547 = vmatpush1.bf16.msra.mxu0 %v7546_v36  ;;  %6781 = vmatprep.subr.bf16.mxu1 %v6780_v46  ;;  %v7554_v36 = vpack.c.bf16 %v14035_v32, %v14034_v20  ;;  %v14036_v46 = vld [vmem:[#allocation50_spill] sm:$0xff]  ;;  %v14046_v32 = vld [vmem:[#allocation72_spill] sm:$0xff] }
 0x2df   : > { %7549 = vmatprep.subr.bf16.mxu0 %v7548_v51  ;;  %v6788_v23 = vpack.c.bf16 %v14037_v56, %v14036_v46  ;;  %v14040_v51 = vld [vmem:[#allocation59_spill] sm:$0xff]  ;;  %v14047_v20 = vld [vmem:[#allocation74_spill] sm:$0xff] }
 0x2e0   : > { %v6790_v3 = vpack.c.bf16 %v14041_v39, %v14040_v51  ;;  %v7560_v56 = vpack.c.bf16 %v14047_v20, %v14046_v32  ;;  %v14049_v46 = vld [vmem:[#allocation79_spill] sm:$0xff]  ;;  %v14053_v51 = vld [vmem:[#allocation88_spill] sm:$0xff] }
 0x2e1   : > { %6783 = vmatpush1.bf16.msra.mxu1 %v6782_v59  ;;  %v14042_v59 = vld [vmem:[#allocation62_spill] sm:$0xff]  ;;  %v14051_v39 = vld [vmem:[#allocation83_spill] sm:$0xff] }
 0x2e2   : > { %7551 = vmatpush1.bf16.msra.mxu0 %v7550_v40  ;;  %6785 = vmatprep.subr.bf16.mxu1 %v6784_v27  ;;  %v7558_v40 = vpack.c.bf16 %v14043_v25, %v14042_v59  ;;  %v14044_v27 = vld [vmem:[#allocation68_spill] sm:$0xff]  ;;  %v14054_v25 = vld [vmem:[#allocation91_spill] sm:$0xff] }
 0x2e3   : > { %7553 = vmatprep.subr.bf16.mxu0 %v7552_v29  ;;  %v6792_v19 = vpack.c.bf16 %v14045_v15, %v14044_v27  ;;  %v14048_v29 = vld [vmem:[#allocation77_spill] sm:$0xff]  ;;  %v14055_v59 = vld [vmem:[#allocation92_spill] sm:$0xff] }
 0x2e4   : > { %v6794_v54 = vpack.c.bf16 %v14049_v46, %v14048_v29  ;;  %v7564_v15 = vpack.c.bf16 %v14055_v59, %v14054_v25  ;;  %v14072_v59 = vld [vmem:[#allocation179_spill] sm:$0xff] }
 0x2e5   : > { %6787 = vmatpush1.bf16.msra.mxu1 %v6786_v8  ;;  %v14050_v8 = vld [vmem:[#allocation80_spill] sm:$0xff] }
 0x2e6   : > { %7555 = vmatpush1.bf16.msra.mxu0 %v7554_v36  ;;  %6789 = vmatprep.subr.bf16.mxu1 %v6788_v23  ;;  %v7562_v36 = vpack.c.bf16 %v14051_v39, %v14050_v8  ;;  %v14052_v23 = vld [vmem:[#allocation86_spill] sm:$0xff]  ;;  %v14062_v39 = vld [vmem:[#allocation167_spill] sm:$0xff] }
 0x2e7   : > { %7557 = vmatprep.subr.bf16.mxu0 %v7556_v10  ;;  %v6796_v47 = vpack.c.bf16 %v14053_v51, %v14052_v23  ;;  %v14056_v10 = vld [vmem:[#allocation146_spill] sm:$0xff] }
 0x2e8   : > { %v14063_v8 = vld [vmem:[#allocation166_spill] sm:$0xff] }
 0x2e9   : > { %6791 = vmatpush1.bf16.msra.mxu1 %v6790_v3  ;;  %v14057_v3 = vld [vmem:[#allocation140_spill] sm:$0xff]  ;;  %v14064_v29 = vpack.c.bf16 %v14062_v39, %v14063_v8  ;;  %v14066_v51 = vld [vmem:[#allocation170_spill] sm:$0xff] }
 0x2ea   : > { %7559 = vmatpush1.bf16.msra.mxu0 %v7558_v40  ;;  %6793 = vmatprep.subr.bf16.mxu1 %v6792_v19  ;;  %v14058_v20 = vpack.c.bf16 %v14056_v10, %v14057_v3  ;;  %v14059_v40 = vld [vmem:[#allocation161_spill] sm:$0xff]  ;;  %v14075_v3 = vld [vmem:[#allocation184_spill] sm:$0xff] }
 0x2eb   : > { %7561 = vmatprep.subr.bf16.mxu0 %v7560_v56  ;;  %v14060_v19 = vld [vmem:[#allocation149_spill] sm:$0xff]  ;;  %v14065_v56 = vld [vmem:[#allocation172_spill] sm:$0xff] }
 0x2ec   : > { %v14061_v46 = vpack.c.bf16 %v14059_v40, %v14060_v19  ;;  %v14067_v23 = vpack.c.bf16 %v14065_v56, %v14066_v51  ;;  %v14078_v19 = vld [vmem:[#allocation188_spill] sm:$0xff]  ;;  %v14084_v51 = vld [vmem:[#allocation197_spill] sm:$0xff] }
 0x2ed   : > { %6795 = vmatpush1.bf16.msra.mxu1 %v6794_v54  ;;  %v14068_v54 = vld [vmem:[#allocation176_spill] sm:$0xff] }
 0x2ee   : > { %7563 = vmatpush1.bf16.msra.mxu0 %v7562_v36  ;;  %6797 = vmatprep.subr.bf16.mxu1 %v6796_v47  ;;  %v14069_v36 = vld [vmem:[#allocation175_spill] sm:$0xff]  ;;  %v14081_v8 = vld [vmem:[#allocation192_spill] sm:$0xff] }
 0x2ef   : > { %7565 = vmatprep.subr.bf16.mxu0 %v7564_v15  ;;  %v14070_v47 = vpack.c.bf16 %v14068_v54, %v14069_v36  ;;  %v14071_v15 = vld [vmem:[#allocation180_spill] sm:$0xff]  ;;  %v14087_v36 = vld [vmem:[#allocation9_spill] sm:$0xff] }
 0x2f0   : > { %v14073_v10 = vpack.c.bf16 %v14071_v15, %v14072_v59  ;;  %v14090_v59 = vld [vmem:[#allocation15_spill] sm:$0xff] }
 0x2f1   : > { %6799 = vmatpush1.bf16.msra.mxu1 %v14058_v20  ;;  %v14074_v20 = vld [vmem:[#allocation185_spill] sm:$0xff] }
 0x2f2   : > { %7567 = vmatpush1.bf16.msra.mxu0 %v14061_v46  ;;  %6801 = vmatprep.subr.bf16.mxu1 %v14064_v29  ;;  %v14076_v40 = vpack.c.bf16 %v14074_v20, %v14075_v3  ;;  %v14077_v46 = vld [vmem:[#allocation190_spill] sm:$0xff] }
 0x2f3   : > { %7569 = vmatprep.subr.bf16.mxu0 %v14067_v23  ;;  %v14079_v39 = vpack.c.bf16 %v14077_v46, %v14078_v19  ;;  %v14080_v29 = vld [vmem:[#allocation194_spill] sm:$0xff]  ;;  %v14083_v23 = vld [vmem:[#allocation199_spill] sm:$0xff] }
 0x2f4   : > { %v14082_v56 = vpack.c.bf16 %v14080_v29, %v14081_v8  ;;  %v14085_v54 = vpack.c.bf16 %v14083_v23, %v14084_v51 }
 0x2f5   : > { %6803 = vmatpush1.bf16.msra.mxu1 %v14070_v47  ;;  %v14086_v47 = vld [vmem:[#allocation13_spill] sm:$0xff] }
 0x2f6   : > { %7571 = vmatpush1.bf16.msra.mxu0 %v14073_v10  ;;  %6805 = vmatprep.subr.bf16.mxu1 %v14076_v40  ;;  %v14088_v15 = vpack.c.bf16 %v14086_v47, %v14087_v36  ;;  %v14089_v10 = vld [vmem:[#allocation204_spill] sm:$0xff]  ;;  %v14092_v40 = vld [vmem:[#allocation18_spill] sm:$0xff] }
 0x2f7   : > { %7573 = vmatprep.subr.bf16.mxu0 %v14079_v39  ;;  %v14091_v20 = vpack.c.bf16 %v14089_v10, %v14090_v59  ;;  %v14093_v46 = vpack.c.bf16 %v13919_v52, %v14092_v40  ;;  %v14094_v39 = vpack.c.bf16 %v13922_v13, %v13921_v17  ;;  %v14099_v10 = vld [vmem:[#allocation63_spill] sm:$0xff]  ;;  %v14102_v40 = vld [vmem:[#allocation69_spill] sm:$0xff] }
 0x2f8   : > { %v14105_v17 = vld [vmem:[#allocation81_spill] sm:$0xff] }
 0x2f9   : > { %6807 = vmatpush1.bf16.msra.mxu1 %v14082_v56  ;;  %v14095_v56 = vpack.c.bf16 %v13924_v37, %v13923_v7 }
 0x2fa   : > { %7575 = vmatpush1.bf16.msra.mxu0 %v14085_v54  ;;  %6809 = vmatprep.subr.bf16.mxu1 %v14088_v15  ;;  %v14096_v54 = vpack.c.bf16 %v13926_v1, %v13925_v12  ;;  %v14097_v15 = vpack.c.bf16 %v13928_v34, %v13927_v26 }
 0x2fb   : > { %7577 = vmatprep.subr.bf16.mxu0 %v14091_v20  ;;  %v14098_v20 = vld [vmem:[#allocation66_spill] sm:$0xff] }
 0x2fc   : > { %v14100_v52 = vpack.c.bf16 %v14098_v20, %v14099_v10 }
 0x2fd   : > { %6811 = vmatpush1.bf16.msra.mxu1 %v14093_v46  ;;  %v14101_v46 = vld [vmem:[#allocation75_spill] sm:$0xff] }
 0x2fe   : > { %7579 = vmatpush1.bf16.msra.mxu0 %v14094_v39  ;;  %6813 = vmatprep.subr.bf16.mxu1 %v14095_v56  ;;  %v14103_v13 = vpack.c.bf16 %v14101_v46, %v14102_v40  ;;  %v14104_v39 = vld [vmem:[#allocation85_spill] sm:$0xff] }
 0x2ff   : > { %7581 = vmatprep.subr.bf16.mxu0 %v14096_v54  ;;  %v14106_v37 = vpack.c.bf16 %v14104_v39, %v14105_v17  ;;  %v14107_v56 = vld [vmem:[#allocation93_spill] sm:$0xff]  ;;  %v14109_v54 = vpack.c.bf16 %v13938_v35, %v13937_v5 }
 0x300   : > { %v14108_v1 = vpack.c.bf16 %v13936_v21, %v14107_v56 }
 0x301   : > { %6815 = vmatpush1.bf16.msra.mxu1 %v14097_v15  ;;  %v14110_v15 = vpack.c.bf16 %v13977_v22, %v13976_v63 }
 0x302   : > { %7583 = vmatpush1.bf16.msra.mxu0 %v14100_v52  ;;  %6817 = vmatprep.subr.bf16.mxu1 %v14103_v13  ;;  %v14111_v52 = vpack.c.bf16 %v13982_v0, %v13981_v16  ;;  %v14112_v13 = vpack.c.bf16 %v13945_v43, %v13944_v42 }
 0x303   : > { %7585 = vmatprep.subr.bf16.mxu0 %v14106_v37  ;;  %v14113_v37 = vpack.c.bf16 %v13983_v38, %v13946_v24  ;;  %v14119_v38 = vld [vmem:[#allocation116_spill] sm:$0xff] }
 0x305   : > { %6819 = vmatpush1.bf16.msra.mxu1 %v14108_v1  ;;  %v14114_v1 = vpack.c.bf16 %v13949_v61, %v13948_v31  ;;  %v14121_v61 = vld [vmem:[#allocation120_spill] sm:$0xff] }
 0x306   : > { %7587 = vmatpush1.bf16.msra.mxu0 %v14109_v54  ;;  %6821 = vmatprep.subr.bf16.mxu1 %v14110_v15  ;;  %v14115_v54 = vpack.c.bf16 %v13951_v9, %v13950_v18  ;;  %v14116_v15 = vpack.c.bf16 %v13953_v41, %v13952_v44  ;;  %v14123_v9 = vld [vmem:[#allocation125_spill] sm:$0xff]  ;;  %v14125_v41 = vld [vmem:[#allocation134_spill] sm:$0xff] }
 0x307   : > { %7589 = vmatprep.subr.bf16.mxu0 %v14111_v52  ;;  %v14117_v52 = vpack.c.bf16 %v13955_v30, %v13954_v58  ;;  %v14130_v30 = vld [vmem:[#allocation158_spill] sm:$0xff]  ;;  %v14132_v58 = vld [vmem:[#allocation103_spill] sm:$0xff] }
 0x309   : > { %6823 = vmatpush1.bf16.msra.mxu1 %v14112_v13  ;;  %v14118_v13 = vld [vmem:[#allocation112_spill] sm:$0xff] }
 0x30a   : > { %7591 = vmatpush1.bf16.msra.mxu0 %v14113_v37  ;;  %6825 = vmatprep.subr.bf16.mxu1 %v14114_v1  ;;  %v14120_v37 = vld [vmem:[#allocation162_spill] sm:$0xff]  ;;  %v14122_v1 = vld [vmem:[#allocation183_spill] sm:$0xff] }
 0x30b   : > { %7593 = vmatprep.subr.bf16.mxu0 %v14115_v54  ;;  %v14124_v54 = vld [vmem:[#allocation131_spill] sm:$0xff] }
 0x30d   : > { %6827 = vmatpush1.bf16.msra.mxu1 %v14116_v15  ;;  %v14126_v15 = vand.u32 4294901760, %v14006_v6  ;;  %v14136_v6 = vld [vmem:[#allocation205_spill] sm:$0xff] }
 0x30e   : > { %7595 = vmatpush1.bf16.msra.mxu0 %v14117_v52  ;;  %6829 = vmatprep.subr.bf16.mxu1 %v14118_v13  ;;  %v14127_v52 = vand.u32 4294901760, %v14007_v49  ;;  %v14128_v13 = vld [vmem:[#allocation142_spill] sm:$0xff] }
 0x30f   : > { %7597 = vmatprep.subr.bf16.mxu0 %v14119_v38  ;;  %v14129_v38 = vld [vmem:[#allocation151_spill] sm:$0xff]  ;;  %v14137_v49 = vld [vmem:[#allocation10_spill] sm:$0xff] }
 0x310   : > { %2531 = vmatmul.mubr.f32.vlgmr.msra.gmra.mrb[0].mxu1 %v14120_v37 }
 0x311   : > { %6831 = vmatpush1.bf16.msra.mxu1 %v14121_v61  ;;  %5099 = vmatmul.mubr.f32.vlgmr.msra.gmra.mrb[0].mxu0 %v14122_v1  ;;  %v14131_v61 = vld [vmem:[#allocation98_spill] sm:$0xff] }
 0x312   : > { %7599 = vmatpush1.bf16.msra.mxu0 %v14123_v9  ;;  %6833 = vmatprep.subr.bf16.mxu1 %v14124_v54  ;;  %v14133_v9 = vld [vmem:[#allocation107_spill] sm:$0xff]  ;;  %v14134_v54 = vld [vmem:[#allocation144_spill] sm:$0xff] }
 0x313   : > { %7601 = vmatprep.subr.bf16.mxu0 %v14125_v41  ;;  %2668 = vmatprep.mubr.f32.mxu1 %v14126_v15  ;;  %v14135_v41 = vld [vmem:[#allocation160_spill] sm:$0xff]  ;;  %v14138_v15 = vld [vmem:[#allocation14_spill] sm:$0xff] }
 0x314   : > { %5236 = vmatprep.mubr.f32.mxu0 %v14127_v52  ;;  %v14139_v52 = vld [vmem:[#allocation19_spill] sm:$0xff] }
 0x315   : > { %6835 = vmatpush1.bf16.msra.mxu1 %v14128_v13  ;;  %v14188_v13 = vld [vmem:[#allocation181_spill] sm:$0xff] }
 0x316   : > { %7603 = vmatpush1.bf16.msra.mxu0 %v14129_v38  ;;  %6837 = vmatprep.subr.bf16.mxu1 %v14130_v30  ;;  %v14140_v38 = vld [vmem:[#allocation23_spill] sm:$0xff] }
 0x317   : > { %7605 = vmatprep.subr.bf16.mxu0 %v14131_v61  ;;  %v14141_v30 = vld [vmem:[#allocation27_spill] sm:$0xff]  ;;  %v14142_v61 = vld [vmem:[#allocation32_spill] sm:$0xff] }
 0x319   : > { %6839 = vmatpush1.bf16.msra.mxu1 %v14132_v58  ;;  %v14143_v58 = vld [vmem:[#allocation37_spill] sm:$0xff] }
 0x31a   : > { %7607 = vmatpush1.bf16.msra.mxu0 %v14133_v9  ;;  %6841 = vmatprep.subr.bf16.mxu1 %v14134_v54  ;;  %v14144_v9 = vld [vmem:[#allocation40_spill] sm:$0xff]  ;;  %v14145_v54 = vld [vmem:[#allocation46_spill] sm:$0xff] }
 0x31b   : > { %7609 = vmatprep.subr.bf16.mxu0 %v14135_v41  ;;  %v14146_v41 = vld [vmem:[#allocation49_spill] sm:$0xff] }
 0x31d   : > { %6843 = vmatpush1.bf16.msra.mxu1 %v14136_v6  ;;  %v14147_v6 = vld [vmem:[#allocation53_spill] sm:$0xff] }
 0x31e   : > { %7611 = vmatpush1.bf16.msra.mxu0 %v14137_v49  ;;  %6845 = vmatprep.subr.bf16.mxu1 %v14138_v15  ;;  %v14148_v49 = vld [vmem:[#allocation58_spill] sm:$0xff]  ;;  %v14149_v15 = vld [vmem:[#allocation64_spill] sm:$0xff] }
 0x31f   : > { %7613 = vmatprep.subr.bf16.mxu0 %v14139_v52  ;;  %v14150_v52 = vld [vmem:[#allocation67_spill] sm:$0xff] }
 0x321   : > { %6847 = vmatpush1.bf16.msra.mxu1 %v14140_v38  ;;  %v14151_v38 = vld [vmem:[#allocation71_spill] sm:$0xff] }
 0x322   : > { %7615 = vmatpush1.bf16.msra.mxu0 %v14141_v30  ;;  %6849 = vmatprep.subr.bf16.mxu1 %v14142_v61  ;;  %v14152_v30 = vld [vmem:[#allocation76_spill] sm:$0xff]  ;;  %v14153_v61 = vld [vmem:[#allocation82_spill] sm:$0xff] }
 0x323   : > { %7617 = vmatprep.subr.bf16.mxu0 %v14143_v58  ;;  %v14154_v58 = vld [vmem:[#allocation84_spill] sm:$0xff] }
 0x325   : > { %6851 = vmatpush1.bf16.msra.mxu1 %v14144_v9  ;;  %v14155_v9 = vld [vmem:[#allocation89_spill] sm:$0xff] }
 0x326   : > { %7619 = vmatpush1.bf16.msra.mxu0 %v14145_v54  ;;  %6853 = vmatprep.subr.bf16.mxu1 %v14146_v41  ;;  %v14156_v54 = vld [vmem:[#allocation95_spill] sm:$0xff] }
 0x327   : > { %7621 = vmatprep.subr.bf16.mxu0 %v14147_v6  ;;  %v14157_v41 = vld [vmem:[#allocation155_spill] sm:$0xff]  ;;  %v14158_v6 = vld [vmem:[#allocation164_spill] sm:$0xff] }
 0x329   : > { %6855 = vmatpush1.bf16.msra.mxu1 %v14148_v49  ;;  %v14159_v49 = vld [vmem:[#allocation168_spill] sm:$0xff] }
 0x32a   : > { %7623 = vmatpush1.bf16.msra.mxu0 %v14149_v15  ;;  %6857 = vmatprep.subr.bf16.mxu1 %v14150_v52  ;;  %v14160_v15 = vld [vmem:[#allocation173_spill] sm:$0xff]  ;;  %v14161_v52 = vld [vmem:[#allocation178_spill] sm:$0xff] }
 0x32b   : > { %7625 = vmatprep.subr.bf16.mxu0 %v14151_v38  ;;  %v14162_v38 = vld [vmem:[#allocation182_spill] sm:$0xff] }
 0x32d   : > { %6859 = vmatpush1.bf16.msra.mxu1 %v14152_v30  ;;  %v14163_v30 = vld [vmem:[#allocation187_spill] sm:$0xff] }
 0x32e   : > { %7627 = vmatpush1.bf16.msra.mxu0 %v14153_v61  ;;  %6861 = vmatprep.subr.bf16.mxu1 %v14154_v58  ;;  %v14164_v61 = vld [vmem:[#allocation191_spill] sm:$0xff]  ;;  %v14165_v58 = vld [vmem:[#allocation196_spill] sm:$0xff] }
 0x32f   : > { %7629 = vmatprep.subr.bf16.mxu0 %v14155_v9  ;;  %v14166_v9 = vld [vmem:[#allocation200_spill] sm:$0xff] }
 0x331   : > { %6863 = vmatpush1.bf16.msra.mxu1 %v14156_v54  ;;  %v14167_v54 = vld [vmem:[#allocation201_spill] sm:$0xff] }
 0x332   : > { %7631 = vmatpush1.bf16.msra.mxu0 %v14157_v41  ;;  %6865 = vmatprep.subr.bf16.mxu1 %v14158_v6  ;;  %v14168_v41 = vld [vmem:[#allocation22_spill] sm:$0xff] }
 0x333   : > { %7633 = vmatprep.subr.bf16.mxu0 %v14159_v49  ;;  %v14169_v6 = vld [vmem:[#allocation206_spill] sm:$0xff]  ;;  %v14170_v49 = vld [vmem:[#allocation33_spill] sm:$0xff] }
 0x335   : > { %6867 = vmatpush1.bf16.msra.mxu1 %v14160_v15  ;;  %v14171_v15 = vld [vmem:[#allocation42_spill] sm:$0xff] }
 0x336   : > { %7635 = vmatpush1.bf16.msra.mxu0 %v14161_v52  ;;  %6869 = vmatprep.subr.bf16.mxu1 %v14162_v38  ;;  %v14172_v52 = vld [vmem:[#allocation52_spill] sm:$0xff]  ;;  %v14173_v38 = vld [vmem:[#allocation61_spill] sm:$0xff] }
 0x337   : > { %7637 = vmatprep.subr.bf16.mxu0 %v14163_v30  ;;  %v14174_v30 = vld [vmem:[#allocation73_spill] sm:$0xff] }
 0x339   : > { %6871 = vmatpush1.bf16.msra.mxu1 %v14164_v61  ;;  %v14175_v61 = vld [vmem:[#allocation78_spill] sm:$0xff] }
 0x33a   : > { %7639 = vmatpush1.bf16.msra.mxu0 %v14165_v58  ;;  %6873 = vmatprep.subr.bf16.mxu1 %v14166_v9  ;;  %v14176_v58 = vld [vmem:[#allocation87_spill] sm:$0xff] }
 0x33b   : > { %7641 = vmatprep.subr.bf16.mxu0 %v14167_v54  ;;  %v14177_v9 = vld [vmem:[#allocation99_spill] sm:$0xff] }
 0x33c   : > { %v14178_v54 = vld [vmem:[#allocation111_spill] sm:$0xff] }
 0x33d   : > { %6875 = vmatpush1.bf16.msra.mxu1 %v14168_v41  ;;  %v14179_v41 = vld [vmem:[#allocation121_spill] sm:$0xff] }
 0x33e   : > { %7643 = vmatpush1.bf16.msra.mxu0 %v14169_v6  ;;  %6877 = vmatprep.subr.bf16.mxu1 %v14170_v49  ;;  %v14180_v6 = vld [vmem:[#allocation129_spill] sm:$0xff]  ;;  %v14181_v49 = vld [vmem:[#allocation147_spill] sm:$0xff] }
 0x33f   : > { %7645 = vmatprep.subr.bf16.mxu0 %v14171_v15  ;;  %v14182_v15 = vld [vmem:[#allocation157_spill] sm:$0xff] }
 0x341   : > { %6879 = vmatpush1.bf16.msra.mxu1 %v14172_v52 }
 0x342   : > { %7647 = vmatpush1.bf16.msra.mxu0 %v14173_v38  ;;  %6881 = vmatprep.subr.bf16.mxu1 %v14174_v30  ;;  %v14183_v38 = vand.u32 4294901760, %v13984_v53  ;;  %v14184_v30 = vand.u32 4294901760, %v13985_v28  ;;  %v14192_v53 = vand.u32 4294901760, %v13990_v55  ;;  %v14194_v28 = vand.u32 4294901760, %v13992_v2 }
 0x343   : > { %7649 = vmatprep.subr.bf16.mxu0 %v14175_v61  ;;  %v14185_v61 = vld [vmem:[#allocation171_spill] sm:$0xff]  ;;  %v14199_v55 = vand.u32 4294901760, %v14122_v1  ;;  %v14201_v2 = vand.u32 4294901760, %v13999_v45  ;;  %v14210_v1 = vld [vmem:[#allocation100_spill] sm:$0xff]  ;;  %v14214_v45 = vld [vmem:[#allocation90_spill] sm:$0xff] }
 0x344   : > { %v6892_v52 = vpack.c.bf16 %v14184_v30, %v14183_v38  ;;  %v14193_v30 = vand.u32 4294901760, %v13991_v11  ;;  %v14200_v11 = vand.u32 4294901760, %v13998_v60 }
 0x345   : > { %6883 = vmatpush1.bf16.msra.mxu1 %v14176_v58  ;;  %v14186_v58 = vand.u32 4294901760, %v13986_v48  ;;  %v14195_v48 = vand.u32 4294901760, %v13993_v4  ;;  %v14202_v4 = vld [vmem:[#allocation152_spill] sm:$0xff] }
 0x346   : > { %7651 = vmatpush1.bf16.msra.mxu0 %v14177_v9  ;;  %6885 = vmatprep.subr.bf16.mxu1 %v14178_v54  ;;  %v14187_v9 = vand.u32 4294901760, %v13987_v50  ;;  %v7662_v38 = vpack.c.bf16 %v14193_v30, %v14192_v53  ;;  %v14197_v50 = vand.u32 4294901760, %v13995_v14 }
 0x347   : > { %7653 = vmatprep.subr.bf16.mxu0 %v14179_v41 }
 0x348   : > { %v7660_v54 = vpack.c.bf16 %v14187_v9, %v14186_v58  ;;  %v6896_v9 = vpack.c.bf16 %v14195_v48, %v14194_v28  ;;  %v14196_v58 = vand.u32 4294901760, %v13994_v57  ;;  %v14204_v57 = vld [vmem:[#allocation156_spill] sm:$0xff]  ;;  %v14211_v28 = vand.u32 4294901760, %v14210_v1  ;;  %v14212_v48 = vld [vmem:[#allocation101_spill] sm:$0xff]  ;;  %v14228_v1 = vld [vmem:[#allocation163_spill] sm:$0xff] }
 0x349   : > { %6887 = vmatpush1.bf16.msra.mxu1 %v14180_v6  ;;  %v14189_v6 = vand.u32 4294901760, %v13988_v62  ;;  %v14213_v60 = vand.u32 4294901760, %v14212_v48 }
 0x34a   : > { %7655 = vmatpush1.bf16.msra.mxu0 %v14181_v49  ;;  %6889 = vmatprep.subr.bf16.mxu1 %v14182_v15  ;;  %v14190_v49 = vand.u32 4294901760, %v13989_v33  ;;  %v14191_v15 = vld [vmem:[#allocation195_spill] sm:$0xff]  ;;  %v7664_v62 = vpack.c.bf16 %v14197_v50, %v14196_v58  ;;  %v14198_v33 = vand.u32 4294901760, %v14120_v37  ;;  %v14208_v37 = vld [vmem:[#allocation96_spill] sm:$0xff] }
 0x34b   : > { %7657 = vmatprep.subr.bf16.mxu0 %v14185_v61  ;;  %v14209_v30 = vand.u32 4294901760, %v14208_v37  ;;  %v7668_v58 = vpack.c.bf16 %v14213_v60, %v14211_v28  ;;  %v14230_v28 = vld [vmem:[#allocation203_spill] sm:$0xff] }
 0x34c   : > { %v6894_v41 = vpack.c.bf16 %v14190_v49, %v14189_v6  ;;  %v6898_v6 = vpack.c.bf16 %v14201_v2, %v14200_v11  ;;  %v14205_v49 = vand.u32 4294901760, %v14204_v57  ;;  %v14220_v2 = vld [vmem:[#allocation108_spill] sm:$0xff]  ;;  %v14231_v48 = vand.u32 4294901760, %v14230_v28 }
 0x34d   : > { %6891 = vmatpush1.bf16.msra.mxu1 %v14188_v13 }
 0x34e   : > { %7659 = vmatpush1.bf16.msra.mxu0 %v14191_v15  ;;  %6893 = vmatprep.subr.bf16.mxu1 %v6892_v52  ;;  %v14206_v52 = vld [vmem:[#allocation94_spill] sm:$0xff] }
 0x34f   : > { %7661 = vmatprep.subr.bf16.mxu0 %v7660_v54  ;;  %v14203_v54 = vand.u32 4294901760, %v14202_v4  ;;  %v14207_v53 = vand.u32 4294901760, %v14206_v52  ;;  %v14221_v4 = vand.u32 4294901760, %v14220_v2 }
 0x350   : > { %2672 = vmatmul.mubr.f32.vlgmr.msra.gmra.mrb[0].mxu1 %v14198_v33  ;;  %v14218_v33 = vld [vmem:[#allocation106_spill] sm:$0xff] }
 0x351   : > { %6895 = vmatpush1.bf16.msra.mxu1 %v6894_v41  ;;  %5240 = vmatmul.mubr.f32.vlgmr.msra.gmra.mrb[0].mxu0 %v14199_v55  ;;  %v7666_v14 = vpack.c.bf16 %v14205_v49, %v14203_v54  ;;  %v6900_v41 = vpack.c.bf16 %v14209_v30, %v14207_v53  ;;  %v14219_v55 = vand.u32 4294901760, %v14218_v33  ;;  %v14224_v49 = vld [vmem:[#allocation148_spill] sm:$0xff]  ;;  %v14226_v53 = vld [vmem:[#allocation154_spill] sm:$0xff] }
 0x352   : > { %7663 = vmatpush1.bf16.msra.mxu0 %v7662_v38  ;;  %6897 = vmatprep.subr.bf16.mxu1 %v6896_v9  ;;  %v14215_v38 = vld [vmem:[#allocation102_spill] sm:$0xff]  ;;  %v14216_v9 = vld [vmem:[#allocation104_spill] sm:$0xff]  ;;  %v14225_v52 = vand.u32 4294901760, %v14224_v49  ;;  %v14227_v37 = vand.u32 4294901760, %v14226_v53 }
 0x353   : > { %7665 = vmatprep.subr.bf16.mxu0 %v7664_v62  ;;  %2935 = vmatprep.mubr.f32.mxu1 %v14214_v45  ;;  %v14217_v50 = vand.u32 4294901760, %v14216_v9  ;;  %v14222_v62 = vld [vmem:[#allocation110_spill] sm:$0xff]  ;;  %v14232_v9 = vld [vmem:[#allocation208_spill] sm:$0xff] }
 0x354   : > { %5503 = vmatprep.mubr.f32.mxu0 %v14215_v38  ;;  %v14223_v54 = vand.u32 4294901760, %v14222_v62  ;;  %v6904_v30 = vpack.c.bf16 %v14227_v37, %v14225_v52  ;;  %v14240_v49 = vld [vmem:[#allocation16_spill] sm:$0xff]  ;;  %v14242_v52 = vld [vmem:[#allocation17_spill] sm:$0xff] }
 0x355   : > { %6899 = vmatpush1.bf16.msra.mxu1 %v6898_v6  ;;  %v6902_v11 = vpack.c.bf16 %v14219_v55, %v14217_v50  ;;  %v14229_v6 = vand.u32 4294901760, %v14228_v1  ;;  %v14236_v55 = vld [vmem:[#allocation11_spill] sm:$0xff]  ;;  %v14243_v53 = vand.u32 4294901760, %v14242_v52  ;;  %v14244_v1 = vld [vmem:[#allocation20_spill] sm:$0xff] }
 0x356   : > { %7667 = vmatpush1.bf16.msra.mxu0 %v7666_v14  ;;  %6901 = vmatprep.subr.bf16.mxu1 %v6900_v41  ;;  %v7670_v57 = vpack.c.bf16 %v14223_v54, %v14221_v4  ;;  %v14233_v14 = vand.u32 4294901760, %v14232_v9  ;;  %v14234_v41 = vld [vmem:[#allocation207_spill] sm:$0xff]  ;;  %v14237_v2 = vand.u32 4294901760, %v14236_v55  ;;  %v14238_v4 = vld [vmem:[#allocation12_spill] sm:$0xff]  ;;  %v14248_v9 = vld [vmem:[#allocation25_spill] sm:$0xff] }
 0x357   : > { %7669 = vmatprep.subr.bf16.mxu0 %v7668_v58  ;;  %v7672_v60 = vpack.c.bf16 %v14231_v48, %v14229_v6  ;;  %v14235_v50 = vand.u32 4294901760, %v14234_v41  ;;  %v14239_v62 = vand.u32 4294901760, %v14238_v4  ;;  %v14241_v58 = vand.u32 4294901760, %v14240_v49  ;;  %v14246_v6 = vld [vmem:[#allocation21_spill] sm:$0xff]  ;;  %v14256_v49 = vld [vmem:[#allocation34_spill] sm:$0xff] }
 0x358   : > { %v14247_v28 = vand.u32 4294901760, %v14246_v6 }
 0x359   : > { %6903 = vmatpush1.bf16.msra.mxu1 %v6902_v11  ;;  %v6906_v33 = vpack.c.bf16 %v14235_v50, %v14233_v14  ;;  %v7674_v54 = vpack.c.bf16 %v14239_v62, %v14237_v2  ;;  %v6908_v37 = vpack.c.bf16 %v14243_v53, %v14241_v58  ;;  %v14245_v11 = vand.u32 4294901760, %v14244_v1  ;;  %v14252_v50 = vld [vmem:[#allocation29_spill] sm:$0xff]  ;;  %v14254_v2 = vld [vmem:[#allocation30_spill] sm:$0xff]  ;;  %v14258_v58 = vld [vmem:[#allocation35_spill] sm:$0xff] }
 0x35a   : > { %7671 = vmatpush1.bf16.msra.mxu0 %v7670_v57  ;;  %6905 = vmatprep.subr.bf16.mxu1 %v6904_v30  ;;  %v14249_v57 = vand.u32 4294901760, %v14248_v9  ;;  %v14250_v30 = vld [vmem:[#allocation26_spill] sm:$0xff]  ;;  %v14253_v55 = vand.u32 4294901760, %v14252_v50  ;;  %v14255_v4 = vand.u32 4294901760, %v14254_v2  ;;  %v14259_v52 = vand.u32 4294901760, %v14258_v58  ;;  %v14264_v9 = vld [vmem:[#allocation41_spill] sm:$0xff] }
 0x35b   : > { %7673 = vmatprep.subr.bf16.mxu0 %v7672_v60  ;;  %v7676_v48 = vpack.c.bf16 %v14247_v28, %v14245_v11  ;;  %v14251_v14 = vand.u32 4294901760, %v14250_v30  ;;  %v14257_v60 = vand.u32 4294901760, %v14256_v49  ;;  %v14260_v1 = vld [vmem:[#allocation38_spill] sm:$0xff] }
 0x35c   : > { %v7678_v62 = vpack.c.bf16 %v14255_v4, %v14253_v55  ;;  %v14262_v11 = vld [vmem:[#allocation202_spill] sm:$0xff]  ;;  %v14270_v55 = vld [vmem:[#allocation47_spill] sm:$0xff] }
 0x35d   : > { %6907 = vmatpush1.bf16.msra.mxu1 %v6906_v33  ;;  %v6910_v41 = vpack.c.bf16 %v14251_v14, %v14249_v57  ;;  %v6912_v53 = vpack.c.bf16 %v14259_v52, %v14257_v60  ;;  %v14261_v33 = vand.u32 4294901760, %v14260_v1  ;;  %v14263_v6 = vand.u32 4294901760, %v14262_v11  ;;  %v14268_v14 = vld [vmem:[#allocation44_spill] sm:$0xff]  ;;  %v14272_v49 = vld [vmem:[#allocation50_spill] sm:$0xff]  ;;  %v14274_v60 = vld [vmem:[#allocation51_spill] sm:$0xff] }
 0x35e   : > { %7675 = vmatpush1.bf16.msra.mxu0 %v7674_v54  ;;  %6909 = vmatprep.subr.bf16.mxu1 %v6908_v37  ;;  %v14265_v54 = vand.u32 4294901760, %v14264_v9  ;;  %v14266_v37 = vld [vmem:[#allocation43_spill] sm:$0xff]  ;;  %v14269_v50 = vand.u32 4294901760, %v14268_v14  ;;  %v14271_v2 = vand.u32 4294901760, %v14270_v55  ;;  %v14275_v58 = vand.u32 4294901760, %v14274_v60 }
 0x35f   : > { %7677 = vmatprep.subr.bf16.mxu0 %v7676_v48  ;;  %v7680_v28 = vpack.c.bf16 %v14263_v6, %v14261_v33  ;;  %v14267_v57 = vand.u32 4294901760, %v14266_v37  ;;  %v14273_v48 = vand.u32 4294901760, %v14272_v49  ;;  %v14276_v1 = vld [vmem:[#allocation55_spill] sm:$0xff]  ;;  %v14278_v33 = vld [vmem:[#allocation56_spill] sm:$0xff]  ;;  %v14289_v49 = vld [vmem:[#allocation70_spill] sm:$0xff] }
 0x360   : > { %v7682_v4 = vpack.c.bf16 %v14271_v2, %v14269_v50  ;;  %v14279_v11 = vand.u32 4294901760, %v14278_v33  ;;  %v14280_v9 = vld [vmem:[#allocation59_spill] sm:$0xff]  ;;  %v14286_v50 = vld [vmem:[#allocation65_spill] sm:$0xff] }
 0x361   : > { %6911 = vmatpush1.bf16.msra.mxu1 %v6910_v41  ;;  %v6914_v30 = vpack.c.bf16 %v14267_v57, %v14265_v54  ;;  %v6916_v52 = vpack.c.bf16 %v14275_v58, %v14273_v48  ;;  %v14277_v41 = vand.u32 4294901760, %v14276_v1  ;;  %v14284_v57 = vld [vmem:[#allocation62_spill] sm:$0xff]  ;;  %v14287_v55 = vand.u32 4294901760, %v14286_v50  ;;  %v14294_v33 = vld [vmem:[#allocation77_spill] sm:$0xff]  ;;  %v14304_v50 = vld [vmem:[#allocation88_spill] sm:$0xff] }
 0x362   : > { %7679 = vmatpush1.bf16.msra.mxu0 %v7678_v62  ;;  %6913 = vmatprep.subr.bf16.mxu1 %v6912_v53  ;;  %v14281_v62 = vand.u32 4294901760, %v14280_v9  ;;  %v14282_v53 = vld [vmem:[#allocation60_spill] sm:$0xff]  ;;  %v14285_v14 = vand.u32 4294901760, %v14284_v57  ;;  %v14290_v48 = vand.u32 4294901760, %v14289_v49  ;;  %v14292_v58 = vld [vmem:[#allocation74_spill] sm:$0xff] }
 0x363   : > { %7681 = vmatprep.subr.bf16.mxu0 %v7680_v28  ;;  %v7684_v6 = vpack.c.bf16 %v14279_v11, %v14277_v41  ;;  %v14283_v54 = vand.u32 4294901760, %v14282_v53  ;;  %v14288_v28 = vand.u32 4294901760, %v14044_v27  ;;  %v14293_v1 = vand.u32 4294901760, %v14292_v58  ;;  %v14300_v27 = vld [vmem:[#allocation83_spill] sm:$0xff] }
 0x364   : > { %v7686_v2 = vpack.c.bf16 %v14287_v55, %v14285_v14  ;;  %v14302_v14 = vld [vmem:[#allocation86_spill] sm:$0xff] }
 0x365   : > { %6915 = vmatpush1.bf16.msra.mxu1 %v6914_v30  ;;  %v6918_v37 = vpack.c.bf16 %v14283_v54, %v14281_v62  ;;  %v6920_v60 = vpack.c.bf16 %v14290_v48, %v14288_v28  ;;  %v14291_v30 = vand.u32 4294901760, %v14046_v32  ;;  %v14298_v62 = vld [vmem:[#allocation80_spill] sm:$0xff]  ;;  %v14301_v54 = vand.u32 4294901760, %v14300_v27  ;;  %v14319_v27 = vld [vmem:[#allocation167_spill] sm:$0xff] }
 0x366   : > { %7683 = vmatpush1.bf16.msra.mxu0 %v7682_v4  ;;  %6917 = vmatprep.subr.bf16.mxu1 %v6916_v52  ;;  %v14295_v4 = vand.u32 4294901760, %v14294_v33  ;;  %v14296_v52 = vld [vmem:[#allocation79_spill] sm:$0xff]  ;;  %v14299_v53 = vand.u32 4294901760, %v14298_v62  ;;  %v14305_v32 = vand.u32 4294901760, %v14304_v50  ;;  %v14307_v28 = vld [vmem:[#allocation92_spill] sm:$0xff]  ;;  %v14313_v33 = vld [vmem:[#allocation149_spill] sm:$0xff] }
 0x367   : > { %7685 = vmatprep.subr.bf16.mxu0 %v7684_v6  ;;  %v7688_v41 = vpack.c.bf16 %v14293_v1, %v14291_v30  ;;  %v14297_v11 = vand.u32 4294901760, %v14296_v52  ;;  %v14303_v6 = vand.u32 4294901760, %v14302_v14  ;;  %v14308_v49 = vand.u32 4294901760, %v14307_v28  ;;  %v14309_v30 = vld [vmem:[#allocation140_spill] sm:$0xff]  ;;  %v14315_v52 = vld [vmem:[#allocation161_spill] sm:$0xff]  ;;  %v14321_v14 = vld [vmem:[#allocation170_spill] sm:$0xff] }
 0x368   : > { %v7690_v57 = vpack.c.bf16 %v14301_v54, %v14299_v53  ;;  %v14317_v53 = vld [vmem:[#allocation166_spill] sm:$0xff] }
 0x369   : > { %6919 = vmatpush1.bf16.msra.mxu1 %v6918_v37  ;;  %v6922_v9 = vpack.c.bf16 %v14297_v11, %v14295_v4  ;;  %v6924_v55 = vpack.c.bf16 %v14305_v32, %v14303_v6  ;;  %v14306_v37 = vand.u32 4294901760, %v14054_v25  ;;  %v14314_v4 = vand.u32 4294901760, %v14313_v33  ;;  %v14323_v6 = vld [vmem:[#allocation172_spill] sm:$0xff] }
 0x36a   : > { %7687 = vmatpush1.bf16.msra.mxu0 %v7686_v2  ;;  %6921 = vmatprep.subr.bf16.mxu1 %v6920_v60  ;;  %v14310_v2 = vand.u32 4294901760, %v14309_v30  ;;  %v14311_v60 = vld [vmem:[#allocation146_spill] sm:$0xff]  ;;  %v14316_v11 = vand.u32 4294901760, %v14315_v52  ;;  %v14320_v25 = vand.u32 4294901760, %v14319_v27  ;;  %v14324_v50 = vand.u32 4294901760, %v14323_v6  ;;  %v14329_v30 = vld [vmem:[#allocation179_spill] sm:$0xff] }
 0x36b   : > { %7689 = vmatprep.subr.bf16.mxu0 %v7688_v41  ;;  %v7692_v48 = vpack.c.bf16 %v14308_v49, %v14306_v37  ;;  %v14312_v58 = vand.u32 4294901760, %v14311_v60  ;;  %v14318_v41 = vand.u32 4294901760, %v14317_v53  ;;  %v14325_v37 = vld [vmem:[#allocation175_spill] sm:$0xff]  ;;  %v14331_v60 = vld [vmem:[#allocation180_spill] sm:$0xff]  ;;  %v14337_v53 = vld [vmem:[#allocation190_spill] sm:$0xff]  ;;  %v14343_v6 = vand.u32 4294901760, %v14087_v36 }
 0x36c   : > { %v7694_v62 = vpack.c.bf16 %v14316_v11, %v14314_v4  ;;  %v14334_v4 = vld [vmem:[#allocation185_spill] sm:$0xff]  ;;  %v14354_v36 = vld [vmem:[#allocation31_spill] sm:$0xff] }
 0x36d   : > { %6923 = vmatpush1.bf16.msra.mxu1 %v6922_v9  ;;  %v6926_v1 = vpack.c.bf16 %v14312_v58, %v14310_v2  ;;  %v6928_v54 = vpack.c.bf16 %v14320_v25, %v14318_v41  ;;  %v14322_v9 = vand.u32 4294901760, %v14321_v14  ;;  %v14330_v2 = vand.u32 4294901760, %v14329_v30 }
 0x36e   : > { %7691 = vmatpush1.bf16.msra.mxu0 %v7690_v57  ;;  %6925 = vmatprep.subr.bf16.mxu1 %v6924_v55  ;;  %v14326_v57 = vand.u32 4294901760, %v14325_v37  ;;  %v14327_v55 = vld [vmem:[#allocation176_spill] sm:$0xff]  ;;  %v14332_v58 = vand.u32 4294901760, %v14331_v60  ;;  %v14335_v52 = vand.u32 4294901760, %v14334_v4  ;;  %v14338_v41 = vand.u32 4294901760, %v14337_v53 }
 0x36f   : > { %7693 = vmatprep.subr.bf16.mxu0 %v7692_v48  ;;  %v7696_v32 = vpack.c.bf16 %v14324_v50, %v14322_v9  ;;  %v14328_v28 = vand.u32 4294901760, %v14327_v55  ;;  %v14333_v48 = vand.u32 4294901760, %v14075_v3  ;;  %v14340_v25 = vand.u32 4294901760, %v14080_v29  ;;  %v14346_v37 = vld [vmem:[#allocation204_spill] sm:$0xff]  ;;  %v14348_v29 = vld [vmem:[#allocation18_spill] sm:$0xff] }
 0x370   : > { %v7698_v33 = vpack.c.bf16 %v14332_v58, %v14330_v2  ;;  %v14341_v14 = vand.u32 4294901760, %v14084_v51  ;;  %v14342_v3 = vand.u32 4294901760, %v14083_v23  ;;  %v14349_v55 = vand.u32 4294901760, %v14348_v29  ;;  %v14352_v23 = vld [vmem:[#allocation28_spill] sm:$0xff]  ;;  %v14357_v58 = vld [vmem:[#allocation39_spill] sm:$0xff] }
 0x371   : > { %6927 = vmatpush1.bf16.msra.mxu1 %v6926_v1  ;;  %v6930_v49 = vpack.c.bf16 %v14328_v28, %v14326_v57  ;;  %v6932_v11 = vpack.c.bf16 %v14335_v52, %v14333_v48  ;;  %v14336_v1 = vand.u32 4294901760, %v14078_v19  ;;  %v14344_v19 = vand.u32 4294901760, %v14086_v47  ;;  %v14350_v28 = vld [vmem:[#allocation24_spill] sm:$0xff] }
 0x372   : > { %7695 = vmatpush1.bf16.msra.mxu0 %v7694_v62  ;;  %6929 = vmatprep.subr.bf16.mxu1 %v6928_v54  ;;  %v14339_v62 = vand.u32 4294901760, %v14081_v8  ;;  %v7702_v9 = vpack.c.bf16 %v14342_v3, %v14341_v14  ;;  %v14347_v8 = vand.u32 4294901760, %v14346_v37  ;;  %v14353_v30 = vand.u32 4294901760, %v14352_v23  ;;  %v14360_v4 = vld [vmem:[#allocation48_spill] sm:$0xff]  ;;  %v14392_v23 = vld [vmem:[#allocation193_spill] sm:$0xff] }
 0x373   : > { %7697 = vmatprep.subr.bf16.mxu0 %v7696_v32  ;;  %v7700_v27 = vpack.c.bf16 %v14338_v41, %v14336_v1  ;;  %v6936_v50 = vpack.c.bf16 %v14344_v19, %v14343_v6  ;;  %v14345_v32 = vand.u32 4294901760, %v14090_v59  ;;  %v14355_v2 = vand.u32 4294901760, %v14354_v36 }
 0x374   : > { %v6934_v54 = vpack.c.bf16 %v14340_v25, %v14339_v62  ;;  %v14356_v60 = vand.u32 4294901760, %v13923_v7  ;;  %v14358_v59 = vand.u32 4294901760, %v14357_v58  ;;  %v14359_v48 = vand.u32 4294901760, %v13925_v12  ;;  %v14400_v58 = vld [vmem:[#allocation169_spill] sm:$0xff] }
 0x375   : > { %6931 = vmatpush1.bf16.msra.mxu1 %v6930_v49  ;;  %v7704_v57 = vpack.c.bf16 %v14347_v8, %v14345_v32  ;;  %v14351_v49 = vand.u32 4294901760, %v14350_v28  ;;  %v7706_v47 = vpack.c.bf16 %v14355_v2, %v14353_v30  ;;  %v14361_v52 = vand.u32 4294901760, %v14360_v4  ;;  %v14404_v4 = vld [vmem:[#allocation142_spill] sm:$0xff] }
 0x376   : > { %7699 = vmatpush1.bf16.msra.mxu0 %v7698_v33  ;;  %6933 = vmatprep.subr.bf16.mxu1 %v6932_v11  ;;  %v6940_v33 = vpack.c.bf16 %v14358_v59, %v14356_v60  ;;  %v14362_v1 = vand.u32 4294901760, %v13927_v26  ;;  %v14363_v53 = vand.u32 4294901760, %v13928_v34  ;;  %v14365_v7 = vand.u32 4294901760, %v14098_v20  ;;  %v14398_v60 = vld [vmem:[#allocation145_spill] sm:$0xff] }
 0x377   : > { %7701 = vmatprep.subr.bf16.mxu0 %v7700_v27  ;;  %v6938_v51 = vpack.c.bf16 %v14351_v49, %v14349_v55  ;;  %v7708_v11 = vpack.c.bf16 %v14361_v52, %v14359_v48  ;;  %v14364_v27 = vand.u32 4294901760, %v14099_v10  ;;  %v14366_v25 = vand.u32 4294901760, %v14102_v40  ;;  %v14387_v55 = vld [vmem:[#allocation177_spill] sm:$0xff]  ;;  %v14403_v48 = vld [vmem:[#allocation134_spill] sm:$0xff]  ;;  %v14405_v52 = vld [vmem:[#allocation151_spill] sm:$0xff] }
 0x378   : > { %v6942_v41 = vpack.c.bf16 %v14363_v53, %v14362_v1  ;;  %v14367_v12 = vand.u32 4294901760, %v14101_v46  ;;  %v14368_v14 = vand.u32 4294901760, %v14105_v17  ;;  %v14369_v26 = vand.u32 4294901760, %v14104_v39  ;;  %v14390_v49 = vld [vmem:[#allocation189_spill] sm:$0xff]  ;;  %v14407_v1 = vld [vmem:[#allocation98_spill] sm:$0xff]  ;;  %v14408_v53 = vld [vmem:[#allocation103_spill] sm:$0xff] }
 0x379   : > { %6935 = vmatpush1.bf16.msra.mxu1 %v6934_v54  ;;  %v7710_v62 = vpack.c.bf16 %v14365_v7, %v14364_v27  ;;  %v14370_v34 = vand.u32 4294901760, %v14107_v56  ;;  %v14372_v20 = vand.u32 4294901760, %v13937_v5  ;;  %v14373_v40 = vand.u32 4294901760, %v13938_v35  ;;  %v14401_v59 = vld [vmem:[#allocation125_spill] sm:$0xff]  ;;  %v14410_v27 = vld [vmem:[#allocation144_spill] sm:$0xff] }
 0x37a   : > { %7703 = vmatpush1.bf16.msra.mxu0 %v7702_v9  ;;  %6937 = vmatprep.subr.bf16.mxu1 %v6936_v50  ;;  %v6944_v54 = vpack.c.bf16 %v14367_v12, %v14366_v25  ;;  %v7712_v3 = vpack.c.bf16 %v14369_v26, %v14368_v14  ;;  %v14371_v9 = vand.u32 4294901760, %v13936_v21  ;;  %v14374_v6 = vand.u32 4294901760, %v13976_v63  ;;  %v14381_v63 = vld [vmem:[#allocation153_spill] sm:$0xff]  ;;  %v14411_v7 = vld [vmem:[#allocation160_spill] sm:$0xff]  ;;  %v14415_v25 = vld [vmem:[#allocation19_spill] sm:$0xff] }
 0x37b   : > { %7705 = vmatprep.subr.bf16.mxu0 %v7704_v57  ;;  %v7714_v46 = vpack.c.bf16 %v14373_v40, %v14372_v20  ;;  %v14375_v17 = vand.u32 4294901760, %v13977_v22  ;;  %v14376_v39 = vand.u32 4294901760, %v13981_v16  ;;  %v14377_v56 = vand.u32 4294901760, %v13982_v0  ;;  %v14384_v57 = vld [vmem:[#allocation165_spill] sm:$0xff]  ;;  %v14416_v12 = vld [vmem:[#allocation23_spill] sm:$0xff]  ;;  %v14418_v14 = vld [vmem:[#allocation32_spill] sm:$0xff] }
 0x37c   : > { %v6946_v10 = vpack.c.bf16 %v14371_v9, %v14370_v34  ;;  %v14378_v21 = vand.u32 4294901760, %v13944_v42  ;;  %v14379_v32 = vand.u32 4294901760, %v13945_v43  ;;  %v14380_v35 = vand.u32 4294901760, %v13946_v24  ;;  %v14419_v26 = vld [vmem:[#allocation37_spill] sm:$0xff]  ;;  %v14421_v34 = vld [vmem:[#allocation46_spill] sm:$0xff]  ;;  %v14425_v40 = vld [vmem:[#allocation64_spill] sm:$0xff] }
 0x37d   : > { %6939 = vmatpush1.bf16.msra.mxu1 %v6938_v51  ;;  %v6948_v19 = vpack.c.bf16 %v14375_v17, %v14374_v6  ;;  %v7716_v50 = vpack.c.bf16 %v14377_v56, %v14376_v39  ;;  %v14382_v37 = vand.u32 4294901760, %v14381_v63  ;;  %v14383_v8 = vand.u32 4294901760, %v13948_v31  ;;  %v14394_v31 = vld [vmem:[#allocation198_spill] sm:$0xff]  ;;  %v14422_v9 = vld [vmem:[#allocation49_spill] sm:$0xff]  ;;  %v14427_v6 = vld [vmem:[#allocation71_spill] sm:$0xff] }
 0x37e   : > { %7707 = vmatpush1.bf16.msra.mxu0 %v7706_v47  ;;  %6941 = vmatprep.subr.bf16.mxu1 %v6940_v33  ;;  %v6950_v5 = vpack.c.bf16 %v14379_v32, %v14378_v21  ;;  %v14385_v16 = vand.u32 4294901760, %v14384_v57  ;;  %v14386_v0 = vand.u32 4294901760, %v13950_v18  ;;  %v14388_v42 = vand.u32 4294901760, %v14387_v55  ;;  %v14396_v18 = vld [vmem:[#allocation112_spill] sm:$0xff]  ;;  %v14402_v33 = vld [vmem:[#allocation131_spill] sm:$0xff]  ;;  %v14424_v20 = vld [vmem:[#allocation58_spill] sm:$0xff] }
 0x37f   : > { %7709 = vmatprep.subr.bf16.mxu0 %v7708_v11  ;;  %v7718_v22 = vpack.c.bf16 %v14382_v37, %v14380_v35  ;;  %v14389_v43 = vand.u32 4294901760, %v13952_v44  ;;  %v14391_v51 = vand.u32 4294901760, %v14390_v49  ;;  %v14393_v30 = vand.u32 4294901760, %v14392_v23  ;;  %v14397_v47 = vld [vmem:[#allocation116_spill] sm:$0xff]  ;;  %v14406_v11 = vld [vmem:[#allocation158_spill] sm:$0xff]  ;;  %v14431_v56 = vld [vmem:[#allocation89_spill] sm:$0xff] }
 0x380   : > { %v6952_v29 = vpack.c.bf16 %v14385_v16, %v14383_v8  ;;  %v7720_v28 = vpack.c.bf16 %v14388_v42, %v14386_v0  ;;  %v14395_v36 = vand.u32 4294901760, %v14394_v31  ;;  %v14399_v44 = vld [vmem:[#allocation120_spill] sm:$0xff]  ;;  %v14433_v21 = vld [vmem:[#allocation155_spill] sm:$0xff]  ;;  %v14436_v35 = vld [vmem:[#allocation173_spill] sm:$0xff] }
 0x381   : > { %6943 = vmatpush1.bf16.msra.mxu1 %v6942_v41  ;;  %v6954_v24 = vpack.c.bf16 %v14391_v51, %v14389_v43  ;;  %v14409_v41 = vld [vmem:[#allocation107_spill] sm:$0xff]  ;;  %v14428_v17 = vld [vmem:[#allocation76_spill] sm:$0xff]  ;;  %v14437_v63 = vld [vmem:[#allocation178_spill] sm:$0xff] }
 0x382   : > { %7711 = vmatpush1.bf16.msra.mxu0 %v7710_v62  ;;  %6945 = vmatprep.subr.bf16.mxu1 %v6944_v54  ;;  %v7722_v2 = vpack.c.bf16 %v14395_v36, %v14393_v30  ;;  %v14412_v62 = vld [vmem:[#allocation205_spill] sm:$0xff]  ;;  %v14417_v54 = vld [vmem:[#allocation27_spill] sm:$0xff]  ;;  %v14430_v39 = vld [vmem:[#allocation84_spill] sm:$0xff] }
 0x383   : > { %7713 = vmatprep.subr.bf16.mxu0 %v7712_v3  ;;  %v14420_v3 = vld [vmem:[#allocation40_spill] sm:$0xff]  ;;  %v14438_v37 = vld [vmem:[#allocation182_spill] sm:$0xff]  ;;  %v14440_v8 = vld [vmem:[#allocation191_spill] sm:$0xff] }
 0x384   : > { %v14434_v32 = vld [vmem:[#allocation164_spill] sm:$0xff]  ;;  %v14444_v0 = vld [vmem:[#allocation22_spill] sm:$0xff]  ;;  %v14446_v42 = vld [vmem:[#allocation33_spill] sm:$0xff] }
 0x385   : > { %6947 = vmatpush1.bf16.msra.mxu1 %v6946_v10  ;;  %v14423_v10 = vld [vmem:[#allocation53_spill] sm:$0xff]  ;;  %v14441_v57 = vld [vmem:[#allocation196_spill] sm:$0xff]  ;;  %v14445_v55 = vld [vmem:[#allocation206_spill] sm:$0xff] }
 0x386   : > { %7715 = vmatpush1.bf16.msra.mxu0 %v7714_v46  ;;  %6949 = vmatprep.subr.bf16.mxu1 %v6948_v19  ;;  %v14426_v46 = vld [vmem:[#allocation67_spill] sm:$0xff]  ;;  %v14429_v19 = vld [vmem:[#allocation82_spill] sm:$0xff]  ;;  %v14442_v16 = vld [vmem:[#allocation200_spill] sm:$0xff] }
 0x387   : > { %7717 = vmatprep.subr.bf16.mxu0 %v7716_v50  ;;  %v14432_v50 = vld [vmem:[#allocation95_spill] sm:$0xff]  ;;  %v14448_v43 = vld [vmem:[#allocation52_spill] sm:$0xff]  ;;  %v14449_v49 = vld [vmem:[#allocation61_spill] sm:$0xff] }
 0x388   : > { %v14450_v51 = vld [vmem:[#allocation73_spill] sm:$0xff]  ;;  %v14452_v23 = vld [vmem:[#allocation87_spill] sm:$0xff] }
 0x389   : > { %6951 = vmatpush1.bf16.msra.mxu1 %v6950_v5  ;;  %v14435_v5 = vld [vmem:[#allocation168_spill] sm:$0xff]  ;;  %v14453_v30 = vld [vmem:[#allocation99_spill] sm:$0xff]  ;;  %v14455_v36 = vld [vmem:[#allocation121_spill] sm:$0xff] }
 0x38a   : > { %7719 = vmatpush1.bf16.msra.mxu0 %v7718_v22  ;;  %6953 = vmatprep.subr.bf16.mxu1 %v6952_v29  ;;  %v14439_v22 = vld [vmem:[#allocation187_spill] sm:$0xff]  ;;  %v14443_v29 = vld [vmem:[#allocation201_spill] sm:$0xff] }
 0x38b   : > { %7721 = vmatprep.subr.bf16.mxu0 %v7720_v28  ;;  %v14447_v28 = vld [vmem:[#allocation42_spill] sm:$0xff]  ;;  %v14454_v31 = vld [vmem:[#allocation111_spill] sm:$0xff] }
 0x38d   : > { %6955 = vmatpush1.bf16.msra.mxu1 %v6954_v24  ;;  %v14451_v24 = vld [vmem:[#allocation78_spill] sm:$0xff] }
 0x38e   : > { %7723 = vmatpush1.bf16.msra.mxu0 %v7722_v2  ;;  %6957 = vmatprep.subr.bf16.mxu1 %v14396_v18  ;;  %v14456_v2 = vld [vmem:[#allocation129_spill] sm:$0xff]  ;;  %v14457_v18 = vld [vmem:[#allocation147_spill] sm:$0xff] }
 0x38f   : > { %7725 = vmatprep.subr.bf16.mxu0 %v14397_v47  ;;  %v14458_v47 = vld [vmem:[#allocation157_spill] sm:$0xff] }
 0x390   : > { %2937 = vmatmul.mubr.f32.vlgmr.msra.gmra.mrb[0].mxu1 %v14398_v60 }
 0x391   : > { %6959 = vmatpush1.bf16.msra.mxu1 %v14399_v44  ;;  %5505 = vmatmul.mubr.f32.vlgmr.msra.gmra.mrb[0].mxu0 %v14400_v58  ;;  %v8063_v44 = vmov 0.0  }
 0x392   : > { %7727 = vmatpush1.bf16.msra.mxu0 %v14401_v59  ;;  %6961 = vmatprep.subr.bf16.mxu1 %v14402_v33  ;;  %v5648_v59 = vld [vmem:[%s11815_s2] sm:$0x3f] }
 0x393   : > { %7729 = vmatprep.subr.bf16.mxu0 %v14403_v48  ;;  %3072 = vmatprep.mubr.f32.mxu1 %v14214_v45  ;;  %v14413_v45 = vld [vmem:[#allocation10_spill] sm:$0xff]  ;;  %v5651_v33 = vsel %vm5649_vm0, %v5648_v59, 0 }
 0x394   : > { %5640 = vmatprep.mubr.f32.mxu0 %v14215_v38  ;;  %v14414_v38 = vld [vmem:[#allocation14_spill] sm:$0xff]  ;;  %v5727_v48 = vand.u32 4294901760, %v5651_v33 }
 0x395   : > { %6963 = vmatpush1.bf16.msra.mxu1 %v14404_v4 }
 0x396   : > { %7731 = vmatpush1.bf16.msra.mxu0 %v14405_v52  ;;  %6965 = vmatprep.subr.bf16.mxu1 %v14406_v11  ;;  %v5728_v4 = vsub.f32 %v5651_v33, %v5727_v48 }
 0x397   : > { %7733 = vmatprep.subr.bf16.mxu0 %v14407_v1 }
 0x399   : > { %6967 = vmatpush1.bf16.msra.mxu1 %v14408_v53 }
 0x39a   : > { %7735 = vmatpush1.bf16.msra.mxu0 %v14409_v41  ;;  %6969 = vmatprep.subr.bf16.mxu1 %v14410_v27 }
 0x39b   : > { %7737 = vmatprep.subr.bf16.mxu0 %v14411_v7 }
 0x39d   : > { %6971 = vmatpush1.bf16.msra.mxu1 %v14412_v62 }
 0x39e   : > { %7739 = vmatpush1.bf16.msra.mxu0 %v14413_v45  ;;  %6973 = vmatprep.subr.bf16.mxu1 %v14414_v38 }
 0x39f   : > { %7741 = vmatprep.subr.bf16.mxu0 %v14415_v25 }
 0x3a1   : > { %6975 = vmatpush1.bf16.msra.mxu1 %v14416_v12 }
 0x3a2   : > { %7743 = vmatpush1.bf16.msra.mxu0 %v14417_v54  ;;  %6977 = vmatprep.subr.bf16.mxu1 %v14418_v14 }
 0x3a3   : > { %7745 = vmatprep.subr.bf16.mxu0 %v14419_v26 }
 0x3a5   : > { %6979 = vmatpush1.bf16.msra.mxu1 %v14420_v3 }
 0x3a6   : > { %7747 = vmatpush1.bf16.msra.mxu0 %v14421_v34  ;;  %6981 = vmatprep.subr.bf16.mxu1 %v14422_v9 }
 0x3a7   : > { %7749 = vmatprep.subr.bf16.mxu0 %v14423_v10 }
 0x3a9   : > { %6983 = vmatpush1.bf16.msra.mxu1 %v14424_v20 }
 0x3aa   : > { %7751 = vmatpush1.bf16.msra.mxu0 %v14425_v40  ;;  %6985 = vmatprep.subr.bf16.mxu1 %v14426_v46 }
 0x3ab   : > { %7753 = vmatprep.subr.bf16.mxu0 %v14427_v6 }
 0x3ad   : > { %6987 = vmatpush1.bf16.msra.mxu1 %v14428_v17 }
 0x3ae   : > { %7755 = vmatpush1.bf16.msra.mxu0 %v14429_v19  ;;  %6989 = vmatprep.subr.bf16.mxu1 %v14430_v39 }
 0x3af   : > { %7757 = vmatprep.subr.bf16.mxu0 %v14431_v56 }
 0x3b1   : > { %6991 = vmatpush1.bf16.msra.mxu1 %v14432_v50 }
 0x3b2   : > { %7759 = vmatpush1.bf16.msra.mxu0 %v14433_v21  ;;  %6993 = vmatprep.subr.bf16.mxu1 %v14434_v32 }
 0x3b3   : > { %7761 = vmatprep.subr.bf16.mxu0 %v14435_v5 }
 0x3b5   : > { %6995 = vmatpush1.bf16.msra.mxu1 %v14436_v35 }
 0x3b6   : > { %7763 = vmatpush1.bf16.msra.mxu0 %v14437_v63  ;;  %6997 = vmatprep.subr.bf16.mxu1 %v14438_v37 }
 0x3b7   : > { %7765 = vmatprep.subr.bf16.mxu0 %v14439_v22 }
 0x3b9   : > { %6999 = vmatpush1.bf16.msra.mxu1 %v14440_v8 }
 0x3ba   : > { %7767 = vmatpush1.bf16.msra.mxu0 %v14441_v57  ;;  %7001 = vmatprep.subr.bf16.mxu1 %v14442_v16 }
 0x3bb   : > { %7769 = vmatprep.subr.bf16.mxu0 %v14443_v29 }
 0x3bd   : > { %7003 = vmatpush1.bf16.msra.mxu1 %v14444_v0 }
 0x3be   : > { %7771 = vmatpush1.bf16.msra.mxu0 %v14445_v55  ;;  %7005 = vmatprep.subr.bf16.mxu1 %v14446_v42 }
 0x3bf   : > { %7773 = vmatprep.subr.bf16.mxu0 %v14447_v28 }
 0x3c1   : > { %7007 = vmatpush1.bf16.msra.mxu1 %v14448_v43 }
 0x3c2   : > { %7775 = vmatpush1.bf16.msra.mxu0 %v14449_v49  ;;  %7009 = vmatprep.subr.bf16.mxu1 %v14450_v51 }
 0x3c3   : > { %7777 = vmatprep.subr.bf16.mxu0 %v14451_v24 }
 0x3c5   : > { %7011 = vmatpush1.bf16.msra.mxu1 %v14452_v23 }
 0x3c6   : > { %7779 = vmatpush1.bf16.msra.mxu0 %v14453_v30  ;;  %7013 = vmatprep.subr.bf16.mxu1 %v14454_v31 }
 0x3c7   : > { %7781 = vmatprep.subr.bf16.mxu0 %v14455_v36 }
 0x3c9   : > { %7015 = vmatpush1.bf16.msra.mxu1 %v14456_v2 }
 0x3ca   : > { %7783 = vmatpush1.bf16.msra.mxu0 %v14457_v18  ;;  %7017 = vmatprep.subr.bf16.mxu1 %v14458_v47 }
 0x3cb   : > { %7785 = vmatprep.subr.bf16.mxu0 %v14185_v61  ;;  %v5729_v61 = vand.u32 4294901760, %v5728_v4 }
 0x3cd   : > { %7019 = vmatpush1.bf16.msra.mxu1 %v14188_v13  ;;  %v5730_v1 = vsub.f32 %v5728_v4, %v5729_v61 }
 0x3ce   : > { %7787 = vmatpush1.bf16.msra.mxu0 %v14191_v15 }
 0x3cf   : > { %v5731_v62 = vand.u32 4294901760, %v5730_v1 }
 0x3d0   : > { %3074 = vmatmul.mubr.f32.vlgmr.msra.gmra.mrb[0].mxu1 %v14398_v60 }
 0x3d1   : > { %5642 = vmatmul.mubr.f32.vlgmr.msra.gmra.mrb[0].mxu0 %v14400_v58  ;;  %5963 = vmatprep.mubr.f32.mxu1 %v8063_v44 }
 0x3d2   : > { %5726 = vmatprep.mubr.f32.mxu0 %v8063_v44 }
 0x4a3   : > { %v3075_v52 = vpop.f32.mrb[0].mxu1 }
 0x4a4   : > { %v5643_v13 = vpop.f32.mrb[0].mxu0  ;;  %v3077_v15 = vpop.f32.mrb[1].mxu1 }
 0x4a5   : > { %v7788_v11 = vadd.f32 %v5643_v13, %v3075_v52  ;;  %v5645_v60 = vpop.f32.mrb[1].mxu0 }
 0x4a6   : > { %v7789_v58 = vadd.f32 %v5645_v60, %v3077_v15 }
 0x4a7   : > { %v5655_v53 = vsel %vm5653_vm1, %v7788_v11, 0 }
 0x4a8   : > { %v5662_v41 = vand.u32 4294901760, %v5655_v53  ;;  %v5658_v27 = vsel %vm5653_vm1, %v7789_v58, 0 }
 0x4a9   : > { %v5660_v7 = vand.u32 4294901760, %v5658_v27 }
 0x4aa   : > { %v5745_v45 = vsub.f32 %v5655_v53, %v5662_v41 }
 0x4ab   : > { %v5739_v38 = vsub.f32 %v5658_v27, %v5660_v7  ;;  %5661 = vmatprep.subr.mxu0 %v5660_v7  ;;  %5898 = vmatprep.subr.mxu1 %v5660_v7 }
 0x4ac   : > { %5663 = vmatpush1.msra.mxu0 %v5662_v41  ;;  %5900 = vmatpush1.msra.mxu1 %v5662_v41  ;;  %v5746_v25 = vand.u32 4294901760, %v5745_v45 }
 0x4ad   : > { %5732 = vmatmul.mubr.f32.vlgmr.msra.gmra.mrb[2].mxu0 %v5731_v62  ;;  %5967 = vmatmul.mubr.f32.vlgmr.msra.gmra.mrb[2].mxu1 %v5729_v61  ;;  %v5740_v12 = vand.u32 4294901760, %v5739_v38 }
 0x4ae   : > { %v5747_v54 = vsub.f32 %v5745_v45, %v5746_v25  ;;  %5812 = vmatprep.mubr.f32.mxu0 %v8063_v44  ;;  %6043 = vmatprep.mubr.f32.mxu1 %v8063_v44 }
 0x4af   : > { %5976 = vmatprep.subr.mxu1 %v5740_v12  ;;  %v5741_v14 = vsub.f32 %v5739_v38, %v5740_v12 }
 0x4b0   : > { %5980 = vmatpush1.msra.mxu1 %v5746_v25  ;;  %v5748_v3 = vand.u32 4294901760, %v5747_v54 }
 0x4b1   : > { %6052 = vmatprep.subr.mxu1 %v5660_v7  ;;  %v5742_v26 = vand.u32 4294901760, %v5741_v14 }
 0x4b3   : > { %5743 = vmatprep.subr.mxu0 %v5742_v26 }
 0x4b4   : > { %5749 = vmatpush1.msra.mxu0 %v5748_v3 }
 0x4b5   : > { %5814 = vmatmul.mubr.f32.vlgmr.msra.gmra.mrb[2].mxu0 %v5727_v48  ;;  %5822 = vmatprep.subr.mxu0 %v5739_v38 }
 0x4b6   : > { %6045 = vmatmul.mubr.f32.vlgmr.msra.gmra.mrb[2].mxu1 %v5727_v48  ;;  %5825 = vmatpush1.msra.mxu0 %v5745_v45 }
 0x4b7   : > { %6054 = vmatpush1.msra.mxu1 %v5662_v41  ;;  %5888 = vmatprep.mubr.f32.mxu0 %v8063_v44 }
 0x4b8   : > { %6117 = vmatprep.mubr.f32.mxu1 %v8063_v44 }
 0x4bd   : > { %5891 = vmatmul.mubr.f32.vlgmr.msra.gmra.mrb[2].mxu0 %v5728_v4 }
 0x4be   : > { %6119 = vmatmul.mubr.f32.vlgmr.msra.gmra.mrb[2].mxu1 %v5727_v48 }
 0x590   : > { %v5892_v34 = vpop.f32.mrb[2].mxu0 }
 0x591   : > { %v6120_v9 = vpop.f32.mrb[2].mxu1  ;;  %v5894_v10 = vpop.f32.mrb[3].mxu0 }
 0x592   : > { %v7790_v20 = vadd.f32 %v6120_v9, %v5892_v34  ;;  %v6122_v40 = vpop.f32.mrb[3].mxu1 }
 0x593   : > { %v7791_v46 = vadd.f32 %v6122_v40, %v5894_v10 }
 0x594   : > { %6125 = vst [vmem:[%s230_s29] sm:$0x3f] %v7790_v20 }
 0x595   : > { %6126 = vst [vmem:[%s230_s29 + $0x8] sm:$0x3f] %v7791_v46 }
 0x596 PF: > { %s17_s19 = sadd.s32 1, %s8057_s19   ;;  %s14459_s30 = sld [smem:[#allocation8_spill]] }
 0x597   : > { %p14_p5 = scmp.ge.s32.totalorder %s17_s19, 6   ;;  %s14460_s12 = smov %s8033_s13 }
 0x598   : > { %s14461_s13 = smov %s8037_s14  ;;  %s14462_s14 = smov %s8188_s9 }
 0x599   : > { %s14463_s15 = smov %s8049_s17  ;;  %s14464_s16 = smov %s8053_s18 }
 0x59a   : > { %s14466_s18 = smov %s14472_s20  ;;  %16 = sbr.rel (!%p14_p5) target bundleno = 8 (0x8), region = 76 }
 0x59c   : > { %s14465_s17 = smov %s14459_s30 }
 0x5a1   :  { %6157 = vsyncpa [#allocation3], 1 }
 0x5a2   :  { %6159 = vsyncpa [#allocation3 + $0x1], 1 }
 0x5a3   :  { %6160 = vsyncpa [#allocation5], 1 }

</bundles_post_ra>
